<compile_context>
chip_gen: v6e
topology: v6e:2x2x1
jax: 0.10.0
libtpu: 0.0.40
codegen_flags: <defaults>
</compile_context>

<pallas_src>
import functools

import jax
import jax.numpy as jnp
import numpy as np
from jax.experimental import pallas as pl
from jax.experimental.pallas import tpu as pltpu

NEG_SLOPE = 0.01   # nn.LeakyReLU default negative_slope
C_MID = 64         # conv output channels
CP = 128           # lane-padded channel block per conv tap (tile-aligned K)


# ------------------------------ fused kernel --------------------------------


def _prepare_block_kernel(xpatch_ref, xflat_ref,
                          w1_ref, b1_ref,
                          w2x_ref, w2a_ref, b2_ref,
                          w3x_ref, w3a_ref, w3b_ref, b3_ref,
                          s1x_ref, s1a_ref, s1b_ref,
                          s2x9_ref, s2a9_ref, s2b9_ref,
                          o_ref,
                          x1p_scr, x2p_scr, *, H, W):
    # xpatch_ref : (H*W, 9*Cin)  f32  im2col patch of the raw input (wrapper-built)
    # xflat_ref  : (H*W, Cin)    f32  raw input (for the SE global average pool)
    # w*_ref     : bf16 conv weights, rows ordered (tap, channel); w2a/w3a/w3b
    #              rows zero-padded per tap to CP=128 channels.
    # s1*_ref    : f32 SE fc1 weight, split per source.
    # s2*9_ref   : f32 SE fc2 weight, split per source and pre-tiled per tap so
    #              sigmoid(h @ s2*9) is the per-patch-column scale for conv3.
    # o_ref      : (H*W, 64) f32
    # x*p_scr    : (H+2, W+2, CP) f32 zero-bordered, lane-padded staging buffers.
    f32, bf16 = jnp.float32, jnp.bfloat16
    HW = H * W

    def lrelu(v):
        return jnp.where(v >= 0, v, NEG_SLOPE * v)

    def dot32(a, b):
        return jnp.dot(a, b, preferred_element_type=f32)

    def im2col(scr):
        # scr: (H+2, W+2, CP).  Every tap block is one full 128-lane tile, so
        # the lane-dim concatenation below is tile-aligned.
        taps = []
        for dh in range(3):
            for dw in range(3):
                taps.append(scr[dh:dh + H, dw:dw + W, :].reshape(HW, CP))
        return jnp.concatenate(taps, axis=-1)          # (HW, 9*CP) f32

    xpatch_f = xpatch_ref[...]                          # (HW, 9*Cin) f32
    xpatch_b = xpatch_f.astype(bf16)

    # ---- conv1 + LeakyReLU: one MXU dot, K = 9*Cin --------------------------
    x1 = lrelu(dot32(xpatch_b, w1_ref[...]) + b1_ref[...])          # (HW, 64) f32

    # stage x1 into the zero-padded halo scratch, build its im2col patch
    x1p_scr[...] = jnp.zeros_like(x1p_scr)
    x1p_scr[1:H + 1, 1:W + 1, :C_MID] = x1.reshape(H, W, C_MID)
    p1_f = im2col(x1p_scr)                                          # (HW, 9*128)

    # ---- conv2 + LeakyReLU: split weights == conv over concat(x, x1) --------
    x2 = lrelu(dot32(xpatch_b, w2x_ref[...])
               + dot32(p1_f.astype(bf16), w2a_ref[...])
               + b2_ref[...])                                       # (HW, 64) f32

    x2p_scr[...] = jnp.zeros_like(x2p_scr)
    x2p_scr[1:H + 1, 1:W + 1, :C_MID] = x2.reshape(H, W, C_MID)
    p2_f = im2col(x2p_scr)                                          # (HW, 9*128)

    # ---- SELayer on concat(x, x1, x2), concat never materialized ------------
    px = jnp.mean(xflat_ref[...], axis=0, keepdims=True)            # (1, Cin)
    pm1 = jnp.mean(x1, axis=0, keepdims=True)                       # (1, 64)
    pm2 = jnp.mean(x2, axis=0, keepdims=True)                       # (1, 64)
    h = jnp.maximum(dot32(px, s1x_ref[...]) + dot32(pm1, s1a_ref[...])
                    + dot32(pm2, s1b_ref[...]), 0.0)                # (1, C//r)
    # per-patch-column SE scales (weights pre-tiled per tap in the wrapper)
    y_x = jax.nn.sigmoid(dot32(h, s2x9_ref[...]))                   # (1, 9*Cin)
    y_1 = jax.nn.sigmoid(dot32(h, s2a9_ref[...]))                   # (1, 9*128)
    y_2 = jax.nn.sigmoid(dot32(h, s2b9_ref[...]))                   # (1, 9*128)

    # ---- conv3 with the SE channel scale folded into its inputs -------------
    a3 = (dot32((xpatch_f * y_x).astype(bf16), w3x_ref[...])
          + dot32((p1_f * y_1).astype(bf16), w3a_ref[...])
          + dot32((p2_f * y_2).astype(bf16), w3b_ref[...])
          + b3_ref[...])
    o_ref[...] = a3.astype(o_ref.dtype)


# ------------------------------- wrapper -------------------------------------


def _build_x_patch(x):
    """x: (B, H, W, Cin) -> (B, H*W, 9*Cin) im2col patch of the raw input."""
    B, H, W, Cin = x.shape
    xp = jnp.pad(x, ((0, 0), (1, 1), (1, 1), (0, 0)))
    taps = [xp[:, dh:dh + H, dw:dw + W, :].reshape(B, H * W, Cin)
            for dh in range(3) for dw in range(3)]
    return jnp.concatenate(taps, axis=-1)


def _prep_operands(p, cin):
    """Split / reshape / zero-pad / tile the params into kernel operands."""
    f32, bf16 = jnp.float32, jnp.bfloat16

    def flat(w):                      # (3,3,C,64) HWIO -> (9*C, 64), rows=(tap, c)
        return w.reshape(9 * w.shape[2], C_MID)

    def flat_padded(w):               # (3,3,64,64) -> (9*CP, 64), zero rows 64:CP
        wp = jnp.pad(w, ((0, 0), (0, 0), (0, CP - w.shape[2]), (0, 0)))
        return wp.reshape(9 * CP, C_MID)

    return dict(
        w1=flat(p["w1"]).astype(bf16),
        b1=p["b1"].reshape(1, C_MID).astype(f32),
        w2x=flat(p["w2"][:, :, :cin, :]).astype(bf16),
        w2a=flat_padded(p["w2"][:, :, cin:, :]).astype(bf16),
        b2=p["b2"].reshape(1, C_MID).astype(f32),
        w3x=flat(p["w3"][:, :, :cin, :]).astype(bf16),
        w3a=flat_padded(p["w3"][:, :, cin:cin + C_MID, :]).astype(bf16),
        w3b=flat_padded(p["w3"][:, :, cin + C_MID:, :]).astype(bf16),
        b3=p["b3"].reshape(1, C_MID).astype(f32),
        s1x=p["se_w1"][:cin, :].astype(f32),
        s1a=p["se_w1"][cin:cin + C_MID, :].astype(f32),
        s1b=p["se_w1"][cin + C_MID:, :].astype(f32),
        s2x9=jnp.tile(p["se_w2"][:, :cin], (1, 9)).astype(f32),
        s2a9=jnp.tile(jnp.pad(p["se_w2"][:, cin:cin + C_MID],
                              ((0, 0), (0, CP - C_MID))), (1, 9)).astype(f32),
        s2b9=jnp.tile(jnp.pad(p["se_w2"][:, cin + C_MID:],
                              ((0, 0), (0, CP - C_MID))), (1, 9)).astype(f32),
    )


def prepare_block_forward(x_nchw, p):
    """PrepareBlock.forward. x_nchw: (B, Cin, H, W) -> (B, 64, H, W)."""
    x = jnp.transpose(x_nchw, (0, 2, 3, 1))            # -> NHWC
    B, H, W, Cin = x.shape
    HW = H * W
    K1 = 9 * Cin
    K2 = 9 * CP
    Cr = p["se_w1"].shape[-1]

    ops = _prep_operands(p, Cin)
    xpatch = _build_x_patch(x)                          # (B, HW, 9*Cin) f32
    xflat = x.reshape(B, HW, Cin)

    def fixed(shape):
        return pl.BlockSpec(shape, lambda bi, _s=shape: (0,) * len(_s))

    kernel = functools.partial(_prepare_block_kernel, H=H, W=W)
    out_flat = pl.pallas_call(
        kernel,
        out_shape=jax.ShapeDtypeStruct((B, HW, C_MID), jnp.float32),
        grid_spec=pltpu.PrefetchScalarGridSpec(
            num_scalar_prefetch=0,
            grid=(B,),
            in_specs=[
                pl.BlockSpec((pl.Squeezed(), HW, K1), lambda bi: (bi, 0, 0)),
                pl.BlockSpec((pl.Squeezed(), HW, Cin), lambda bi: (bi, 0, 0)),
                fixed((K1, C_MID)),   # w1
                fixed((1, C_MID)),    # b1
                fixed((K1, C_MID)),   # w2x
                fixed((K2, C_MID)),   # w2a
                fixed((1, C_MID)),    # b2
                fixed((K1, C_MID)),   # w3x
                fixed((K2, C_MID)),   # w3a
                fixed((K2, C_MID)),   # w3b
                fixed((1, C_MID)),    # b3
                fixed((Cin, Cr)),     # s1x
                fixed((C_MID, Cr)),   # s1a
                fixed((C_MID, Cr)),   # s1b
                fixed((Cr, K1)),      # s2x9
                fixed((Cr, K2)),      # s2a9
                fixed((Cr, K2)),      # s2b9
            ],
            out_specs=pl.BlockSpec((pl.Squeezed(), HW, C_MID),
                                   lambda bi: (bi, 0, 0)),
            scratch_shapes=[
                pltpu.VMEM((H + 2, W + 2, CP), jnp.float32),
                pltpu.VMEM((H + 2, W + 2, CP), jnp.float32),
            ],
        ),
        compiler_params=pltpu.CompilerParams(
            dimension_semantics=("parallel",),
            vmem_limit_bytes=48 * 1024 * 1024),
    )(xpatch, xflat,
      ops["w1"], ops["b1"],
      ops["w2x"], ops["w2a"], ops["b2"],
      ops["w3x"], ops["w3a"], ops["w3b"], ops["b3"],
      ops["s1x"], ops["s1a"], ops["s1b"],
      ops["s2x9"], ops["s2a9"], ops["s2b9"])

    out = out_flat.reshape(B, H, W, C_MID)
    return jnp.transpose(out, (0, 3, 1, 2))             # -> NCHW


# ---------------------------- synthetic params --------------------------------


def init_params(key, cin, reduction=16):
    c_cat = cin + 2 * C_MID          # channels after cat(x, x1, x2)
    c_hid = c_cat // reduction       # SE bottleneck
    ks = jax.random.split(key, 8)
    s = 0.05
    return dict(
        w1=s * jax.random.normal(ks[0], (3, 3, cin, C_MID), jnp.float32),
        b1=s * jax.random.normal(ks[1], (C_MID,), jnp.float32),
        w2=s * jax.random.normal(ks[2], (3, 3, cin + C_MID, C_MID), jnp.float32),
        b2=s * jax.random.normal(ks[3], (C_MID,), jnp.float32),
        w3=s * jax.random.normal(ks[4], (3, 3, c_cat, C_MID), jnp.float32),
        b3=s * jax.random.normal(ks[5], (C_MID,), jnp.float32),
        se_w1=s * jax.random.normal(ks[6], (c_cat, c_hid), jnp.float32),
        se_w2=s * jax.random.normal(ks[7], (c_hid, c_cat), jnp.float32),
    )


# ------------------------- pure-JAX reference check ---------------------------


def _ref_forward(x_nchw, p):
    hi = jax.lax.Precision.HIGHEST
    x = jnp.transpose(x_nchw, (0, 2, 3, 1))

    def conv(v, w, b):
        y = jax.lax.conv_general_dilated(
            v, w, (1, 1), "SAME",
            dimension_numbers=("NHWC", "HWIO", "NHWC"), precision=hi)
        return y + b[None, None, None, :]

    lrelu = lambda v: jnp.where(v >= 0, v, NEG_SLOPE * v)
    x1 = lrelu(conv(x, p["w1"], p["b1"]))
    x2 = lrelu(conv(jnp.concatenate([x, x1], -1), p["w2"], p["b2"]))
    xc = jnp.concatenate([x, x1, x2], -1)
    pooled = jnp.mean(xc, axis=(1, 2))                               # (B, C)
    h = jnp.maximum(jnp.dot(pooled, p["se_w1"], precision=hi), 0.0)
    y = jax.nn.sigmoid(jnp.dot(h, p["se_w2"], precision=hi))
    xs = xc * y[:, None, None, :]
    x3 = conv(xs, p["w3"], p["b3"])
    return jnp.transpose(x3, (0, 3, 1, 2))


if __name__ == "__main__":
    B, Cin, H, W = 2, 4, 16, 16
    key = jax.random.PRNGKey(0)
    kx, kp = jax.random.split(key)
    x = jax.random.normal(kx, (B, Cin, H, W), jnp.float32)
    params = init_params(kp, Cin)

    fwd = jax.jit(prepare_block_forward)
    out = jax.block_until_ready(fwd(x, params))
    assert out.shape == (B, 64, H, W), out.shape

    ref = jax.block_until_ready(_ref_forward(x, params))
    # bf16 MXU operands (f32 accumulation) vs an f32-HIGHEST reference.
    np.testing.assert_allclose(np.asarray(out), np.asarray(ref),
                               atol=5e-2, rtol=5e-2)
    print("KERNEL_OK")
</pallas_src>

<mosaic_0001>
module attributes {stable_mosaic.version = 11 : i64} {
  func.func @_prepare_block_kernel(%arg0: i32, %arg1: memref<1x256x36xf32, #tpu.memory_space<vmem>>, %arg2: memref<1x256x4xf32, #tpu.memory_space<vmem>>, %arg3: memref<36x64xbf16, #tpu.memory_space<vmem>>, %arg4: memref<1x64xf32, #tpu.memory_space<vmem>>, %arg5: memref<36x64xbf16, #tpu.memory_space<vmem>>, %arg6: memref<1152x64xbf16, #tpu.memory_space<vmem>>, %arg7: memref<1x64xf32, #tpu.memory_space<vmem>>, %arg8: memref<36x64xbf16, #tpu.memory_space<vmem>>, %arg9: memref<1152x64xbf16, #tpu.memory_space<vmem>>, %arg10: memref<1152x64xbf16, #tpu.memory_space<vmem>>, %arg11: memref<1x64xf32, #tpu.memory_space<vmem>>, %arg12: memref<4x8xf32, #tpu.memory_space<vmem>>, %arg13: memref<64x8xf32, #tpu.memory_space<vmem>>, %arg14: memref<64x8xf32, #tpu.memory_space<vmem>>, %arg15: memref<8x36xf32, #tpu.memory_space<vmem>>, %arg16: memref<8x1152xf32, #tpu.memory_space<vmem>>, %arg17: memref<8x1152xf32, #tpu.memory_space<vmem>>, %arg18: memref<1x256x64xf32, #tpu.memory_space<vmem>>, %arg19: memref<18x18x128xf32, #tpu.memory_space<vmem>>, %arg20: memref<18x18x128xf32, #tpu.memory_space<vmem>>) attributes {dimension_semantics = [#tpu.dimension_semantics<parallel>], iteration_bounds = array<i64: 2>, scalar_prefetch = 0 : i64, scratch_operands = 2 : i64, tpu.core_type = #tpu.core_type<tc>, window_params = [{transform_indices = @transform_0, window_bounds = array<i64: 1, 256, 36>}, {transform_indices = @transform_1, window_bounds = array<i64: 1, 256, 4>}, {pipeline_mode = #tpu.pipeline_mode<synchronous>, transform_indices = @transform_2, window_bounds = array<i64: 36, 64>}, {pipeline_mode = #tpu.pipeline_mode<synchronous>, transform_indices = @transform_3, window_bounds = array<i64: 1, 64>}, {pipeline_mode = #tpu.pipeline_mode<synchronous>, transform_indices = @transform_4, window_bounds = array<i64: 36, 64>}, {pipeline_mode = #tpu.pipeline_mode<synchronous>, transform_indices = @transform_5, window_bounds = array<i64: 1152, 64>}, {pipeline_mode = #tpu.pipeline_mode<synchronous>, transform_indices = @transform_6, window_bounds = array<i64: 1, 64>}, {pipeline_mode = #tpu.pipeline_mode<synchronous>, transform_indices = @transform_7, window_bounds = array<i64: 36, 64>}, {pipeline_mode = #tpu.pipeline_mode<synchronous>, transform_indices = @transform_8, window_bounds = array<i64: 1152, 64>}, {pipeline_mode = #tpu.pipeline_mode<synchronous>, transform_indices = @transform_9, window_bounds = array<i64: 1152, 64>}, {pipeline_mode = #tpu.pipeline_mode<synchronous>, transform_indices = @transform_10, window_bounds = array<i64: 1, 64>}, {pipeline_mode = #tpu.pipeline_mode<synchronous>, transform_indices = @transform_11, window_bounds = array<i64: 4, 8>}, {pipeline_mode = #tpu.pipeline_mode<synchronous>, transform_indices = @transform_12, window_bounds = array<i64: 64, 8>}, {pipeline_mode = #tpu.pipeline_mode<synchronous>, transform_indices = @transform_13, window_bounds = array<i64: 64, 8>}, {pipeline_mode = #tpu.pipeline_mode<synchronous>, transform_indices = @transform_14, window_bounds = array<i64: 8, 36>}, {pipeline_mode = #tpu.pipeline_mode<synchronous>, transform_indices = @transform_15, window_bounds = array<i64: 8, 1152>}, {pipeline_mode = #tpu.pipeline_mode<synchronous>, transform_indices = @transform_16, window_bounds = array<i64: 8, 1152>}, {transform_indices = @transform_17, window_bounds = array<i64: 1, 256, 64>}]} {
    %c0 = arith.constant 0 : index
    %c0_0 = arith.constant 0 : index
    %c0_1 = arith.constant 0 : index
    %0 = vector.load %arg1[%c0, %c0_0, %c0_1] : memref<1x256x36xf32, #tpu.memory_space<vmem>>, vector<1x256x36xf32>
    %1 = vector.shape_cast %0 : vector<1x256x36xf32> to vector<256x36xf32>
    %2 = arith.truncf %1 : vector<256x36xf32> to vector<256x36xbf16>
    %c0_2 = arith.constant 0 : index
    %c0_3 = arith.constant 0 : index
    %3 = vector.load %arg3[%c0_2, %c0_3] : memref<36x64xbf16, #tpu.memory_space<vmem>>, vector<36x64xbf16>
    %cst = arith.constant dense<0.000000e+00> : vector<256x64xf32>
    %4 = tpu.matmul %2, %3, %cst {dimension_numbers = #tpu.dot_dimension_numbers<[1], [0], [0], [1], [0, 0, 1, 1], [], []>} : vector<256x36xbf16>, vector<36x64xbf16>, vector<256x64xf32> -> vector<256x64xf32>
    %c0_4 = arith.constant 0 : index
    %c0_5 = arith.constant 0 : index
    %5 = vector.load %arg4[%c0_4, %c0_5] : memref<1x64xf32, #tpu.memory_space<vmem>>, vector<1x64xf32>
    %6 = vector.broadcast %5 : vector<1x64xf32> to vector<256x64xf32>
    %7 = arith.addf %4, %6 : vector<256x64xf32>
    %cst_6 = arith.constant 0.000000e+00 : f32
    %8 = vector.broadcast %cst_6 : f32 to vector<256x64xf32>
    %9 = arith.cmpf oge, %7, %8 : vector<256x64xf32>
    %cst_7 = arith.constant 0.00999999977 : f32
    %10 = vector.broadcast %cst_7 : f32 to vector<256x64xf32>
    %11 = arith.mulf %10, %7 : vector<256x64xf32>
    %12 = arith.select %9, %7, %11 : vector<256x64xi1>, vector<256x64xf32>
    %cst_8 = arith.constant 0.000000e+00 : f32
    %13 = vector.broadcast %cst_8 : f32 to vector<18x18x128xf32>
    %c0_9 = arith.constant 0 : index
    %c0_10 = arith.constant 0 : index
    %c0_11 = arith.constant 0 : index
    %14 = vector.load %arg19[%c0_9, %c0_10, %c0_11] : memref<18x18x128xf32, #tpu.memory_space<vmem>>, vector<18x18x128xf32>
    tpu.vector_store %arg19[%c0_9, %c0_10, %c0_11], %13 {strides = array<i32>} : memref<18x18x128xf32, #tpu.memory_space<vmem>>, vector<18x18x128xf32>,
    %15 = vector.shape_cast %12 : vector<256x64xf32> to vector<16x16x64xf32>
    %c1 = arith.constant 1 : index
    %c1_12 = arith.constant 1 : index
    %c0_13 = arith.constant 0 : index
    %16 = vector.load %arg19[%c1, %c1_12, %c0_13] : memref<18x18x128xf32, #tpu.memory_space<vmem>>, vector<16x16x64xf32>
    tpu.vector_store %arg19[%c1, %c1_12, %c0_13], %15 {strides = array<i32>} : memref<18x18x128xf32, #tpu.memory_space<vmem>>, vector<16x16x64xf32>,
    %c0_14 = arith.constant 0 : index
    %c0_15 = arith.constant 0 : index
    %c0_16 = arith.constant 0 : index
    %17 = vector.load %arg19[%c0_14, %c0_15, %c0_16] : memref<18x18x128xf32, #tpu.memory_space<vmem>>, vector<16x16x128xf32>
    %18 = vector.shape_cast %17 : vector<16x16x128xf32> to vector<256x128xf32>
    %c0_17 = arith.constant 0 : index
    %c1_18 = arith.constant 1 : index
    %c0_19 = arith.constant 0 : index
    %19 = vector.load %arg19[%c0_17, %c1_18, %c0_19] : memref<18x18x128xf32, #tpu.memory_space<vmem>>, vector<16x16x128xf32>
    %20 = vector.shape_cast %19 : vector<16x16x128xf32> to vector<256x128xf32>
    %c0_20 = arith.constant 0 : index
    %c2 = arith.constant 2 : index
    %c0_21 = arith.constant 0 : index
    %21 = vector.load %arg19[%c0_20, %c2, %c0_21] : memref<18x18x128xf32, #tpu.memory_space<vmem>>, vector<16x16x128xf32>
    %22 = vector.shape_cast %21 : vector<16x16x128xf32> to vector<256x128xf32>
    %c1_22 = arith.constant 1 : index
    %c0_23 = arith.constant 0 : index
    %c0_24 = arith.constant 0 : index
    %23 = vector.load %arg19[%c1_22, %c0_23, %c0_24] : memref<18x18x128xf32, #tpu.memory_space<vmem>>, vector<16x16x128xf32>
    %24 = vector.shape_cast %23 : vector<16x16x128xf32> to vector<256x128xf32>
    %c1_25 = arith.constant 1 : index
    %c1_26 = arith.constant 1 : index
    %c0_27 = arith.constant 0 : index
    %25 = vector.load %arg19[%c1_25, %c1_26, %c0_27] : memref<18x18x128xf32, #tpu.memory_space<vmem>>, vector<16x16x128xf32>
    %26 = vector.shape_cast %25 : vector<16x16x128xf32> to vector<256x128xf32>
    %c1_28 = arith.constant 1 : index
    %c2_29 = arith.constant 2 : index
    %c0_30 = arith.constant 0 : index
    %27 = vector.load %arg19[%c1_28, %c2_29, %c0_30] : memref<18x18x128xf32, #tpu.memory_space<vmem>>, vector<16x16x128xf32>
    %28 = vector.shape_cast %27 : vector<16x16x128xf32> to vector<256x128xf32>
    %c2_31 = arith.constant 2 : index
    %c0_32 = arith.constant 0 : index
    %c0_33 = arith.constant 0 : index
    %29 = vector.load %arg19[%c2_31, %c0_32, %c0_33] : memref<18x18x128xf32, #tpu.memory_space<vmem>>, vector<16x16x128xf32>
    %30 = vector.shape_cast %29 : vector<16x16x128xf32> to vector<256x128xf32>
    %c2_34 = arith.constant 2 : index
    %c1_35 = arith.constant 1 : index
    %c0_36 = arith.constant 0 : index
    %31 = vector.load %arg19[%c2_34, %c1_35, %c0_36] : memref<18x18x128xf32, #tpu.memory_space<vmem>>, vector<16x16x128xf32>
    %32 = vector.shape_cast %31 : vector<16x16x128xf32> to vector<256x128xf32>
    %c2_37 = arith.constant 2 : index
    %c2_38 = arith.constant 2 : index
    %c0_39 = arith.constant 0 : index
    %33 = vector.load %arg19[%c2_37, %c2_38, %c0_39] : memref<18x18x128xf32, #tpu.memory_space<vmem>>, vector<16x16x128xf32>
    %34 = vector.shape_cast %33 : vector<16x16x128xf32> to vector<256x128xf32>
    %35 = tpu.concatenate %18, %20, %22, %24, %26, %28, %30, %32, %34 in 1 : vector<256x128xf32>, vector<256x128xf32>, vector<256x128xf32>, vector<256x128xf32>, vector<256x128xf32>, vector<256x128xf32>, vector<256x128xf32>, vector<256x128xf32>, vector<256x128xf32> -> vector<256x1152xf32>
    %c0_40 = arith.constant 0 : index
    %c0_41 = arith.constant 0 : index
    %36 = vector.load %arg5[%c0_40, %c0_41] : memref<36x64xbf16, #tpu.memory_space<vmem>>, vector<36x64xbf16>
    %cst_42 = arith.constant dense<0.000000e+00> : vector<256x64xf32>
    %37 = tpu.matmul %2, %36, %cst_42 {dimension_numbers = #tpu.dot_dimension_numbers<[1], [0], [0], [1], [0, 0, 1, 1], [], []>} : vector<256x36xbf16>, vector<36x64xbf16>, vector<256x64xf32> -> vector<256x64xf32>
    %38 = arith.truncf %35 : vector<256x1152xf32> to vector<256x1152xbf16>
    %c0_43 = arith.constant 0 : index
    %c0_44 = arith.constant 0 : index
    %39 = vector.load %arg6[%c0_43, %c0_44] : memref<1152x64xbf16, #tpu.memory_space<vmem>>, vector<1152x64xbf16>
    %cst_45 = arith.constant dense<0.000000e+00> : vector<256x64xf32>
    %40 = tpu.matmul %38, %39, %cst_45 {dimension_numbers = #tpu.dot_dimension_numbers<[1], [0], [0], [1], [0, 0, 1, 1], [], []>} : vector<256x1152xbf16>, vector<1152x64xbf16>, vector<256x64xf32> -> vector<256x64xf32>
    %41 = arith.addf %37, %40 : vector<256x64xf32>
    %c0_46 = arith.constant 0 : index
    %c0_47 = arith.constant 0 : index
    %42 = vector.load %arg7[%c0_46, %c0_47] : memref<1x64xf32, #tpu.memory_space<vmem>>, vector<1x64xf32>
    %43 = vector.broadcast %42 : vector<1x64xf32> to vector<256x64xf32>
    %44 = arith.addf %41, %43 : vector<256x64xf32>
    %cst_48 = arith.constant 0.000000e+00 : f32
    %45 = vector.broadcast %cst_48 : f32 to vector<256x64xf32>
    %46 = arith.cmpf oge, %44, %45 : vector<256x64xf32>
    %cst_49 = arith.constant 0.00999999977 : f32
    %47 = vector.broadcast %cst_49 : f32 to vector<256x64xf32>
    %48 = arith.mulf %47, %44 : vector<256x64xf32>
    %49 = arith.select %46, %44, %48 : vector<256x64xi1>, vector<256x64xf32>
    %cst_50 = arith.constant 0.000000e+00 : f32
    %50 = vector.broadcast %cst_50 : f32 to vector<18x18x128xf32>
    %c0_51 = arith.constant 0 : index
    %c0_52 = arith.constant 0 : index
    %c0_53 = arith.constant 0 : index
    %51 = vector.load %arg20[%c0_51, %c0_52, %c0_53] : memref<18x18x128xf32, #tpu.memory_space<vmem>>, vector<18x18x128xf32>
    tpu.vector_store %arg20[%c0_51, %c0_52, %c0_53], %50 {strides = array<i32>} : memref<18x18x128xf32, #tpu.memory_space<vmem>>, vector<18x18x128xf32>,
    %52 = vector.shape_cast %49 : vector<256x64xf32> to vector<16x16x64xf32>
    %c1_54 = arith.constant 1 : index
    %c1_55 = arith.constant 1 : index
    %c0_56 = arith.constant 0 : index
    %53 = vector.load %arg20[%c1_54, %c1_55, %c0_56] : memref<18x18x128xf32, #tpu.memory_space<vmem>>, vector<16x16x64xf32>
    tpu.vector_store %arg20[%c1_54, %c1_55, %c0_56], %52 {strides = array<i32>} : memref<18x18x128xf32, #tpu.memory_space<vmem>>, vector<16x16x64xf32>,
    %c0_57 = arith.constant 0 : index
    %c0_58 = arith.constant 0 : index
    %c0_59 = arith.constant 0 : index
    %54 = vector.load %arg20[%c0_57, %c0_58, %c0_59] : memref<18x18x128xf32, #tpu.memory_space<vmem>>, vector<16x16x128xf32>
    %55 = vector.shape_cast %54 : vector<16x16x128xf32> to vector<256x128xf32>
    %c0_60 = arith.constant 0 : index
    %c1_61 = arith.constant 1 : index
    %c0_62 = arith.constant 0 : index
    %56 = vector.load %arg20[%c0_60, %c1_61, %c0_62] : memref<18x18x128xf32, #tpu.memory_space<vmem>>, vector<16x16x128xf32>
    %57 = vector.shape_cast %56 : vector<16x16x128xf32> to vector<256x128xf32>
    %c0_63 = arith.constant 0 : index
    %c2_64 = arith.constant 2 : index
    %c0_65 = arith.constant 0 : index
    %58 = vector.load %arg20[%c0_63, %c2_64, %c0_65] : memref<18x18x128xf32, #tpu.memory_space<vmem>>, vector<16x16x128xf32>
    %59 = vector.shape_cast %58 : vector<16x16x128xf32> to vector<256x128xf32>
    %c1_66 = arith.constant 1 : index
    %c0_67 = arith.constant 0 : index
    %c0_68 = arith.constant 0 : index
    %60 = vector.load %arg20[%c1_66, %c0_67, %c0_68] : memref<18x18x128xf32, #tpu.memory_space<vmem>>, vector<16x16x128xf32>
    %61 = vector.shape_cast %60 : vector<16x16x128xf32> to vector<256x128xf32>
    %c1_69 = arith.constant 1 : index
    %c1_70 = arith.constant 1 : index
    %c0_71 = arith.constant 0 : index
    %62 = vector.load %arg20[%c1_69, %c1_70, %c0_71] : memref<18x18x128xf32, #tpu.memory_space<vmem>>, vector<16x16x128xf32>
    %63 = vector.shape_cast %62 : vector<16x16x128xf32> to vector<256x128xf32>
    %c1_72 = arith.constant 1 : index
    %c2_73 = arith.constant 2 : index
    %c0_74 = arith.constant 0 : index
    %64 = vector.load %arg20[%c1_72, %c2_73, %c0_74] : memref<18x18x128xf32, #tpu.memory_space<vmem>>, vector<16x16x128xf32>
    %65 = vector.shape_cast %64 : vector<16x16x128xf32> to vector<256x128xf32>
    %c2_75 = arith.constant 2 : index
    %c0_76 = arith.constant 0 : index
    %c0_77 = arith.constant 0 : index
    %66 = vector.load %arg20[%c2_75, %c0_76, %c0_77] : memref<18x18x128xf32, #tpu.memory_space<vmem>>, vector<16x16x128xf32>
    %67 = vector.shape_cast %66 : vector<16x16x128xf32> to vector<256x128xf32>
    %c2_78 = arith.constant 2 : index
    %c1_79 = arith.constant 1 : index
    %c0_80 = arith.constant 0 : index
    %68 = vector.load %arg20[%c2_78, %c1_79, %c0_80] : memref<18x18x128xf32, #tpu.memory_space<vmem>>, vector<16x16x128xf32>
    %69 = vector.shape_cast %68 : vector<16x16x128xf32> to vector<256x128xf32>
    %c2_81 = arith.constant 2 : index
    %c2_82 = arith.constant 2 : index
    %c0_83 = arith.constant 0 : index
    %70 = vector.load %arg20[%c2_81, %c2_82, %c0_83] : memref<18x18x128xf32, #tpu.memory_space<vmem>>, vector<16x16x128xf32>
    %71 = vector.shape_cast %70 : vector<16x16x128xf32> to vector<256x128xf32>
    %72 = tpu.concatenate %55, %57, %59, %61, %63, %65, %67, %69, %71 in 1 : vector<256x128xf32>, vector<256x128xf32>, vector<256x128xf32>, vector<256x128xf32>, vector<256x128xf32>, vector<256x128xf32>, vector<256x128xf32>, vector<256x128xf32>, vector<256x128xf32> -> vector<256x1152xf32>
    %c0_84 = arith.constant 0 : index
    %c0_85 = arith.constant 0 : index
    %c0_86 = arith.constant 0 : index
    %73 = vector.load %arg2[%c0_84, %c0_85, %c0_86] : memref<1x256x4xf32, #tpu.memory_space<vmem>>, vector<1x256x4xf32>
    %74 = vector.shape_cast %73 : vector<1x256x4xf32> to vector<256x4xf32>
    %cst_87 = arith.constant dense<0.000000e+00> : vector<4xf32>
    %75 = vector.multi_reduction <add>, %74, %cst_87 [0] : vector<256x4xf32> to vector<4xf32>
    %76 = vector.shape_cast %75 : vector<4xf32> to vector<1x4xf32>
    %cst_88 = arith.constant 2.560000e+02 : f32
    %77 = vector.broadcast %cst_88 : f32 to vector<1x4xf32>
    %78 = arith.divf %76, %77 : vector<1x4xf32>
    %cst_89 = arith.constant dense<0.000000e+00> : vector<64xf32>
    %79 = vector.multi_reduction <add>, %12, %cst_89 [0] : vector<256x64xf32> to vector<64xf32>
    %80 = vector.shape_cast %79 : vector<64xf32> to vector<1x64xf32>
    %cst_90 = arith.constant 2.560000e+02 : f32
    %81 = vector.broadcast %cst_90 : f32 to vector<1x64xf32>
    %82 = arith.divf %80, %81 : vector<1x64xf32>
    %cst_91 = arith.constant dense<0.000000e+00> : vector<64xf32>
    %83 = vector.multi_reduction <add>, %49, %cst_91 [0] : vector<256x64xf32> to vector<64xf32>
    %84 = vector.shape_cast %83 : vector<64xf32> to vector<1x64xf32>
    %cst_92 = arith.constant 2.560000e+02 : f32
    %85 = vector.broadcast %cst_92 : f32 to vector<1x64xf32>
    %86 = arith.divf %84, %85 : vector<1x64xf32>
    %c0_93 = arith.constant 0 : index
    %c0_94 = arith.constant 0 : index
    %87 = vector.load %arg12[%c0_93, %c0_94] : memref<4x8xf32, #tpu.memory_space<vmem>>, vector<4x8xf32>
    %cst_95 = arith.constant dense<0.000000e+00> : vector<1x8xf32>
    %88 = tpu.matmul %78, %87, %cst_95 {dimension_numbers = #tpu.dot_dimension_numbers<[1], [0], [0], [1], [0, 0, 1, 1], [], []>} : vector<1x4xf32>, vector<4x8xf32>, vector<1x8xf32> -> vector<1x8xf32>
    %c0_96 = arith.constant 0 : index
    %c0_97 = arith.constant 0 : index
    %89 = vector.load %arg13[%c0_96, %c0_97] : memref<64x8xf32, #tpu.memory_space<vmem>>, vector<64x8xf32>
    %cst_98 = arith.constant dense<0.000000e+00> : vector<1x8xf32>
    %90 = tpu.matmul %82, %89, %cst_98 {dimension_numbers = #tpu.dot_dimension_numbers<[1], [0], [0], [1], [0, 0, 1, 1], [], []>} : vector<1x64xf32>, vector<64x8xf32>, vector<1x8xf32> -> vector<1x8xf32>
    %91 = arith.addf %88, %90 : vector<1x8xf32>
    %c0_99 = arith.constant 0 : index
    %c0_100 = arith.constant 0 : index
    %92 = vector.load %arg14[%c0_99, %c0_100] : memref<64x8xf32, #tpu.memory_space<vmem>>, vector<64x8xf32>
    %cst_101 = arith.constant dense<0.000000e+00> : vector<1x8xf32>
    %93 = tpu.matmul %86, %92, %cst_101 {dimension_numbers = #tpu.dot_dimension_numbers<[1], [0], [0], [1], [0, 0, 1, 1], [], []>} : vector<1x64xf32>, vector<64x8xf32>, vector<1x8xf32> -> vector<1x8xf32>
    %94 = arith.addf %91, %93 : vector<1x8xf32>
    %cst_102 = arith.constant 0.000000e+00 : f32
    %95 = vector.broadcast %cst_102 : f32 to vector<1x8xf32>
    %96 = arith.maximumf %94, %95 : vector<1x8xf32>
    %c0_103 = arith.constant 0 : index
    %c0_104 = arith.constant 0 : index
    %97 = vector.load %arg15[%c0_103, %c0_104] : memref<8x36xf32, #tpu.memory_space<vmem>>, vector<8x36xf32>
    %cst_105 = arith.constant dense<0.000000e+00> : vector<1x36xf32>
    %98 = tpu.matmul %96, %97, %cst_105 {dimension_numbers = #tpu.dot_dimension_numbers<[1], [0], [0], [1], [0, 0, 1, 1], [], []>} : vector<1x8xf32>, vector<8x36xf32>, vector<1x36xf32> -> vector<1x36xf32>
    %99 = arith.negf %98 : vector<1x36xf32>
    %100 = math.exp %99 : vector<1x36xf32>
    %cst_106 = arith.constant 1.000000e+00 : f32
    %101 = vector.broadcast %cst_106 : f32 to vector<1x36xf32>
    %102 = arith.addf %101, %100 : vector<1x36xf32>
    %103 = arith.divf %101, %102 : vector<1x36xf32>
    %c0_107 = arith.constant 0 : index
    %c0_108 = arith.constant 0 : index
    %104 = vector.load %arg16[%c0_107, %c0_108] : memref<8x1152xf32, #tpu.memory_space<vmem>>, vector<8x1152xf32>
    %cst_109 = arith.constant dense<0.000000e+00> : vector<1x1152xf32>
    %105 = tpu.matmul %96, %104, %cst_109 {dimension_numbers = #tpu.dot_dimension_numbers<[1], [0], [0], [1], [0, 0, 1, 1], [], []>} : vector<1x8xf32>, vector<8x1152xf32>, vector<1x1152xf32> -> vector<1x1152xf32>
    %106 = arith.negf %105 : vector<1x1152xf32>
    %107 = math.exp %106 : vector<1x1152xf32>
    %cst_110 = arith.constant 1.000000e+00 : f32
    %108 = vector.broadcast %cst_110 : f32 to vector<1x1152xf32>
    %109 = arith.addf %108, %107 : vector<1x1152xf32>
    %110 = arith.divf %108, %109 : vector<1x1152xf32>
    %c0_111 = arith.constant 0 : index
    %c0_112 = arith.constant 0 : index
    %111 = vector.load %arg17[%c0_111, %c0_112] : memref<8x1152xf32, #tpu.memory_space<vmem>>, vector<8x1152xf32>
    %cst_113 = arith.constant dense<0.000000e+00> : vector<1x1152xf32>
    %112 = tpu.matmul %96, %111, %cst_113 {dimension_numbers = #tpu.dot_dimension_numbers<[1], [0], [0], [1], [0, 0, 1, 1], [], []>} : vector<1x8xf32>, vector<8x1152xf32>, vector<1x1152xf32> -> vector<1x1152xf32>
    %113 = arith.negf %112 : vector<1x1152xf32>
    %114 = math.exp %113 : vector<1x1152xf32>
    %cst_114 = arith.constant 1.000000e+00 : f32
    %115 = vector.broadcast %cst_114 : f32 to vector<1x1152xf32>
    %116 = arith.addf %115, %114 : vector<1x1152xf32>
    %117 = arith.divf %115, %116 : vector<1x1152xf32>
    %118 = vector.broadcast %103 : vector<1x36xf32> to vector<256x36xf32>
    %119 = arith.mulf %1, %118 : vector<256x36xf32>
    %120 = arith.truncf %119 : vector<256x36xf32> to vector<256x36xbf16>
    %c0_115 = arith.constant 0 : index
    %c0_116 = arith.constant 0 : index
    %121 = vector.load %arg8[%c0_115, %c0_116] : memref<36x64xbf16, #tpu.memory_space<vmem>>, vector<36x64xbf16>
    %cst_117 = arith.constant dense<0.000000e+00> : vector<256x64xf32>
    %122 = tpu.matmul %120, %121, %cst_117 {dimension_numbers = #tpu.dot_dimension_numbers<[1], [0], [0], [1], [0, 0, 1, 1], [], []>} : vector<256x36xbf16>, vector<36x64xbf16>, vector<256x64xf32> -> vector<256x64xf32>
    %123 = vector.broadcast %110 : vector<1x1152xf32> to vector<256x1152xf32>
    %124 = arith.mulf %35, %123 : vector<256x1152xf32>
    %125 = arith.truncf %124 : vector<256x1152xf32> to vector<256x1152xbf16>
    %c0_118 = arith.constant 0 : index
    %c0_119 = arith.constant 0 : index
    %126 = vector.load %arg9[%c0_118, %c0_119] : memref<1152x64xbf16, #tpu.memory_space<vmem>>, vector<1152x64xbf16>
    %cst_120 = arith.constant dense<0.000000e+00> : vector<256x64xf32>
    %127 = tpu.matmul %125, %126, %cst_120 {dimension_numbers = #tpu.dot_dimension_numbers<[1], [0], [0], [1], [0, 0, 1, 1], [], []>} : vector<256x1152xbf16>, vector<1152x64xbf16>, vector<256x64xf32> -> vector<256x64xf32>
    %128 = arith.addf %122, %127 : vector<256x64xf32>
    %129 = vector.broadcast %117 : vector<1x1152xf32> to vector<256x1152xf32>
    %130 = arith.mulf %72, %129 : vector<256x1152xf32>
    %131 = arith.truncf %130 : vector<256x1152xf32> to vector<256x1152xbf16>
    %c0_121 = arith.constant 0 : index
    %c0_122 = arith.constant 0 : index
    %132 = vector.load %arg10[%c0_121, %c0_122] : memref<1152x64xbf16, #tpu.memory_space<vmem>>, vector<1152x64xbf16>
    %cst_123 = arith.constant dense<0.000000e+00> : vector<256x64xf32>
    %133 = tpu.matmul %131, %132, %cst_123 {dimension_numbers = #tpu.dot_dimension_numbers<[1], [0], [0], [1], [0, 0, 1, 1], [], []>} : vector<256x1152xbf16>, vector<1152x64xbf16>, vector<256x64xf32> -> vector<256x64xf32>
    %134 = arith.addf %128, %133 : vector<256x64xf32>
    %c0_124 = arith.constant 0 : index
    %c0_125 = arith.constant 0 : index
    %135 = vector.load %arg11[%c0_124, %c0_125] : memref<1x64xf32, #tpu.memory_space<vmem>>, vector<1x64xf32>
    %136 = vector.broadcast %135 : vector<1x64xf32> to vector<256x64xf32>
    %137 = arith.addf %134, %136 : vector<256x64xf32>
    %c0_126 = arith.constant 0 : index
    %c0_127 = arith.constant 0 : index
    %c0_128 = arith.constant 0 : index
    %138 = vector.load %arg18[%c0_126, %c0_127, %c0_128] : memref<1x256x64xf32, #tpu.memory_space<vmem>>, vector<1x256x64xf32>
    %139 = vector.shape_cast %138 : vector<1x256x64xf32> to vector<256x64xf32>
    %140 = vector.shape_cast %137 : vector<256x64xf32> to vector<1x256x64xf32>
    tpu.vector_store %arg18[%c0_126, %c0_127, %c0_128], %140 {strides = array<i32>} : memref<1x256x64xf32, #tpu.memory_space<vmem>>, vector<1x256x64xf32>,
    return
  }
  func.func @transform_0(%arg0: i32) -> (i32, i32, i32) {
    %c0_i32 = arith.constant 0 : i32
    %c0_i32_0 = arith.constant 0 : i32
    %c0_i32_1 = arith.constant 0 : i32
    return %arg0, %c0_i32, %c0_i32_0 : i32, i32, i32
  }
  func.func @transform_1(%arg0: i32) -> (i32, i32, i32) {
    %c0_i32 = arith.constant 0 : i32
    %c0_i32_0 = arith.constant 0 : i32
    %c0_i32_1 = arith.constant 0 : i32
    return %arg0, %c0_i32, %c0_i32_0 : i32, i32, i32
  }
  func.func @transform_2(%arg0: i32) -> (i32, i32) {
    %c0_i32 = arith.constant 0 : i32
    %c0_i32_0 = arith.constant 0 : i32
    %c0_i32_1 = arith.constant 0 : i32
    return %c0_i32, %c0_i32_0 : i32, i32
  }
  func.func @transform_3(%arg0: i32) -> (i32, i32) {
    %c0_i32 = arith.constant 0 : i32
    %c0_i32_0 = arith.constant 0 : i32
    %c0_i32_1 = arith.constant 0 : i32
    return %c0_i32, %c0_i32_0 : i32, i32
  }
  func.func @transform_4(%arg0: i32) -> (i32, i32) {
    %c0_i32 = arith.constant 0 : i32
    %c0_i32_0 = arith.constant 0 : i32
    %c0_i32_1 = arith.constant 0 : i32
    return %c0_i32, %c0_i32_0 : i32, i32
  }
  func.func @transform_5(%arg0: i32) -> (i32, i32) {
    %c0_i32 = arith.constant 0 : i32
    %c0_i32_0 = arith.constant 0 : i32
    %c0_i32_1 = arith.constant 0 : i32
    return %c0_i32, %c0_i32_0 : i32, i32
  }
  func.func @transform_6(%arg0: i32) -> (i32, i32) {
    %c0_i32 = arith.constant 0 : i32
    %c0_i32_0 = arith.constant 0 : i32
    %c0_i32_1 = arith.constant 0 : i32
    return %c0_i32, %c0_i32_0 : i32, i32
  }
  func.func @transform_7(%arg0: i32) -> (i32, i32) {
    %c0_i32 = arith.constant 0 : i32
    %c0_i32_0 = arith.constant 0 : i32
    %c0_i32_1 = arith.constant 0 : i32
    return %c0_i32, %c0_i32_0 : i32, i32
  }
  func.func @transform_8(%arg0: i32) -> (i32, i32) {
    %c0_i32 = arith.constant 0 : i32
    %c0_i32_0 = arith.constant 0 : i32
    %c0_i32_1 = arith.constant 0 : i32
    return %c0_i32, %c0_i32_0 : i32, i32
  }
  func.func @transform_9(%arg0: i32) -> (i32, i32) {
    %c0_i32 = arith.constant 0 : i32
    %c0_i32_0 = arith.constant 0 : i32
    %c0_i32_1 = arith.constant 0 : i32
    return %c0_i32, %c0_i32_0 : i32, i32
  }
  func.func @transform_10(%arg0: i32) -> (i32, i32) {
    %c0_i32 = arith.constant 0 : i32
    %c0_i32_0 = arith.constant 0 : i32
    %c0_i32_1 = arith.constant 0 : i32
    return %c0_i32, %c0_i32_0 : i32, i32
  }
  func.func @transform_11(%arg0: i32) -> (i32, i32) {
    %c0_i32 = arith.constant 0 : i32
    %c0_i32_0 = arith.constant 0 : i32
    %c0_i32_1 = arith.constant 0 : i32
    return %c0_i32, %c0_i32_0 : i32, i32
  }
  func.func @transform_12(%arg0: i32) -> (i32, i32) {
    %c0_i32 = arith.constant 0 : i32
    %c0_i32_0 = arith.constant 0 : i32
    %c0_i32_1 = arith.constant 0 : i32
    return %c0_i32, %c0_i32_0 : i32, i32
  }
  func.func @transform_13(%arg0: i32) -> (i32, i32) {
    %c0_i32 = arith.constant 0 : i32
    %c0_i32_0 = arith.constant 0 : i32
    %c0_i32_1 = arith.constant 0 : i32
    return %c0_i32, %c0_i32_0 : i32, i32
  }
  func.func @transform_14(%arg0: i32) -> (i32, i32) {
    %c0_i32 = arith.constant 0 : i32
    %c0_i32_0 = arith.constant 0 : i32
    %c0_i32_1 = arith.constant 0 : i32
    return %c0_i32, %c0_i32_0 : i32, i32
  }
  func.func @transform_15(%arg0: i32) -> (i32, i32) {
    %c0_i32 = arith.constant 0 : i32
    %c0_i32_0 = arith.constant 0 : i32
    %c0_i32_1 = arith.constant 0 : i32
    return %c0_i32, %c0_i32_0 : i32, i32
  }
  func.func @transform_16(%arg0: i32) -> (i32, i32) {
    %c0_i32 = arith.constant 0 : i32
    %c0_i32_0 = arith.constant 0 : i32
    %c0_i32_1 = arith.constant 0 : i32
    return %c0_i32, %c0_i32_0 : i32, i32
  }
  func.func @transform_17(%arg0: i32) -> (i32, i32, i32) {
    %c0_i32 = arith.constant 0 : i32
    %c0_i32_0 = arith.constant 0 : i32
    %c0_i32_1 = arith.constant 0 : i32
    return %arg0, %c0_i32, %c0_i32_0 : i32, i32, i32
  }
}

</mosaic_0001>

<bundles_post_ra>
// kernel: tile.19
= control target key start
LH: loop header
LB: loop body
LE: loop exit
PB: predicated region body
PF: predicated region fallthrough
CT: control target
= control target key end

     0   :  { %vm47_vm0 = vcmask 64512   ;;  %s185_s0 = inlined_call_operand.vmem [shape: f32[8,9,4], index: 0, kind: input, shape index: {}]   ;;  %s186_s1 = inlined_call_operand.vmem [shape: f32[8,36], index: 1, kind: output, shape index: {}]  }
   0x1   :  { %v96_v0 = vld [vmem:[%s185_s0 + $0x20] sm:$0xf]  ;;  %v97_v1 = vld [vmem:[%s185_s0 + $0x1c] sm:$0xf]  ;;  %v98_v2 = vld [vmem:[%s185_s0 + $0x18] sm:$0xf] }
   0x2   :  { %9 = vst [vmem:[#allocation0 + $0x10] sm:$0xf] %v96_v0  ;;  %14 = vst [vmem:[#allocation0 + $0x40] sm:$0xf] %v97_v1  ;;  %v99_v3 = vld [vmem:[%s185_s0 + $0x14] sm:$0xf] }
   0x3   :  { %19 = vst [vmem:[#allocation0 + $0x28] sm:$0xf] %v98_v2  ;;  %v100_v4 = vld [vmem:[%s185_s0 + $0x10] sm:$0xf]  ;;  %v101_v5 = vld [vmem:[%s185_s0 + $0xc] sm:$0xf] }
   0x4   :  { %24 = vst [vmem:[#allocation0 + $0x30] sm:$0xf] %v99_v3  ;;  %29 = vst [vmem:[#allocation0 + $0x20] sm:$0xf] %v100_v4  ;;  %v102_v6 = vld [vmem:[%s185_s0 + $0x8] sm:$0xf] }
   0x5   :  { %34 = vst [vmem:[#allocation0 + $0x18] sm:$0xf] %v101_v5  ;;  %v103_v7 = vld [vmem:[%s185_s0 + $0x4] sm:$0xf]  ;;  %v44_v8 = vld [vmem:[%s185_s0] sm:$0xf] }
   0x6   :  { %39 = vst [vmem:[#allocation0] sm:$0xf] %v102_v6  ;;  %43 = vst [vmem:[#allocation0 + $0x8] sm:$0xf] %v103_v7 }
   0x7   :  { %45 = vst [vmem:[#allocation0 + $0x38] sm:$0xf] %v44_v8 }
   0x9   :  { %v80_v10 = vld [vmem:[#allocation0 + $0x40] sm:$0xf]   ;;  %v85_v11 = vld [vmem:[#allocation0 + $0x10] sm:$0xf]  }
   0xa   :  { %v75_v9 = vld [vmem:[#allocation0 + $0x28] sm:$0xf]   ;;  %110 = vst.msk [vmem:[%s186_s1 + $0x1c] sm:$0xf] %vm47_vm0, %v80_v10   ;;  %111 = vst.msk [vmem:[%s186_s1 + $0x20] sm:$0xf] %vm47_vm0, %v85_v11  }
   0xb   :  { %v65_v13 = vld [vmem:[#allocation0 + $0x20] sm:$0xf]   ;;  %v70_v14 = vld [vmem:[#allocation0 + $0x30] sm:$0xf]   ;;  %109 = vst.msk [vmem:[%s186_s1 + $0x18] sm:$0xf] %vm47_vm0, %v75_v9  }
   0xc   :  { %v60_v12 = vld [vmem:[#allocation0 + $0x18] sm:$0xf]   ;;  %107 = vst.msk [vmem:[%s186_s1 + $0x10] sm:$0xf] %vm47_vm0, %v65_v13   ;;  %108 = vst.msk [vmem:[%s186_s1 + $0x14] sm:$0xf] %vm47_vm0, %v70_v14  }
   0xd   :  { %v50_v16 = vld [vmem:[#allocation0 + $0x8] sm:$0xf]   ;;  %v55_v17 = vld [vmem:[#allocation0] sm:$0xf]   ;;  %106 = vst.msk [vmem:[%s186_s1 + $0xc] sm:$0xf] %vm47_vm0, %v60_v12  }
   0xe   :  { %v46_v15 = vld [vmem:[#allocation0 + $0x38] sm:$0xf]   ;;  %104 = vst.msk [vmem:[%s186_s1 + $0x4] sm:$0xf] %vm47_vm0, %v50_v16   ;;  %105 = vst.msk [vmem:[%s186_s1 + $0x8] sm:$0xf] %vm47_vm0, %v55_v17  }
   0xf   :  { %48 = vst.msk [vmem:[%s186_s1] sm:$0xf] %vm47_vm0, %v46_v15  }

// kernel: prepare_block_forward.1
= control target key start
LH: loop header
LB: loop body
LE: loop exit
PB: predicated region body
PF: predicated region fallthrough
CT: control target
= control target key end

     0   :  { %s15928_s0 = inlined_call_operand.vmem [shape: f32[2,256,36], index: 0, kind: input, shape index: {}]   ;;  %s15929_s1 = inlined_call_operand.vmem [shape: f32[2,256,4], index: 1, kind: input, shape index: {}]   ;;  %s15930_s2 = inlined_call_operand.vmem [shape: bf16[36,64], index: 2, kind: input, shape index: {}]   ;;  %s15931_s3 = inlined_call_operand.vmem [shape: f32[1,64], index: 3, kind: input, shape index: {}]   ;;  %s15932_s4 = inlined_call_operand.vmem [shape: bf16[36,64], index: 4, kind: input, shape index: {}]   ;;  %s15933_s5 = inlined_call_operand.vmem [shape: bf16[1152,64], index: 5, kind: input, shape index: {}]   ;;  %s15934_s6 = inlined_call_operand.vmem [shape: f32[1,64], index: 6, kind: input, shape index: {}]   ;;  %s15935_s7 = inlined_call_operand.vmem [shape: bf16[36,64], index: 7, kind: input, shape index: {}]   ;;  %s15936_s8 = inlined_call_operand.vmem [shape: bf16[1152,64], index: 8, kind: input, shape index: {}]   ;;  %s15937_s9 = inlined_call_operand.vmem [shape: bf16[1152,64], index: 9, kind: input, shape index: {}]   ;;  %s15938_s10 = inlined_call_operand.vmem [shape: f32[1,64], index: 10, kind: input, shape index: {}]   ;;  %s15939_s11 = inlined_call_operand.vmem [shape: f32[4,8], index: 11, kind: input, shape index: {}]   ;;  %s15940_s12 = inlined_call_operand.vmem [shape: f32[64,8], index: 12, kind: input, shape index: {}]   ;;  %s15941_s13 = inlined_call_operand.vmem [shape: f32[64,8], index: 13, kind: input, shape index: {}]   ;;  %s15942_s14 = inlined_call_operand.vmem [shape: f32[8,36], index: 14, kind: input, shape index: {}]   ;;  %s15943_s15 = inlined_call_operand.vmem [shape: f32[8,1152], index: 15, kind: input, shape index: {}]   ;;  %s15944_s16 = inlined_call_operand.vmem [shape: f32[8,1152], index: 16, kind: input, shape index: {}]   ;;  %s15945_s17 = inlined_call_operand.hbm [shape: f32[2,256,64], index: 17, kind: output, shape index: {}]  }
   0x1   :  { %16038 = sst [smem:[#allocation62_spill]] %s15928_s0 }
   0x2   :  { %16039 = sst [smem:[#allocation63_spill]] %s15929_s1 }
   0x3   :  { %16040 = sst [smem:[#allocation64_spill]] %s15930_s2 }
   0x4   :  { %22 = vsyncpa [#allocation5], 0 }
   0x5   :  { %24 = vsyncpa [#allocation5 + $0x1], 0  ;;  %s11986_s24 = smov 0   ;;  %s11988_s25 = smov 0  }
   0x6   :  { %s11990_s26 = smov 0   ;;  %s11992_s27 = smov 0  }
   0x7 LB: > { %16041 = sst [smem:[#allocation7_spill]] %s11876_s24  ;;  %s12007_s28 = sadd.s32 4294967295, %s11888_s27   ;;  %s11888_s27 = sphi %s11992_s27, %s16270_s27   ;;  %s11884_s26 = sphi %s11990_s26, %s16272_s26   ;;  %s11880_s25 = sphi %s11988_s25, %s16274_s25   ;;  %s11876_s24 = sphi %s11986_s24, %s16273_s24  }
   0x8   : > { %16042 = sst [smem:[#allocation8_spill]] %s11884_s26  ;;  %s9124_s29 = sadd.s32 4294967294, %s11888_s27  }
   0x9   : > { %s12011_s0 = sadd.s32 1, %s11888_s27   ;;  %s404_s30 = sadd.s32 1, %s11884_s26 }
   0xa   : > { %16043 = sst [smem:[#allocation9_spill]] %s12011_s0  ;;  %s401_s18 = ssub.s32 %s11888_s27, %s12011_s0 }
   0xb   : > { %p414_p0 = scmp.ne.s32.totalorder %s11884_s26, %s11880_s25  ;;  %p402_p1 = scmp.eq.s32.totalorder %s401_s18, 0 }
   0xc   : > { %p415_p2 = scmp.eq.s32.totalorder %s12007_s28, 1  ;;  %p420_p3 = scmp.ne.s32.totalorder %s11880_s25, %s11876_s24 }
   0xd   : > { %p421_p4 = scmp.eq.s32.totalorder %s9124_s29, 1  ;;  %p9127_p7 = scmp.ge.s32.totalorder %s11888_s27, 1 }
   0xe   : > { %s12022_s19 = scalar_select %p402_p1, %s11884_s26, %s404_s30  }
   0xf   : > { %p12024_p5 = por %p415_p2, %p414_p0  ;;  %p12028_p6 = por %p421_p4, %p420_p3 }
  0x10   : > { %16044 = sst [smem:[#allocation10_spill]] %s12022_s19  ;;  %p500_p8 = scmp.lt.s32.totalorder %s11888_s27, 3 }
  0x11   : > { %s16046_s20 = scalar_select %p12028_p6, 1, 0 }
  0x12   : > { %p501_p9 = pnand %p9127_p7, %p500_p8 }
  0x13   : > { %16047 = sst [smem:[#allocation11_spill]] %s16046_s20 }
  0x14   : > { %504 = sbr.rel (%p501_p9) target bundleno = 2078 (0x81e), region = 88 }
  0x19   : > { %s16048_s2 = sld [smem:[#allocation64_spill]]  ;;  %vm692_vm0 = vcmask 1041408   ;;  %p557_p10 = scmp.lt.s32.totalorder %s12007_s28, 1  ;;  %v11338_v4 = vld [vmem:[%s15933_s5 + $0x78] sm:$0xff]   ;;  %vm643_vm1 = vcmask 293888   ;;  %v11340_v23 = vld [vmem:[%s15933_s5 + $0x70] sm:$0xff]  }
  0x1a   : > { %s16049_s19 = sld [smem:[#allocation62_spill]]  ;;  %v11339_v16 = vld [vmem:[%s15933_s5 + $0x38] sm:$0xff]   ;;  %v11341_v33 = vld [vmem:[%s15933_s5 + $0x30] sm:$0xff]   ;;  %v11343_v37 = vld [vmem:[%s15933_s5 + $0x68] sm:$0xff]   ;;  %vm1008_vm2 = vcmask 523264   ;;  %s554_s21 = sand.u32 1, %s11880_s25  }
  0x1b   : > { %s12045_s30 = scalar_select %p557_p10, %s12007_s28, 1  ;;  %v11342_v35 = vld [vmem:[%s15933_s5 + $0xf8] sm:$0xff]   ;;  %v11345_v43 = vld [vmem:[%s15933_s5 + $0x28] sm:$0xff]   ;;  %v11346_v46 = vld [vmem:[%s15933_s5 + $0xf0] sm:$0xff]  }
  0x1c   : > { %v11344_v39 = vld [vmem:[%s15933_s5 + $0xb8] sm:$0xff]   ;;  %v11347_v49 = vld [vmem:[%s15933_s5 + $0x60] sm:$0xff]   ;;  %v11348_v52 = vld [vmem:[%s15933_s5 + $0xb0] sm:$0xff]   ;;  %s16059_s20 = sld [smem:[#allocation63_spill]]  ;;  %s9128_s23 = sshll.u32 %s554_s21, 8 }
  0x1d   : > { %s15950_s22 = sshll.u32 %s12045_s30, 8  ;;  %v11349_v53 = vld [vmem:[%s15933_s5 + $0x20] sm:$0xff]   ;;  %v11350_v55 = vld [vmem:[%s15933_s5 + $0xe8] sm:$0xff]   ;;  %v11351_v57 = vld [vmem:[%s15933_s5 + $0x58] sm:$0xff]   ;;  %s15726_s24 = scalar_lea.vmem [#allocation4], %s9128_s23 }
  0x1e   : > { %v11352_v59 = vld [vmem:[%s15933_s5 + $0xa8] sm:$0xff]  }
  0x1f   : > { %v11335_v0 = vld [vmem:[%s16048_s2 + $0x10] ss:$0 sps:$4 sm:$0x33]   ;;  %v11336_v1 = vld [vmem:[%s16048_s2 + $0x8] sm:$0xff]   ;;  %v11337_v3 = vld [vmem:[%s16048_s2] sm:$0xff]  }
  0x20   : > { %11288 = vmatprep.subr.msk.bf16.mxu0 %vm692_vm0, %v11335_v0  ;;  %v694_v2 = vsel %vm692_vm0, %v11335_v0, 0  ;;  %11289 = vmatprep.subr.msk.bf16.mxu1 %vm692_vm0, %v11335_v0  ;;  %s12056_s26 = scalar_lea.vmem %s16049_s19, %s15950_s22  ;;  %s16058_s22 = sshll.u32 %s12045_s30, 8 }
  0x21   : > { %10951 = vmatpush3.bf16.msra.mxu0 %v694_v2  ;;  %11269 = vmatpush3.bf16.msra.mxu1 %v694_v2  ;;  %v568_v5 = vld [vmem:[%s12056_s26] sm:$0xff]  ;;  %v569_v6 = vld [vmem:[%s12056_s26 + $0x8] sm:$0xff]  ;;  %v570_v7 = vld [vmem:[%s12056_s26 + $0x10] sm:$0xff]  ;;  %s11893_s30 = smov [#allocation4]  }
  0x22   : > { %10952 = vmatprep.subr.bf16.mxu0 %v11336_v1  ;;  %11267 = vmatprep.subr.bf16.mxu1 %v11336_v1  ;;  %v12064_v8 = vpack.c.bf16 %v569_v6, %v568_v5  ;;  %v571_v9 = vld [vmem:[%s12056_s26 + $0x18] sm:$0xff]  ;;  %v572_v10 = vld [vmem:[%s12056_s26 + $0x20] sm:$0xff]  ;;  %v573_v11 = vld [vmem:[%s12056_s26 + $0x28] sm:$0xff]  ;;  %s12861_s18 = scalar_lea.vmem %s16059_s20, %s16058_s22  ;;  %s11832_s23 = sshll.u32 %s11893_s30, 4  ;;  %s11833_s23 = int_to_ptr.vmem [resolvable:$false] %s11832_s23 }
  0x23   : > { %v12071_v12 = vpack.c.bf16 %v571_v9, %v570_v7  ;;  %v12073_v13 = vpack.c.bf16 %v573_v11, %v572_v10  ;;  %v584_v14 = vld [vmem:[%s12056_s26 + $0x80] sm:$0xff]  ;;  %v585_v15 = vld [vmem:[%s12056_s26 + $0x88] sm:$0xff]  ;;  %v586_v18 = vld [vmem:[%s12056_s26 + $0x90] sm:$0xff]  ;;  %v11890_v9 = vmov 0.0   ;;  %s11834_s29 = scalar_lea.vmem %s11833_s23, 8192 }
  0x24   : > { %10956 = vmatprep.mubr.msk.bf16.mxu0 %vm643_vm1, %v12064_v8  ;;  %v12080_v17 = vpack.c.bf16 %v585_v15, %v584_v14  ;;  %v587_v19 = vld [vmem:[%s12056_s26 + $0x98] sm:$0xff]  ;;  %v588_v20 = vld [vmem:[%s12056_s26 + $0xa0] sm:$0xff]  ;;  %v589_v22 = vld [vmem:[%s12056_s26 + $0xa8] sm:$0xff]  ;;  %959 = vst [vmem:[#allocation2 + $0x30] sm:$0xff] %v11890_v9 }
  0x25   : > { %10953 = vmatpush3.bf16.msra.mxu0 %v11336_v1  ;;  %11270 = vmatpush3.bf16.msra.mxu1 %v11336_v1  ;;  %v12087_v21 = vpack.c.bf16 %v587_v19, %v586_v18  ;;  %v574_v24 = vld [vmem:[%s12056_s26 + $0x30] sm:$0xff]  ;;  %v575_v25 = vld [vmem:[%s12056_s26 + $0x38] sm:$0xff]  ;;  %v576_v26 = vld [vmem:[%s12056_s26 + $0x40] sm:$0xff]  ;;  %v12100_v27 = vpack.c.bf16 %v589_v22, %v588_v20  ;;  %960 = vst [vmem:[#allocation2 + $0x38] sm:$0xff] %v11890_v9 }
  0x26   : > { %10954 = vmatprep.subr.bf16.mxu0 %v11337_v3  ;;  %11268 = vmatprep.subr.bf16.mxu1 %v11337_v3  ;;  %v577_v28 = vld [vmem:[%s12056_s26 + $0x48] sm:$0xff]  ;;  %v590_v29 = vld [vmem:[%s12056_s26 + $0xb0] sm:$0xff]  ;;  %v591_v30 = vld [vmem:[%s12056_s26 + $0xb8] sm:$0xff]  ;;  %v12114_v34 = vpack.c.bf16 %v575_v25, %v574_v24  ;;  %953 = vst [vmem:[#allocation2] sm:$0xff] %v11890_v9 }
  0x27   : > { %16050 = vst [vmem:[#allocation12_spill] sm:$0xff] %v12087_v21  ;;  %10972 = vmatprep.mubr.msk.bf16.mxu1 %vm643_vm1, %v12080_v17  ;;  %16051 = vst [vmem:[#allocation13_spill] sm:$0xff] %v12100_v27  ;;  %v592_v31 = vld [vmem:[%s12056_s26 + $0xc0] sm:$0xff]  ;;  %v593_v32 = vld [vmem:[%s12056_s26 + $0xc8] sm:$0xff]  ;;  %v12119_v36 = vpack.c.bf16 %v577_v28, %v576_v26  ;;  %v12124_v38 = vpack.c.bf16 %v591_v30, %v590_v29  ;;  %v11891_v28 = vmov 0.0|0.0  }
  0x28   : > { %v578_v40 = vld [vmem:[%s12056_s26 + $0x50] sm:$0xff]  ;;  %v579_v41 = vld [vmem:[%s12056_s26 + $0x58] sm:$0xff]  ;;  %v12131_v42 = vpack.c.bf16 %v593_v32, %v592_v31  ;;  %v580_v44 = vld [vmem:[%s12056_s26 + $0x60] sm:$0xff]  ;;  %954 = vst [vmem:[#allocation2 + $0x8] sm:$0xff] %v11890_v9 }
  0x29   : > { %10955 = vmatpush3.bf16.msra.mxu0 %v11337_v3  ;;  %11271 = vmatpush3.bf16.msra.mxu1 %v11337_v3  ;;  %16052 = vst [vmem:[#allocation14_spill] sm:$0xff] %v12124_v38  ;;  %v581_v45 = vld [vmem:[%s12056_s26 + $0x68] sm:$0xff]  ;;  %v594_v47 = vld [vmem:[%s12056_s26 + $0xd0] sm:$0xff]  ;;  %v595_v48 = vld [vmem:[%s12056_s26 + $0xd8] sm:$0xff]  ;;  %v12162_v54 = vpack.c.bf16 %v579_v41, %v578_v40 }
  0x2a   : > { %9470 = vmatprep.subr.bf16.mxu1 %v11338_v4  ;;  %9582 = vmatprep.subr.bf16.mxu0 %v11342_v35  ;;  %16053 = vst [vmem:[#allocation15_spill] sm:$0xff] %v12131_v42  ;;  %v596_v50 = vld [vmem:[%s12056_s26 + $0xe0] sm:$0xff]  ;;  %v597_v51 = vld [vmem:[%s12056_s26 + $0xe8] sm:$0xff]  ;;  %v12167_v56 = vpack.c.bf16 %v581_v45, %v580_v44  ;;  %v12172_v58 = vpack.c.bf16 %v595_v48, %v594_v47  ;;  %v582_v60 = vld [vmem:[%s12056_s26 + $0x70] sm:$0xff] }
  0x2b   : > { %v583_v61 = vld [vmem:[%s12056_s26 + $0x78] sm:$0xff]  ;;  %v12179_v62 = vpack.c.bf16 %v597_v51, %v596_v50  ;;  %v598_v63 = vld [vmem:[%s12056_s26 + $0xf0] sm:$0xff]  ;;  %v11354_v4 = vld [vmem:[%s15933_s5 + $0xe0] sm:$0xff]   ;;  %955 = vst [vmem:[#allocation2 + $0x10] sm:$0x3] %v11890_v9 }
  0x2c   : > { %10957 = vmatmul.mubr.msk.bf16.vlgmr.msra.gmra.mxu0 %vm643_vm1, %v12071_v12  ;;  %10973 = vmatmul.mubr.msk.bf16.vlgmr.msra.gmra.mxu1 %vm643_vm1, %v12087_v21  ;;  %16054 = vst [vmem:[#allocation16_spill] sm:$0xff] %v12172_v58  ;;  %v599_v0 = vld [vmem:[%s12056_s26 + $0xf8] sm:$0xff]  ;;  %v12191_v1 = vpack.c.bf16 %v583_v61, %v582_v60  ;;  %v11355_v5 = vld [vmem:[%s15933_s5 + $0x50] sm:$0xff]   ;;  %v12211_v6 = vld [vmem:[%s15933_s5 + $0xa0] sm:$0xff]  }
  0x2d   : > { %10960 = vmatprep.mubr.msk.bf16.mxu0 %vm643_vm1, %v12073_v13  ;;  %10976 = vmatprep.mubr.msk.bf16.mxu1 %vm643_vm1, %v12100_v27  ;;  %16055 = vst [vmem:[#allocation17_spill] sm:$0xff] %v12179_v62  ;;  %v12193_v2 = vpack.c.bf16 %v599_v0, %v598_v63  ;;  %v11353_v3 = vld [vmem:[%s15933_s5 + $0x18] sm:$0xff]   ;;  %v12216_v7 = vld [vmem:[%s15933_s5 + $0x10] sm:$0xff]   ;;  %956 = vst [vmem:[#allocation2 + $0x18] sm:$0xff] %v11890_v9 }
  0x2e   : > { %9471 = vmatpush3.bf16.msra.mxu1 %v11339_v16  ;;  %9583 = vmatpush3.bf16.msra.mxu0 %v11344_v39  ;;  %957 = vst [vmem:[#allocation2 + $0x20] sm:$0xff] %v11890_v9  ;;  %958 = vst [vmem:[#allocation2 + $0x28] sm:$0x3] %v11890_v9  ;;  %v11358_v10 = vld [vmem:[%s15933_s5 + $0xd8] sm:$0xff]   ;;  %v11359_v11 = vld [vmem:[%s15933_s5 + $0x48] sm:$0xff]  }
  0x2f   : > { %9472 = vmatprep.subr.bf16.mxu1 %v11340_v23  ;;  %9584 = vmatprep.subr.bf16.mxu0 %v11346_v46  ;;  %16056 = vst [vmem:[#allocation18_spill] sm:$0xff] %v12193_v2  ;;  %961 = vst [vmem:[#allocation2 + $0x40] sm:$0x3] %v11890_v9  ;;  %v11360_v14 = vld [vmem:[%s15933_s5 + $0x98] sm:$0xff]   ;;  %v11361_v15 = vld [vmem:[%s15933_s5 + $0x8] sm:$0xff]  }
  0x30   : > { %962 = vst [vmem:[#allocation2 + $0x48] sm:$0xff] %v11890_v9  ;;  %963 = vst [vmem:[#allocation2 + $0x50] sm:$0xff] %v11890_v9  ;;  %v11362_v16 = vld [vmem:[%s15933_s5 + $0xd0] sm:$0xff]   ;;  %v11363_v18 = vld [vmem:[%s15933_s5 + $0x40] sm:$0xff]  }
  0x31   : > { %964 = vst [vmem:[#allocation2 + $0x58] sm:$0x3] %v11890_v9  ;;  %965 = vst [vmem:[#allocation2 + $0x60] sm:$0xff] %v11890_v9  ;;  %v11364_v19 = vld [vmem:[%s15933_s5 + $0x90] sm:$0xff]   ;;  %v11365_v20 = vld [vmem:[%s15933_s5] sm:$0xff]  }
  0x32   : > { %9473 = vmatpush3.bf16.msra.mxu1 %v11341_v33  ;;  %9585 = vmatpush3.bf16.msra.mxu0 %v11348_v52  ;;  %966 = vst [vmem:[#allocation2 + $0x68] sm:$0xff] %v11890_v9  ;;  %967 = vst [vmem:[#allocation2 + $0x70] sm:$0x3] %v11890_v9  ;;  %v1073_v22 = vld [vmem:[#allocation2 + $0x1] sm:$0xff]  ;;  %v1074_v23 = vld [vmem:[#allocation2 + $0x9] sm:$0xff] }
  0x33   : > { %9474 = vmatprep.subr.bf16.mxu1 %v11343_v37  ;;  %9586 = vmatprep.subr.bf16.mxu0 %v11350_v55  ;;  %968 = vst [vmem:[#allocation2 + $0x78] sm:$0xff] %v11890_v9  ;;  %969 = vst [vmem:[#allocation2 + $0x80] sm:$0xff] %v11890_v9  ;;  %v1336_v24 = vpack.c.bf16 %v1074_v23, %v1073_v22  ;;  %v11366_v25 = vld [vmem:[%s15933_s5 + $0xc8] sm:$0xff]   ;;  %v11368_v29 = vld [vmem:[%s15933_s5 + $0xc0] sm:$0xff]  }
  0x34   : > { %10961 = vmatmul.mubr.msk.bf16.gmra.mxu0 %vm643_vm1, %v12114_v34  ;;  %10977 = vmatmul.mubr.msk.bf16.gmra.mxu1 %vm643_vm1, %v12124_v38  ;;  %970 = vst [vmem:[#allocation2 + $0x88] sm:$0x3] %v11890_v9  ;;  %971 = vst [vmem:[#allocation2 + $0x90] sm:$0xff] %v11890_v9  ;;  %v11367_v26 = vld [vmem:[%s15933_s5 + $0x88] sm:$0xff]   ;;  %v11369_v30 = vld [vmem:[%s15933_s5 + $0x80] sm:$0xff]  }
  0x35   : > { %10964 = vmatprep.mubr.msk.bf16.mxu0 %vm643_vm1, %v12119_v36  ;;  %10980 = vmatprep.mubr.msk.bf16.mxu1 %vm643_vm1, %v12131_v42  ;;  %972 = vst [vmem:[#allocation2 + $0x98] sm:$0xff] %v11890_v9  ;;  %973 = vst [vmem:[#allocation2 + $0xa0] sm:$0x3] %v11890_v9  ;;  %v11370_v31 = vld [vmem:[%s15933_s5 + $0x178] sm:$0xff]   ;;  %v11374_v35 = vld [vmem:[%s15933_s5 + $0x170] sm:$0xff]  }
  0x36   : > { %9475 = vmatpush3.bf16.msra.mxu1 %v11345_v43  ;;  %9587 = vmatpush3.bf16.msra.mxu0 %v11352_v59  ;;  %974 = vst [vmem:[#allocation2 + $0xa8] sm:$0xff] %v11890_v9  ;;  %975 = vst [vmem:[#allocation2 + $0xb0] sm:$0xff] %v11890_v9  ;;  %v11371_v32 = vld [vmem:[%s15933_s5 + $0x138] sm:$0xff]   ;;  %v11375_v37 = vld [vmem:[%s15933_s5 + $0x130] sm:$0xff]  }
  0x37   : > { %9476 = vmatprep.subr.bf16.mxu1 %v11347_v49  ;;  %9588 = vmatprep.subr.bf16.mxu0 %v11354_v4  ;;  %976 = vst [vmem:[#allocation2 + $0xb8] sm:$0x3] %v11890_v9  ;;  %977 = vst [vmem:[#allocation2 + $0xc0] sm:$0xff] %v11890_v9  ;;  %v11372_v33 = vld [vmem:[%s15933_s5 + $0x1f8] sm:$0xff]   ;;  %v11378_v39 = vld [vmem:[%s15933_s5 + $0x168] sm:$0xff]  }
  0x38   : > { %978 = vst [vmem:[#allocation2 + $0xc8] sm:$0xff] %v11890_v9  ;;  %979 = vst [vmem:[#allocation2 + $0xd0] sm:$0x3] %v11890_v9  ;;  %v11379_v40 = vld [vmem:[%s15933_s5 + $0x128] sm:$0xff]   ;;  %v11382_v41 = vld [vmem:[%s15933_s5 + $0x160] sm:$0xff]  }
  0x39   : > { %980 = vst [vmem:[#allocation2 + $0xd8] sm:$0xff] %v11890_v9  ;;  %981 = vst [vmem:[#allocation2 + $0xe0] sm:$0xff] %v11890_v9  ;;  %v11383_v43 = vld [vmem:[%s15933_s5 + $0x120] sm:$0xff]   ;;  %v11386_v44 = vld [vmem:[%s15933_s5 + $0x158] sm:$0xff]  }
  0x3a   : > { %9477 = vmatpush3.bf16.msra.mxu1 %v11349_v53  ;;  %982 = vst [vmem:[#allocation2 + $0xe8] sm:$0x3] %v11890_v9  ;;  %983 = vst [vmem:[#allocation2 + $0xf0] sm:$0xff] %v11890_v9  ;;  %9589 = vmatpush3.bf16.msra.mxu0 %v12211_v6  ;;  %v11387_v45 = vld [vmem:[%s15933_s5 + $0x118] sm:$0xff]   ;;  %v11390_v46 = vld [vmem:[%s15933_s5 + $0x150] sm:$0xff]  }
  0x3b   : > { %9478 = vmatprep.subr.bf16.mxu1 %v11351_v57  ;;  %984 = vst [vmem:[#allocation2 + $0xf8] sm:$0xff] %v11890_v9  ;;  %985 = vst [vmem:[#allocation2 + $0x100] sm:$0x3] %v11890_v9  ;;  %9590 = vmatprep.subr.bf16.mxu0 %v11358_v10  ;;  %v11391_v47 = vld [vmem:[%s15933_s5 + $0x110] sm:$0xff]   ;;  %v11394_v48 = vld [vmem:[%s15933_s5 + $0x148] sm:$0xff]  }
  0x3c   : > { %10965 = vmatmul.mubr.msk.bf16.gmra.mxu0 %vm643_vm1, %v12162_v54  ;;  %10981 = vmatmul.mubr.msk.bf16.gmra.mxu1 %vm643_vm1, %v12172_v58  ;;  %986 = vst [vmem:[#allocation2 + $0x108] sm:$0xff] %v11890_v9  ;;  %987 = vst [vmem:[#allocation2 + $0x110] sm:$0xff] %v11890_v9  ;;  %v11395_v49 = vld [vmem:[%s15933_s5 + $0x108] sm:$0xff]   ;;  %v12412_v50 = vld [vmem:[%s15931_s3] ss:$0 sm:$0xff] }
  0x3d   : > { %10968 = vmatprep.mubr.msk.bf16.mxu0 %vm643_vm1, %v12167_v56  ;;  %10984 = vmatprep.mubr.msk.bf16.mxu1 %vm643_vm1, %v12179_v62  ;;  %988 = vst [vmem:[#allocation2 + $0x118] sm:$0x3] %v11890_v9  ;;  %989 = vst [vmem:[#allocation2 + $0x120] sm:$0xff] %v11890_v9  ;;  %v11398_v53 = vld [vmem:[%s15933_s5 + $0x140] sm:$0xff]  }
  0x3e   : > { %9479 = vmatpush3.bf16.msra.mxu1 %v11353_v3  ;;  %990 = vst [vmem:[#allocation2 + $0x128] sm:$0xff] %v11890_v9  ;;  %991 = vst [vmem:[#allocation2 + $0x130] sm:$0x3] %v11890_v9  ;;  %9591 = vmatpush3.bf16.msra.mxu0 %v11360_v14  ;;  %v11399_v55 = vld [vmem:[%s15933_s5 + $0x100] sm:$0xff]  }
  0x3f   : > { %9480 = vmatprep.subr.bf16.mxu1 %v11355_v5  ;;  %992 = vst [vmem:[#allocation2 + $0x138] sm:$0xff] %v11890_v9  ;;  %993 = vst [vmem:[#allocation2 + $0x140] sm:$0xff] %v11890_v9  ;;  %9592 = vmatprep.subr.bf16.mxu0 %v11362_v16 }
  0x40   : > { %994 = vst [vmem:[#allocation2 + $0x148] sm:$0x3] %v11890_v9  ;;  %995 = vst [vmem:[#allocation2 + $0x150] sm:$0xff] %v11890_v9 }
  0x41   : > { %996 = vst [vmem:[#allocation2 + $0x158] sm:$0xff] %v11890_v9  ;;  %997 = vst [vmem:[#allocation2 + $0x160] sm:$0x3] %v11890_v9 }
  0x42   : > { %998 = vst [vmem:[#allocation2 + $0x168] sm:$0xff] %v11890_v9  ;;  %999 = vst [vmem:[#allocation2 + $0x170] sm:$0xff] %v11890_v9  ;;  %9481 = vmatpush3.bf16.msra.mxu1 %v12216_v7  ;;  %9593 = vmatpush3.bf16.msra.mxu0 %v11364_v19 }
  0x43   : > { %1000 = vst [vmem:[#allocation2 + $0x178] sm:$0x3] %v11890_v9  ;;  %1001 = vst [vmem:[#allocation2 + $0x180] sm:$0xff] %v11890_v9  ;;  %9482 = vmatprep.subr.bf16.mxu1 %v11359_v11  ;;  %9594 = vmatprep.subr.bf16.mxu0 %v11366_v25 }
  0x44   : > { %10969 = vmatmul.mubr.msk.bf16.gmra.mxu0 %vm643_vm1, %v12191_v1  ;;  %10985 = vmatmul.mubr.msk.bf16.gmra.mxu1 %vm643_vm1, %v12193_v2  ;;  %1002 = vst [vmem:[#allocation2 + $0x188] sm:$0xff] %v11890_v9  ;;  %1003 = vst [vmem:[#allocation2 + $0x190] sm:$0x3] %v11890_v9 }
  0x45   : > { %1004 = vst [vmem:[#allocation2 + $0x198] sm:$0xff] %v11890_v9  ;;  %1005 = vst [vmem:[#allocation2 + $0x1a0] sm:$0xff] %v11890_v9  ;;  %2087 = vmatprep.mubr.bf16.mxu1 %v1336_v24 }
  0x46   : > { %1006 = vst [vmem:[#allocation2 + $0x1a8] sm:$0x3] %v11890_v9  ;;  %3174 = vst [vmem:[#allocation3] sm:$0xff] %v11890_v9  ;;  %9483 = vmatpush3.bf16.msra.mxu1 %v11361_v15  ;;  %9595 = vmatpush3.bf16.msra.mxu0 %v11367_v26 }
  0x47   : > { %3175 = vst [vmem:[#allocation3 + $0x8] sm:$0xff] %v11890_v9  ;;  %3176 = vst [vmem:[#allocation3 + $0x10] sm:$0x3] %v11890_v9  ;;  %9484 = vmatprep.subr.bf16.mxu1 %v11363_v18  ;;  %9596 = vmatprep.subr.bf16.mxu0 %v11368_v29 }
  0x48   : > { %3177 = vst [vmem:[#allocation3 + $0x18] sm:$0xff] %v11890_v9  ;;  %3178 = vst [vmem:[#allocation3 + $0x20] sm:$0xff] %v11890_v9 }
  0x49   : > { %3179 = vst [vmem:[#allocation3 + $0x28] sm:$0x3] %v11890_v9  ;;  %3180 = vst [vmem:[#allocation3 + $0x30] sm:$0xff] %v11890_v9 }
  0x4a   : > { %3181 = vst [vmem:[#allocation3 + $0x38] sm:$0xff] %v11890_v9  ;;  %3182 = vst [vmem:[#allocation3 + $0x40] sm:$0x3] %v11890_v9  ;;  %9485 = vmatpush3.bf16.msra.mxu1 %v11365_v20  ;;  %9597 = vmatpush3.bf16.msra.mxu0 %v11369_v30 }
  0x4b   : > { %3183 = vst [vmem:[#allocation3 + $0x48] sm:$0xff] %v11890_v9  ;;  %3184 = vst [vmem:[#allocation3 + $0x50] sm:$0xff] %v11890_v9  ;;  %9694 = vmatprep.subr.bf16.mxu1 %v11370_v31  ;;  %9806 = vmatprep.subr.bf16.mxu0 %v11372_v33 }
  0x4c   : > { %3185 = vst [vmem:[#allocation3 + $0x58] sm:$0x3] %v11890_v9  ;;  %3186 = vst [vmem:[#allocation3 + $0x60] sm:$0xff] %v11890_v9 }
  0x4d   : > { %3187 = vst [vmem:[#allocation3 + $0x68] sm:$0xff] %v11890_v9  ;;  %3188 = vst [vmem:[#allocation3 + $0x70] sm:$0x3] %v11890_v9  ;;  %2088 = vmatmul.mubr.bf16.vlgmr.msra.gmra.mxu1 %v11891_v28 }
  0x4e   : > { %3189 = vst [vmem:[#allocation3 + $0x78] sm:$0xff] %v11890_v9  ;;  %3190 = vst [vmem:[#allocation3 + $0x80] sm:$0xff] %v11890_v9  ;;  %9695 = vmatpush3.bf16.msra.mxu1 %v11371_v32 }
  0x4f   : > { %3191 = vst [vmem:[#allocation3 + $0x88] sm:$0x3] %v11890_v9  ;;  %3192 = vst [vmem:[#allocation3 + $0x90] sm:$0xff] %v11890_v9  ;;  %9696 = vmatprep.subr.bf16.mxu1 %v11374_v35 }
  0x50   : > { %3193 = vst [vmem:[#allocation3 + $0x98] sm:$0xff] %v11890_v9  ;;  %3194 = vst [vmem:[#allocation3 + $0xa0] sm:$0x3] %v11890_v9 }
  0x51   : > { %3195 = vst [vmem:[#allocation3 + $0xa8] sm:$0xff] %v11890_v9  ;;  %3196 = vst [vmem:[#allocation3 + $0xb0] sm:$0xff] %v11890_v9 }
  0x52   : > { %3197 = vst [vmem:[#allocation3 + $0xb8] sm:$0x3] %v11890_v9  ;;  %3198 = vst [vmem:[#allocation3 + $0xc0] sm:$0xff] %v11890_v9  ;;  %9697 = vmatpush3.bf16.msra.mxu1 %v11375_v37 }
  0x53   : > { %3199 = vst [vmem:[#allocation3 + $0xc8] sm:$0xff] %v11890_v9  ;;  %3200 = vst [vmem:[#allocation3 + $0xd0] sm:$0x3] %v11890_v9  ;;  %9698 = vmatprep.subr.bf16.mxu1 %v11378_v39 }
  0x54   : > { %3201 = vst [vmem:[#allocation3 + $0xd8] sm:$0xff] %v11890_v9  ;;  %3202 = vst [vmem:[#allocation3 + $0xe0] sm:$0xff] %v11890_v9 }
  0x55   : > { %3203 = vst [vmem:[#allocation3 + $0xe8] sm:$0x3] %v11890_v9  ;;  %3204 = vst [vmem:[#allocation3 + $0xf0] sm:$0xff] %v11890_v9 }
  0x56   : > { %3205 = vst [vmem:[#allocation3 + $0xf8] sm:$0xff] %v11890_v9  ;;  %3206 = vst [vmem:[#allocation3 + $0x100] sm:$0x3] %v11890_v9  ;;  %9699 = vmatpush3.bf16.msra.mxu1 %v11379_v40 }
  0x57   : > { %3207 = vst [vmem:[#allocation3 + $0x108] sm:$0xff] %v11890_v9  ;;  %3208 = vst [vmem:[#allocation3 + $0x110] sm:$0xff] %v11890_v9  ;;  %9700 = vmatprep.subr.bf16.mxu1 %v11382_v41 }
  0x58   : > { %3209 = vst [vmem:[#allocation3 + $0x118] sm:$0x3] %v11890_v9  ;;  %3210 = vst [vmem:[#allocation3 + $0x120] sm:$0xff] %v11890_v9 }
  0x59   : > { %3211 = vst [vmem:[#allocation3 + $0x128] sm:$0xff] %v11890_v9  ;;  %3212 = vst [vmem:[#allocation3 + $0x130] sm:$0x3] %v11890_v9 }
  0x5a   : > { %3213 = vst [vmem:[#allocation3 + $0x138] sm:$0xff] %v11890_v9  ;;  %3214 = vst [vmem:[#allocation3 + $0x140] sm:$0xff] %v11890_v9  ;;  %9701 = vmatpush3.bf16.msra.mxu1 %v11383_v43 }
  0x5b   : > { %3215 = vst [vmem:[#allocation3 + $0x148] sm:$0x3] %v11890_v9  ;;  %3216 = vst [vmem:[#allocation3 + $0x150] sm:$0xff] %v11890_v9  ;;  %9702 = vmatprep.subr.bf16.mxu1 %v11386_v44 }
  0x5c   : > { %3217 = vst [vmem:[#allocation3 + $0x158] sm:$0xff] %v11890_v9  ;;  %3218 = vst [vmem:[#allocation3 + $0x160] sm:$0x3] %v11890_v9 }
  0x5d   : > { %3219 = vst [vmem:[#allocation3 + $0x168] sm:$0xff] %v11890_v9  ;;  %3220 = vst [vmem:[#allocation3 + $0x170] sm:$0xff] %v11890_v9 }
  0x5e   : > { %3221 = vst [vmem:[#allocation3 + $0x178] sm:$0x3] %v11890_v9  ;;  %3222 = vst [vmem:[#allocation3 + $0x180] sm:$0xff] %v11890_v9  ;;  %9703 = vmatpush3.bf16.msra.mxu1 %v11387_v45 }
  0x5f   : > { %3223 = vst [vmem:[#allocation3 + $0x188] sm:$0xff] %v11890_v9  ;;  %3224 = vst [vmem:[#allocation3 + $0x190] sm:$0x3] %v11890_v9  ;;  %9704 = vmatprep.subr.bf16.mxu1 %v11390_v46 }
  0x60   : > { %3225 = vst [vmem:[#allocation3 + $0x198] sm:$0xff] %v11890_v9  ;;  %3226 = vst [vmem:[#allocation3 + $0x1a0] sm:$0xff] %v11890_v9 }
  0x61   : > { %3227 = vst [vmem:[#allocation3 + $0x1a8] sm:$0x3] %v11890_v9 }
  0x62   : > { %9705 = vmatpush3.bf16.msra.mxu1 %v11391_v47 }
  0x63   : > { %9706 = vmatprep.subr.bf16.mxu1 %v11394_v48 }
  0x66   : > { %9707 = vmatpush3.bf16.msra.mxu1 %v11395_v49 }
  0x67   : > { %9708 = vmatprep.subr.bf16.mxu1 %v11398_v53 }
  0x6a   : > { %9709 = vmatpush3.bf16.msra.mxu1 %v11399_v55 }
  0xec   : > { %v10958_v51 = vpop.f32.mrf.mxu0  ;;  %v10974_v59 = vpop.f32.mrf.mxu1 }
  0xed   : > { %v739_v52 = vadd.f32 %v10958_v51, %v12412_v50  ;;  %v803_v63 = vadd.f32 %v10974_v59, %v12412_v50  ;;  %v12456_v59 = vld [vmem:[#allocation2 + $0x2] sm:$0xff] }
  0xee   : > { %v730_v57 = vpop.f32.mrf.mxu0  ;;  %v794_v3 = vpop.f32.mrf.mxu1 }
  0xef   : > { %vm859_vm3 = vcmp.ge.f32.partialorder %v739_v52, 0.0  ;;  %v891_v60 = vmul.f32 0.01, %v739_v52  ;;  %v731_v61 = vadd.f32 %v12412_v50, %v730_v57  ;;  %vm875_vm5 = vcmp.ge.f32.partialorder %v803_v63, 0.0 }
  0xf0   : > { %v10959_v0 = vpop.f32.mrf.mxu0  ;;  %v907_v9 = vmul.f32 0.01, %v803_v63  ;;  %v795_v10 = vadd.f32 %v12412_v50, %v794_v3  ;;  %v10975_v11 = vpop.f32.mrf.mxu1 }
  0xf1   : > { %v923_v4 = vsel %vm859_vm3, %v739_v52, %v891_v60  ;;  %vm857_vm4 = vcmp.ge.f32.partialorder %v731_v61, 0.0  ;;  %v889_v5 = vmul.f32 0.01, %v731_v61  ;;  %v742_v6 = vadd.f32 %v10959_v0, %v12412_v50  ;;  %v1106_v60 = vld [vmem:[#allocation2 + $0xa] sm:$0xff] }
  0xf2   : > { %1011 = vst.msk [vmem:[#allocation2 + $0x31] sm:$0xff] %vm1008_vm2, %v923_v4  ;;  %v733_v7 = vpop.f32.mrf.mxu0  ;;  %v12428_v19 = vsel %vm875_vm5, %v803_v63, %v907_v9  ;;  %vm873_vm7 = vcmp.ge.f32.partialorder %v795_v10, 0.0  ;;  %v905_v20 = vmul.f32 0.01, %v795_v10  ;;  %v797_v22 = vpop.f32.mrf.mxu1  ;;  %v806_v29 = vadd.f32 %v10975_v11, %v12412_v50 }
  0xf3   : > { %v921_v14 = vsel %vm857_vm4, %v731_v61, %v889_v5  ;;  %vm860_vm6 = vcmp.ge.f32.partialorder %v742_v6, 0.0  ;;  %v892_v15 = vmul.f32 0.01, %v742_v6  ;;  %v734_v16 = vadd.f32 %v12412_v50, %v733_v7  ;;  %1027 = vst.msk [vmem:[#allocation2 + $0xf1] sm:$0xff] %vm1008_vm2, %v12428_v19 }
  0xf4   : > { %1009 = vst.msk [vmem:[#allocation2 + $0x19] sm:$0xff] %vm1008_vm2, %v921_v14  ;;  %v10962_v18 = vpop.f32.mrf.mxu0  ;;  %v12434_v28 = vsel %vm873_vm7, %v795_v10, %v905_v20  ;;  %v12437_v30 = vpop.f32.mrf.mxu1  ;;  %v3654_v35 = vsel %vm1008_vm2, %v921_v14, 0.0  ;;  %vm876_vm10 = vcmp.ge.f32.partialorder %v806_v29, 0.0  ;;  %v908_v40 = vmul.f32 0.01, %v806_v29 }
  0xf5   : > { %v924_v23 = vsel %vm860_vm6, %v742_v6, %v892_v15  ;;  %vm858_vm8 = vcmp.ge.f32.partialorder %v734_v16, 0.0  ;;  %v890_v24 = vmul.f32 0.01, %v734_v16  ;;  %v755_v25 = vadd.f32 %v10962_v18, %v12412_v50  ;;  %1025 = vst.msk [vmem:[#allocation2 + $0xd9] sm:$0xff] %vm1008_vm2, %v12434_v28 }
  0xf6   : > { %1012 = vst.msk [vmem:[#allocation2 + $0x39] sm:$0xff] %vm1008_vm2, %v924_v23  ;;  %v746_v26 = vpop.f32.mrf.mxu0  ;;  %v12445_v41 = vpop.f32.mrf.mxu1  ;;  %v3657_v46 = vsel %vm1008_vm2, %v923_v4, 0.0  ;;  %v12450_v49 = vsel %vm876_vm10, %v806_v29, %v908_v40  ;;  %v798_v51 = vadd.f32 %v12412_v50, %v797_v22  ;;  %v3659_v61 = vsel %vm1008_vm2, %v924_v23, 0.0 }
  0xf7   : > { %v922_v31 = vsel %vm858_vm8, %v734_v16, %v890_v24  ;;  %vm863_vm9 = vcmp.ge.f32.partialorder %v755_v25, 0.0  ;;  %v895_v32 = vmul.f32 0.01, %v755_v25  ;;  %v747_v33 = vadd.f32 %v12412_v50, %v746_v26  ;;  %1028 = vst.msk [vmem:[#allocation2 + $0xf9] sm:$0xff] %vm1008_vm2, %v12450_v49 }
  0xf8   : > { %1010 = vst.msk [vmem:[#allocation2 + $0x21] sm:$0xff] %vm1008_vm2, %v922_v31  ;;  %v3655_v37 = vsel %vm1008_vm2, %v922_v31, 0.0  ;;  %v10963_v39 = vpop.f32.mrf.mxu0  ;;  %v12453_v52 = vpop.f32.mrf.mxu1  ;;  %v1337_v14 = vpack.c.bf16 %v1106_v60, %v12456_v59  ;;  %v906_v16 = vmul.f32 0.01, %v798_v51  ;;  %vm874_vm15 = vcmp.ge.f32.partialorder %v798_v51, 0.0  ;;  %v11376_v60 = vld [vmem:[%s15933_s5 + $0x1f0] sm:$0xff]  }
  0xf9   : > { %v3656_v43 = vadd.f32 %v3655_v37, %v3654_v35  ;;  %v927_v44 = vsel %vm863_vm9, %v755_v25, %v895_v32  ;;  %vm861_vm11 = vcmp.ge.f32.partialorder %v747_v33, 0.0  ;;  %v893_v45 = vmul.f32 0.01, %v747_v33  ;;  %v1077_v37 = vld [vmem:[#allocation2 + $0x31] sm:$0xff] }
  0xfa   : > { %1015 = vst.msk [vmem:[#allocation2 + $0x61] sm:$0xff] %vm1008_vm2, %v927_v44  ;;  %v758_v47 = vadd.f32 %v10963_v39, %v12412_v50  ;;  %v749_v48 = vpop.f32.mrf.mxu0  ;;  %v12463_v4 = vpop.f32.mrf.mxu1  ;;  %v3665_v9 = vsel %vm1008_vm2, %v927_v44, 0.0  ;;  %v12482_v59 = vsel %vm874_vm15, %v798_v51, %v906_v16 }
  0xfb   : > { %v3658_v53 = vadd.f32 %v3657_v46, %v3656_v43  ;;  %v925_v55 = vsel %vm861_vm11, %v747_v33, %v893_v45  ;;  %v750_v57 = vadd.f32 %v12412_v50, %v749_v48  ;;  %v1075_v23 = vld [vmem:[#allocation2 + $0x19] sm:$0xff]  ;;  %1026 = vst.msk [vmem:[#allocation2 + $0xe1] sm:$0xff] %vm1008_vm2, %v12482_v59 }
  0xfc   : > { %1013 = vst.msk [vmem:[#allocation2 + $0x49] sm:$0xff] %vm1008_vm2, %v925_v55  ;;  %v3661_v63 = vsel %vm1008_vm2, %v925_v55, 0.0  ;;  %vm864_vm12 = vcmp.ge.f32.partialorder %v758_v47, 0.0  ;;  %v896_v0 = vmul.f32 0.01, %v758_v47  ;;  %v10966_v3 = vpop.f32.mrf.mxu0  ;;  %v12468_v18 = vpop.f32.mrf.mxu1  ;;  %v1137_v35 = vld [vmem:[#allocation2 + $0x18] sm:$0xff] }
  0xfd   : > { %v3660_v5 = vadd.f32 %v3659_v61, %v3658_v53  ;;  %vm862_vm13 = vcmp.ge.f32.partialorder %v750_v57, 0.0  ;;  %v894_v6 = vmul.f32 0.01, %v750_v57  ;;  %v771_v7 = vadd.f32 %v10966_v3, %v12412_v50  ;;  %v1078_v15 = vld [vmem:[#allocation2 + $0x39] sm:$0xff] }
  0xfe   : > { %v928_v10 = vsel %vm864_vm12, %v758_v47, %v896_v0  ;;  %v762_v11 = vpop.f32.mrf.mxu0  ;;  %v1140_v39 = vld [vmem:[#allocation2 + $0x38] sm:$0xff]  ;;  %v1354_v46 = vpack.c.bf16 %v1078_v15, %v1077_v37  ;;  %v12478_v47 = vpop.f32.mrf.mxu1 }
  0xff   : > { %v3662_v20 = vadd.f32 %v3661_v63, %v3660_v5  ;;  %1016 = vst.msk [vmem:[#allocation2 + $0x69] sm:$0xff] %vm1008_vm2, %v928_v10  ;;  %v926_v22 = vsel %vm862_vm13, %v750_v57, %v894_v6  ;;  %vm867_vm14 = vcmp.ge.f32.partialorder %v771_v7, 0.0  ;;  %v1076_v24 = vld [vmem:[#allocation2 + $0x21] sm:$0xff]  ;;  %v899_v29 = vmul.f32 0.01, %v771_v7  ;;  %v11373_v45 = vld [vmem:[%s15933_s5 + $0x1b8] sm:$0xff]  }
 0x100   : > { %v1138_v25 = vld [vmem:[#allocation2 + $0x20] sm:$0xff]  ;;  %1014 = vst.msk [vmem:[#allocation2 + $0x51] sm:$0xff] %vm1008_vm2, %v926_v22  ;;  %v3663_v26 = vsel %vm1008_vm2, %v926_v22, 0.0  ;;  %v763_v31 = vadd.f32 %v12412_v50, %v762_v11  ;;  %v10967_v32 = vpop.f32.mrf.mxu0  ;;  %v1345_v33 = vpack.c.bf16 %v1076_v24, %v1075_v23  ;;  %v1139_v57 = vld [vmem:[#allocation2 + $0x30] sm:$0xff]  ;;  %v3667_v3 = vsel %vm1008_vm2, %v928_v10, 0.0  ;;  %v12505_v23 = vpop.f32.mrf.mxu1 }
 0x101   : > { %v3664_v40 = vadd.f32 %v3663_v26, %v3662_v20  ;;  %v774_v43 = vadd.f32 %v10967_v32, %v12412_v50  ;;  %v1338_v44 = vpack.c.bf16 %v1138_v25, %v1137_v35  ;;  %v931_v48 = vsel %vm867_vm14, %v771_v7, %v899_v29  ;;  %v11377_v7 = vld [vmem:[%s15933_s5 + $0x1b0] sm:$0xff]   ;;  %v1107_v16 = vld [vmem:[#allocation2 + $0x1a] sm:$0xff]  ;;  %v1108_v20 = vld [vmem:[#allocation2 + $0x22] sm:$0xff] }
 0x102   : > { %vm865_vm3 = vcmp.ge.f32.partialorder %v763_v31, 0.0  ;;  %v897_v53 = vmul.f32 0.01, %v763_v31  ;;  %v765_v55 = vpop.f32.mrf.mxu0  ;;  %2095 = vmatprep.mubr.bf16.mxu1 %v1345_v33  ;;  %1019 = vst.msk [vmem:[#allocation2 + $0x91] sm:$0xff] %vm1008_vm2, %v931_v48  ;;  %v1347_v0 = vpack.c.bf16 %v1140_v39, %v1139_v57  ;;  %v819_v26 = vadd.f32 %v12437_v30, %v12412_v50  ;;  %v11380_v29 = vld [vmem:[%s15933_s5 + $0x1e8] sm:$0xff]   ;;  %v12522_v57 = vpop.f32.mrf.mxu1 }
 0x103   : > { %v3666_v61 = vadd.f32 %v3665_v9, %v3664_v40  ;;  %vm868_vm4 = vcmp.ge.f32.partialorder %v774_v43, 0.0  ;;  %v900_v63 = vmul.f32 0.01, %v774_v43  ;;  %2248 = vmatprep.mubr.bf16.mxu0 %v1338_v44  ;;  %2096 = vmatmul.mubr.bf16.gmra.mxu1 %v1338_v44  ;;  %v766_v5 = vadd.f32 %v12412_v50, %v765_v55  ;;  %v12499_v9 = vld [vmem:[%s15933_s5 + $0x238] sm:$0xff]   ;;  %v1079_v22 = vld [vmem:[#allocation2 + $0x49] sm:$0xff] }
 0x104   : > { %v929_v51 = vsel %vm865_vm3, %v763_v31, %v897_v53  ;;  %2249 = vmatmul.mubr.bf16.vlgmr.msra.gmra.mxu0 %v1337_v14  ;;  %v10970_v6 = vpop.f32.mrf.mxu0  ;;  %2103 = vmatprep.mubr.bf16.mxu1 %v1354_v46  ;;  %v3673_v37 = vsel %vm1008_vm2, %v931_v48, 0.0  ;;  %v1141_v30 = vld [vmem:[#allocation2 + $0x48] sm:$0xff]  ;;  %vm879_vm8 = vcmp.ge.f32.partialorder %v819_v26, 0.0 }
 0x105   : > { %1017 = vst.msk [vmem:[#allocation2 + $0x79] sm:$0xff] %vm1008_vm2, %v929_v51  ;;  %v3668_v11 = vadd.f32 %v3667_v3, %v3666_v61  ;;  %v3669_v10 = vsel %vm1008_vm2, %v929_v51, 0.0  ;;  %v932_v15 = vsel %vm868_vm4, %v774_v43, %v900_v63  ;;  %9807 = vmatpush3.bf16.msra.mxu0 %v11373_v45  ;;  %v787_v14 = vadd.f32 %v10970_v6, %v12412_v50  ;;  %v11381_v48 = vld [vmem:[%s15933_s5 + $0x1a8] sm:$0xff]   ;;  %v11384_v51 = vld [vmem:[%s15933_s5 + $0x1e0] sm:$0xff]  }
 0x106   : > { %2256 = vmatprep.mubr.bf16.mxu0 %v1347_v0  ;;  %1020 = vst.msk [vmem:[#allocation2 + $0x99] sm:$0xff] %vm1008_vm2, %v932_v15  ;;  %vm866_vm5 = vcmp.ge.f32.partialorder %v766_v5, 0.0  ;;  %v898_v24 = vmul.f32 0.01, %v766_v5  ;;  %v778_v25 = vpop.f32.mrf.mxu0  ;;  %9808 = vmatprep.subr.bf16.mxu0 %v11376_v60  ;;  %v12516_v43 = vpack.c.bf16 %v1108_v20, %v1107_v16  ;;  %v911_v3 = vmul.f32 0.01, %v819_v26 }
 0x107   : > { %10988 = vmatprep.subr.bf16.mxu1 %v12499_v9  ;;  %v3670_v31 = vadd.f32 %v3669_v10, %v3668_v11  ;;  %vm871_vm6 = vcmp.ge.f32.partialorder %v787_v14, 0.0  ;;  %v903_v32 = vmul.f32 0.01, %v787_v14  ;;  %v779_v33 = vadd.f32 %v12412_v50, %v778_v25  ;;  %v1080_v35 = vld [vmem:[#allocation2 + $0x51] sm:$0xff]  ;;  %v12546_v25 = vpop.f32.mrf.mxu1 }
 0x108   : > { %v930_v39 = vsel %vm866_vm5, %v766_v5, %v898_v24  ;;  %v10971_v40 = vpop.f32.mrf.mxu0  ;;  %v12518_v44 = vpack.c.bf16 %v1080_v35, %v1079_v22  ;;  %v1142_v45 = vld [vmem:[#allocation2 + $0x50] sm:$0xff]  ;;  %v3675_v5 = vsel %vm1008_vm2, %v932_v15, 0.0  ;;  %v1110_v22 = vld [vmem:[#allocation2 + $0x3a] sm:$0xff]  ;;  %v811_v24 = vadd.f32 %v12412_v50, %v12445_v41 }
 0x109   : > { %1018 = vst.msk [vmem:[#allocation2 + $0x81] sm:$0xff] %vm1008_vm2, %v930_v39  ;;  %v3671_v46 = vsel %vm1008_vm2, %v930_v39, 0.0  ;;  %v935_v53 = vsel %vm871_vm6, %v787_v14, %v903_v32  ;;  %vm869_vm7 = vcmp.ge.f32.partialorder %v779_v33, 0.0  ;;  %v901_v55 = vmul.f32 0.01, %v779_v33  ;;  %9809 = vmatpush3.bf16.msra.mxu0 %v11377_v7  ;;  %v1109_v20 = vld [vmem:[#allocation2 + $0x32] sm:$0xff] }
 0x10a   : > { %v3672_v60 = vadd.f32 %v3671_v46, %v3670_v31  ;;  %1023 = vst.msk [vmem:[#allocation2 + $0xc1] sm:$0xff] %vm1008_vm2, %v935_v53  ;;  %v790_v61 = vadd.f32 %v10971_v40, %v12412_v50  ;;  %v781_v63 = vpop.f32.mrf.mxu0  ;;  %9810 = vmatprep.subr.bf16.mxu0 %v11380_v29  ;;  %v12534_v11 = vpack.c.bf16 %v1142_v45, %v1141_v30  ;;  %v11385_v29 = vld [vmem:[%s15933_s5 + $0x1a0] sm:$0xff]   ;;  %v11388_v41 = vld [vmem:[%s15933_s5 + $0x1d8] sm:$0xff]   ;;  %v1082_v39 = vld [vmem:[#allocation2 + $0x69] sm:$0xff]  ;;  %vm877_vm11 = vcmp.ge.f32.partialorder %v811_v24, 0.0 }
 0x10b   : > { %v933_v6 = vsel %vm869_vm7, %v779_v33, %v901_v55  ;;  %v782_v7 = vadd.f32 %v12412_v50, %v781_v63  ;;  %2104 = vmatmul.mubr.bf16.gmra.mxu1 %v1347_v0  ;;  %v12542_v0 = vsel %vm879_vm8, %v819_v26, %v911_v3  ;;  %v1081_v33 = vld [vmem:[#allocation2 + $0x61] sm:$0xff]  ;;  %v822_v26 = vadd.f32 %v12453_v52, %v12412_v50  ;;  %v12571_v3 = vpop.f32.mrf.mxu1 }
 0x10c   : > { %v3674_v10 = vadd.f32 %v3673_v37, %v3672_v60  ;;  %1021 = vst.msk [vmem:[#allocation2 + $0xa9] sm:$0xff] %vm1008_vm2, %v933_v6  ;;  %v3677_v14 = vsel %vm1008_vm2, %v933_v6, 0.0  ;;  %vm872_vm9 = vcmp.ge.f32.partialorder %v790_v61, 0.0  ;;  %v904_v16 = vmul.f32 0.01, %v790_v61  ;;  %2257 = vmatmul.mubr.bf16.gmra.mxu0 %v12516_v43  ;;  %2111 = vmatprep.mubr.bf16.mxu1 %v12518_v44  ;;  %1031 = vst.msk [vmem:[#allocation2 + $0x121] sm:$0xff] %vm1008_vm2, %v12542_v0 }
 0x10d   : > { %vm870_vm10 = vcmp.ge.f32.partialorder %v782_v7, 0.0  ;;  %v902_v15 = vmul.f32 0.01, %v782_v7  ;;  %2264 = vmatprep.mubr.bf16.mxu0 %v12534_v11  ;;  %9811 = vmatpush3.bf16.msra.mxu0 %v11381_v48  ;;  %v12560_v37 = vpack.c.bf16 %v1110_v22, %v1109_v20  ;;  %v1143_v40 = vld [vmem:[#allocation2 + $0x60] sm:$0xff]  ;;  %v1144_v30 = vld [vmem:[#allocation2 + $0x68] sm:$0xff]  ;;  %vm880_vm12 = vcmp.ge.f32.partialorder %v822_v26, 0.0 }
 0x10e   : > { %v3676_v31 = vadd.f32 %v3675_v5, %v3674_v10  ;;  %v936_v32 = vsel %vm872_vm9, %v790_v61, %v904_v16  ;;  %9812 = vmatprep.subr.bf16.mxu0 %v11384_v51  ;;  %v909_v45 = vmul.f32 0.01, %v811_v24  ;;  %v912_v55 = vmul.f32 0.01, %v822_v26  ;;  %v11392_v10 = vld [vmem:[%s15933_s5 + $0x1d0] sm:$0xff]  }
 0x10f   : > { %1024 = vst.msk [vmem:[#allocation2 + $0xc9] sm:$0xff] %vm1008_vm2, %v936_v32  ;;  %v934_v35 = vsel %vm870_vm10, %v782_v7, %v902_v15  ;;  %v3681_v48 = vsel %vm1008_vm2, %v935_v53, 0.0  ;;  %v814_v61 = vadd.f32 %v12412_v50, %v12463_v4  ;;  %v835_v63 = vadd.f32 %v12468_v18, %v12412_v50  ;;  %v11389_v4 = vld [vmem:[%s15933_s5 + $0x198] sm:$0xff]  }
 0x110   : > { %v3678_v46 = vadd.f32 %v3677_v14, %v3676_v31  ;;  %1022 = vst.msk [vmem:[#allocation2 + $0xb1] sm:$0xff] %vm1008_vm2, %v934_v35  ;;  %v3679_v52 = vsel %vm1008_vm2, %v934_v35, 0.0  ;;  %v12565_v60 = vsel %vm877_vm11, %v811_v24, %v909_v45  ;;  %v12573_v5 = vpack.c.bf16 %v1082_v39, %v1081_v33  ;;  %v10987_v31 = vpop.f32.mrf.mxu1  ;;  %v1084_v35 = vld [vmem:[#allocation2 + $0x81] sm:$0xff] }
 0x111   : > { %9813 = vmatpush3.bf16.msra.mxu0 %v11385_v29  ;;  %v12575_v6 = vpack.c.bf16 %v1144_v30, %v1143_v40  ;;  %1029 = vst.msk [vmem:[#allocation2 + $0x109] sm:$0xff] %vm1008_vm2, %v12565_v60  ;;  %v12579_v53 = vsel %vm880_vm12, %v822_v26, %v912_v55  ;;  %v3683_v18 = vsel %vm1008_vm2, %v936_v32, 0.0  ;;  %vm878_vm13 = vcmp.ge.f32.partialorder %v814_v61, 0.0  ;;  %v11393_v32 = vld [vmem:[%s15933_s5 + $0x190] sm:$0xff]   ;;  %v1145_v30 = vld [vmem:[#allocation2 + $0x78] sm:$0xff]  ;;  %v1146_v45 = vld [vmem:[#allocation2 + $0x80] sm:$0xff] }
 0x112   : > { %v3680_v51 = vadd.f32 %v3679_v52, %v3678_v46  ;;  %9814 = vmatprep.subr.bf16.mxu0 %v11388_v41  ;;  %1032 = vst.msk [vmem:[#allocation2 + $0x129] sm:$0xff] %vm1008_vm2, %v12579_v53  ;;  %v910_v7 = vmul.f32 0.01, %v814_v61  ;;  %vm883_vm14 = vcmp.ge.f32.partialorder %v835_v63, 0.0  ;;  %v915_v16 = vmul.f32 0.01, %v835_v63 }
 0x113   : > { %2112 = vmatmul.mubr.bf16.gmra.mxu1 %v12534_v11  ;;  %v827_v20 = vadd.f32 %v12412_v50, %v12478_v47  ;;  %v3685_v22 = vsel %vm1008_vm2, %v12434_v28, 0.0  ;;  %v838_v24 = vadd.f32 %v12505_v23, %v12412_v50  ;;  %v830_v29 = vadd.f32 %v12412_v50, %v12522_v57  ;;  %v11396_v47 = vld [vmem:[%s15933_s5 + $0x1c8] sm:$0xff]   ;;  %v1112_v26 = vld [vmem:[#allocation2 + $0x52] sm:$0xff] }
 0x114   : > { %v3682_v14 = vadd.f32 %v3681_v48, %v3680_v51  ;;  %2265 = vmatmul.mubr.bf16.gmra.mxu0 %v12560_v37  ;;  %2119 = vmatprep.mubr.bf16.mxu1 %v12573_v5  ;;  %v12598_v15 = vsel %vm878_vm13, %v814_v61, %v910_v7  ;;  %v3687_v33 = vsel %vm1008_vm2, %v12482_v59, 0.0  ;;  %v1111_v23 = vld [vmem:[#allocation2 + $0x4a] sm:$0xff]  ;;  %v12615_v57 = vsel %vm883_vm14, %v835_v63, %v915_v16  ;;  %v1083_v41 = vld [vmem:[#allocation2 + $0x79] sm:$0xff]  ;;  %v845_v51 = vpop.f32.mrf.mxu1 }
 0x115   : > { %2272 = vmatprep.mubr.bf16.mxu0 %v12575_v6  ;;  %1030 = vst.msk [vmem:[#allocation2 + $0x111] sm:$0xff] %vm1008_vm2, %v12598_v15  ;;  %vm881_vm15 = vcmp.ge.f32.partialorder %v827_v20, 0.0  ;;  %9815 = vmatpush3.bf16.msra.mxu0 %v11389_v4  ;;  %1035 = vst.msk [vmem:[#allocation2 + $0x151] sm:$0xff] %vm1008_vm2, %v12615_v57  ;;  %v913_v39 = vmul.f32 0.01, %v827_v20  ;;  %vm884_vm3 = vcmp.ge.f32.partialorder %v838_v24, 0.0  ;;  %v851_v52 = vadd.f32 %v12546_v25, %v12412_v50 }
 0x116   : > { %v3684_v28 = vadd.f32 %v3683_v18, %v3682_v14  ;;  %v916_v40 = vmul.f32 0.01, %v838_v24  ;;  %9816 = vmatprep.subr.bf16.mxu0 %v11392_v10  ;;  %vm882_vm4 = vcmp.ge.f32.partialorder %v830_v29, 0.0  ;;  %v914_v46 = vmul.f32 0.01, %v830_v29  ;;  %v11400_v16 = vld [vmem:[%s15933_s5 + $0x1c0] sm:$0xff]  }
 0x117   : > { %v3689_v55 = vsel %vm1008_vm2, %v12428_v19, 0.0  ;;  %v3691_v48 = vsel %vm1008_vm2, %v12450_v49, 0.0  ;;  %v12626_v61 = vsel %vm881_vm15, %v827_v20, %v913_v39  ;;  %v12630_v18 = vpack.c.bf16 %v1112_v26, %v1111_v23  ;;  %v11397_v49 = vld [vmem:[%s15933_s5 + $0x188] sm:$0xff]   ;;  %v1086_v26 = vld [vmem:[#allocation2 + $0x99] sm:$0xff] }
 0x118   : > { %v3686_v59 = vadd.f32 %v3685_v22, %v3684_v28  ;;  %v12628_v63 = vsel %vm884_vm3, %v838_v24, %v916_v40  ;;  %v12632_v7 = vpack.c.bf16 %v1084_v35, %v1083_v41  ;;  %1033 = vst.msk [vmem:[#allocation2 + $0x139] sm:$0xff] %vm1008_vm2, %v12626_v61  ;;  %v946_v19 = vsel %vm882_vm4, %v830_v29, %v914_v46  ;;  %v1113_v28 = vld [vmem:[#allocation2 + $0x62] sm:$0xff]  ;;  %v1147_v40 = vld [vmem:[#allocation2 + $0x90] sm:$0xff] }
 0x119   : > { %1036 = vst.msk [vmem:[#allocation2 + $0x159] sm:$0xff] %vm1008_vm2, %v12628_v63  ;;  %9817 = vmatpush3.bf16.msra.mxu0 %v11393_v32  ;;  %v12642_v25 = vpack.c.bf16 %v1146_v45, %v1145_v30  ;;  %1034 = vst.msk [vmem:[#allocation2 + $0x141] sm:$0xff] %vm1008_vm2, %v946_v19  ;;  %vm887_vm5 = vcmp.ge.f32.partialorder %v851_v52, 0.0  ;;  %v919_v10 = vmul.f32 0.01, %v851_v52  ;;  %v843_v14 = vadd.f32 %v12412_v50, %v12571_v3 }
 0x11a   : > { %v3688_v4 = vadd.f32 %v3687_v33, %v3686_v59  ;;  %9818 = vmatprep.subr.bf16.mxu0 %v11396_v47  ;;  %v854_v22 = vadd.f32 %v10987_v31, %v12412_v50  ;;  %v846_v24 = vadd.f32 %v12412_v50, %v845_v51  ;;  %v3693_v29 = vsel %vm1008_vm2, %v12565_v60, 0.0  ;;  %v1114_v33 = vld [vmem:[#allocation2 + $0x6a] sm:$0xff]  ;;  %v11401_v50 = vld [vmem:[%s15933_s5 + $0x180] sm:$0xff]   ;;  %v1148_v59 = vld [vmem:[#allocation2 + $0x98] sm:$0xff] }
 0x11b   : > { %2120 = vmatmul.mubr.bf16.gmra.mxu1 %v12575_v6  ;;  %v12657_v3 = vsel %vm887_vm5, %v851_v52, %v919_v10  ;;  %vm885_vm6 = vcmp.ge.f32.partialorder %v843_v14, 0.0  ;;  %v917_v32 = vmul.f32 0.01, %v843_v14  ;;  %v3695_v60 = vsel %vm1008_vm2, %v12598_v15, 0.0  ;;  %v1085_v31 = vld [vmem:[#allocation2 + $0x91] sm:$0xff] }
 0x11c   : > { %v3690_v20 = vadd.f32 %v3689_v55, %v3688_v4  ;;  %2273 = vmatmul.mubr.bf16.gmra.mxu0 %v12630_v18  ;;  %2127 = vmatprep.mubr.bf16.mxu1 %v12632_v7  ;;  %1039 = vst.msk [vmem:[#allocation2 + $0x181] sm:$0xff] %vm1008_vm2, %v12657_v3  ;;  %vm888_vm7 = vcmp.ge.f32.partialorder %v854_v22, 0.0  ;;  %v920_v23 = vmul.f32 0.01, %v854_v22  ;;  %vm886_vm8 = vcmp.ge.f32.partialorder %v846_v24, 0.0 }
 0x11d   : > { %2280 = vmatprep.mubr.bf16.mxu0 %v12642_v25  ;;  %9819 = vmatpush3.bf16.msra.mxu0 %v11397_v49  ;;  %v949_v41 = vsel %vm885_vm6, %v843_v14, %v917_v32  ;;  %v918_v35 = vmul.f32 0.01, %v846_v24  ;;  %v3697_v45 = vsel %vm1008_vm2, %v12542_v0, 0.0  ;;  %v12670_v15 = vpack.c.bf16 %v1114_v33, %v1113_v28  ;;  %v1115_v14 = vld [vmem:[#allocation2 + $0x7a] sm:$0xff]  ;;  %v1150_v32 = vld [vmem:[#allocation2 + $0xb0] sm:$0xff] }
 0x11e   : > { %v3692_v47 = vadd.f32 %v3691_v48, %v3690_v20  ;;  %9820 = vmatprep.subr.bf16.mxu0 %v11400_v16  ;;  %1037 = vst.msk [vmem:[#allocation2 + $0x169] sm:$0xff] %vm1008_vm2, %v949_v41  ;;  %v952_v30 = vsel %vm888_vm7, %v854_v22, %v920_v23  ;;  %v12672_v55 = vpack.c.bf16 %v1086_v26, %v1085_v31  ;;  %v12678_v48 = vld [vmem:[%s15932_s4 + $0x10] ss:$0 sps:$4 sm:$0x33]   ;;  %v3699_v51 = vsel %vm1008_vm2, %v12579_v53, 0.0  ;;  %v1116_v16 = vld [vmem:[#allocation2 + $0x82] sm:$0xff] }
 0x11f   : > { %1040 = vst.msk [vmem:[#allocation2 + $0x189] sm:$0xff] %vm1008_vm2, %v952_v30  ;;  %v950_v46 = vsel %vm886_vm8, %v846_v24, %v918_v35  ;;  %v12683_v0 = vpack.c.bf16 %v1148_v59, %v1147_v40  ;;  %v3701_v49 = vsel %vm1008_vm2, %v12626_v61, 0.0  ;;  %v3703_v53 = vsel %vm1008_vm2, %v946_v19, 0.0  ;;  %v1087_v20 = vld [vmem:[#allocation2 + $0xa9] sm:$0xff]  ;;  %v1088_v22 = vld [vmem:[#allocation2 + $0xb1] sm:$0xff]  ;;  %v1118_v35 = vld [vmem:[#allocation2 + $0x9a] sm:$0xff] }
 0x120   : > { %v3694_v39 = vadd.f32 %v3693_v29, %v3692_v47  ;;  %1038 = vst.msk [vmem:[#allocation2 + $0x171] sm:$0xff] %vm1008_vm2, %v950_v46  ;;  %v1149_v29 = vld [vmem:[#allocation2 + $0xa8] sm:$0xff]  ;;  %v3705_v47 = vsel %vm1008_vm2, %v12615_v57, 0.0  ;;  %v12695_v61 = vpack.c.bf16 %v1116_v16, %v1115_v14  ;;  %v12697_v33 = vpack.c.bf16 %v1088_v22, %v1087_v20  ;;  %v1117_v31 = vld [vmem:[#allocation2 + $0x92] sm:$0xff]  ;;  %v1151_v59 = vld [vmem:[#allocation2 + $0xc0] sm:$0xff] }
 0x121   : > { %9821 = vmatpush3.bf16.msra.mxu0 %v11401_v50  ;;  %v3707_v23 = vsel %vm1008_vm2, %v12628_v63, 0.0  ;;  %v12702_v19 = vpack.c.bf16 %v1150_v32, %v1149_v29  ;;  %v3711_v26 = vsel %vm1008_vm2, %v950_v46, 0.0  ;;  %v1090_v63 = vld [vmem:[#allocation2 + $0xc9] sm:$0xff]  ;;  %v1120_v16 = vld [vmem:[#allocation2 + $0xb2] sm:$0xff]  ;;  %v1092_v20 = vld [vmem:[#allocation2 + $0xe1] sm:$0xff]  ;;  %vm3582_vm9 = vcmask 31744  }
 0x122   : > { %v3696_v52 = vadd.f32 %v3695_v60, %v3694_v39  ;;  %11290 = vmatprep.subr.msk.bf16.mxu0 %vm692_vm0, %v12678_v48  ;;  %v3709_v60 = vsel %vm1008_vm2, %v949_v41, 0.0  ;;  %v1089_v39 = vld [vmem:[#allocation2 + $0xc1] sm:$0xff]  ;;  %v3715_v41 = vsel %vm1008_vm2, %v952_v30, 0.0  ;;  %v1153_v22 = vld [vmem:[#allocation2 + $0xd8] sm:$0xff]  ;;  %vm11892_vm10 = vmmov 0  }
 0x123   : > { %2128 = vmatmul.mubr.bf16.gmra.mxu1 %v12642_v25  ;;  %v1164_v2 = vld [vmem:[#allocation2 + $0x158] sm:$0xff]  ;;  %vm3879_vm11 = vcmask 1043456  }
 0x124   : > { %v3698_v4 = vadd.f32 %v3697_v45, %v3696_v52  ;;  %2281 = vmatmul.mubr.bf16.gmra.mxu0 %v12670_v15  ;;  %2135 = vmatprep.mubr.bf16.mxu1 %v12672_v55  ;;  %v1152_v45 = vld [vmem:[#allocation2 + $0xc8] sm:$0xff]  ;;  %v3713_v52 = vsel %vm1008_vm2, %v12657_v3, 0.0  ;;  %v1091_v3 = vld [vmem:[#allocation2 + $0xd9] sm:$0xff] }
 0x125   : > { %2288 = vmatprep.mubr.bf16.mxu0 %v12683_v0  ;;  %v12726_v29 = vpack.c.bf16 %v1092_v20, %v1091_v3  ;;  %v1125_v20 = vld [vmem:[#allocation2 + $0xf2] sm:$0xff]  ;;  %v1165_v58 = vld [vmem:[#allocation2 + $0x168] sm:$0xff] }
 0x126   : > { %v3700_v10 = vadd.f32 %v3699_v51, %v3698_v4  ;;  %v12711_v4 = vpack.c.bf16 %v1118_v35, %v1117_v31  ;;  %v1094_v31 = vld [vmem:[#allocation2 + $0xf9] sm:$0xff]  ;;  %v1168_v38 = vld [vmem:[#allocation2 + $0x188] sm:$0xff] }
 0x127   : > { %v1156_v35 = vld [vmem:[#allocation2 + $0xf8] sm:$0xff]  ;;  %v1166_v42 = vld [vmem:[#allocation2 + $0x170] sm:$0xff] }
 0x128   : > { %v3702_v24 = vadd.f32 %v3701_v49, %v3700_v10  ;;  %v12713_v49 = vpack.c.bf16 %v1090_v63, %v1089_v39  ;;  %v12717_v10 = vpack.c.bf16 %v1152_v45, %v1151_v59  ;;  %v1123_v59 = vld [vmem:[#allocation2 + $0xda] sm:$0xff]  ;;  %v1124_v45 = vld [vmem:[#allocation2 + $0xe2] sm:$0xff]  ;;  %v1104_v62 = vld [vmem:[#allocation2 + $0x171] sm:$0xff] }
 0x129   : > { %v12746_v3 = vpack.c.bf16 %v1124_v45, %v1123_v59  ;;  %v1099_v59 = vld [vmem:[#allocation2 + $0x139] sm:$0xff]  ;;  %v1100_v45 = vld [vmem:[#allocation2 + $0x141] sm:$0xff] }
 0x12a   : > { %v3704_v28 = vadd.f32 %v3703_v53, %v3702_v24  ;;  %v1119_v53 = vld [vmem:[#allocation2 + $0xaa] sm:$0xff]  ;;  %v1154_v24 = vld [vmem:[#allocation2 + $0xe0] sm:$0xff] }
 0x12b   : > { %2136 = vmatmul.mubr.bf16.gmra.mxu1 %v12683_v0  ;;  %v12724_v30 = vpack.c.bf16 %v1120_v16, %v1119_v53  ;;  %v12729_v32 = vpack.c.bf16 %v1154_v24, %v1153_v22  ;;  %v1126_v22 = vld [vmem:[#allocation2 + $0xfa] sm:$0xff] }
 0x12c   : > { %v3706_v50 = vadd.f32 %v3705_v47, %v3704_v28  ;;  %2289 = vmatmul.mubr.bf16.gmra.mxu0 %v12695_v61  ;;  %2143 = vmatprep.mubr.bf16.mxu1 %v12697_v33  ;;  %v9486_v47 = vpop.f32.mrf.mxu1  ;;  %v1097_v24 = vld [vmem:[#allocation2 + $0x121] sm:$0xff] }
 0x12d   : > { %2296 = vmatprep.mubr.bf16.mxu0 %v12702_v19 }
 0x12e   : > { %v3708_v57 = vadd.f32 %v3707_v23, %v3706_v50  ;;  %v9487_v28 = vpop.f32.mrf.mxu1  ;;  %v1093_v23 = vld [vmem:[#allocation2 + $0xf1] sm:$0xff] }
 0x12f   : > { %v12734_v50 = vadd.f32 %v9487_v28, %v9486_v47  ;;  %v12738_v63 = vpack.c.bf16 %v1094_v31, %v1093_v23  ;;  %v1098_v47 = vld [vmem:[#allocation2 + $0x129] sm:$0xff]  ;;  %v1159_v28 = vld [vmem:[#allocation2 + $0x120] sm:$0xff] }
 0x130   : > { %v3710_v40 = vadd.f32 %v3709_v60, %v3708_v57  ;;  %v1121_v60 = vld [vmem:[#allocation2 + $0xc2] sm:$0xff]  ;;  %v1122_v57 = vld [vmem:[#allocation2 + $0xca] sm:$0xff] }
 0x131   : > { %v12736_v39 = vpack.c.bf16 %v1122_v57, %v1121_v60  ;;  %v1160_v23 = vld [vmem:[#allocation2 + $0x128] sm:$0xff]  ;;  %v12756_v60 = vpack.c.bf16 %v1126_v22, %v1125_v20  ;;  %v12758_v57 = vpack.c.bf16 %v1098_v47, %v1097_v24  ;;  %v1101_v47 = vld [vmem:[#allocation2 + $0x151] sm:$0xff] }
 0x132   : > { %v3712_v51 = vadd.f32 %v3711_v26, %v3710_v40  ;;  %v1155_v26 = vld [vmem:[#allocation2 + $0xf0] sm:$0xff]  ;;  %v12761_v31 = vpack.c.bf16 %v1160_v23, %v1159_v28  ;;  %v1129_v22 = vld [vmem:[#allocation2 + $0x122] sm:$0xff]  ;;  %v1102_v28 = vld [vmem:[#allocation2 + $0x159] sm:$0xff] }
 0x133   : > { %2144 = vmatmul.mubr.bf16.gmra.mxu1 %v12702_v19  ;;  %v12741_v40 = vpack.c.bf16 %v1156_v35, %v1155_v26  ;;  %v1127_v26 = vld [vmem:[#allocation2 + $0x10a] sm:$0xff]  ;;  %v1128_v35 = vld [vmem:[#allocation2 + $0x112] sm:$0xff] }
 0x134   : > { %v3714_v46 = vadd.f32 %v3713_v52, %v3712_v51  ;;  %2297 = vmatmul.mubr.bf16.gmra.mxu0 %v12711_v4  ;;  %2151 = vmatprep.mubr.bf16.mxu1 %v12713_v49  ;;  %v1095_v52 = vld [vmem:[#allocation2 + $0x109] sm:$0xff]  ;;  %v1096_v51 = vld [vmem:[#allocation2 + $0x111] sm:$0xff] }
 0x135   : > { %2304 = vmatprep.mubr.bf16.mxu0 %v12717_v10  ;;  %v12748_v53 = vpack.c.bf16 %v1096_v51, %v1095_v52  ;;  %v1161_v52 = vld [vmem:[#allocation2 + $0x138] sm:$0xff]  ;;  %v1162_v51 = vld [vmem:[#allocation2 + $0x140] sm:$0xff]  ;;  %v1130_v24 = vld [vmem:[#allocation2 + $0x12a] sm:$0xff] }
 0x136   : > { %v12722_v14 = vadd.f32 %v3715_v41, %v3714_v46  ;;  %v1157_v41 = vld [vmem:[#allocation2 + $0x108] sm:$0xff]  ;;  %v1158_v46 = vld [vmem:[#allocation2 + $0x110] sm:$0xff]  ;;  %v12771_v20 = vpack.c.bf16 %v1162_v51, %v1161_v52 }
 0x137   : > { %v12751_v16 = vpack.c.bf16 %v1158_v46, %v1157_v41  ;;  %v12766_v41 = vpack.c.bf16 %v1128_v35, %v1127_v26  ;;  %v12768_v46 = vpack.c.bf16 %v1100_v45, %v1099_v59  ;;  %v1163_v23 = vld [vmem:[#allocation2 + $0x150] sm:$0xff]  ;;  %v12776_v26 = vpack.c.bf16 %v1130_v24, %v1129_v22  ;;  %v1131_v45 = vld [vmem:[#allocation2 + $0x13a] sm:$0xff]  ;;  %v1132_v52 = vld [vmem:[#allocation2 + $0x142] sm:$0xff] }
 0x138   : > { %16057 = vst [vmem:[#allocation19_spill] sm:$0xff] %v12722_v14  ;;  %v12778_v35 = vpack.c.bf16 %v1102_v28, %v1101_v47  ;;  %v12781_v59 = vpack.c.bf16 %v1164_v2, %v1163_v23  ;;  %v1103_v51 = vld [vmem:[#allocation2 + $0x169] sm:$0xff]  ;;  %v12786_v22 = vpack.c.bf16 %v1132_v52, %v1131_v45  ;;  %v12791_v2 = vpack.c.bf16 %v1166_v42, %v1165_v58  ;;  %v1133_v47 = vld [vmem:[#allocation2 + $0x152] sm:$0xff]  ;;  %v1134_v28 = vld [vmem:[#allocation2 + $0x15a] sm:$0xff] }
 0x139   : > { %v12788_v24 = vpack.c.bf16 %v1104_v62, %v1103_v51  ;;  %v1167_v23 = vld [vmem:[#allocation2 + $0x180] sm:$0xff]  ;;  %v12796_v27 = vpack.c.bf16 %v1134_v28, %v1133_v47  ;;  %v1135_v58 = vld [vmem:[#allocation2 + $0x16a] sm:$0xff]  ;;  %v1136_v45 = vld [vmem:[#allocation2 + $0x172] sm:$0xff] }
 0x13a   : > { %v12799_v62 = vpack.c.bf16 %v1168_v38, %v1167_v23  ;;  %v1170_v42 = vld [vmem:[#allocation2 + $0x21] sm:$0xff]  ;;  %v1169_v52 = vld [vmem:[#allocation2 + $0x19] sm:$0xff]  ;;  %v12804_v14 = vpack.c.bf16 %v1136_v45, %v1135_v58  ;;  %v1266_v47 = vld [vmem:[#allocation2 + $0x31] sm:$0xff] }
 0x13b   : > { %2152 = vmatmul.mubr.bf16.gmra.mxu1 %v12717_v10  ;;  %v1267_v51 = vld [vmem:[#allocation2 + $0x39] sm:$0xff]  ;;  %v1339_v21 = vpack.c.bf16 %v1170_v42, %v1169_v52  ;;  %v11404_v38 = vld [vmem:[%s15933_s5 + $0x230] sm:$0xff]  }
 0x13c   : > { %2305 = vmatmul.mubr.bf16.gmra.mxu0 %v12724_v30  ;;  %2159 = vmatprep.mubr.bf16.mxu1 %v12726_v29  ;;  %v1342_v28 = vpack.c.bf16 %v1267_v51, %v1266_v47  ;;  %v1235_v23 = vld [vmem:[#allocation2 + $0x38] sm:$0xff]  ;;  %v1234_v42 = vld [vmem:[#allocation2 + $0x30] sm:$0xff]  ;;  %v12838_v52 = vld [vmem:[#allocation2] sm:$0xff] }
 0x13d   : > { %2312 = vmatprep.mubr.bf16.mxu0 %v12729_v32  ;;  %v1341_v58 = vpack.c.bf16 %v1235_v23, %v1234_v42  ;;  %v11408_v45 = vld [vmem:[%s15933_s5 + $0x218] sm:$0xff]  }
 0x13e   : > { %v3553_v51 = vld [vmem:[%s12861_s18 + $0x18] sm:$0xff] }
 0x13f   : > { %v3557_v42 = vld [vmem:[%s12861_s18 + $0x38] sm:$0xff] }
 0x143   : > { %2160 = vmatmul.mubr.bf16.gmra.mxu1 %v12729_v32 }
 0x144   : > { %2313 = vmatmul.mubr.bf16.gmra.mxu0 %v12736_v39  ;;  %2167 = vmatprep.mubr.bf16.mxu1 %v12738_v63 }
 0x145   : > { %2320 = vmatprep.mubr.bf16.mxu0 %v12741_v40 }
 0x14b   : > { %2168 = vmatmul.mubr.bf16.gmra.mxu1 %v12741_v40 }
 0x14c   : > { %2321 = vmatmul.mubr.bf16.gmra.mxu0 %v12746_v3  ;;  %2175 = vmatprep.mubr.bf16.mxu1 %v12748_v53 }
 0x14d   : > { %2328 = vmatprep.mubr.bf16.mxu0 %v12751_v16 }
 0x153   : > { %2176 = vmatmul.mubr.bf16.gmra.mxu1 %v12751_v16 }
 0x154   : > { %2329 = vmatmul.mubr.bf16.gmra.mxu0 %v12756_v60  ;;  %2183 = vmatprep.mubr.bf16.mxu1 %v12758_v57 }
 0x155   : > { %2336 = vmatprep.mubr.bf16.mxu0 %v12761_v31 }
 0x15b   : > { %2184 = vmatmul.mubr.bf16.gmra.mxu1 %v12761_v31 }
 0x15c   : > { %2337 = vmatmul.mubr.bf16.gmra.mxu0 %v12766_v41  ;;  %2191 = vmatprep.mubr.bf16.mxu1 %v12768_v46 }
 0x15d   : > { %2344 = vmatprep.mubr.bf16.mxu0 %v12771_v20 }
 0x163   : > { %2192 = vmatmul.mubr.bf16.gmra.mxu1 %v12771_v20 }
 0x164   : > { %2345 = vmatmul.mubr.bf16.gmra.mxu0 %v12776_v26  ;;  %2199 = vmatprep.mubr.bf16.mxu1 %v12778_v35 }
 0x165   : > { %2352 = vmatprep.mubr.bf16.mxu0 %v12781_v59 }
 0x16b   : > { %2200 = vmatmul.mubr.bf16.gmra.mxu1 %v12781_v59 }
 0x16c   : > { %2353 = vmatmul.mubr.bf16.gmra.mxu0 %v12786_v22  ;;  %2207 = vmatprep.mubr.bf16.mxu1 %v12788_v24 }
 0x16d   : > { %2360 = vmatprep.mubr.bf16.mxu0 %v12791_v2 }
 0x173   : > { %2208 = vmatmul.mubr.bf16.gmra.mxu1 %v12791_v2 }
 0x174   : > { %2361 = vmatmul.mubr.bf16.gmra.mxu0 %v12796_v27  ;;  %2409 = vmatprep.mubr.bf16.mxu1 %v12516_v43  ;;  %v11405_v43 = vld [vmem:[%s15933_s5 + $0x228] sm:$0xff]  }
 0x175   : > { %2368 = vmatprep.mubr.bf16.mxu0 %v12799_v62 }
 0x17b   : > { %2410 = vmatmul.mubr.bf16.vlgmr.msra.gmra.mxu1 %v1339_v21  ;;  %v2876_v21 = vsel %vm692_vm0, %v12678_v48, 0  ;;  %v11410_v48 = vld [vmem:[%s15932_s4] sm:$0xff]  }
 0x17c   : > { %2369 = vmatmul.mubr.bf16.gmra.mxu0 %v12804_v14  ;;  %2417 = vmatprep.mubr.bf16.mxu1 %v12560_v37  ;;  %v11406_v37 = vld [vmem:[%s15932_s4 + $0x8] sm:$0xff]  }
 0x17d   : > { %2570 = vmatprep.mubr.bf16.mxu0 %v1342_v28  ;;  %10989 = vmatpush3.bf16.msra.mxu1 %v12499_v9  ;;  %v11407_v9 = vld [vmem:[%s15933_s5 + $0x220] sm:$0xff]  }
 0x17e   : > { %10990 = vmatprep.subr.bf16.mxu1 %v11404_v38 }
 0x181   : > { %10991 = vmatpush3.bf16.msra.mxu1 %v11404_v38 }
 0x182   : > { %10992 = vmatprep.subr.bf16.mxu1 %v11405_v43 }
 0x183   : > { %2418 = vmatmul.mubr.bf16.gmra.mxu1 %v1342_v28  ;;  %v3555_v28 = vld [vmem:[%s12861_s18 + $0x28] sm:$0xff] }
 0x184   : > { %2571 = vmatmul.mubr.bf16.vlgmr.msra.gmra.mxu0 %v1341_v58  ;;  %2425 = vmatprep.mubr.bf16.mxu1 %v12630_v18  ;;  %v11409_v18 = vld [vmem:[%s15933_s5 + $0x210] sm:$0xff]   ;;  %v9489_v58 = vpop.f32.mrf.mxu1 }
 0x185   : > { %11037 = vmatpush3.bf16.msra.mxu0 %v2876_v21  ;;  %2578 = vmatprep.mubr.bf16.mxu0 %v12518_v44 }
 0x186   : > { %10993 = vmatpush3.bf16.msra.mxu1 %v11405_v43  ;;  %11038 = vmatprep.subr.bf16.mxu0 %v11406_v37  ;;  %v9490_v21 = vpop.f32.mrf.mxu1 }
 0x187   : > { %10994 = vmatprep.subr.bf16.mxu1 %v11407_v9 }
 0x189   : > { %11039 = vmatpush3.bf16.msra.mxu0 %v11406_v37 }
 0x18a   : > { %10995 = vmatpush3.bf16.msra.mxu1 %v11407_v9  ;;  %11040 = vmatprep.subr.bf16.mxu0 %v11410_v48 }
 0x18b   : > { %2426 = vmatmul.mubr.bf16.gmra.mxu1 %v12518_v44  ;;  %10996 = vmatprep.subr.bf16.mxu1 %v11408_v45  ;;  %v11411_v44 = vld [vmem:[%s15933_s5 + $0x208] sm:$0xff]  }
 0x18c   : > { %2579 = vmatmul.mubr.bf16.gmra.mxu0 %v12534_v11  ;;  %2433 = vmatprep.mubr.bf16.mxu1 %v12670_v15  ;;  %v11412_v11 = vld [vmem:[%s15933_s5 + $0x200] sm:$0xff]   ;;  %v3552_v15 = vld [vmem:[%s12861_s18 + $0x10] sm:$0xff] }
 0x18d   : > { %2586 = vmatprep.mubr.bf16.mxu0 %v12573_v5  ;;  %11041 = vmatpush3.bf16.msra.mxu0 %v11410_v48  ;;  %v3559_v48 = vld [vmem:[%s12861_s18 + $0x48] sm:$0xff] }
 0x18e   : > { %10997 = vmatpush3.bf16.msra.mxu1 %v11408_v45  ;;  %11122 = vmatprep.subr.mxu0 %v12838_v52 }
 0x18f   : > { %10998 = vmatprep.subr.bf16.mxu1 %v11409_v18 }
 0x192   : > { %10999 = vmatpush3.bf16.msra.mxu1 %v11409_v18 }
 0x193   : > { %2434 = vmatmul.mubr.bf16.gmra.mxu1 %v12573_v5  ;;  %11000 = vmatprep.subr.bf16.mxu1 %v11411_v44  ;;  %v3550_v5 = vld [vmem:[%s12861_s18] sm:$0xff] }
 0x194   : > { %2587 = vmatmul.mubr.bf16.gmra.mxu0 %v12575_v6  ;;  %2441 = vmatprep.mubr.bf16.mxu1 %v12695_v61  ;;  %v3551_v6 = vld [vmem:[%s12861_s18 + $0x8] sm:$0xff] }
 0x195   : > { %2594 = vmatprep.mubr.bf16.mxu0 %v12632_v7 }
 0x196   : > { %11001 = vmatpush3.bf16.msra.mxu1 %v11411_v44  ;;  %v3560_v44 = vld [vmem:[%s12861_s18 + $0x50] sm:$0xff] }
 0x197   : > { %11002 = vmatprep.subr.bf16.mxu1 %v11412_v11 }
 0x19a   : > { %11003 = vmatpush3.bf16.msra.mxu1 %v11412_v11 }
 0x19b   : > { %2442 = vmatmul.mubr.bf16.gmra.mxu1 %v12632_v7  ;;  %11074 = vmatprep.subr.mxu1 %v12838_v52  ;;  %v3583_v7 = vsel %vm3582_vm9, %v3550_v5, 0.0 }
 0x19c   : > { %2595 = vmatmul.mubr.bf16.gmra.mxu0 %v12642_v25  ;;  %2449 = vmatprep.mubr.bf16.mxu1 %v12711_v4  ;;  %v3584_v25 = vsel %vm3582_vm9, %v3551_v6, 0.0  ;;  %v3586_v4 = vsel %vm3582_vm9, %v3552_v15, 0.0 }
 0x19d   : > { %2602 = vmatprep.mubr.bf16.mxu0 %v12672_v55  ;;  %v3585_v61 = vadd.f32 %v3584_v25, %v3583_v7 }
 0x1a3   : > { %2450 = vmatmul.mubr.bf16.gmra.mxu1 %v12672_v55  ;;  %v3587_v55 = vadd.f32 %v3586_v4, %v3585_v61 }
 0x1a4   : > { %2603 = vmatmul.mubr.bf16.gmra.mxu0 %v12683_v0  ;;  %2457 = vmatprep.mubr.bf16.mxu1 %v12724_v30  ;;  %v3588_v0 = vsel %vm3582_vm9, %v3553_v51, 0.0  ;;  %v3554_v30 = vld [vmem:[%s12861_s18 + $0x20] sm:$0xff] }
 0x1a5   : > { %2610 = vmatprep.mubr.bf16.mxu0 %v12697_v33  ;;  %v3589_v47 = vadd.f32 %v3588_v0, %v3587_v55  ;;  %v3590_v38 = vsel %vm3582_vm9, %v3554_v30, 0.0  ;;  %v9491_v55 = vadd.f32 %v9490_v21, %v9489_v58 }
 0x1a7   : > { %v3591_v43 = vadd.f32 %v3590_v38, %v3589_v47 }
 0x1ab   : > { %2458 = vmatmul.mubr.bf16.gmra.mxu1 %v12697_v33  ;;  %v3592_v33 = vsel %vm3582_vm9, %v3555_v28, 0.0 }
 0x1ac   : > { %2611 = vmatmul.mubr.bf16.gmra.mxu0 %v12702_v19  ;;  %2465 = vmatprep.mubr.bf16.mxu1 %v12736_v39  ;;  %v3556_v19 = vld [vmem:[%s12861_s18 + $0x30] sm:$0xff]  ;;  %v3593_v39 = vadd.f32 %v3592_v33, %v3591_v43  ;;  %v3562_v33 = vld [vmem:[%s12861_s18 + $0x60] sm:$0xff] }
 0x1ad   : > { %2618 = vmatprep.mubr.bf16.mxu0 %v12713_v49  ;;  %v3594_v23 = vsel %vm3582_vm9, %v3556_v19, 0.0 }
 0x1b3   : > { %2466 = vmatmul.mubr.bf16.gmra.mxu1 %v12713_v49  ;;  %v3595_v49 = vadd.f32 %v3594_v23, %v3593_v39 }
 0x1b4   : > { %2619 = vmatmul.mubr.bf16.gmra.mxu0 %v12717_v10  ;;  %2473 = vmatprep.mubr.bf16.mxu1 %v12746_v3  ;;  %v3596_v10 = vsel %vm3582_vm9, %v3557_v42, 0.0  ;;  %v3558_v3 = vld [vmem:[%s12861_s18 + $0x40] sm:$0xff] }
 0x1b5   : > { %2626 = vmatprep.mubr.bf16.mxu0 %v12726_v29  ;;  %v3597_v37 = vadd.f32 %v3596_v10, %v3595_v49  ;;  %v3598_v9 = vsel %vm3582_vm9, %v3558_v3, 0.0  ;;  %v3606_v49 = vsel %vm3582_vm9, %v3562_v33, 0.0  ;;  %v3563_v10 = vld [vmem:[%s12861_s18 + $0x68] sm:$0xff] }
 0x1bb   : > { %2474 = vmatmul.mubr.bf16.gmra.mxu1 %v12726_v29  ;;  %v3599_v29 = vadd.f32 %v3598_v9, %v3597_v37 }
 0x1bc   : > { %2627 = vmatmul.mubr.bf16.gmra.mxu0 %v12729_v32  ;;  %2481 = vmatprep.mubr.bf16.mxu1 %v12756_v60  ;;  %v3600_v32 = vsel %vm3582_vm9, %v3559_v48, 0.0 }
 0x1bd   : > { %2634 = vmatprep.mubr.bf16.mxu0 %v12738_v63  ;;  %v3601_v25 = vadd.f32 %v3600_v32, %v3599_v29  ;;  %v3608_v29 = vsel %vm3582_vm9, %v3563_v10, 0.0 }
 0x1c3   : > { %v9492_v45 = vpop.f32.mrf.mxu1  ;;  %2482 = vmatmul.mubr.bf16.gmra.mxu1 %v12738_v63  ;;  %v3602_v63 = vsel %vm3582_vm9, %v3560_v44, 0.0 }
 0x1c4   : > { %v9598_v18 = vpop.f32.mrf.mxu0  ;;  %2635 = vmatmul.mubr.bf16.gmra.mxu0 %v12741_v40  ;;  %2489 = vmatprep.mubr.bf16.mxu1 %v12766_v41  ;;  %v3561_v41 = vld [vmem:[%s12861_s18 + $0x58] sm:$0xff]  ;;  %v3603_v47 = vadd.f32 %v3602_v63, %v3601_v25 }
 0x1c5   : > { %2642 = vmatprep.mubr.bf16.mxu0 %v12748_v53  ;;  %v9493_v60 = vpop.f32.mrf.mxu1 }
 0x1c6   : > { %v9494_v11 = vadd.f32 %v9493_v60, %v9492_v45  ;;  %v9599_v5 = vpop.f32.mrf.mxu0  ;;  %v3564_v60 = vld [vmem:[%s12861_s18 + $0x70] sm:$0xff] }
 0x1c7   : > { %v9600_v6 = vadd.f32 %v9599_v5, %v9598_v18  ;;  %v9495_v7 = vpop.f32.mrf.mxu1  ;;  %v3610_v25 = vsel %vm3582_vm9, %v3564_v60, 0.0 }
 0x1c8   : > { %v9601_v15 = vpop.f32.mrf.mxu0 }
 0x1c9   : > { %v12906_v61 = vadd.f32 %v9600_v6, %v12734_v50  ;;  %v9496_v40 = vpop.f32.mrf.mxu1  ;;  %v3604_v50 = vsel %vm3582_vm9, %v3561_v41, 0.0 }
 0x1ca   : > { %v9497_v4 = vadd.f32 %v9496_v40, %v9495_v7  ;;  %v9602_v51 = vpop.f32.mrf.mxu0 }
 0x1cb   : > { %v9603_v0 = vadd.f32 %v9602_v51, %v9601_v15  ;;  %v9498_v30 = vpop.f32.mrf.mxu1  ;;  %2490 = vmatmul.mubr.bf16.gmra.mxu1 %v12748_v53  ;;  %v3605_v53 = vadd.f32 %v3604_v50, %v3603_v47  ;;  %v3565_v15 = vld [vmem:[%s12861_s18 + $0x78] sm:$0xff] }
 0x1cc   : > { %v9604_v38 = vpop.f32.mrf.mxu0  ;;  %2643 = vmatmul.mubr.bf16.gmra.mxu0 %v12751_v16  ;;  %2497 = vmatprep.mubr.bf16.mxu1 %v12776_v26 }
 0x1cd   : > { %v12913_v28 = vadd.f32 %v9603_v0, %v9491_v55  ;;  %2650 = vmatprep.mubr.bf16.mxu0 %v12758_v57  ;;  %v9499_v43 = vpop.f32.mrf.mxu1  ;;  %v3607_v48 = vadd.f32 %v3606_v49, %v3605_v53  ;;  %v3612_v0 = vsel %vm3582_vm9, %v3565_v15, 0.0 }
 0x1ce   : > { %v9500_v19 = vadd.f32 %v9499_v43, %v9498_v30  ;;  %v9605_v39 = vpop.f32.mrf.mxu0 }
 0x1cf   : > { %v9606_v23 = vadd.f32 %v9605_v39, %v9604_v38  ;;  %v9501_v42 = vpop.f32.mrf.mxu1  ;;  %v3566_v38 = vld [vmem:[%s12861_s18 + $0x80] sm:$0xff] }
 0x1d0   : > { %v9607_v58 = vpop.f32.mrf.mxu0 }
 0x1d1   : > { %v12918_v16 = vadd.f32 %v9606_v23, %v9494_v11  ;;  %v9502_v26 = vpop.f32.mrf.mxu1  ;;  %v3614_v23 = vsel %vm3582_vm9, %v3566_v38, 0.0 }
 0x1d2   : > { %v9503_v3 = vadd.f32 %v9502_v26, %v9501_v42  ;;  %v9608_v21 = vpop.f32.mrf.mxu0  ;;  %v3567_v42 = vld [vmem:[%s12861_s18 + $0x88] sm:$0xff] }
 0x1d3   : > { %v9609_v37 = vadd.f32 %v9608_v21, %v9607_v58  ;;  %v9504_v9 = vpop.f32.mrf.mxu1  ;;  %2498 = vmatmul.mubr.bf16.gmra.mxu1 %v12758_v57  ;;  %v3609_v57 = vadd.f32 %v3608_v29, %v3607_v48  ;;  %v3616_v21 = vsel %vm3582_vm9, %v3567_v42, 0.0  ;;  %v3568_v48 = vld [vmem:[%s12861_s18 + $0x90] sm:$0xff] }
 0x1d4   : > { %v9610_v45 = vpop.f32.mrf.mxu0  ;;  %2651 = vmatmul.mubr.bf16.gmra.mxu0 %v12761_v31  ;;  %2505 = vmatprep.mubr.bf16.mxu1 %v12786_v22 }
 0x1d5   : > { %v12925_v18 = vadd.f32 %v9609_v37, %v9497_v4  ;;  %2658 = vmatprep.mubr.bf16.mxu0 %v12768_v46  ;;  %v9505_v32 = vpop.f32.mrf.mxu1  ;;  %v3611_v51 = vadd.f32 %v3610_v25, %v3609_v57  ;;  %v3569_v25 = vld [vmem:[%s12861_s18 + $0x98] sm:$0xff] }
 0x1d6   : > { %v9506_v44 = vadd.f32 %v9505_v32, %v9504_v9  ;;  %v9611_v11 = vpop.f32.mrf.mxu0 }
 0x1d7   : > { %v9612_v5 = vadd.f32 %v9611_v11, %v9610_v45  ;;  %v9507_v6 = vpop.f32.mrf.mxu1 }
 0x1d8   : > { %v9613_v7 = vpop.f32.mrf.mxu0 }
 0x1d9   : > { %v12930_v31 = vadd.f32 %v9612_v5, %v9500_v19  ;;  %v9508_v22 = vpop.f32.mrf.mxu1 }
 0x1da   : > { %v9509_v63 = vadd.f32 %v9508_v22, %v9507_v6  ;;  %v9614_v40 = vpop.f32.mrf.mxu0  ;;  %v1295_v6 = vld [vmem:[#allocation2 + $0x189] sm:$0xff] }
 0x1db   : > { %v9615_v41 = vadd.f32 %v9614_v40, %v9613_v7  ;;  %v9510_v4 = vpop.f32.mrf.mxu1  ;;  %2506 = vmatmul.mubr.bf16.gmra.mxu1 %v12768_v46  ;;  %v3613_v46 = vadd.f32 %v3612_v0, %v3611_v51  ;;  %v3620_v0 = vsel %vm3582_vm9, %v3569_v25, 0.0 }
 0x1dc   : > { %v9616_v55 = vpop.f32.mrf.mxu0  ;;  %2659 = vmatmul.mubr.bf16.gmra.mxu0 %v12771_v20  ;;  %2513 = vmatprep.mubr.bf16.mxu1 %v12796_v27 }
 0x1dd   : > { %v12937_v30 = vadd.f32 %v9615_v41, %v9503_v3  ;;  %2666 = vmatprep.mubr.bf16.mxu0 %v12778_v35  ;;  %v9511_v47 = vpop.f32.mrf.mxu1  ;;  %v3615_v10 = vadd.f32 %v3614_v23, %v3613_v46  ;;  %v1297_v46 = vld [vmem:[#allocation2 + $0x1a1] sm:$0xff]  ;;  %v1298_v23 = vld [vmem:[#allocation2 + $0x32] sm:$0xff] }
 0x1de   : > { %v9512_v50 = vadd.f32 %v9511_v47, %v9510_v4  ;;  %v9617_v43 = vpop.f32.mrf.mxu0 }
 0x1df   : > { %v9618_v33 = vadd.f32 %v9617_v43, %v9616_v55  ;;  %v9513_v19 = vpop.f32.mrf.mxu1  ;;  %v3617_v11 = vadd.f32 %v3616_v21, %v3615_v10  ;;  %v3571_v10 = vld [vmem:[%s12861_s18 + $0xa8] sm:$0xff] }
 0x1e0   : > { %v9619_v39 = vpop.f32.mrf.mxu0 }
 0x1e1   : > { %v12942_v20 = vadd.f32 %v9618_v33, %v9506_v44  ;;  %v9514_v27 = vpop.f32.mrf.mxu1  ;;  %v1232_v44 = vld [vmem:[#allocation2 + $0x18a] sm:$0xff] }
 0x1e2   : > { %v9515_v53 = vadd.f32 %v9514_v27, %v9513_v19  ;;  %v9620_v58 = vpop.f32.mrf.mxu0  ;;  %v1296_v19 = vld [vmem:[#allocation2 + $0x199] sm:$0xff] }
 0x1e3   : > { %v9621_v49 = vadd.f32 %v9620_v58, %v9619_v39  ;;  %v9516_v26 = vpop.f32.mrf.mxu1  ;;  %2514 = vmatmul.mubr.bf16.gmra.mxu1 %v12778_v35  ;;  %v1231_v35 = vld [vmem:[#allocation2 + $0x182] sm:$0xff]  ;;  %v1299_v27 = vld [vmem:[#allocation2 + $0x3a] sm:$0xff] }
 0x1e4   : > { %v9622_v3 = vpop.f32.mrf.mxu0  ;;  %2667 = vmatmul.mubr.bf16.gmra.mxu0 %v12781_v59  ;;  %2521 = vmatprep.mubr.bf16.mxu1 %v12804_v14  ;;  %v1294_v59 = vld [vmem:[#allocation2 + $0x181] sm:$0xff]  ;;  %v3618_v14 = vsel %vm3582_vm9, %v3568_v48, 0.0 }
 0x1e5   : > { %v12949_v37 = vadd.f32 %v9621_v49, %v9509_v63  ;;  %2674 = vmatprep.mubr.bf16.mxu0 %v12788_v24  ;;  %v9517_v9 = vpop.f32.mrf.mxu1  ;;  %v12957_v63 = vpack.c.bf16 %v1232_v44, %v1231_v35  ;;  %v1468_v4 = vpack.c.bf16 %v1295_v6, %v1294_v59  ;;  %v3619_v51 = vadd.f32 %v3618_v14, %v3617_v11  ;;  %v3572_v11 = vld [vmem:[%s12861_s18 + $0xb0] sm:$0xff] }
 0x1e6   : > { %v9518_v45 = vadd.f32 %v9517_v9, %v9516_v26  ;;  %v9623_v29 = vpop.f32.mrf.mxu0  ;;  %v1477_v26 = vpack.c.bf16 %v1297_v46, %v1296_v19  ;;  %v1343_v9 = vpack.c.bf16 %v1299_v27, %v1298_v23  ;;  %v3624_v35 = vsel %vm3582_vm9, %v3571_v10, 0.0  ;;  %v1300_v6 = vld [vmem:[#allocation2 + $0x4a] sm:$0xff]  ;;  %v1301_v14 = vld [vmem:[#allocation2 + $0x52] sm:$0xff] }
 0x1e7   : > { %v9624_v32 = vadd.f32 %v9623_v29, %v9622_v3  ;;  %v9519_v60 = vpop.f32.mrf.mxu1  ;;  %v3621_v42 = vadd.f32 %v3620_v0, %v3619_v51  ;;  %v1352_v0 = vpack.c.bf16 %v1301_v14, %v1300_v6  ;;  %v3802_v46 = vld [vmem:[%s15940_s12 + $0x38] sm:$0xff]  ;;  %v3575_v14 = vld [vmem:[%s12861_s18 + $0xc8] sm:$0xff] }
 0x1e8   : > { %v9625_v5 = vpop.f32.mrf.mxu0 }
 0x1e9   : > { %v12954_v57 = vadd.f32 %v9624_v32, %v9512_v50  ;;  %v9520_v7 = vpop.f32.mrf.mxu1  ;;  %v3570_v50 = vld [vmem:[%s12861_s18 + $0xa0] sm:$0xff] }
 0x1ea   : > { %v9521_v22 = vadd.f32 %v9520_v7, %v9519_v60  ;;  %v9626_v15 = vpop.f32.mrf.mxu0  ;;  %v3622_v58 = vsel %vm3582_vm9, %v3570_v50, 0.0 }
 0x1eb   : > { %v9627_v40 = vadd.f32 %v9626_v15, %v9625_v5  ;;  %v9522_v41 = vpop.f32.mrf.mxu1  ;;  %2522 = vmatmul.mubr.bf16.gmra.mxu1 %v12788_v24  ;;  %v3623_v32 = vadd.f32 %v3622_v58, %v3621_v42  ;;  %v1302_v15 = vld [vmem:[#allocation2 + $0x62] sm:$0xff] }
 0x1ec   : > { %v9628_v55 = vpop.f32.mrf.mxu0  ;;  %2675 = vmatmul.mubr.bf16.gmra.mxu0 %v12791_v2  ;;  %2529 = vmatprep.mubr.bf16.mxu1 %v12957_v63 }
 0x1ed   : > { %v12963_v47 = vadd.f32 %v9627_v40, %v9515_v53  ;;  %2682 = vmatprep.mubr.bf16.mxu0 %v1468_v4  ;;  %v9523_v38 = vpop.f32.mrf.mxu1  ;;  %v1303_v40 = vld [vmem:[#allocation2 + $0x6a] sm:$0xff] }
 0x1ee   : > { %v9524_v43 = vadd.f32 %v9523_v38, %v9522_v41  ;;  %v9629_v33 = vpop.f32.mrf.mxu0  ;;  %v3625_v41 = vadd.f32 %v3624_v35, %v3623_v32  ;;  %v3573_v38 = vld [vmem:[%s12861_s18 + $0xb8] sm:$0xff]  ;;  %v1361_v19 = vpack.c.bf16 %v1303_v40, %v1302_v15  ;;  %v3799_v40 = vld [vmem:[%s15940_s12 + $0x20] sm:$0xff] }
 0x1ef   : > { %v9630_v24 = vadd.f32 %v9629_v33, %v9628_v55  ;;  %v9525_v39 = vpop.f32.mrf.mxu1  ;;  %v3628_v42 = vsel %vm3582_vm9, %v3573_v38, 0.0  ;;  %v1306_v32 = vld [vmem:[#allocation2 + $0x92] sm:$0xff] }
 0x1f0   : > { %v9631_v2 = vpop.f32.mrf.mxu0 }
 0x1f1   : > { %v12967_v49 = vadd.f32 %v9630_v24, %v9518_v45  ;;  %v9526_v53 = vpop.f32.mrf.mxu1 }
 0x1f2   : > { %v9527_v3 = vadd.f32 %v9526_v53, %v9525_v39  ;;  %v9632_v21 = vpop.f32.mrf.mxu0  ;;  %v3574_v53 = vld [vmem:[%s12861_s18 + $0xc0] sm:$0xff] }
 0x1f3   : > { %v9633_v48 = vadd.f32 %v9632_v21, %v9631_v2  ;;  %v9528_v29 = vpop.f32.mrf.mxu1  ;;  %2530 = vmatmul.mubr.bf16.gmra.mxu1 %v1468_v4  ;;  %v1304_v21 = vld [vmem:[#allocation2 + $0x7a] sm:$0xff] }
 0x1f4   : > { %v9634_v60 = vpop.f32.mrf.mxu0  ;;  %2683 = vmatmul.mubr.bf16.gmra.mxu0 %v12799_v62  ;;  %11004 = vmatprep.mubr.bf16.mxu1 %v1343_v9  ;;  %v1476_v62 = vpack.c.bf16 %v12838_v52, %v12838_v52  ;;  %v1305_v9 = vld [vmem:[#allocation2 + $0x82] sm:$0xff] }
 0x1f5   : > { %v12972_v44 = vadd.f32 %v9633_v48, %v9521_v22  ;;  %v9529_v45 = vpop.f32.mrf.mxu1  ;;  %2690 = vmatprep.mubr.bf16.mxu0 %v1477_v26  ;;  %v3626_v22 = vsel %vm3582_vm9, %v3572_v11, 0.0  ;;  %v3800_v48 = vld [vmem:[%s15940_s12 + $0x28] sm:$0xff]  ;;  %v1370_v6 = vpack.c.bf16 %v1305_v9, %v1304_v21  ;;  %v3577_v9 = vld [vmem:[%s12861_s18 + $0xd8] sm:$0xff] }
 0x1f6   : > { %v9530_v5 = vadd.f32 %v9529_v45, %v9528_v29  ;;  %v9635_v59 = vpop.f32.mrf.mxu0  ;;  %v3627_v23 = vadd.f32 %v3626_v22, %v3625_v41  ;;  %v3630_v45 = vsel %vm3582_vm9, %v3574_v53, 0.0  ;;  %v3798_v22 = vld [vmem:[%s15940_s12 + $0x18] sm:$0xff] }
 0x1f7   : > { %v9636_v7 = vadd.f32 %v9635_v59, %v9634_v60  ;;  %v9531_v25 = vpop.f32.mrf.mxu1  ;;  %v1307_v60 = vld [vmem:[#allocation2 + $0x9a] sm:$0xff] }
 0x1f8   : > { %v9637_v4 = vpop.f32.mrf.mxu0  ;;  %v3629_v35 = vadd.f32 %v3628_v42, %v3627_v23  ;;  %v1379_v15 = vpack.c.bf16 %v1307_v60, %v1306_v32  ;;  %v3796_v32 = vld [vmem:[%s15940_s12 + $0x8] sm:$0xff] }
 0x1f9   : > { %v12978_v51 = vadd.f32 %v9636_v7, %v9524_v43  ;;  %v9532_v55 = vpop.f32.mrf.mxu1  ;;  %v3801_v43 = vld [vmem:[%s15940_s12 + $0x30] sm:$0xff] }
 0x1fa   : > { %v9533_v50 = vadd.f32 %v9532_v55, %v9531_v25  ;;  %v9638_v33 = vpop.f32.mrf.mxu0  ;;  %v3632_v55 = vsel %vm3582_vm9, %v3575_v14, 0.0 }
 0x1fb   : > { %v9639_v24 = vadd.f32 %v9638_v33, %v9637_v4  ;;  %v9534_v39 = vpop.f32.mrf.mxu1  ;;  %11005 = vmatmul.mubr.bf16.vlgmr.msra.gmra.mxu1 %v1352_v0  ;;  %v3576_v33 = vld [vmem:[%s12861_s18 + $0xd0] sm:$0xff] }
 0x1fc   : > { %v9640_v27 = vpop.f32.mrf.mxu0  ;;  %2691 = vmatmul.mubr.bf16.gmra.mxu0 %v1476_v62  ;;  %11008 = vmatprep.mubr.bf16.mxu1 %v1361_v19  ;;  %v3631_v62 = vadd.f32 %v3630_v45, %v3629_v35  ;;  %v3795_v45 = vld [vmem:[%s15940_s12] sm:$0xff] }
 0x1fd   : > { %v12988_v2 = vadd.f32 %v9639_v24, %v9527_v3  ;;  %v9535_v58 = vpop.f32.mrf.mxu1  ;;  %11042 = vmatprep.mubr.msk.bf16.mxu0 %vm643_vm1, %v12064_v8  ;;  %11075 = vmatpush3.msra.mxu1 %v3802_v46  ;;  %v1308_v24 = vld [vmem:[#allocation2 + $0xaa] sm:$0xff] }
 0x1fe   : > { %v9536_v26 = vadd.f32 %v9535_v58, %v9534_v39  ;;  %v9641_v10 = vpop.f32.mrf.mxu0  ;;  %11076 = vmatprep.subr.mxu1 %v12838_v52  ;;  %v1309_v39 = vld [vmem:[#allocation2 + $0xb2] sm:$0xff]  ;;  %v3633_v42 = vadd.f32 %v3632_v55, %v3631_v62  ;;  %v3634_v58 = vsel %vm3582_vm9, %v3576_v33, 0.0 }
 0x1ff   : > { %v9642_v29 = vadd.f32 %v9641_v10, %v9640_v27  ;;  %v9537_v3 = vpop.f32.mrf.mxu1  ;;  %11077 = vmatpush3.msra.mxu1 %v3801_v43  ;;  %v1310_v27 = vld [vmem:[#allocation2 + $0xc2] sm:$0xff]  ;;  %v1311_v43 = vld [vmem:[#allocation2 + $0xca] sm:$0xff]  ;;  %v1388_v21 = vpack.c.bf16 %v1309_v39, %v1308_v24 }
 0x200   : > { %v9643_v8 = vpop.f32.mrf.mxu0  ;;  %11078 = vmatprep.subr.mxu1 %v12838_v52  ;;  %v3579_v24 = vld [vmem:[%s12861_s18 + $0xe8] sm:$0xff] }
 0x201   : > { %v12999_v11 = vadd.f32 %v9642_v29, %v9530_v5  ;;  %v9538_v59 = vpop.f32.mrf.mxu1  ;;  %11079 = vmatpush3.msra.mxu1 %v3800_v48 }
 0x202   : > { %v9539_v7 = vadd.f32 %v9538_v59, %v9537_v3  ;;  %v9644_v25 = vpop.f32.mrf.mxu0  ;;  %11080 = vmatprep.subr.mxu1 %v12838_v52  ;;  %v1397_v3 = vpack.c.bf16 %v1311_v43, %v1310_v27  ;;  %v3636_v59 = vsel %vm3582_vm9, %v3577_v9, 0.0 }
 0x203   : > { %v9645_v41 = vadd.f32 %v9644_v25, %v9643_v8  ;;  %v9540_v4 = vpop.f32.mrf.mxu1  ;;  %11009 = vmatmul.mubr.bf16.gmra.mxu1 %v1370_v6  ;;  %v3635_v8 = vadd.f32 %v3634_v58, %v3633_v42  ;;  %v3578_v25 = vld [vmem:[%s12861_s18 + $0xe0] sm:$0xff] }
 0x204   : > { %v9646_v5 = vpop.f32.mrf.mxu0  ;;  %11043 = vmatmul.mubr.msk.bf16.vlgmr.msra.gmra.mxu0 %vm643_vm1, %v12071_v12  ;;  %11012 = vmatprep.mubr.bf16.mxu1 %v1379_v15  ;;  %v3797_v12 = vld [vmem:[%s15940_s12 + $0x10] sm:$0xff] }
 0x205   : > { %v13012_v0 = vadd.f32 %v9645_v41, %v9533_v50  ;;  %v9541_v38 = vpop.f32.mrf.mxu1  ;;  %11046 = vmatprep.mubr.msk.bf16.mxu0 %vm643_vm1, %v12073_v13  ;;  %11081 = vmatpush3.msra.mxu1 %v3799_v40  ;;  %v1312_v41 = vld [vmem:[#allocation2 + $0xda] sm:$0xff] }
 0x206   : > { %v9542_v19 = vadd.f32 %v9541_v38, %v9540_v4  ;;  %v9647_v46 = vpop.f32.mrf.mxu0  ;;  %11082 = vmatprep.subr.mxu1 %v12838_v52 }
 0x207   : > { %v9648_v23 = vadd.f32 %v9647_v46, %v9646_v5  ;;  %v9543_v50 = vpop.f32.mrf.mxu1  ;;  %11083 = vmatpush3.msra.mxu1 %v3798_v22  ;;  %v1314_v5 = vld [vmem:[#allocation2 + $0xf2] sm:$0xff]  ;;  %v1315_v22 = vld [vmem:[#allocation2 + $0xfa] sm:$0xff] }
 0x208   : > { %v9649_v13 = vpop.f32.mrf.mxu0  ;;  %11084 = vmatprep.subr.mxu1 %v12838_v52 }
 0x209   : > { %v13023_v53 = vadd.f32 %v9648_v23, %v9536_v26  ;;  %v9544_v10 = vpop.f32.mrf.mxu1  ;;  %11085 = vmatpush3.msra.mxu1 %v3797_v12  ;;  %v1415_v23 = vpack.c.bf16 %v1315_v22, %v1314_v5 }
 0x20a   : > { %v9545_v48 = vadd.f32 %v9544_v10, %v9543_v50  ;;  %v9650_v29 = vpop.f32.mrf.mxu0  ;;  %11086 = vmatprep.subr.mxu1 %v12838_v52  ;;  %v3580_v10 = vld [vmem:[%s12861_s18 + $0xf0] sm:$0xff] }
 0x20b   : > { %v9651_v60 = vadd.f32 %v9650_v29, %v9649_v13  ;;  %v9546_v35 = vpop.f32.mrf.mxu1  ;;  %11013 = vmatmul.mubr.bf16.gmra.mxu1 %v1388_v21  ;;  %v3640_v13 = vsel %vm3582_vm9, %v3579_v24, 0.0  ;;  %v1316_v29 = vld [vmem:[#allocation2 + $0x10a] sm:$0xff] }
 0x20c   : > { %v9652_v26 = vpop.f32.mrf.mxu0  ;;  %11047 = vmatmul.mubr.msk.bf16.gmra.mxu0 %vm643_vm1, %v12114_v34  ;;  %11016 = vmatprep.mubr.bf16.mxu1 %v1397_v3  ;;  %v1313_v34 = vld [vmem:[#allocation2 + $0xe2] sm:$0xff]  ;;  %v1317_v3 = vld [vmem:[#allocation2 + $0x112] sm:$0xff] }
 0x20d   : > { %v13036_v6 = vadd.f32 %v9651_v60, %v9539_v7  ;;  %v9547_v14 = vpop.f32.mrf.mxu1  ;;  %11050 = vmatprep.mubr.msk.bf16.mxu0 %vm643_vm1, %v12119_v36  ;;  %11087 = vmatpush3.msra.mxu1 %v3796_v32  ;;  %v3637_v7 = vadd.f32 %v3636_v59, %v3635_v8  ;;  %v3638_v36 = vsel %vm3582_vm9, %v3578_v25, 0.0  ;;  %v1406_v46 = vpack.c.bf16 %v1313_v34, %v1312_v41  ;;  %v1319_v8 = vld [vmem:[#allocation2 + $0x12a] sm:$0xff]  ;;  %v3581_v25 = vld [vmem:[%s12861_s18 + $0xf8] sm:$0xff]  ;;  %s9450_s18 = sshll.u32 %s12007_s28, 12  ;;  %s15888_s28 = scalar_lea.sflag [#allocation5], %s554_s21 }
 0x20e   : > { %v9548_v15 = vadd.f32 %v9547_v14, %v9546_v35  ;;  %v9653_v40 = vpop.f32.mrf.mxu0  ;;  %11088 = vmatprep.subr.mxu1 %v12838_v52  ;;  %v1318_v35 = vld [vmem:[#allocation2 + $0x122] sm:$0xff]  ;;  %v1424_v14 = vpack.c.bf16 %v1317_v3, %v1316_v29  ;;  %v3644_v22 = vsel %vm3582_vm9, %v3581_v25, 0.0  ;;  %s15877_s19 = scalar_lea.hbm %s15945_s17, %s9450_s18 }
 0x20f   : > { %v9654_v4 = vadd.f32 %v9653_v40, %v9652_v26  ;;  %v9549_v62 = vpop.f32.mrf.mxu1  ;;  %11089 = vmatpush3.msra.mxu1 %v3795_v45  ;;  %v3639_v43 = vadd.f32 %v3638_v36, %v3637_v7  ;;  %v3642_v45 = vsel %vm3582_vm9, %v3580_v10, 0.0  ;;  %v1433_v41 = vpack.c.bf16 %v1319_v8, %v1318_v35  ;;  %v16061_v35 = vld [vmem:[#allocation12_spill] sm:$0xff] }
 0x210   : > { %v9655_v55 = vpop.f32.mrf.mxu0  ;;  %11093 = vmatprep.subr.mxu1 %v12838_v52 }
 0x211   : > { %v13044_v38 = vadd.f32 %v9654_v4, %v9542_v19  ;;  %v9550_v33 = vpop.f32.mrf.mxu1 }
 0x212   : > { %v9551_v39 = vadd.f32 %v9550_v33, %v9549_v62  ;;  %v9656_v12 = vpop.f32.mrf.mxu0  ;;  %v1320_v33 = vld [vmem:[#allocation2 + $0x13a] sm:$0xff] }
 0x213   : > { %v9657_v50 = vadd.f32 %v9656_v12, %v9655_v55  ;;  %v9552_v27 = vpop.f32.mrf.mxu1  ;;  %11017 = vmatmul.mubr.bf16.gmra.mxu1 %v1406_v46  ;;  %v1321_v46 = vld [vmem:[#allocation2 + $0x142] sm:$0xff] }
 0x214   : > { %v9658_v42 = vpop.f32.mrf.mxu0  ;;  %11051 = vmatmul.mubr.msk.bf16.gmra.mxu0 %vm643_vm1, %v12162_v54  ;;  %11020 = vmatprep.mubr.bf16.mxu1 %v1415_v23  ;;  %v3641_v54 = vadd.f32 %v3640_v13, %v3639_v43  ;;  %v1322_v23 = vld [vmem:[#allocation2 + $0x152] sm:$0xff] }
 0x215   : > { %v13050_v19 = vadd.f32 %v9657_v50, %v9545_v48  ;;  %v9553_v58 = vpop.f32.mrf.mxu1  ;;  %11054 = vmatprep.mubr.msk.bf16.mxu0 %vm643_vm1, %v12167_v56  ;;  %v1323_v50 = vld [vmem:[#allocation2 + $0x15a] sm:$0xff] }
 0x216   : > { %v9554_v21 = vadd.f32 %v9553_v58, %v9552_v27  ;;  %v9659_v9 = vpop.f32.mrf.mxu0  ;;  %v3643_v62 = vadd.f32 %v3642_v45, %v3641_v54  ;;  %v1442_v58 = vpack.c.bf16 %v1321_v46, %v1320_v33  ;;  %v1451_v29 = vpack.c.bf16 %v1323_v50, %v1322_v23  ;;  %v1329_v23 = vld [vmem:[#allocation2 + $0x1a2] sm:$0xff] }
 0x217   : > { %v9660_v32 = vadd.f32 %v9659_v9, %v9658_v42  ;;  %v9555_v60 = vpop.f32.mrf.mxu1 }
 0x218   : > { %v9661_v26 = vpop.f32.mrf.mxu0  ;;  %v3645_v27 = vadd.f32 %v3644_v22, %v3643_v62 }
 0x219   : > { %v13056_v48 = vadd.f32 %v9660_v32, %v9548_v15  ;;  %v9556_v59 = vpop.f32.mrf.mxu1 }
 0x21a   : > { %v9557_v56 = vadd.f32 %v9556_v59, %v9555_v60  ;;  %v9662_v40 = vpop.f32.mrf.mxu0  ;;  %v3646_v32 = vrot.slane %v3645_v27, 4  ;;  %v1324_v59 = vld [vmem:[#allocation2 + $0x16a] sm:$0xff] }
 0x21b   : > { %v9663_v34 = vadd.f32 %v9662_v40, %v9661_v26  ;;  %v9558_v4 = vpop.f32.mrf.mxu1  ;;  %11021 = vmatmul.mubr.bf16.gmra.mxu1 %v1424_v14  ;;  %v16062_v26 = vld [vmem:[#allocation13_spill] sm:$0xff]  ;;  %v1325_v14 = vld [vmem:[#allocation2 + $0x172] sm:$0xff] }
 0x21c   : > { %v9664_v5 = vpop.f32.mrf.mxu0  ;;  %11055 = vmatmul.mubr.msk.bf16.gmra.mxu0 %vm643_vm1, %v12191_v1  ;;  %11024 = vmatprep.mubr.bf16.mxu1 %v1433_v41  ;;  %v16060_v1 = vld [vmem:[#allocation19_spill] sm:$0xff]  ;;  %v3647_v41 = vadd.f32 %v3646_v32, %v3645_v27  ;;  %v1460_v22 = vpack.c.bf16 %v1325_v14, %v1324_v59  ;;  %v16065_v14 = vld [vmem:[#allocation16_spill] sm:$0xff] }
 0x21d   : > { %v13062_v7 = vadd.f32 %v9663_v34, %v9551_v39  ;;  %v9559_v15 = vpop.f32.mrf.mxu1  ;;  %11058 = vmatprep.mubr.msk.bf16.mxu0 %vm643_vm1, %v12080_v17  ;;  %v3717_v42 = vrot.slane %v16060_v1, 4 }
 0x21e   : > { %v9560_v55 = vadd.f32 %v9559_v15, %v9558_v4  ;;  %v9665_v36 = vpop.f32.mrf.mxu0  ;;  %v3648_v33 = vrot.slane %v3647_v41, 2 }
 0x21f   : > { %v9666_v24 = vadd.f32 %v9665_v36, %v9664_v5  ;;  %v9561_v12 = vpop.f32.mrf.mxu1  ;;  %v3718_v8 = vadd.f32 %v3717_v42, %v16060_v1 }
 0x220   : > { %v9667_v43 = vpop.f32.mrf.mxu0 }
 0x221   : > { %v13067_v13 = vadd.f32 %v9666_v24, %v9554_v21  ;;  %v9562_v39 = vpop.f32.mrf.mxu1  ;;  %v3719_v4 = vrot.slane %v3718_v8, 2  ;;  %v16063_v24 = vld [vmem:[#allocation14_spill] sm:$0xff] }
 0x222   : > { %v9563_v10 = vadd.f32 %v9562_v39, %v9561_v12  ;;  %v9668_v9 = vpop.f32.mrf.mxu0  ;;  %v1328_v12 = vld [vmem:[#allocation2 + $0x19a] sm:$0xff] }
 0x223   : > { %v9669_v17 = vadd.f32 %v9668_v9, %v9667_v43  ;;  %v9564_v3 = vpop.f32.mrf.mxu1  ;;  %11025 = vmatmul.mubr.bf16.gmra.mxu1 %v1442_v58  ;;  %v3720_v50 = vadd.f32 %v3719_v4, %v3718_v8  ;;  %v16064_v43 = vld [vmem:[#allocation15_spill] sm:$0xff]  ;;  %v1478_v9 = vpack.c.bf16 %v1329_v23, %v1328_v12 }
 0x224   : > { %v9670_v60 = vpop.f32.mrf.mxu0  ;;  %11059 = vmatmul.mubr.msk.bf16.gmra.mxu0 %vm643_vm1, %v16061_v35  ;;  %11028 = vmatprep.mubr.bf16.mxu1 %v1451_v29  ;;  %v3649_v29 = vadd.f32 %v3648_v33, %v3647_v41  ;;  %v16066_v41 = vld [vmem:[#allocation17_spill] sm:$0xff] }
 0x225   : > { %v13072_v54 = vadd.f32 %v9669_v17, %v9557_v56  ;;  %v9565_v21 = vpop.f32.mrf.mxu1  ;;  %11062 = vmatprep.mubr.msk.bf16.mxu0 %vm643_vm1, %v16062_v26  ;;  %v3721_v32 = vrot.slane %v3720_v50, 1 }
 0x226   : > { %v9671_v45 = vpop.f32.mrf.mxu0  ;;  %v9566_v42 = vadd.f32 %v9565_v21, %v9564_v3 }
 0x227   : > { %v9672_v25 = vadd.f32 %v9671_v45, %v9670_v60  ;;  %v9567_v40 = vpop.f32.mrf.mxu1  ;;  %v3650_v45 = vrot.slane %v3649_v29, 1  ;;  %v3722_v3 = vadd.f32 %v3721_v32, %v3720_v50 }
 0x228   : > { %v9673_v34 = vpop.f32.mrf.mxu0 }
 0x229   : > { %v13076_v62 = vadd.f32 %v9672_v25, %v9560_v55  ;;  %v9568_v5 = vpop.f32.mrf.mxu1 }
 0x22a   : > { %v9674_v15 = vpop.f32.mrf.mxu0  ;;  %v9569_v26 = vadd.f32 %v9568_v5, %v9567_v40 }
 0x22b   : > { %v9675_v36 = vadd.f32 %v9674_v15, %v9673_v34  ;;  %v9570_v56 = vpop.f32.mrf.mxu1  ;;  %11029 = vmatmul.mubr.bf16.gmra.mxu1 %v1460_v22  ;;  %v3651_v22 = vadd.f32 %v3650_v45, %v3649_v29 }
 0x22c   : > { %v9676_v46 = vpop.f32.mrf.mxu0  ;;  %11063 = vmatmul.mubr.msk.bf16.gmra.mxu0 %vm643_vm1, %v16063_v24  ;;  %11032 = vmatprep.mubr.bf16.mxu1 %v12957_v63  ;;  %v3794_v24 = vld [vmem:[%s15939_s11] sm:$0xf] }
 0x22d   : > { %v13081_v27 = vadd.f32 %v9675_v36, %v9563_v10  ;;  %v9571_v55 = vpop.f32.mrf.mxu1  ;;  %11066 = vmatprep.mubr.msk.bf16.mxu0 %vm643_vm1, %v16064_v43  ;;  %v3723_v36 = vmul.f32 0.00390625, %v3722_v3 }
 0x22e   : > { %v9677_v1 = vpop.f32.mrf.mxu0  ;;  %v9572_v34 = vadd.f32 %v9571_v55, %v9570_v56  ;;  %v3653_v56 = vmul.f32 0.00390625, %v3651_v22 }
 0x22f   : > { %v9678_v39 = vadd.f32 %v9677_v1, %v9676_v46  ;;  %v9573_v58 = vpop.f32.mrf.mxu1  ;;  %v16067_v1 = vld [vmem:[#allocation18_spill] sm:$0xff] }
 0x230   : > { %v9679_v17 = vpop.f32.mrf.mxu0 }
 0x231   : > { %v13085_v60 = vadd.f32 %v9678_v39, %v9566_v42  ;;  %v9574_v63 = vpop.f32.mrf.mxu1 }
 0x232   : > { %v9680_v35 = vpop.f32.mrf.mxu0  ;;  %v9575_v23 = vadd.f32 %v9574_v63, %v9573_v58 }
 0x233   : > { %v9681_v8 = vadd.f32 %v9680_v35, %v9679_v17  ;;  %v9576_v10 = vpop.f32.mrf.mxu1  ;;  %11033 = vmatmul.mubr.bf16.gmra.mxu1 %v1478_v9 }
 0x234   : > { %v9682_v59 = vpop.f32.mrf.mxu0  ;;  %11067 = vmatmul.mubr.msk.bf16.gmra.mxu0 %vm643_vm1, %v16065_v14  ;;  %11090 = vmatprep.mubr.msk.f32.mxu1 %vm11892_vm10, %v12838_v52 }
 0x235   : > { %v13091_v21 = vadd.f32 %v9681_v8, %v9569_v26  ;;  %v9577_v25 = vpop.f32.mrf.mxu1  ;;  %11070 = vmatprep.mubr.msk.bf16.mxu0 %vm643_vm1, %v16066_v41  ;;  %v13112_v26 = vld [vmem:[#allocation2] sm:$0xff] }
 0x236   : > { %v9683_v40 = vpop.f32.mrf.mxu0  ;;  %v9578_v29 = vadd.f32 %v9577_v25, %v9576_v10 }
 0x237   : > { %v9684_v4 = vadd.f32 %v9683_v40, %v9682_v59  ;;  %v9579_v5 = vpop.f32.mrf.mxu1 }
 0x238   : > { %v9685_v15 = vpop.f32.mrf.mxu0 }
 0x239   : > { %v13095_v33 = vadd.f32 %v9684_v4, %v9572_v34  ;;  %v9580_v46 = vpop.f32.mrf.mxu1 }
 0x23a   : > { %v9686_v12 = vpop.f32.mrf.mxu0  ;;  %v9581_v3 = vadd.f32 %v9580_v46, %v9579_v5 }
 0x23b   : > { %v9687_v50 = vadd.f32 %v9686_v12, %v9685_v15  ;;  %v9710_v43 = vpop.f32.mrf.mxu1  ;;  %11091 = vmatmul.mubr.msk.f32.vlgmr.msra.gmra.mxu1 %vm1008_vm2, %v3723_v36 }
 0x23c   : > { %v9688_v55 = vpop.f32.mrf.mxu0  ;;  %11071 = vmatmul.mubr.msk.bf16.gmra.mxu0 %vm643_vm1, %v16067_v1  ;;  %11094 = vmatpush3.msk.msra.mxu1 %vm3879_vm11, %v3794_v24 }
 0x23d   : > { %v13103_v42 = vadd.f32 %v9687_v50, %v9575_v23  ;;  %v9711_v39 = vpop.f32.mrf.mxu1  ;;  %11095 = vmatprep.mubr.msk.f32.mxu1 %vm11892_vm10, %v12838_v52  ;;  %11098 = vmatprep.subr.mxu1 %v12838_v52 }
 0x23e   : > { %v9689_v9 = vpop.f32.mrf.mxu0  ;;  %v9712_v58 = vadd.f32 %v9711_v39, %v9710_v43  ;;  %11124 = vmatprep.mubr.msk.f32.mxu0 %vm11892_vm10, %v12838_v52 }
 0x23f   : > { %v9690_v17 = vadd.f32 %v9689_v9, %v9688_v55  ;;  %v9713_v32 = vpop.f32.mrf.mxu1  ;;  %11096 = vmatmul.mubr.msk.f32.vlgmr.msra.gmra.mxu1 %vm3582_vm9, %v3653_v56 }
 0x240   : > { %v2412_v63 = vadd.f32 %v9712_v58, %v12906_v61  ;;  %v9691_v35 = vpop.f32.mrf.mxu0  ;;  %11114 = vmatprep.mubr.msk.f32.mxu1 %vm11892_vm10, %v13112_v26 }
 0x241   : > { %v13116_v8 = vadd.f32 %v9690_v17, %v9578_v29  ;;  %v9714_v45 = vpop.f32.mrf.mxu1 }
 0x242   : > { %v9692_v59 = vpop.f32.mrf.mxu0  ;;  %v9715_v14 = vadd.f32 %v9714_v45, %v9713_v32 }
 0x243   : > { %v9693_v52 = vadd.f32 %v9692_v59, %v9691_v35  ;;  %v9716_v10 = vpop.f32.mrf.mxu1 }
 0x244   : > { %v2415_v25 = vadd.f32 %v9715_v14, %v12913_v28  ;;  %v9822_v41 = vpop.f32.mrf.mxu0 }
 0x245   : > { %v13119_v40 = vadd.f32 %v9693_v52, %v9581_v3  ;;  %v9717_v61 = vpop.f32.mrf.mxu1 }
 0x246   : > { %v9718_v34 = vadd.f32 %v9717_v61, %v9716_v10  ;;  %v9823_v4 = vpop.f32.mrf.mxu0 }
 0x247   : > { %v9824_v22 = vadd.f32 %v9823_v4, %v9822_v41  ;;  %v9719_v15 = vpop.f32.mrf.mxu1 }
 0x248   : > { %v2420_v36 = vadd.f32 %v9718_v34, %v12918_v16  ;;  %v9825_v24 = vpop.f32.mrf.mxu0 }
 0x249   : > { %v9720_v12 = vpop.f32.mrf.mxu1  ;;  %v13122_v23 = vadd.f32 %v9824_v22, %v2412_v63 }
 0x24a   : > { %v9721_v50 = vadd.f32 %v9720_v12, %v9719_v15  ;;  %v9826_v5 = vpop.f32.mrf.mxu0 }
 0x24b   : > { %v9827_v46 = vadd.f32 %v9826_v5, %v9825_v24  ;;  %v9722_v43 = vpop.f32.mrf.mxu1 }
 0x24c   : > { %v2423_v28 = vadd.f32 %v9721_v50, %v12925_v18  ;;  %v9828_v56 = vpop.f32.mrf.mxu0 }
 0x24d   : > { %v9723_v55 = vpop.f32.mrf.mxu1  ;;  %v13125_v1 = vadd.f32 %v9827_v46, %v2415_v25 }
 0x24e   : > { %v9724_v39 = vadd.f32 %v9723_v55, %v9722_v43  ;;  %v9829_v9 = vpop.f32.mrf.mxu0 }
 0x24f   : > { %v9830_v58 = vadd.f32 %v9829_v9, %v9828_v56  ;;  %v9725_v29 = vpop.f32.mrf.mxu1 }
 0x250   : > { %v2428_v16 = vadd.f32 %v9724_v39, %v12930_v31  ;;  %v9831_v17 = vpop.f32.mrf.mxu0 }
 0x251   : > { %v9726_v32 = vpop.f32.mrf.mxu1  ;;  %v13128_v63 = vadd.f32 %v9830_v58, %v2420_v36 }
 0x252   : > { %v9727_v35 = vadd.f32 %v9726_v32, %v9725_v29  ;;  %v9832_v45 = vpop.f32.mrf.mxu0 }
 0x253   : > { %v9833_v59 = vadd.f32 %v9832_v45, %v9831_v17  ;;  %v9728_v14 = vpop.f32.mrf.mxu1 }
 0x254   : > { %v2431_v18 = vadd.f32 %v9727_v35, %v12937_v30  ;;  %v9834_v3 = vpop.f32.mrf.mxu0 }
 0x255   : > { %v9729_v52 = vpop.f32.mrf.mxu1  ;;  %v13131_v10 = vadd.f32 %v9833_v59, %v2423_v28 }
 0x256   : > { %v9730_v25 = vadd.f32 %v9729_v52, %v9728_v14  ;;  %v9835_v41 = vpop.f32.mrf.mxu0 }
 0x257   : > { %v9836_v61 = vadd.f32 %v9835_v41, %v9834_v3  ;;  %v9731_v34 = vpop.f32.mrf.mxu1 }
 0x258   : > { %v2436_v31 = vadd.f32 %v9730_v25, %v12942_v20  ;;  %v9837_v4 = vpop.f32.mrf.mxu0 }
 0x259   : > { %v9732_v22 = vpop.f32.mrf.mxu1  ;;  %v13134_v15 = vadd.f32 %v9836_v61, %v2428_v16 }
 0x25a   : > { %v9733_v36 = vadd.f32 %v9732_v22, %v9731_v34  ;;  %v9838_v24 = vpop.f32.mrf.mxu0 }
 0x25b   : > { %v9839_v12 = vadd.f32 %v9838_v24, %v9837_v4  ;;  %v9734_v50 = vpop.f32.mrf.mxu1 }
 0x25c   : > { %v2439_v30 = vadd.f32 %v9733_v36, %v12949_v37  ;;  %v9840_v5 = vpop.f32.mrf.mxu0 }
 0x25d   : > { %v9735_v46 = vpop.f32.mrf.mxu1  ;;  %v13137_v43 = vadd.f32 %v9839_v12, %v2431_v18 }
 0x25e   : > { %v9736_v28 = vadd.f32 %v9735_v46, %v9734_v50  ;;  %v9841_v56 = vpop.f32.mrf.mxu0 }
 0x25f   : > { %v9842_v55 = vadd.f32 %v9841_v56, %v9840_v5  ;;  %v9737_v39 = vpop.f32.mrf.mxu1 }
 0x260   : > { %v2444_v20 = vadd.f32 %v9736_v28, %v12954_v57  ;;  %v9843_v9 = vpop.f32.mrf.mxu0 }
 0x261   : > { %v9738_v58 = vpop.f32.mrf.mxu1  ;;  %v13140_v29 = vadd.f32 %v9842_v55, %v2436_v31 }
 0x262   : > { %v9739_v16 = vadd.f32 %v9738_v58, %v9737_v39  ;;  %v9844_v17 = vpop.f32.mrf.mxu0 }
 0x263   : > { %v9845_v32 = vadd.f32 %v9844_v17, %v9843_v9  ;;  %v9740_v35 = vpop.f32.mrf.mxu1 }
 0x264   : > { %v2447_v37 = vadd.f32 %v9739_v16, %v12963_v47  ;;  %v9846_v45 = vpop.f32.mrf.mxu0 }
 0x265   : > { %v9741_v59 = vpop.f32.mrf.mxu1  ;;  %v13143_v14 = vadd.f32 %v9845_v32, %v2439_v30 }
 0x266   : > { %v9742_v18 = vadd.f32 %v9741_v59, %v9740_v35  ;;  %v9847_v3 = vpop.f32.mrf.mxu0 }
 0x267   : > { %v9848_v52 = vadd.f32 %v9847_v3, %v9846_v45  ;;  %v9743_v25 = vpop.f32.mrf.mxu1 }
 0x268   : > { %v2452_v57 = vadd.f32 %v9742_v18, %v12967_v49  ;;  %v9849_v41 = vpop.f32.mrf.mxu0 }
 0x269   : > { %v9744_v61 = vpop.f32.mrf.mxu1  ;;  %v13146_v34 = vadd.f32 %v9848_v52, %v2444_v20 }
 0x26a   : > { %v9745_v31 = vadd.f32 %v9744_v61, %v9743_v25  ;;  %v9850_v4 = vpop.f32.mrf.mxu0 }
 0x26b   : > { %v9851_v22 = vadd.f32 %v9850_v4, %v9849_v41  ;;  %v9746_v36 = vpop.f32.mrf.mxu1 }
 0x26c   : > { %v2455_v47 = vadd.f32 %v9745_v31, %v12972_v44  ;;  %v9852_v24 = vpop.f32.mrf.mxu0 }
 0x26d   : > { %v9747_v12 = vpop.f32.mrf.mxu1  ;;  %v13149_v50 = vadd.f32 %v9851_v22, %v2447_v37 }
 0x26e   : > { %v9748_v30 = vadd.f32 %v9747_v12, %v9746_v36  ;;  %v9853_v5 = vpop.f32.mrf.mxu0 }
 0x26f   : > { %v9854_v46 = vadd.f32 %v9853_v5, %v9852_v24  ;;  %v9749_v28 = vpop.f32.mrf.mxu1 }
 0x270   : > { %v2460_v49 = vadd.f32 %v9748_v30, %v12978_v51  ;;  %v9855_v56 = vpop.f32.mrf.mxu0 }
 0x271   : > { %v9750_v55 = vpop.f32.mrf.mxu1  ;;  %v13152_v39 = vadd.f32 %v9854_v46, %v2452_v57 }
 0x272   : > { %v9751_v20 = vadd.f32 %v9750_v55, %v9749_v28  ;;  %v9856_v9 = vpop.f32.mrf.mxu0 }
 0x273   : > { %v9857_v58 = vadd.f32 %v9856_v9, %v9855_v56  ;;  %v9752_v16 = vpop.f32.mrf.mxu1 }
 0x274   : > { %v2463_v44 = vadd.f32 %v9751_v20, %v12988_v2  ;;  %v9858_v17 = vpop.f32.mrf.mxu0 }
 0x275   : > { %v9753_v32 = vpop.f32.mrf.mxu1  ;;  %v13155_v35 = vadd.f32 %v9857_v58, %v2455_v47 }
 0x276   : > { %v9754_v37 = vadd.f32 %v9753_v32, %v9752_v16  ;;  %v9859_v45 = vpop.f32.mrf.mxu0 }
 0x277   : > { %v9860_v59 = vadd.f32 %v9859_v45, %v9858_v17  ;;  %v9755_v18 = vpop.f32.mrf.mxu1 }
 0x278   : > { %v2468_v51 = vadd.f32 %v9754_v37, %v12999_v11  ;;  %v9861_v3 = vpop.f32.mrf.mxu0 }
 0x279   : > { %v9756_v52 = vpop.f32.mrf.mxu1  ;;  %v13158_v25 = vadd.f32 %v9860_v59, %v2460_v49 }
 0x27a   : > { %v9757_v57 = vadd.f32 %v9756_v52, %v9755_v18  ;;  %v9862_v41 = vpop.f32.mrf.mxu0 }
 0x27b   : > { %v9863_v61 = vadd.f32 %v9862_v41, %v9861_v3  ;;  %v9758_v31 = vpop.f32.mrf.mxu1 }
 0x27c   : > { %v2471_v2 = vadd.f32 %v9757_v57, %v13012_v0  ;;  %v9864_v4 = vpop.f32.mrf.mxu0 }
 0x27d   : > { %v9759_v22 = vpop.f32.mrf.mxu1  ;;  %v13161_v36 = vadd.f32 %v9863_v61, %v2463_v44 }
 0x27e   : > { %v9760_v47 = vadd.f32 %v9759_v22, %v9758_v31  ;;  %v9865_v24 = vpop.f32.mrf.mxu0 }
 0x27f   : > { %v9866_v12 = vadd.f32 %v9865_v24, %v9864_v4  ;;  %v9761_v30 = vpop.f32.mrf.mxu1 }
 0x280   : > { %v2476_v11 = vadd.f32 %v9760_v47, %v13023_v53  ;;  %v9867_v5 = vpop.f32.mrf.mxu0 }
 0x281   : > { %v9762_v46 = vpop.f32.mrf.mxu1  ;;  %v13164_v28 = vadd.f32 %v9866_v12, %v2468_v51 }
 0x282   : > { %v9763_v49 = vadd.f32 %v9762_v46, %v9761_v30  ;;  %v9868_v56 = vpop.f32.mrf.mxu0 }
 0x283   : > { %v9869_v55 = vadd.f32 %v9868_v56, %v9867_v5  ;;  %v9764_v20 = vpop.f32.mrf.mxu1 }
 0x284   : > { %v2479_v0 = vadd.f32 %v9763_v49, %v13036_v6  ;;  %v9870_v9 = vpop.f32.mrf.mxu0 }
 0x285   : > { %v9765_v58 = vpop.f32.mrf.mxu1  ;;  %v13167_v16 = vadd.f32 %v9869_v55, %v2471_v2 }
 0x286   : > { %v9766_v44 = vadd.f32 %v9765_v58, %v9764_v20  ;;  %v9871_v17 = vpop.f32.mrf.mxu0 }
 0x287   : > { %v9872_v32 = vadd.f32 %v9871_v17, %v9870_v9  ;;  %v9767_v37 = vpop.f32.mrf.mxu1 }
 0x288   : > { %v2484_v53 = vadd.f32 %v9766_v44, %v13044_v38  ;;  %v9873_v45 = vpop.f32.mrf.mxu0 }
 0x289   : > { %v9768_v59 = vpop.f32.mrf.mxu1  ;;  %v13170_v18 = vadd.f32 %v9872_v32, %v2476_v11 }
 0x28a   : > { %v9769_v51 = vadd.f32 %v9768_v59, %v9767_v37  ;;  %v9874_v3 = vpop.f32.mrf.mxu0 }
 0x28b   : > { %v9875_v52 = vadd.f32 %v9874_v3, %v9873_v45  ;;  %v9770_v57 = vpop.f32.mrf.mxu1  ;;  %v3959_v3 = vld [vmem:[%s15941_s13 + $0x30] sm:$0xff] }
 0x28c   : > { %v2487_v6 = vadd.f32 %v9769_v51, %v13050_v19  ;;  %v9876_v41 = vpop.f32.mrf.mxu0 }
 0x28d   : > { %v9771_v61 = vpop.f32.mrf.mxu1  ;;  %v13173_v31 = vadd.f32 %v9875_v52, %v2479_v0 }
 0x28e   : > { %v9772_v2 = vadd.f32 %v9771_v61, %v9770_v57  ;;  %v9877_v4 = vpop.f32.mrf.mxu0 }
 0x28f   : > { %v9878_v22 = vadd.f32 %v9877_v4, %v9876_v41  ;;  %v9773_v47 = vpop.f32.mrf.mxu1  ;;  %v3958_v41 = vld [vmem:[%s15941_s13 + $0x28] sm:$0xff] }
 0x290   : > { %v2492_v38 = vadd.f32 %v9772_v2, %v13056_v48  ;;  %v9879_v24 = vpop.f32.mrf.mxu0 }
 0x291   : > { %v9774_v12 = vpop.f32.mrf.mxu1  ;;  %v13176_v30 = vadd.f32 %v9878_v22, %v2484_v53 }
 0x292   : > { %v9775_v11 = vadd.f32 %v9774_v12, %v9773_v47  ;;  %v9880_v5 = vpop.f32.mrf.mxu0 }
 0x293   : > { %v9881_v46 = vadd.f32 %v9880_v5, %v9879_v24  ;;  %v9776_v49 = vpop.f32.mrf.mxu1 }
 0x294   : > { %v2495_v19 = vadd.f32 %v9775_v11, %v13062_v7  ;;  %v9882_v56 = vpop.f32.mrf.mxu0  ;;  %v3960_v7 = vld [vmem:[%s15941_s13 + $0x38] sm:$0xff] }
 0x295   : > { %v9777_v55 = vpop.f32.mrf.mxu1  ;;  %v13179_v20 = vadd.f32 %v9881_v46, %v2487_v6  ;;  %11099 = vmatpush3.msra.mxu1 %v3960_v7  ;;  %v3956_v11 = vld [vmem:[%s15941_s13 + $0x18] sm:$0xff] }
 0x296   : > { %v9778_v0 = vadd.f32 %v9777_v55, %v9776_v49  ;;  %v9883_v9 = vpop.f32.mrf.mxu0  ;;  %11100 = vmatprep.subr.mxu1 %v13112_v26 }
 0x297   : > { %v9884_v58 = vadd.f32 %v9883_v9, %v9882_v56  ;;  %v9779_v44 = vpop.f32.mrf.mxu1  ;;  %11101 = vmatpush3.msra.mxu1 %v3959_v3 }
 0x298   : > { %v2500_v48 = vadd.f32 %v9778_v0, %v13067_v13  ;;  %v9885_v17 = vpop.f32.mrf.mxu0  ;;  %11102 = vmatprep.subr.mxu1 %v13112_v26 }
 0x299   : > { %v9780_v32 = vpop.f32.mrf.mxu1  ;;  %v13182_v37 = vadd.f32 %v9884_v58, %v2492_v38  ;;  %11103 = vmatpush3.msra.mxu1 %v3958_v41  ;;  %v3954_v58 = vld [vmem:[%s15941_s13 + $0x8] sm:$0xff] }
 0x29a   : > { %v9781_v53 = vadd.f32 %v9780_v32, %v9779_v44  ;;  %v9886_v45 = vpop.f32.mrf.mxu0  ;;  %11104 = vmatprep.subr.mxu1 %v13112_v26 }
 0x29b   : > { %v9887_v59 = vadd.f32 %v9886_v45, %v9885_v17  ;;  %v9782_v51 = vpop.f32.mrf.mxu1 }
 0x29c   : > { %v2503_v52 = vadd.f32 %v9781_v53, %v13072_v54  ;;  %v9888_v57 = vpop.f32.mrf.mxu0  ;;  %v3957_v54 = vld [vmem:[%s15941_s13 + $0x20] sm:$0xff] }
 0x29d   : > { %v9783_v13 = vpop.f32.mrf.mxu1  ;;  %v13191_v6 = vadd.f32 %v9887_v59, %v2495_v19  ;;  %11105 = vmatpush3.msra.mxu1 %v3957_v54 }
 0x29e   : > { %v9784_v61 = vadd.f32 %v9783_v13, %v9782_v51  ;;  %v9889_v2 = vpop.f32.mrf.mxu0  ;;  %11106 = vmatprep.subr.mxu1 %v13112_v26 }
 0x29f   : > { %v9890_v4 = vadd.f32 %v9889_v2, %v9888_v57  ;;  %v9785_v22 = vpop.f32.mrf.mxu1  ;;  %11107 = vmatpush3.msra.mxu1 %v3956_v11 }
 0x2a0   : > { %v2508_v47 = vadd.f32 %v9784_v61, %v13076_v62  ;;  %v9891_v38 = vpop.f32.mrf.mxu0  ;;  %v3955_v62 = vld [vmem:[%s15941_s13 + $0x10] sm:$0xff]  ;;  %11108 = vmatprep.subr.mxu1 %v13112_v26 }
 0x2a1   : > { %v9786_v24 = vpop.f32.mrf.mxu1  ;;  %v13202_v12 = vadd.f32 %v9890_v4, %v2500_v48  ;;  %11109 = vmatpush3.msra.mxu1 %v3955_v62 }
 0x2a2   : > { %v9787_v5 = vadd.f32 %v9786_v24, %v9785_v22  ;;  %v9892_v46 = vpop.f32.mrf.mxu0  ;;  %11110 = vmatprep.subr.mxu1 %v13112_v26 }
 0x2a3   : > { %v9893_v49 = vadd.f32 %v9892_v46, %v9891_v38  ;;  %v9788_v19 = vpop.f32.mrf.mxu1  ;;  %11111 = vmatpush3.msra.mxu1 %v3954_v58 }
 0x2a4   : > { %v2511_v56 = vadd.f32 %v9787_v5, %v13081_v27  ;;  %v9894_v55 = vpop.f32.mrf.mxu0  ;;  %v3953_v27 = vld [vmem:[%s15941_s13] sm:$0xff]  ;;  %11112 = vmatprep.subr.mxu1 %v13112_v26 }
 0x2a5   : > { %v9789_v0 = vpop.f32.mrf.mxu1  ;;  %v13213_v9 = vadd.f32 %v9893_v49, %v2503_v52  ;;  %11113 = vmatpush3.msra.mxu1 %v3953_v27 }
 0x2a6   : > { %v9790_v44 = vadd.f32 %v9789_v0, %v9788_v19  ;;  %v9895_v48 = vpop.f32.mrf.mxu0  ;;  %11117 = vmatprep.subr.mxu1 %v13112_v26 }
 0x2a7   : > { %v9896_v17 = vadd.f32 %v9895_v48, %v9894_v55  ;;  %v9791_v32 = vpop.f32.mrf.mxu1 }
 0x2a8   : > { %v2516_v53 = vadd.f32 %v9790_v44, %v13085_v60  ;;  %v9897_v45 = vpop.f32.mrf.mxu0 }
 0x2a9   : > { %v9792_v59 = vpop.f32.mrf.mxu1  ;;  %v13224_v51 = vadd.f32 %v9896_v17, %v2508_v47 }
 0x2aa   : > { %v9793_v7 = vadd.f32 %v9792_v59, %v9791_v32  ;;  %v9898_v3 = vpop.f32.mrf.mxu0 }
 0x2ab   : > { %v9899_v52 = vadd.f32 %v9898_v3, %v9897_v45  ;;  %v9794_v57 = vpop.f32.mrf.mxu1 }
 0x2ac   : > { %v2519_v13 = vadd.f32 %v9793_v7, %v13091_v21  ;;  %v9900_v41 = vpop.f32.mrf.mxu0 }
 0x2ad   : > { %v9795_v61 = vpop.f32.mrf.mxu1  ;;  %v13229_v2 = vadd.f32 %v9899_v52, %v2511_v56 }
 0x2ae   : > { %v9796_v60 = vadd.f32 %v9795_v61, %v9794_v57  ;;  %v9901_v4 = vpop.f32.mrf.mxu0 }
 0x2af   : > { %v9902_v22 = vadd.f32 %v9901_v4, %v9900_v41  ;;  %v9797_v54 = vpop.f32.mrf.mxu1 }
 0x2b0   : > { %v2524_v47 = vadd.f32 %v9796_v60, %v13095_v33  ;;  %v9903_v38 = vpop.f32.mrf.mxu0 }
 0x2b1   : > { %v9798_v24 = vpop.f32.mrf.mxu1  ;;  %v13232_v11 = vadd.f32 %v9902_v22, %v2516_v53 }
 0x2b2   : > { %v9799_v5 = vadd.f32 %v9798_v24, %v9797_v54  ;;  %v9904_v46 = vpop.f32.mrf.mxu0 }
 0x2b3   : > { %v9905_v49 = vadd.f32 %v9904_v46, %v9903_v38  ;;  %v9800_v26 = vpop.f32.mrf.mxu1 }
 0x2b4   : > { %v2527_v21 = vadd.f32 %v9799_v5, %v13103_v42  ;;  %v9906_v19 = vpop.f32.mrf.mxu0 }
 0x2b5   : > { %v9801_v62 = vpop.f32.mrf.mxu1  ;;  %v13235_v56 = vadd.f32 %v9905_v49, %v2519_v13 }
 0x2b6   : > { %v9802_v55 = vadd.f32 %v9801_v62, %v9800_v26  ;;  %v9907_v0 = vpop.f32.mrf.mxu0 }
 0x2b7   : > { %v9908_v58 = vadd.f32 %v9907_v0, %v9906_v19  ;;  %v9803_v44 = vpop.f32.mrf.mxu1 }
 0x2b8   : > { %v13238_v33 = vadd.f32 %v9802_v55, %v13116_v8  ;;  %v9909_v48 = vpop.f32.mrf.mxu0 }
 0x2b9   : > { %v9804_v17 = vpop.f32.mrf.mxu1  ;;  %v13240_v32 = vadd.f32 %v9908_v58, %v2524_v47 }
 0x2ba   : > { %v9805_v27 = vadd.f32 %v9804_v17, %v9803_v44  ;;  %v9910_v53 = vpop.f32.mrf.mxu0 }
 0x2bb   : > { %v9911_v45 = vadd.f32 %v9910_v53, %v9909_v48  ;;  %v11006_v59 = vpop.f32.mrf.mxu1 }
 0x2bc   : > { %v13243_v42 = vadd.f32 %v9805_v27, %v13119_v40  ;;  %v9912_v7 = vpop.f32.mrf.mxu0  ;;  %v2742_v60 = vadd.f32 %v11006_v59, %v13128_v63  ;;  %v13255_v40 = vld [vmem:[%s15934_s6] ss:$0 sm:$0xff] }
 0x2bd   : > { %v2733_v3 = vpop.f32.mrf.mxu1  ;;  %v13245_v52 = vadd.f32 %v9911_v45, %v2527_v21 }
 0x2be   : > { %v9913_v57 = vpop.f32.mrf.mxu0  ;;  %v2734_v54 = vadd.f32 %v2733_v3, %v13122_v23 }
 0x2bf   : > { %v11007_v13 = vpop.f32.mrf.mxu1 }
 0x2c0   : > { %v13247_v41 = vpop.f32.mrf.mxu0  ;;  %v2745_v5 = vadd.f32 %v11007_v13, %v13131_v10 }
 0x2c1   : > { %v2736_v8 = vpop.f32.mrf.mxu1 }
 0x2c2   : > { %v13249_v61 = vpop.f32.mrf.mxu0  ;;  %v2737_v0 = vadd.f32 %v2736_v8, %v13125_v1 }
 0x2c3   : > { %v11010_v4 = vpop.f32.mrf.mxu1 }
 0x2c4   : > { %v11044_v22 = vpop.f32.mrf.mxu0  ;;  %v2758_v23 = vadd.f32 %v11010_v4, %v13140_v29 }
 0x2c5   : > { %v2921_v47 = vadd.f32 %v11044_v22, %v2742_v60  ;;  %v2749_v38 = vpop.f32.mrf.mxu1 }
 0x2c6   : > { %v2912_v24 = vpop.f32.mrf.mxu0  ;;  %v2750_v27 = vadd.f32 %v2749_v38, %v13134_v15  ;;  %v9914_v15 = vadd.f32 %v9913_v57, %v9912_v7 }
 0x2c7   : > { %v3048_v46 = vadd.f32 %v13255_v40, %v2921_v47  ;;  %v2913_v49 = vadd.f32 %v2912_v24, %v2734_v54  ;;  %v11011_v26 = vpop.f32.mrf.mxu1 }
 0x2c8   : > { %v11045_v21 = vpop.f32.mrf.mxu0  ;;  %v2761_v60 = vadd.f32 %v11011_v26, %v13143_v14 }
 0x2c9   : > { %vm3080_vm12 = vcmp.ge.f32.partialorder %v3048_v46, 0.0  ;;  %v3112_v63 = vmul.f32 0.01, %v3048_v46  ;;  %v3046_v19 = vadd.f32 %v13255_v40, %v2913_v49  ;;  %v2924_v62 = vadd.f32 %v11045_v21, %v2745_v5  ;;  %v2752_v55 = vpop.f32.mrf.mxu1 }
 0x2ca   : > { %v2915_v58 = vpop.f32.mrf.mxu0  ;;  %v2753_v14 = vadd.f32 %v2752_v55, %v13137_v43  ;;  %v13280_v43 = vadd.f32 %v9914_v15, %v13238_v33 }
 0x2cb   : > { %v3144_v44 = vsel %vm3080_vm12, %v3048_v46, %v3112_v63  ;;  %vm3078_vm13 = vcmp.ge.f32.partialorder %v3046_v19, 0.0  ;;  %v3110_v48 = vmul.f32 0.01, %v3046_v19  ;;  %v3049_v10 = vadd.f32 %v13255_v40, %v2924_v62  ;;  %v11014_v17 = vpop.f32.mrf.mxu1 }
 0x2cc   : > { %3231 = vst.msk [vmem:[#allocation3 + $0x31] sm:$0xff] %vm1008_vm2, %v3144_v44  ;;  %v2916_v53 = vadd.f32 %v2915_v58, %v2737_v0  ;;  %v11048_v45 = vpop.f32.mrf.mxu0 }
 0x2cd   : > { %v3142_v59 = vsel %vm3078_vm13, %v3046_v19, %v3110_v48  ;;  %vm3081_vm14 = vcmp.ge.f32.partialorder %v3049_v10, 0.0  ;;  %v3113_v3 = vmul.f32 0.01, %v3049_v10  ;;  %v2937_v13 = vadd.f32 %v11048_v45, %v2758_v23  ;;  %v2765_v1 = vpop.f32.mrf.mxu1 }
 0x2ce   : > { %3229 = vst.msk [vmem:[#allocation3 + $0x19] sm:$0xff] %vm1008_vm2, %v3142_v59  ;;  %v3047_v29 = vadd.f32 %v13255_v40, %v2916_v53  ;;  %v2928_v8 = vpop.f32.mrf.mxu0  ;;  %v3724_v63 = vsel %vm1008_vm2, %v3142_v59, 0.0  ;;  %v2774_v19 = vadd.f32 %v11014_v17, %v13152_v39  ;;  %v3727_v39 = vsel %vm1008_vm2, %v3144_v44, 0.0 }
 0x2cf   : > { %v3145_v4 = vsel %vm3081_vm14, %v3049_v10, %v3113_v3  ;;  %v3052_v22 = vadd.f32 %v13255_v40, %v2937_v13  ;;  %v2929_v54 = vadd.f32 %v2928_v8, %v2750_v27  ;;  %v11015_v47 = vpop.f32.mrf.mxu1  ;;  %v2766_v55 = vadd.f32 %v2765_v1, %v13146_v34 }
 0x2d0   : > { %3232 = vst.msk [vmem:[#allocation3 + $0x39] sm:$0xff] %vm1008_vm2, %v3145_v4  ;;  %vm3079_vm15 = vcmp.ge.f32.partialorder %v3047_v29, 0.0  ;;  %v3111_v38 = vmul.f32 0.01, %v3047_v29  ;;  %v11049_v24 = vpop.f32.mrf.mxu0  ;;  %v9917_v59 = vadd.f32 %v13249_v61, %v13247_v41  ;;  %v3729_v8 = vsel %vm1008_vm2, %v3145_v4, 0.0 }
 0x2d1   : > { %vm3084_vm3 = vcmp.ge.f32.partialorder %v3052_v22, 0.0  ;;  %v3116_v5 = vmul.f32 0.01, %v3052_v22  ;;  %v3050_v46 = vadd.f32 %v13255_v40, %v2929_v54  ;;  %v2940_v49 = vadd.f32 %v11049_v24, %v2761_v60  ;;  %v2768_v21 = vpop.f32.mrf.mxu1 }
 0x2d2   : > { %v3143_v26 = vsel %vm3079_vm15, %v3047_v29, %v3111_v38  ;;  %v2931_v62 = vpop.f32.mrf.mxu0  ;;  %v2769_v41 = vadd.f32 %v2768_v21, %v13149_v50  ;;  %v13297_v21 = vadd.f32 %v9917_v59, %v13243_v42 }
 0x2d3   : > { %3230 = vst.msk [vmem:[#allocation3 + $0x21] sm:$0xff] %vm1008_vm2, %v3143_v26  ;;  %v3725_v7 = vsel %vm1008_vm2, %v3143_v26, 0.0  ;;  %v3148_v57 = vsel %vm3084_vm3, %v3052_v22, %v3116_v5  ;;  %vm3082_vm4 = vcmp.ge.f32.partialorder %v3050_v46, 0.0  ;;  %v3114_v0 = vmul.f32 0.01, %v3050_v46  ;;  %v11018_v23 = vpop.f32.mrf.mxu1 }
 0x2d4   : > { %v3726_v58 = vadd.f32 %v3725_v7, %v3724_v63  ;;  %3235 = vst.msk [vmem:[#allocation3 + $0x61] sm:$0xff] %vm1008_vm2, %v3148_v57  ;;  %v3053_v48 = vadd.f32 %v13255_v40, %v2940_v49  ;;  %v2932_v10 = vadd.f32 %v2931_v62, %v2753_v14  ;;  %v11052_v27 = vpop.f32.mrf.mxu0  ;;  %v2777_v22 = vadd.f32 %v11015_v47, %v13155_v35 }
 0x2d5   : > { %v3146_v17 = vsel %vm3082_vm4, %v3050_v46, %v3114_v0  ;;  %v2953_v53 = vadd.f32 %v11052_v27, %v2774_v19  ;;  %v2781_v45 = vpop.f32.mrf.mxu1  ;;  %v2790_v35 = vadd.f32 %v11018_v23, %v13164_v28  ;;  %v3735_v0 = vsel %vm1008_vm2, %v3148_v57, 0.0 }
 0x2d6   : > { %v3728_v3 = vadd.f32 %v3727_v39, %v3726_v58  ;;  %3233 = vst.msk [vmem:[#allocation3 + $0x49] sm:$0xff] %vm1008_vm2, %v3146_v17  ;;  %vm3085_vm5 = vcmp.ge.f32.partialorder %v3053_v48, 0.0  ;;  %v3117_v13 = vmul.f32 0.01, %v3053_v48  ;;  %v2944_v29 = vpop.f32.mrf.mxu0  ;;  %v3051_v33 = vadd.f32 %v13255_v40, %v2932_v10 }
 0x2d7   : > { %v3056_v44 = vadd.f32 %v13255_v40, %v2953_v53  ;;  %v2945_v60 = vadd.f32 %v2944_v29, %v2766_v55  ;;  %v11019_v34 = vpop.f32.mrf.mxu1  ;;  %v3731_v15 = vsel %vm1008_vm2, %v3146_v17, 0.0  ;;  %v2782_v42 = vadd.f32 %v2781_v45, %v13158_v25 }
 0x2d8   : > { %v3730_v1 = vadd.f32 %v3729_v8, %v3728_v3  ;;  %v3149_v54 = vsel %vm3085_vm5, %v3053_v48, %v3117_v13  ;;  %v11053_v61 = vpop.f32.mrf.mxu0  ;;  %vm3083_vm6 = vcmp.ge.f32.partialorder %v3051_v33, 0.0  ;;  %v3115_v38 = vmul.f32 0.01, %v3051_v33 }
 0x2d9   : > { %3236 = vst.msk [vmem:[#allocation3 + $0x69] sm:$0xff] %vm1008_vm2, %v3149_v54  ;;  %vm3088_vm7 = vcmp.ge.f32.partialorder %v3056_v44, 0.0  ;;  %v2784_v4 = vpop.f32.mrf.mxu1  ;;  %v3120_v5 = vmul.f32 0.01, %v3056_v44  ;;  %v3054_v46 = vadd.f32 %v13255_v40, %v2945_v60  ;;  %v2956_v49 = vadd.f32 %v11053_v61, %v2777_v22 }
 0x2da   : > { %v3732_v24 = vadd.f32 %v3731_v15, %v3730_v1  ;;  %v2947_v63 = vpop.f32.mrf.mxu0  ;;  %v3147_v14 = vsel %vm3083_vm6, %v3051_v33, %v3115_v38  ;;  %v2793_v27 = vadd.f32 %v11019_v34, %v13167_v16  ;;  %v3737_v17 = vsel %vm1008_vm2, %v3149_v54, 0.0 }
 0x2db   : > { %v2948_v47 = vadd.f32 %v2947_v63, %v2769_v41  ;;  %v11022_v50 = vpop.f32.mrf.mxu1  ;;  %3234 = vst.msk [vmem:[#allocation3 + $0x51] sm:$0xff] %vm1008_vm2, %v3147_v14  ;;  %v3733_v26 = vsel %vm1008_vm2, %v3147_v14, 0.0  ;;  %v3152_v19 = vsel %vm3088_vm7, %v3056_v44, %v3120_v5  ;;  %vm3086_vm8 = vcmp.ge.f32.partialorder %v3054_v46, 0.0 }
 0x2dc   : > { %v3118_v62 = vmul.f32 0.01, %v3054_v46  ;;  %v11056_v7 = vpop.f32.mrf.mxu0  ;;  %v3734_v58 = vadd.f32 %v3733_v26, %v3732_v24  ;;  %3239 = vst.msk [vmem:[#allocation3 + $0x91] sm:$0xff] %vm1008_vm2, %v3152_v19  ;;  %v3057_v28 = vadd.f32 %v13255_v40, %v2956_v49  ;;  %v2785_v16 = vadd.f32 %v2784_v4, %v13161_v36 }
 0x2dd   : > { %v3055_v23 = vadd.f32 %v13255_v40, %v2948_v47  ;;  %v2797_v48 = vpop.f32.mrf.mxu1  ;;  %v2969_v39 = vadd.f32 %v11056_v7, %v2790_v35  ;;  %v3743_v38 = vsel %vm1008_vm2, %v3152_v19, 0.0  ;;  %v2806_v4 = vadd.f32 %v11022_v50, %v13176_v30 }
 0x2de   : > { %v3150_v10 = vsel %vm3086_vm8, %v3054_v46, %v3118_v62  ;;  %v2960_v55 = vpop.f32.mrf.mxu0  ;;  %v3736_v53 = vadd.f32 %v3735_v0, %v3734_v58  ;;  %vm3089_vm9 = vcmp.ge.f32.partialorder %v3057_v28, 0.0  ;;  %v3121_v57 = vmul.f32 0.01, %v3057_v28 }
 0x2df   : > { %3237 = vst.msk [vmem:[#allocation3 + $0x79] sm:$0xff] %vm1008_vm2, %v3150_v10  ;;  %v11023_v59 = vpop.f32.mrf.mxu1  ;;  %vm3087_vm11 = vcmp.ge.f32.partialorder %v3055_v23, 0.0  ;;  %v3119_v3 = vmul.f32 0.01, %v3055_v23  ;;  %v3060_v13 = vadd.f32 %v13255_v40, %v2969_v39  ;;  %v2961_v29 = vadd.f32 %v2960_v55, %v2782_v42 }
 0x2e0   : > { %v11057_v8 = vpop.f32.mrf.mxu0  ;;  %v3738_v25 = vadd.f32 %v3737_v17, %v3736_v53  ;;  %v3153_v45 = vsel %vm3089_vm9, %v3057_v28, %v3121_v57  ;;  %v3739_v60 = vsel %vm1008_vm2, %v3150_v10, 0.0  ;;  %v2798_v63 = vadd.f32 %v2797_v48, %v13170_v18 }
 0x2e1   : > { %v2972_v33 = vadd.f32 %v11057_v8, %v2793_v27  ;;  %v2800_v44 = vpop.f32.mrf.mxu1  ;;  %3240 = vst.msk [vmem:[#allocation3 + $0x99] sm:$0xff] %vm1008_vm2, %v3153_v45  ;;  %v3151_v34 = vsel %vm3087_vm11, %v3055_v23, %v3119_v3  ;;  %vm3092_vm12 = vcmp.ge.f32.partialorder %v3060_v13, 0.0  ;;  %v3124_v1 = vmul.f32 0.01, %v3060_v13 }
 0x2e2   : > { %v2963_v22 = vpop.f32.mrf.mxu0  ;;  %v3740_v54 = vadd.f32 %v3739_v60, %v3738_v25  ;;  %3238 = vst.msk [vmem:[#allocation3 + $0x81] sm:$0xff] %vm1008_vm2, %v3151_v34  ;;  %v3741_v41 = vsel %vm1008_vm2, %v3151_v34, 0.0  ;;  %v3058_v61 = vadd.f32 %v13255_v40, %v2961_v29  ;;  %v2809_v30 = vadd.f32 %v11023_v59, %v13179_v20 }
 0x2e3   : > { %v3061_v15 = vadd.f32 %v13255_v40, %v2972_v33  ;;  %v11026_v36 = vpop.f32.mrf.mxu1  ;;  %v3156_v24 = vsel %vm3092_vm12, %v3060_v13, %v3124_v1  ;;  %v2964_v5 = vadd.f32 %v2963_v22, %v2785_v16  ;;  %v3745_v28 = vsel %vm1008_vm2, %v3153_v45, 0.0 }
 0x2e4   : > { %v11060_v46 = vpop.f32.mrf.mxu0  ;;  %v3742_v49 = vadd.f32 %v3741_v41, %v3740_v54  ;;  %3243 = vst.msk [vmem:[#allocation3 + $0xc1] sm:$0xff] %vm1008_vm2, %v3156_v24  ;;  %vm3090_vm13 = vcmp.ge.f32.partialorder %v3058_v61, 0.0  ;;  %v3122_v14 = vmul.f32 0.01, %v3058_v61  ;;  %v2801_v10 = vadd.f32 %v2800_v44, %v13173_v31 }
 0x2e5   : > { %v2813_v35 = vpop.f32.mrf.mxu1  ;;  %vm3093_vm14 = vcmp.ge.f32.partialorder %v3061_v15, 0.0  ;;  %v3125_v47 = vmul.f32 0.01, %v3061_v15  ;;  %v3059_v26 = vadd.f32 %v13255_v40, %v2964_v5  ;;  %v2985_v62 = vadd.f32 %v11060_v46, %v2806_v4 }
 0x2e6   : > { %v2976_v7 = vpop.f32.mrf.mxu0  ;;  %v3744_v19 = vadd.f32 %v3743_v38, %v3742_v49  ;;  %v3154_v0 = vsel %vm3090_vm13, %v3058_v61, %v3122_v14  ;;  %v2822_v53 = vadd.f32 %v11026_v36, %v13202_v12  ;;  %v3751_v33 = vsel %vm1008_vm2, %v3156_v24, 0.0 }
 0x2e7   : > { %v2977_v50 = vadd.f32 %v2976_v7, %v2798_v63  ;;  %v11027_v58 = vpop.f32.mrf.mxu1  ;;  %3241 = vst.msk [vmem:[#allocation3 + $0xa9] sm:$0xff] %vm1008_vm2, %v3154_v0  ;;  %v3157_v18 = vsel %vm3093_vm14, %v3061_v15, %v3125_v47  ;;  %vm3091_vm15 = vcmp.ge.f32.partialorder %v3059_v26, 0.0  ;;  %v3123_v23 = vmul.f32 0.01, %v3059_v26 }
 0x2e8   : > { %v11061_v48 = vpop.f32.mrf.mxu0  ;;  %v3746_v42 = vadd.f32 %v3745_v28, %v3744_v19  ;;  %3244 = vst.msk [vmem:[#allocation3 + $0xc9] sm:$0xff] %vm1008_vm2, %v3157_v18  ;;  %v3064_v27 = vadd.f32 %v13255_v40, %v2985_v62  ;;  %v3747_v55 = vsel %vm1008_vm2, %v3154_v0, 0.0  ;;  %v2814_v1 = vadd.f32 %v2813_v35, %v13182_v37 }
 0x2e9   : > { %v3062_v39 = vadd.f32 %v13255_v40, %v2977_v50  ;;  %v2816_v20 = vpop.f32.mrf.mxu1  ;;  %v3155_v17 = vsel %vm3091_vm15, %v3059_v26, %v3123_v23  ;;  %v2988_v57 = vadd.f32 %v11061_v48, %v2809_v30  ;;  %v3753_v61 = vsel %vm1008_vm2, %v3157_v18, 0.0 }
 0x2ea   : > { %v2979_v59 = vpop.f32.mrf.mxu0  ;;  %v3748_v3 = vadd.f32 %v3747_v55, %v3746_v42  ;;  %3242 = vst.msk [vmem:[#allocation3 + $0xb1] sm:$0xff] %vm1008_vm2, %v3155_v17  ;;  %v3749_v13 = vsel %vm1008_vm2, %v3155_v17, 0.0  ;;  %vm3096_vm3 = vcmp.ge.f32.partialorder %v3064_v27, 0.0  ;;  %v3128_v29 = vmul.f32 0.01, %v3064_v27 }
 0x2eb   : > { %v11030_v31 = vpop.f32.mrf.mxu1  ;;  %vm3094_vm4 = vcmp.ge.f32.partialorder %v3062_v39, 0.0  ;;  %v3126_v8 = vmul.f32 0.01, %v3062_v39  ;;  %v3065_v25 = vadd.f32 %v13255_v40, %v2988_v57  ;;  %v2980_v45 = vadd.f32 %v2979_v59, %v2801_v10 }
 0x2ec   : > { %v11064_v16 = vpop.f32.mrf.mxu0  ;;  %v3750_v44 = vadd.f32 %v3749_v13, %v3748_v3  ;;  %v3160_v12 = vsel %vm3096_vm3, %v3064_v27, %v3128_v29  ;;  %v2825_v24 = vadd.f32 %v11027_v58, %v13213_v9  ;;  %v2817_v46 = vadd.f32 %v2816_v20, %v13191_v6 }
 0x2ed   : > { %v3001_v60 = vadd.f32 %v11064_v16, %v2822_v53  ;;  %v2829_v34 = vpop.f32.mrf.mxu1  ;;  %3247 = vst.msk [vmem:[#allocation3 + $0xf1] sm:$0xff] %vm1008_vm2, %v3160_v12  ;;  %v3158_v22 = vsel %vm3094_vm4, %v3062_v39, %v3126_v8  ;;  %vm3097_vm5 = vcmp.ge.f32.partialorder %v3065_v25, 0.0  ;;  %v3129_v54 = vmul.f32 0.01, %v3065_v25 }
 0x2ee   : > { %v2992_v41 = vpop.f32.mrf.mxu0  ;;  %v3752_v15 = vadd.f32 %v3751_v33, %v3750_v44  ;;  %3245 = vst.msk [vmem:[#allocation3 + $0xd9] sm:$0xff] %vm1008_vm2, %v3158_v22  ;;  %v3063_v36 = vadd.f32 %v13255_v40, %v2980_v45  ;;  %v3755_v14 = vsel %vm1008_vm2, %v3158_v22, 0.0  ;;  %v2838_v6 = vadd.f32 %v11030_v31, %v13232_v11 }
 0x2ef   : > { %v3068_v38 = vadd.f32 %v13255_v40, %v3001_v60  ;;  %v11031_v4 = vpop.f32.mrf.mxu1  ;;  %v3161_v5 = vsel %vm3097_vm5, %v3065_v25, %v3129_v54  ;;  %v2993_v37 = vadd.f32 %v2992_v41, %v2814_v1  ;;  %v3759_v48 = vsel %vm1008_vm2, %v3160_v12, 0.0 }
 0x2f0   : > { %v11065_v49 = vpop.f32.mrf.mxu0  ;;  %v3754_v63 = vadd.f32 %v3753_v61, %v3752_v15  ;;  %3248 = vst.msk [vmem:[#allocation3 + $0xf9] sm:$0xff] %vm1008_vm2, %v3161_v5  ;;  %vm3095_vm6 = vcmp.ge.f32.partialorder %v3063_v36, 0.0  ;;  %v3127_v35 = vmul.f32 0.01, %v3063_v36  ;;  %v2830_v39 = vadd.f32 %v2829_v34, %v13224_v51 }
 0x2f1   : > { %v2832_v47 = vpop.f32.mrf.mxu1  ;;  %vm3100_vm7 = vcmp.ge.f32.partialorder %v3068_v38, 0.0  ;;  %v3132_v26 = vmul.f32 0.01, %v3068_v38  ;;  %v3066_v62 = vadd.f32 %v13255_v40, %v2993_v37  ;;  %v3004_v7 = vadd.f32 %v11065_v49, %v2825_v24 }
 0x2f2   : > { %v2995_v19 = vpop.f32.mrf.mxu0  ;;  %v3756_v9 = vadd.f32 %v3755_v14, %v3754_v63  ;;  %v3159_v0 = vsel %vm3095_vm6, %v3063_v36, %v3127_v35  ;;  %v2841_v55 = vadd.f32 %v11031_v4, %v13235_v56  ;;  %v3761_v57 = vsel %vm1008_vm2, %v3161_v5, 0.0 }
 0x2f3   : > { %v2996_v30 = vadd.f32 %v2995_v19, %v2817_v46  ;;  %v11034_v50 = vpop.f32.mrf.mxu1  ;;  %3246 = vst.msk [vmem:[#allocation3 + $0xe1] sm:$0xff] %vm1008_vm2, %v3159_v0  ;;  %v3757_v58 = vsel %vm1008_vm2, %v3159_v0, 0.0  ;;  %v3164_v28 = vsel %vm3100_vm7, %v3068_v38, %v3132_v26  ;;  %vm3098_vm8 = vcmp.ge.f32.partialorder %v3066_v62, 0.0 }
 0x2f4   : > { %v3130_v18 = vmul.f32 0.01, %v3066_v62  ;;  %v11068_v23 = vpop.f32.mrf.mxu0  ;;  %v3758_v42 = vadd.f32 %v3757_v58, %v3756_v9  ;;  %3251 = vst.msk [vmem:[#allocation3 + $0x121] sm:$0xff] %vm1008_vm2, %v3164_v28  ;;  %v3069_v10 = vadd.f32 %v13255_v40, %v3004_v7  ;;  %v2833_v56 = vadd.f32 %v2832_v47, %v13229_v2 }
 0x2f5   : > { %v3067_v27 = vadd.f32 %v13255_v40, %v2996_v30  ;;  %v2845_v11 = vpop.f32.mrf.mxu1  ;;  %v3017_v17 = vadd.f32 %v11068_v23, %v2838_v6  ;;  %v3767_v61 = vsel %vm1008_vm2, %v3164_v28, 0.0  ;;  %v2854_v15 = vadd.f32 %v11034_v50, %v13280_v43 }
 0x2f6   : > { %v3162_v20 = vsel %vm3098_vm8, %v3066_v62, %v3130_v18  ;;  %v3008_v53 = vpop.f32.mrf.mxu0  ;;  %v3760_v59 = vadd.f32 %v3759_v48, %v3758_v42  ;;  %vm3101_vm9 = vcmp.ge.f32.partialorder %v3069_v10, 0.0  ;;  %v3133_v3 = vmul.f32 0.01, %v3069_v10 }
 0x2f7   : > { %3249 = vst.msk [vmem:[#allocation3 + $0x109] sm:$0xff] %vm1008_vm2, %v3162_v20  ;;  %v11035_v13 = vpop.f32.mrf.mxu1  ;;  %vm3099_vm11 = vcmp.ge.f32.partialorder %v3067_v27, 0.0  ;;  %v3131_v29 = vmul.f32 0.01, %v3067_v27  ;;  %v3072_v31 = vadd.f32 %v13255_v40, %v3017_v17  ;;  %v3009_v8 = vadd.f32 %v3008_v53, %v2830_v39 }
 0x2f8   : > { %v11069_v25 = vpop.f32.mrf.mxu0  ;;  %v3762_v51 = vadd.f32 %v3761_v57, %v3760_v59  ;;  %v3165_v45 = vsel %vm3101_vm9, %v3069_v10, %v3133_v3  ;;  %v3763_v44 = vsel %vm1008_vm2, %v3162_v20, 0.0  ;;  %v2846_v5 = vadd.f32 %v2845_v11, %v13240_v32 }
 0x2f9   : > { %v3020_v16 = vadd.f32 %v11069_v25, %v2841_v55  ;;  %v2848_v33 = vpop.f32.mrf.mxu1  ;;  %3252 = vst.msk [vmem:[#allocation3 + $0x129] sm:$0xff] %vm1008_vm2, %v3165_v45  ;;  %v3163_v12 = vsel %vm3099_vm11, %v3067_v27, %v3131_v29  ;;  %vm3104_vm12 = vcmp.ge.f32.partialorder %v3072_v31, 0.0  ;;  %v3136_v60 = vmul.f32 0.01, %v3072_v31 }
 0x2fa   : > { %v3011_v34 = vpop.f32.mrf.mxu0  ;;  %v3764_v1 = vadd.f32 %v3763_v44, %v3762_v51  ;;  %3250 = vst.msk [vmem:[#allocation3 + $0x111] sm:$0xff] %vm1008_vm2, %v3163_v12  ;;  %v3765_v22 = vsel %vm1008_vm2, %v3163_v12, 0.0  ;;  %v3070_v54 = vadd.f32 %v13255_v40, %v3009_v8  ;;  %v2857_v43 = vadd.f32 %v11035_v13, %v13297_v21 }
 0x2fb   : > { %v3073_v41 = vadd.f32 %v13255_v40, %v3020_v16  ;;  %v3872_v2 = vpop.f32.mrf.mxu1  ;;  %v3168_v36 = vsel %vm3104_vm12, %v3072_v31, %v3136_v60  ;;  %v3012_v38 = vadd.f32 %v3011_v34, %v2833_v56  ;;  %v3769_v19 = vsel %vm1008_vm2, %v3165_v45, 0.0 }
 0x2fc   : > { %v11072_v4 = vpop.f32.mrf.mxu0  ;;  %v3766_v24 = vadd.f32 %v3765_v22, %v3764_v1  ;;  %3255 = vst.msk [vmem:[#allocation3 + $0x151] sm:$0xff] %vm1008_vm2, %v3168_v36  ;;  %vm3102_vm13 = vcmp.ge.f32.partialorder %v3070_v54, 0.0  ;;  %v3134_v46 = vmul.f32 0.01, %v3070_v54  ;;  %v2849_v30 = vadd.f32 %v2848_v33, %v13245_v52 }
 0x2fd   : > { %v11092_v37 = vpop.f32.mrf.mxu1  ;;  %vm3105_vm14 = vcmp.ge.f32.partialorder %v3073_v41, 0.0  ;;  %v3137_v49 = vmul.f32 0.01, %v3073_v41  ;;  %v3071_v63 = vadd.f32 %v13255_v40, %v3012_v38  ;;  %v3033_v14 = vadd.f32 %v11072_v4, %v2854_v15  ;;  %v13393_v15 = vld [vmem:[#allocation2] sm:$0xff]  ;;  %v4118_v38 = vld [vmem:[%s15943_s15 + $0x8] sm:$0xff] }
 0x2fe   : > { %v3024_v35 = vpop.f32.mrf.mxu0  ;;  %v3768_v47 = vadd.f32 %v3767_v61, %v3766_v24  ;;  %v3166_v26 = vsel %vm3102_vm13, %v3070_v54, %v3134_v46  ;;  %v3775_v53 = vsel %vm1008_vm2, %v3168_v36, 0.0  ;;  %v4036_v36 = vld [vmem:[%s15942_s14] sm:$0xff]  ;;  %v4537_v24 = vld [vmem:[%s15944_s16 + $0x18] sm:$0xff]  ;;  %vm4037_vm7 = vcmask 64512  }
 0x2ff   : > { %v3025_v62 = vadd.f32 %v3024_v35, %v2846_v5  ;;  %v3949_v7 = vpop.f32.mrf.mxu1  ;;  %3253 = vst.msk [vmem:[#allocation3 + $0x139] sm:$0xff] %vm1008_vm2, %v3166_v26  ;;  %v3169_v32 = vsel %vm3105_vm14, %v3073_v41, %v3137_v49  ;;  %vm3103_vm15 = vcmp.ge.f32.partialorder %v3071_v63, 0.0  ;;  %v3135_v9 = vmul.f32 0.01, %v3071_v63  ;;  %v4125_v4 = vld [vmem:[%s15943_s15 + $0x40] sm:$0xff]  ;;  %v4120_v35 = vld [vmem:[%s15943_s15 + $0x18] sm:$0xff] }
 0x300   : > { %v11073_v0 = vpop.f32.mrf.mxu0  ;;  %v3770_v6 = vadd.f32 %v3769_v19, %v3768_v47  ;;  %3256 = vst.msk [vmem:[#allocation3 + $0x159] sm:$0xff] %vm1008_vm2, %v3169_v32  ;;  %v3076_v50 = vadd.f32 %v13255_v40, %v3033_v14  ;;  %v3771_v28 = vsel %vm1008_vm2, %v3166_v26, 0.0  ;;  %v3950_v48 = vadd.f32 %v3949_v7, %v3872_v2  ;;  %11123 = vmatpush3.msra.mxu0 %v4125_v4  ;;  %v4536_v14 = vld [vmem:[%s15944_s16 + $0x10] sm:$0xff]  ;;  %v4541_v47 = vld [vmem:[%s15944_s16 + $0x38] sm:$0xff]  ;;  %v4121_v7 = vld [vmem:[%s15943_s15 + $0x20] sm:$0xff] }
 0x301   : > { %v3074_v58 = vadd.f32 %v13255_v40, %v3025_v62  ;;  %v11097_v21 = vpop.f32.mrf.mxu1  ;;  %v3167_v18 = vsel %vm3103_vm15, %v3071_v63, %v3135_v9  ;;  %v3036_v23 = vadd.f32 %v11073_v0, %v2857_v43  ;;  %v3777_v29 = vsel %vm1008_vm2, %v3169_v32, 0.0  ;;  %4644 = vmatprep.subr.mxu0 %v4537_v24  ;;  %v4117_v63 = vld [vmem:[%s15943_s15] sm:$0xff]  ;;  %v4119_v26 = vld [vmem:[%s15943_s15 + $0x10] sm:$0xff]  ;;  %v4122_v62 = vld [vmem:[%s15943_s15 + $0x28] sm:$0xff] }
 0x302   : > { %v3027_v42 = vpop.f32.mrf.mxu0  ;;  %v3772_v10 = vadd.f32 %v3771_v28, %v3770_v6  ;;  %3254 = vst.msk [vmem:[#allocation3 + $0x141] sm:$0xff] %vm1008_vm2, %v3167_v18  ;;  %v3773_v27 = vsel %vm1008_vm2, %v3167_v18, 0.0  ;;  %vm3108_vm3 = vcmp.ge.f32.partialorder %v3076_v50, 0.0  ;;  %v3140_v11 = vmul.f32 0.01, %v3076_v50  ;;  %v4540_v43 = vld [vmem:[%s15944_s16 + $0x30] sm:$0xff] }
 0x303   : > { %vm3106_vm4 = vcmp.ge.f32.partialorder %v3074_v58, 0.0  ;;  %v3138_v52 = vmul.f32 0.01, %v3074_v58  ;;  %v3077_v39 = vadd.f32 %v13255_v40, %v3036_v23  ;;  %v3028_v20 = vadd.f32 %v3027_v42, %v2849_v30  ;;  %v4124_v19 = vld [vmem:[%s15943_s15 + $0x38] sm:$0xff]  ;;  %v4123_v32 = vld [vmem:[%s15943_s15 + $0x30] sm:$0xff]  ;;  %v4535_v9 = vld [vmem:[%s15944_s16 + $0x8] sm:$0xff] }
 0x304   : > { %v3774_v55 = vadd.f32 %v3773_v27, %v3772_v10  ;;  %v3172_v17 = vsel %vm3108_vm3, %v3076_v50, %v3140_v11  ;;  %v4534_v0 = vld [vmem:[%s15944_s16] sm:$0xff]  ;;  %v4539_v6 = vld [vmem:[%s15944_s16 + $0x28] sm:$0xff]  ;;  %v11414_v21 = vld [vmem:[%s15936_s8 + $0x38] sm:$0xff]  }
 0x305   : > { %3259 = vst.msk [vmem:[#allocation3 + $0x181] sm:$0xff] %vm1008_vm2, %v3172_v17  ;;  %v3170_v57 = vsel %vm3106_vm4, %v3074_v58, %v3138_v52  ;;  %vm3109_vm5 = vcmp.ge.f32.partialorder %v3077_v39, 0.0  ;;  %v3141_v59 = vmul.f32 0.01, %v3077_v39  ;;  %v3075_v13 = vadd.f32 %v13255_v40, %v3028_v20  ;;  %v4538_v30 = vld [vmem:[%s15944_s16 + $0x20] sm:$0xff]  ;;  %v11413_v58 = vld [vmem:[%s15936_s8 + $0x78] sm:$0xff]  }
 0x306   : > { %v3776_v3 = vadd.f32 %v3775_v53, %v3774_v55  ;;  %3257 = vst.msk [vmem:[#allocation3 + $0x169] sm:$0xff] %vm1008_vm2, %v3170_v57  ;;  %v3779_v51 = vsel %vm1008_vm2, %v3170_v57, 0.0  ;;  %v3783_v44 = vsel %vm1008_vm2, %v3172_v17, 0.0  ;;  %v4542_v50 = vld [vmem:[%s15944_s16 + $0x40] sm:$0xff]  ;;  %v11415_v28 = vld [vmem:[%s15936_s8 + $0x70] sm:$0xff]   ;;  %v11417_v18 = vld [vmem:[%s15936_s8 + $0xf8] sm:$0xff]  }
 0x307   : > { %v3173_v31 = vsel %vm3109_vm5, %v3077_v39, %v3141_v59  ;;  %vm3107_vm6 = vcmp.ge.f32.partialorder %v3075_v13, 0.0  ;;  %v3139_v25 = vmul.f32 0.01, %v3075_v13  ;;  %v11416_v23 = vld [vmem:[%s15936_s8 + $0x30] sm:$0xff]   ;;  %v11419_v42 = vld [vmem:[%s15936_s8 + $0x68] sm:$0xff]   ;;  %v11423_v52 = vld [vmem:[%s15936_s8 + $0x60] sm:$0xff]  }
 0x308   : > { %v3778_v8 = vadd.f32 %v3777_v29, %v3776_v3  ;;  %3260 = vst.msk [vmem:[#allocation3 + $0x189] sm:$0xff] %vm1008_vm2, %v3173_v31  ;;  %v3785_v12 = vsel %vm1008_vm2, %v3173_v31, 0.0  ;;  %v11421_v10 = vld [vmem:[%s15936_s8 + $0xf0] sm:$0xff]   ;;  %v11420_v27 = vld [vmem:[%s15936_s8 + $0x28] sm:$0xff]   ;;  %v11424_v20 = vld [vmem:[%s15936_s8 + $0x20] sm:$0xff]  }
 0x309   : > { %v3171_v56 = vsel %vm3107_vm6, %v3075_v13, %v3139_v25  ;;  %v11422_v11 = vld [vmem:[%s15936_s8 + $0xb0] sm:$0xff]   ;;  %v11425_v39 = vld [vmem:[%s15936_s8 + $0xe8] sm:$0xff]   ;;  %v11427_v17 = vld [vmem:[%s15936_s8 + $0x58] sm:$0xff]  }
 0x30a   : > { %v3780_v45 = vadd.f32 %v3779_v51, %v3778_v8  ;;  %3258 = vst.msk [vmem:[#allocation3 + $0x171] sm:$0xff] %vm1008_vm2, %v3171_v56  ;;  %v3781_v16 = vsel %vm1008_vm2, %v3171_v56, 0.0  ;;  %v11426_v55 = vld [vmem:[%s15936_s8 + $0xa8] sm:$0xff]   ;;  %v11429_v53 = vld [vmem:[%s15936_s8 + $0xe0] sm:$0xff]   ;;  %v11428_v57 = vld [vmem:[%s15936_s8 + $0x18] sm:$0xff]  }
 0x30b   : > { %v11430_v59 = vld [vmem:[%s15936_s8 + $0xa0] sm:$0xff]   ;;  %v11431_v3 = vld [vmem:[%s15936_s8 + $0x50] sm:$0xff]   ;;  %v11433_v13 = vld [vmem:[%s15936_s8 + $0xd8] sm:$0xff]  }
 0x30c   : > { %v3782_v33 = vadd.f32 %v3781_v16, %v3780_v45  ;;  %v11432_v29 = vld [vmem:[%s15936_s8 + $0x10] sm:$0xff]   ;;  %v11434_v31 = vld [vmem:[%s15936_s8 + $0x98] sm:$0xff]   ;;  %v11435_v8 = vld [vmem:[%s15936_s8 + $0x48] sm:$0xff]  }
 0x30d   : > { %v11437_v25 = vld [vmem:[%s15936_s8 + $0xd0] sm:$0xff]   ;;  %v11436_v51 = vld [vmem:[%s15936_s8 + $0x8] sm:$0xff]   ;;  %v11439_v56 = vld [vmem:[%s15936_s8 + $0x40] sm:$0xff]  }
 0x30e   : > { %v3784_v40 = vadd.f32 %v3783_v44, %v3782_v33  ;;  %v11438_v45 = vld [vmem:[%s15936_s8 + $0x90] sm:$0xff]   ;;  %v11441_v16 = vld [vmem:[%s15936_s8 + $0xc8] sm:$0xff]   ;;  %v11440_v33 = vld [vmem:[%s15936_s8] sm:$0xff]  }
 0x30f   : > { %v11442_v44 = vld [vmem:[%s15936_s8 + $0x88] sm:$0xff]  }
 0x310   : > { %v3786_v60 = vadd.f32 %v3785_v12, %v3784_v40  ;;  %v11444_v40 = vld [vmem:[%s15936_s8 + $0xc0] sm:$0xff]  }
 0x311   : > { %v11446_v12 = vld [vmem:[%s15936_s8 + $0x80] sm:$0xff]  }
 0x312   : > { %v3787_v34 = vrot.slane %v3786_v60, 4 }
 0x314   : > { %v3788_v1 = vadd.f32 %v3787_v34, %v3786_v60  ;;  %v11443_v60 = vld [vmem:[%s15936_s8 + $0x178] sm:$0xff]  }
 0x315   : > { %v11452_v34 = vld [vmem:[%s15936_s8 + $0x1f8] sm:$0xff]  }
 0x316   : > { %v3789_v22 = vrot.slane %v3788_v1, 2 }
 0x318   : > { %v3790_v54 = vadd.f32 %v3789_v22, %v3788_v1 }
 0x31a   : > { %v3791_v41 = vrot.slane %v3790_v54, 1 }
 0x31c   : > { %v3792_v2 = vadd.f32 %v3791_v41, %v3790_v54 }
 0x31e   : > { %v3793_v61 = vmul.f32 0.00390625, %v3792_v2 }
 0x320   : > { %11115 = vmatmul.mubr.msk.f32.vlgmr.msra.gmra.mxu1 %vm1008_vm2, %v3793_v61 }
 0x321   : > { %11119 = vmatprep.mubr.msk.f32.mxu1 %vm11892_vm10, %v13393_v15  ;;  %11118 = vmatpush3.msra.mxu1 %v4036_v36 }
 0x322   : > { %4156 = vmatprep.subr.mxu1 %v4118_v38 }
 0x3e0   : > { %v4030_v5 = vpop.f32.mrf.mxu1 }
 0x3e1   : > { %v4034_v46 = vadd.f32 %v4030_v5, %v3950_v48  ;;  %v11418_v48 = vld [vmem:[%s15936_s8 + $0xb8] sm:$0xff]  }
 0x3e2   : > { %v11116_v37 = vpop.f32.mrf.mxu1 }
 0x3e3   : > { %v4035_v49 = vmax.f32 %v4034_v46, 0.0 }
 0x3e5   : > { %11120 = vmatmul.mubr.msk.f32.vlgmr.msra.gmra.mxu1 %vm4037_vm7, %v4035_v49  ;;  %11125 = vmatmul.mubr.msk.f32.vlgmr.msra.gmra.mxu0 %vm4037_vm7, %v4035_v49 }
 0x3e6   : > { %4157 = vmatpush1.msra.mxu1 %v4117_v63  ;;  %4190 = vmatprep.mubr.f32.mxu1 %v13393_v15 }
 0x3e7   : > { %4645 = vmatpush1.msra.mxu0 %v4536_v14  ;;  %4678 = vmatprep.mubr.f32.mxu0 %v13393_v15 }
 0x3e8   : > { %4227 = vmatprep.subr.mxu1 %v4120_v35  ;;  %4786 = vmatprep.subr.mxu0 %v4541_v47 }
 0x3e9   : > { %9251 = vmatmul.mubr.msk.f32.vlgmr.msra.gmra.mxu1 %vm4037_vm7, %v4035_v49  ;;  %9266 = vmatmul.mubr.msk.f32.vlgmr.msra.gmra.mxu0 %vm4037_vm7, %v4035_v49 }
 0x3ea   : > { %4228 = vmatpush1.msra.mxu1 %v4119_v26  ;;  %4261 = vmatprep.mubr.f32.mxu1 %v13393_v15 }
 0x3eb   : > { %4787 = vmatpush1.msra.mxu0 %v4540_v43  ;;  %4820 = vmatprep.mubr.f32.mxu0 %v13393_v15 }
 0x3ec   : > { %4298 = vmatprep.subr.mxu1 %v4122_v62  ;;  %9987 = vmatprep.subr.bf16.mxu0 %v11413_v58 }
 0x3ed   : > { %9252 = vmatmul.mubr.msk.f32.vlgmr.msra.gmra.mxu1 %vm4037_vm7, %v4035_v49  ;;  %9268 = vmatmul.mubr.msk.f32.vlgmr.msra.gmra.mxu0 %vm4037_vm7, %v4035_v49 }
 0x3ee   : > { %4299 = vmatpush1.msra.mxu1 %v4121_v7  ;;  %4332 = vmatprep.mubr.f32.mxu1 %v13393_v15 }
 0x3ef   : > { %4369 = vmatprep.subr.mxu1 %v4124_v19  ;;  %9988 = vmatpush3.bf16.msra.mxu0 %v11414_v21  ;;  %v4951_v21 = vlaneseq }
 0x3f0   : > { %9989 = vmatprep.subr.bf16.mxu0 %v11415_v28 }
 0x3f1   : > { %9253 = vmatmul.mubr.msk.f32.vlgmr.msra.gmra.mxu1 %vm4037_vm7, %v4035_v49  ;;  %v4952_v28 = vshrl.u32 %v4951_v21, 7  ;;  %v11450_v21 = vld [vmem:[%s15936_s8 + $0x128] sm:$0xff]  }
 0x3f2   : > { %4370 = vmatpush1.msra.mxu1 %v4123_v32  ;;  %4403 = vmatprep.mubr.f32.mxu1 %v13393_v15 }
 0x3f3   : > { %4573 = vmatprep.subr.mxu1 %v4535_v9  ;;  %9990 = vmatpush3.bf16.msra.mxu0 %v11416_v23 }
 0x3f4   : > { %9991 = vmatprep.subr.bf16.mxu0 %v11419_v42 }
 0x3f5   : > { %9254 = vmatmul.mubr.msk.f32.vlgmr.msra.gmra.mxu1 %vm4037_vm7, %v4035_v49 }
 0x3f6   : > { %4574 = vmatpush1.msra.mxu1 %v4534_v0  ;;  %4607 = vmatprep.mubr.f32.mxu1 %v13393_v15 }
 0x3f7   : > { %4715 = vmatprep.subr.mxu1 %v4539_v6  ;;  %9992 = vmatpush3.bf16.msra.mxu0 %v11420_v27 }
 0x3f8   : > { %9993 = vmatprep.subr.bf16.mxu0 %v11423_v52 }
 0x3f9   : > { %9265 = vmatmul.mubr.msk.f32.vlgmr.msra.gmra.mxu1 %vm4037_vm7, %v4035_v49 }
 0x3fa   : > { %4716 = vmatpush1.msra.mxu1 %v4538_v30  ;;  %4749 = vmatprep.mubr.f32.mxu1 %v13393_v15 }
 0x3fb   : > { %11127 = vmatprep.subr.mxu1 %v13393_v15  ;;  %9994 = vmatpush3.bf16.msra.mxu0 %v11424_v20  ;;  %v11639_v20 = vld [vmem:[#allocation2 + $0x1] sm:$0xff] }
 0x3fc   : > { %9995 = vmatprep.subr.bf16.mxu0 %v11427_v17  ;;  %v11640_v17 = vld [vmem:[#allocation2 + $0x9] sm:$0xff] }
 0x3fd   : > { %9267 = vmatmul.mubr.msk.f32.vlgmr.msra.gmra.mxu1 %vm4037_vm7, %v4035_v49 }
 0x3fe   : > { %11128 = vmatpush3.msra.mxu1 %v4542_v50  ;;  %11129 = vmatprep.mubr.msk.f32.mxu1 %vm11892_vm10, %v13393_v15 }
 0x3ff   : > { %10099 = vmatprep.subr.bf16.mxu1 %v11417_v18  ;;  %9996 = vmatpush3.bf16.msra.mxu0 %v11428_v57 }
 0x400   : > { %9997 = vmatprep.subr.bf16.mxu0 %v11431_v3 }
 0x401   : > { %11130 = vmatmul.mubr.msk.f32.vlgmr.msra.gmra.mxu1 %vm4037_vm7, %v4035_v49 }
 0x402   : > { %10100 = vmatpush3.bf16.msra.mxu1 %v11418_v48  ;;  %v13600_v48 = vsub.s32 0, %v4952_v28 }
 0x403   : > { %10101 = vmatprep.subr.bf16.mxu1 %v11421_v10  ;;  %9998 = vmatpush3.bf16.msra.mxu0 %v11432_v29 }
 0x404   : > { %9999 = vmatprep.subr.bf16.mxu0 %v11435_v8  ;;  %v11445_v8 = vld [vmem:[%s15936_s8 + $0x138] sm:$0xff]  }
 0x406   : > { %10102 = vmatpush3.bf16.msra.mxu1 %v11422_v11 }
 0x407   : > { %10103 = vmatprep.subr.bf16.mxu1 %v11425_v39  ;;  %10000 = vmatpush3.bf16.msra.mxu0 %v11436_v51 }
 0x408   : > { %10001 = vmatprep.subr.bf16.mxu0 %v11439_v56 }
 0x40a   : > { %10104 = vmatpush3.bf16.msra.mxu1 %v11426_v55 }
 0x40b   : > { %10105 = vmatprep.subr.bf16.mxu1 %v11429_v53  ;;  %10002 = vmatpush3.bf16.msra.mxu0 %v11440_v33  ;;  %v11645_v33 = vld [vmem:[#allocation2 + $0x2] sm:$0xff] }
 0x40c   : > { %10211 = vmatprep.subr.bf16.mxu0 %v11443_v60  ;;  %v11646_v60 = vld [vmem:[#allocation2 + $0xa] sm:$0xff] }
 0x40e   : > { %10106 = vmatpush3.bf16.msra.mxu1 %v11430_v59  ;;  %v11641_v59 = vld [vmem:[#allocation2 + $0x19] sm:$0xff] }
 0x40f   : > { %10107 = vmatprep.subr.bf16.mxu1 %v11433_v13  ;;  %v11642_v13 = vld [vmem:[#allocation2 + $0x21] sm:$0xff] }
 0x412   : > { %10108 = vmatpush3.bf16.msra.mxu1 %v11434_v31 }
 0x413   : > { %10109 = vmatprep.subr.bf16.mxu1 %v11437_v25  ;;  %v11643_v25 = vld [vmem:[#allocation2 + $0x18] sm:$0xff] }
 0x416   : > { %10110 = vmatpush3.bf16.msra.mxu1 %v11438_v45  ;;  %v11644_v45 = vld [vmem:[#allocation2 + $0x20] sm:$0xff] }
 0x417   : > { %10111 = vmatprep.subr.bf16.mxu1 %v11441_v16 }
 0x41a   : > { %10112 = vmatpush3.bf16.msra.mxu1 %v11442_v44  ;;  %v11447_v44 = vld [vmem:[%s15936_s8 + $0x170] sm:$0xff]  }
 0x41b   : > { %10113 = vmatprep.subr.bf16.mxu1 %v11444_v40 }
 0x41e   : > { %10114 = vmatpush3.bf16.msra.mxu1 %v11446_v12 }
 0x41f   : > { %10323 = vmatprep.subr.bf16.mxu1 %v11452_v34 }
 0x4a5   : > { %v13578_v1 = vpop.f32.mrf.mxu1  ;;  %v13580_v22 = vpop.f32.mrf.mxu0 }
 0x4a6   : > { %16068 = vst [vmem:[#allocation19_spill] sm:$0xff] %v13578_v1  ;;  %16069 = vst [vmem:[#allocation12_spill] sm:$0xff] %v13580_v22 }
 0x4a7   : > { %v11121_v54 = vpop.f32.mrf.mxu1  ;;  %v11126_v41 = vpop.f32.mrf.mxu0 }
 0x4a8   : > { %v11647_v54 = vld [vmem:[#allocation2 + $0x30] sm:$0xff] }
 0x4a9   : > { %v4192_v2 = vpop.f32.mrf.mxu1 }
 0x4aa   : > { %v9256_v63 = vmul.f32 -1.442695, %v4192_v2  ;;  %v11648_v2 = vld [vmem:[#allocation2 + $0x38] sm:$0xff] }
 0x4ab   : > { %v4194_v61 = vpop.f32.mrf.mxu1 }
 0x4ac   : > { %v9257_v49 = vmul.f32 -1.442695, %v4194_v61 }
 0x4ad   : > { %v4263_v36 = vpop.f32.mrf.mxu1 }
 0x4ae   : > { %v9258_v47 = vmul.f32 -1.442695, %v4263_v36  ;;  %11560 = vpow2.f32 %v9257_v49 }
 0x4af   : > { %v4265_v38 = vpop.f32.mrf.mxu1  ;;  %11562 = vpow2.f32 %v9256_v63 }
 0x4b0   : > { %v9259_v35 = vmul.f32 -1.442695, %v4265_v38  ;;  %v11448_v38 = vld [vmem:[%s15936_s8 + $0x130] sm:$0xff]  }
 0x4b1   : > { %v13582_v4 = vpop.f32.mrf.mxu1 }
 0x4b2   : > { %11564 = vpow2.f32 %v9259_v35 }
 0x4b3   : > { %v13584_v24 = vpop.f32.mrf.mxu1  ;;  %11566 = vpow2.f32 %v9258_v47  ;;  %v11449_v47 = vld [vmem:[%s15936_s8 + $0x168] sm:$0xff]  }
 0x4b5   : > { %v13586_v5 = vpop.f32.mrf.mxu1 }
 0x4b7   : > { %v13588_v46 = vpop.f32.mrf.mxu1 }
 0x4b9   : > { %v13590_v37 = vpop.f32.mrf.mxu1 }
 0x4ba   : > { %16070 = vst [vmem:[#allocation13_spill] sm:$0xff] %v13590_v37  ;;  %v13911_v37 = vld [vmem:[#allocation2 + $0xe0] sm:$0xff] }
 0x4bb   : > { %v13592_v14 = vpop.f32.mrf.mxu1  ;;  %v11561_v19 = vpop.eup %11560  ;;  %16080 = vst [vmem:[#allocation24_spill] sm:$0xff] %v13911_v37 }
 0x4bc   : > { %16071 = vst [vmem:[#allocation14_spill] sm:$0xff] %v13592_v14  ;;  %v11563_v32 = vpop.eup %11562  ;;  %v4508_v6 = vadd.f32 1.0, %v11561_v19 }
 0x4bd   : > { %v13594_v26 = vpop.f32.mrf.mxu1  ;;  %v4507_v30 = vadd.f32 1.0, %v11563_v32  ;;  %v11650_v32 = vld [vmem:[#allocation2 + $0x39] sm:$0xff] }
 0x4be   : > { %16072 = vst [vmem:[#allocation15_spill] sm:$0xff] %v13594_v26  ;;  %11568 = vrcp.f32 %v4508_v6  ;;  %v13645_v6 = vld [vmem:[#allocation2 + $0x1a] sm:$0xff] }
 0x4bf   : > { %v13596_v43 = vpop.f32.mrf.mxu1  ;;  %v11565_v9 = vpop.eup %11564  ;;  %11570 = vrcp.f32 %v4507_v30 }
 0x4c0   : > { %16073 = vst [vmem:[#allocation16_spill] sm:$0xff] %v13596_v43  ;;  %v11567_v0 = vpop.eup %11566  ;;  %v4510_v50 = vadd.f32 1.0, %v11565_v9  ;;  %v13891_v43 = vld [vmem:[#allocation2 + $0xc1] sm:$0xff] }
 0x4c1   : > { %v13598_v62 = vpop.f32.mrf.mxu1  ;;  %v4509_v58 = vadd.f32 1.0, %v11567_v0  ;;  %v11454_v0 = vld [vmem:[%s15936_s8 + $0x1b8] sm:$0xff]   ;;  %16077 = vst [vmem:[#allocation21_spill] sm:$0xff] %v13891_v43 }
 0x4c2   : > { %11572 = vrcp.f32 %v4510_v50  ;;  %v13649_v50 = vld [vmem:[#allocation2 + $0x22] sm:$0xff] }
 0x4c3   : > { %v11131_v7 = vpop.f32.mrf.mxu1  ;;  %11574 = vrcp.f32 %v4509_v58 }
 0x4c4   : > { %v11649_v7 = vld [vmem:[#allocation2 + $0x31] sm:$0xff] }
 0x4cb   : > { %v11569_v18 = vpop.eup %11568 }
 0x4cc   : > { %v11571_v23 = vpop.eup %11570  ;;  %v13603_v27 = vrot.slane %v11569_v18, %v13600_v48  ;;  %v13656_v18 = vld [vmem:[#allocation2 + $0x48] sm:$0xff] }
 0x4cd   : > { %v13606_v11 = vrot.slane %v11571_v23, %v13600_v48 }
 0x4ce   : > { %v5045_v55 = vmul.f32 %v11639_v20, %v13603_v27  ;;  %v5054_v53 = vmul.f32 %v11640_v17, %v13603_v27  ;;  %v5063_v3 = vmul.f32 %v11641_v59, %v13603_v27  ;;  %v5072_v29 = vmul.f32 %v11642_v13, %v13603_v27  ;;  %v11451_v20 = vld [vmem:[%s15936_s8 + $0x160] sm:$0xff]   ;;  %v11455_v13 = vld [vmem:[%s15936_s8 + $0x158] sm:$0xff]  }
 0x4cf   : > { %v11573_v42 = vpop.eup %11572  ;;  %v5044_v57 = vmul.f32 %v13393_v15, %v13606_v11  ;;  %v5062_v49 = vmul.f32 %v11643_v25, %v13606_v11  ;;  %v5071_v63 = vmul.f32 %v11644_v45, %v13606_v11  ;;  %v5081_v19 = vmul.f32 %v11649_v7, %v13603_v27  ;;  %v13724_v7 = vld [vmem:[#allocation2 + $0x61] sm:$0xff] }
 0x4d0   : > { %v11575_v10 = vpop.eup %11574  ;;  %v13609_v52 = vrot.slane %v11573_v42, %v13600_v48  ;;  %v5333_v31 = vpack.c.bf16 %v5054_v53, %v5045_v55  ;;  %v5342_v40 = vpack.c.bf16 %v5072_v29, %v5063_v3  ;;  %v5090_v9 = vmul.f32 %v11650_v32, %v13603_v27  ;;  %v13660_v42 = vld [vmem:[#allocation2 + $0x50] sm:$0xff]  ;;  %v11453_v53 = vld [vmem:[%s15936_s8 + $0x120] sm:$0xff]  }
 0x4d1   : > { %v13612_v39 = vrot.slane %v11575_v10, %v13600_v48  ;;  %v5332_v16 = vpack.c.bf16 %v5044_v57, %v5044_v57  ;;  %v5341_v28 = vpack.c.bf16 %v5071_v63, %v5062_v49  ;;  %v5080_v57 = vmul.f32 %v11647_v54, %v13606_v11  ;;  %v13675_v29 = vld [vmem:[#allocation2 + $0x49] sm:$0xff] }
 0x4d2   : > { %v5047_v51 = vmul.f32 %v11643_v25, %v13609_v52  ;;  %v5056_v56 = vmul.f32 %v11644_v45, %v13609_v52  ;;  %6084 = vmatprep.mubr.bf16.mxu0 %v5333_v31  ;;  %v5065_v41 = vmul.f32 %v11647_v54, %v13609_v52  ;;  %v5074_v61 = vmul.f32 %v11648_v2, %v13609_v52  ;;  %v11458_v45 = vld [vmem:[%s15936_s8 + $0x1b0] sm:$0xff]  }
 0x4d3   : > { %v5046_v15 = vmul.f32 %v11645_v33, %v13612_v39  ;;  %v5055_v34 = vmul.f32 %v11646_v60, %v13612_v39  ;;  %6085 = vmatmul.mubr.bf16.vlgmr.msra.gmra.mxu0 %v5332_v16  ;;  %v5064_v30 = vmul.f32 %v13645_v6, %v13612_v39  ;;  %v5073_v58 = vmul.f32 %v13649_v50, %v13612_v39  ;;  %v13693_v33 = vld [vmem:[#allocation2 + $0x3a] sm:$0xff]  ;;  %v13728_v32 = vld [vmem:[#allocation2 + $0x69] sm:$0xff] }
 0x4d4   : > { %v5335_v12 = vpack.c.bf16 %v5056_v56, %v5047_v51  ;;  %10212 = vmatpush3.bf16.msra.mxu0 %v11445_v8  ;;  %6092 = vmatprep.mubr.bf16.mxu0 %v5342_v40  ;;  %v5344_v35 = vpack.c.bf16 %v5074_v61, %v5065_v41  ;;  %v5083_v23 = vmul.f32 %v13656_v18, %v13609_v52  ;;  %v13679_v8 = vld [vmem:[#allocation2 + $0x51] sm:$0xff] }
 0x4d5   : > { %v5334_v36 = vpack.c.bf16 %v5055_v34, %v5046_v15  ;;  %10213 = vmatprep.subr.bf16.mxu0 %v11447_v44  ;;  %v5092_v10 = vmul.f32 %v13660_v42, %v13609_v52  ;;  %v5351_v55 = vpack.c.bf16 %v5090_v9, %v5081_v19  ;;  %v5343_v17 = vpack.c.bf16 %v5073_v58, %v5064_v30  ;;  %v11456_v51 = vld [vmem:[%s15936_s8 + $0x1f0] sm:$0xff]   ;;  %v11457_v44 = vld [vmem:[%s15936_s8 + $0x118] sm:$0xff]   ;;  %v13704_v34 = vld [vmem:[#allocation2 + $0x68] sm:$0xff] }
 0x4d6   : > { %6245 = vmatprep.mubr.bf16.mxu1 %v5335_v12  ;;  %v5089_v59 = vmul.f32 %v11648_v2, %v13606_v11  ;;  %v5099_v31 = vmul.f32 %v13675_v29, %v13603_v27  ;;  %v5108_v25 = vmul.f32 %v13679_v8, %v13603_v27  ;;  %v13689_v56 = vld [vmem:[#allocation2 + $0x32] sm:$0xff]  ;;  %v5091_v15 = vmul.f32 %v13693_v33, %v13612_v39  ;;  %v13700_v12 = vld [vmem:[#allocation2 + $0x60] sm:$0xff]  ;;  %v11460_v2 = vld [vmem:[%s15936_s8 + $0x1e8] sm:$0xff]  }
 0x4d7   : > { %6246 = vmatmul.mubr.bf16.vlgmr.msra.gmra.mxu1 %v5334_v36  ;;  %v5353_v3 = vpack.c.bf16 %v5092_v10, %v5083_v23  ;;  %v5082_v16 = vmul.f32 %v13689_v56, %v13612_v39  ;;  %v5101_v60 = vmul.f32 %v13700_v12, %v13609_v52  ;;  %v5110_v54 = vmul.f32 %v13704_v34, %v13609_v52  ;;  %v11459_v41 = vld [vmem:[%s15936_s8 + $0x150] sm:$0xff]   ;;  %v13743_v10 = vld [vmem:[#allocation2 + $0x78] sm:$0xff] }
 0x4d8   : > { %6253 = vmatprep.mubr.bf16.mxu1 %v5344_v35  ;;  %10214 = vmatpush3.bf16.msra.mxu0 %v11448_v38  ;;  %v5350_v40 = vpack.c.bf16 %v5089_v59, %v5080_v57  ;;  %v5360_v61 = vpack.c.bf16 %v5108_v25, %v5099_v31  ;;  %v11461_v38 = vld [vmem:[%s15936_s8 + $0x110] sm:$0xff]   ;;  %v5098_v49 = vmul.f32 %v13656_v18, %v13606_v11 }
 0x4d9   : > { %10215 = vmatprep.subr.bf16.mxu0 %v11449_v47  ;;  %10324 = vmatpush3.bf16.msra.mxu1 %v11454_v0  ;;  %v5352_v36 = vpack.c.bf16 %v5091_v15, %v5082_v16  ;;  %v5107_v63 = vmul.f32 %v13660_v42, %v13606_v11  ;;  %v5362_v35 = vpack.c.bf16 %v5110_v54, %v5101_v60  ;;  %v11462_v47 = vld [vmem:[%s15936_s8 + $0x1a8] sm:$0xff]  }
 0x4da   : > { %10325 = vmatprep.subr.bf16.mxu1 %v11456_v51  ;;  %v5117_v19 = vmul.f32 %v13724_v7, %v13603_v27  ;;  %v5126_v9 = vmul.f32 %v13728_v32, %v13603_v27  ;;  %v11463_v0 = vld [vmem:[%s15936_s8 + $0x148] sm:$0xff]   ;;  %v5125_v31 = vmul.f32 %v13704_v34, %v13606_v11  ;;  %v11466_v51 = vld [vmem:[%s15936_s8 + $0x1a0] sm:$0xff]  }
 0x4db   : > { %6093 = vmatmul.mubr.bf16.gmra.mxu0 %v5341_v28  ;;  %v13735_v30 = vld [vmem:[#allocation2 + $0x4a] sm:$0xff]  ;;  %v5359_v23 = vpack.c.bf16 %v5107_v63, %v5098_v49  ;;  %v13768_v15 = vld [vmem:[#allocation2 + $0x81] sm:$0xff]  ;;  %v13787_v49 = vld [vmem:[#allocation2 + $0x98] sm:$0xff] }
 0x4dc   : > { %6100 = vmatprep.mubr.bf16.mxu0 %v5351_v55  ;;  %10216 = vmatpush3.bf16.msra.mxu0 %v11450_v21  ;;  %v5100_v58 = vmul.f32 %v13735_v30, %v13612_v39  ;;  %v13739_v21 = vld [vmem:[#allocation2 + $0x52] sm:$0xff]  ;;  %v13747_v55 = vld [vmem:[#allocation2 + $0x80] sm:$0xff]  ;;  %v5369_v57 = vpack.c.bf16 %v5126_v9, %v5117_v19  ;;  %v5146_v63 = vmul.f32 %v13787_v49, %v13609_v52 }
 0x4dd   : > { %10217 = vmatprep.subr.bf16.mxu0 %v11451_v20  ;;  %10326 = vmatpush3.bf16.msra.mxu1 %v11458_v45  ;;  %v5109_v28 = vmul.f32 %v13739_v21, %v13612_v39  ;;  %v5119_v20 = vmul.f32 %v13743_v10, %v13609_v52  ;;  %v13764_v45 = vld [vmem:[#allocation2 + $0x79] sm:$0xff]  ;;  %v13775_v60 = vld [vmem:[#allocation2 + $0x62] sm:$0xff] }
 0x4de   : > { %10327 = vmatprep.subr.bf16.mxu1 %v11460_v2  ;;  %v5135_v16 = vmul.f32 %v13764_v45, %v13603_v27  ;;  %v5118_v54 = vmul.f32 %v13775_v60, %v13612_v39  ;;  %v11469_v19 = vld [vmem:[%s15936_s8 + $0x100] sm:$0xff]   ;;  %v11470_v9 = vld [vmem:[%s15936_s8 + $0x198] sm:$0xff]  }
 0x4df   : > { %6254 = vmatmul.mubr.bf16.gmra.mxu1 %v5343_v17  ;;  %v5128_v17 = vmul.f32 %v13747_v55, %v13609_v52  ;;  %v5361_v59 = vpack.c.bf16 %v5109_v28, %v5100_v58  ;;  %v11471_v58 = vld [vmem:[%s15936_s8 + $0x1d0] sm:$0xff]   ;;  %v5134_v28 = vmul.f32 %v13743_v10, %v13606_v11 }
 0x4e0   : > { %6261 = vmatprep.mubr.bf16.mxu1 %v5353_v3  ;;  %10218 = vmatpush3.bf16.msra.mxu0 %v11453_v53  ;;  %v11464_v53 = vld [vmem:[%s15936_s8 + $0x1e0] sm:$0xff]   ;;  %v11465_v3 = vld [vmem:[%s15936_s8 + $0x108] sm:$0xff]  }
 0x4e1   : > { %10219 = vmatprep.subr.bf16.mxu0 %v11455_v13  ;;  %10328 = vmatpush3.bf16.msra.mxu1 %v11462_v47  ;;  %v5116_v13 = vmul.f32 %v13700_v12, %v13606_v11  ;;  %v5371_v25 = vpack.c.bf16 %v5128_v17, %v5119_v20  ;;  %v13810_v17 = vld [vmem:[%s15936_s8 + $0x238] sm:$0xff]  }
 0x4e2   : > { %10329 = vmatprep.subr.bf16.mxu1 %v11464_v53  ;;  %v13812_v53 = vld [vmem:[#allocation2 + $0x91] sm:$0xff] }
 0x4e3   : > { %6101 = vmatmul.mubr.bf16.gmra.mxu0 %v5350_v40  ;;  %v11467_v40 = vld [vmem:[%s15936_s8 + $0x140] sm:$0xff]  }
 0x4e4   : > { %6108 = vmatprep.mubr.bf16.mxu0 %v5360_v61  ;;  %10220 = vmatpush3.bf16.msra.mxu0 %v11457_v44  ;;  %v5144_v44 = vmul.f32 %v13768_v15, %v13603_v27  ;;  %v5368_v61 = vpack.c.bf16 %v5125_v31, %v5116_v13  ;;  %v11472_v13 = vld [vmem:[%s15936_s8 + $0x190] sm:$0xff]   ;;  %v13823_v31 = vld [vmem:[#allocation2 + $0x7a] sm:$0xff] }
 0x4e5   : > { %10221 = vmatprep.subr.bf16.mxu0 %v11459_v41  ;;  %v13779_v41 = vld [vmem:[#allocation2 + $0x6a] sm:$0xff]  ;;  %10330 = vmatpush3.bf16.msra.mxu1 %v11466_v51  ;;  %v13827_v51 = vld [vmem:[#allocation2 + $0x82] sm:$0xff] }
 0x4e6   : > { %v5127_v2 = vmul.f32 %v13779_v41, %v13612_v39  ;;  %v5378_v47 = vpack.c.bf16 %v5144_v44, %v5135_v16  ;;  %v5145_v16 = vmul.f32 %v13827_v51, %v13612_v39  ;;  %v11473_v44 = vld [vmem:[%s15936_s8 + $0x1c8] sm:$0xff]  }
 0x4e7   : > { %6262 = vmatmul.mubr.bf16.gmra.mxu1 %v5352_v36  ;;  %v13783_v36 = vld [vmem:[#allocation2 + $0x90] sm:$0xff] }
 0x4e8   : > { %6269 = vmatprep.mubr.bf16.mxu1 %v5362_v35  ;;  %10222 = vmatpush3.bf16.msra.mxu0 %v11461_v38  ;;  %v5137_v38 = vmul.f32 %v13783_v36, %v13609_v52  ;;  %v11468_v35 = vld [vmem:[%s15936_s8 + $0x1d8] sm:$0xff]  }
 0x4e9   : > { %10223 = vmatprep.subr.bf16.mxu0 %v11463_v0  ;;  %v5370_v0 = vpack.c.bf16 %v5127_v2, %v5118_v54  ;;  %10331 = vmatprep.subr.bf16.mxu1 %v11468_v35  ;;  %v13834_v54 = vld [vmem:[#allocation2 + $0xa8] sm:$0xff] }
 0x4ea   : > { %v5380_v20 = vpack.c.bf16 %v5146_v63, %v5137_v38  ;;  %10332 = vmatpush3.bf16.msra.mxu1 %v11470_v9  ;;  %v5155_v2 = vmul.f32 %v13834_v54, %v13609_v52  ;;  %v11474_v35 = vld [vmem:[%s15936_s8 + $0x188] sm:$0xff]   ;;  %v5152_v9 = vmul.f32 %v13783_v36, %v13606_v11 }
 0x4eb   : > { %6109 = vmatmul.mubr.bf16.gmra.mxu0 %v5359_v23  ;;  %v5143_v23 = vmul.f32 %v13747_v55, %v13606_v11  ;;  %10333 = vmatprep.subr.bf16.mxu1 %v11471_v58 }
 0x4ec   : > { %6116 = vmatprep.mubr.bf16.mxu0 %v5369_v57  ;;  %10224 = vmatpush3.bf16.msra.mxu0 %v11465_v3  ;;  %v5153_v57 = vmul.f32 %v13812_v53, %v13603_v27 }
 0x4ed   : > { %10225 = vmatprep.subr.bf16.mxu0 %v11467_v40  ;;  %v5377_v40 = vpack.c.bf16 %v5143_v23, %v5134_v28  ;;  %v13853_v28 = vld [vmem:[#allocation2 + $0xa9] sm:$0xff] }
 0x4ee   : > { %10334 = vmatpush3.bf16.msra.mxu1 %v11472_v13  ;;  %v5171_v23 = vmul.f32 %v13853_v28, %v13603_v27  ;;  %v13864_v13 = vld [vmem:[#allocation2 + $0x92] sm:$0xff] }
 0x4ef   : > { %6270 = vmatmul.mubr.bf16.gmra.mxu1 %v5361_v59  ;;  %v13816_v59 = vld [vmem:[#allocation2 + $0x99] sm:$0xff]  ;;  %10335 = vmatprep.subr.bf16.mxu1 %v11473_v44 }
 0x4f0   : > { %6277 = vmatprep.mubr.bf16.mxu1 %v5371_v25  ;;  %v5162_v3 = vmul.f32 %v13816_v59, %v13603_v27  ;;  %10226 = vmatpush3.bf16.msra.mxu0 %v11469_v19  ;;  %v5136_v25 = vmul.f32 %v13823_v31, %v13612_v39  ;;  %v11476_v19 = vld [vmem:[%s15936_s8 + $0x1c0] sm:$0xff]  }
 0x4f1   : > { %11132 = vmatprep.subr.bf16.mxu0 %v13810_v17 }
 0x4f2   : > { %v5387_v63 = vpack.c.bf16 %v5162_v3, %v5153_v57  ;;  %10336 = vmatpush3.bf16.msra.mxu1 %v11474_v35  ;;  %v11477_v3 = vld [vmem:[%s15936_s8 + $0x180] sm:$0xff]  }
 0x4f3   : > { %6117 = vmatmul.mubr.bf16.gmra.mxu0 %v5368_v61  ;;  %v13838_v61 = vld [vmem:[#allocation2 + $0xb0] sm:$0xff]  ;;  %10337 = vmatprep.subr.bf16.mxu1 %v11476_v19 }
 0x4f4   : > { %6124 = vmatprep.mubr.bf16.mxu0 %v5378_v47  ;;  %16074 = vst [vmem:[#allocation17_spill] sm:$0xff] %v13838_v61  ;;  %v5164_v38 = vmul.f32 %v13838_v61, %v13609_v52  ;;  %v5379_v47 = vpack.c.bf16 %v5145_v16, %v5136_v25  ;;  %v5154_v25 = vmul.f32 %v13864_v13, %v13612_v39  ;;  %v13868_v16 = vld [vmem:[#allocation2 + $0x9a] sm:$0xff] }
 0x4f5   : > { %v5163_v44 = vmul.f32 %v13868_v16, %v13612_v39 }
 0x4f6   : > { %v5389_v58 = vpack.c.bf16 %v5164_v38, %v5155_v2  ;;  %v13872_v2 = vld [vmem:[#allocation2 + $0xc0] sm:$0xff]  ;;  %10338 = vmatpush3.bf16.msra.mxu1 %v11477_v3 }
 0x4f7   : > { %6278 = vmatmul.mubr.bf16.gmra.mxu1 %v5370_v0  ;;  %v5161_v0 = vmul.f32 %v13787_v49, %v13606_v11  ;;  %16075 = vst [vmem:[#allocation18_spill] sm:$0xff] %v13872_v2  ;;  %v5173_v38 = vmul.f32 %v13872_v2, %v13609_v52  ;;  %v5388_v19 = vpack.c.bf16 %v5163_v44, %v5154_v25  ;;  %v13899_v25 = vld [vmem:[#allocation2 + $0xaa] sm:$0xff] }
 0x4f8   : > { %6285 = vmatprep.mubr.bf16.mxu1 %v5380_v20  ;;  %v13857_v20 = vld [vmem:[#allocation2 + $0xb1] sm:$0xff]  ;;  %v5172_v44 = vmul.f32 %v13899_v25, %v13612_v39  ;;  %v5188_v1 = vmul.f32 %v13872_v2, %v13606_v11 }
 0x4f9   : > { %v5180_v57 = vmul.f32 %v13857_v20, %v13603_v27  ;;  %v13947_v2 = vld [vmem:[#allocation2 + $0xf1] sm:$0xff] }
 0x4fa   : > { %16087 = vst [vmem:[#allocation31_spill] sm:$0xff] %v13947_v2 }
 0x4fb   : > { %6125 = vmatmul.mubr.bf16.gmra.mxu0 %v5377_v40  ;;  %v5386_v40 = vpack.c.bf16 %v5161_v0, %v5152_v9  ;;  %v5170_v9 = vmul.f32 %v13834_v54, %v13606_v11  ;;  %v5179_v0 = vmul.f32 %v13838_v61, %v13606_v11  ;;  %v13923_v61 = vld [vmem:[#allocation2 + $0xe1] sm:$0xff] }
 0x4fc   : > { %6132 = vmatprep.mubr.bf16.mxu0 %v5387_v63  ;;  %v13876_v63 = vld [vmem:[#allocation2 + $0xc8] sm:$0xff]  ;;  %16082 = vst [vmem:[#allocation26_spill] sm:$0xff] %v13923_v61 }
 0x4fd   : > { %16076 = vst [vmem:[#allocation20_spill] sm:$0xff] %v13876_v63  ;;  %v5182_v35 = vmul.f32 %v13876_v63, %v13609_v52 }
 0x4ff   : > { %6286 = vmatmul.mubr.bf16.gmra.mxu1 %v5379_v47  ;;  %v13883_v47 = vld [vmem:[%s15935_s7 + $0x10] ss:$0 sps:$4 sm:$0x33]   ;;  %v5398_v26 = vpack.c.bf16 %v5182_v35, %v5173_v38  ;;  %v5395_v35 = vpack.c.bf16 %v5179_v0, %v5170_v9  ;;  %v5197_v9 = vmul.f32 %v13876_v63, %v13606_v11 }
 0x500   : > { %6293 = vmatprep.mubr.bf16.mxu1 %v5389_v58  ;;  %v5396_v58 = vpack.c.bf16 %v5180_v57, %v5171_v23  ;;  %11291 = vmatprep.subr.msk.bf16.mxu1 %vm692_vm0, %v13883_v47  ;;  %v5189_v23 = vmul.f32 %v13891_v43, %v13603_v27  ;;  %v13895_v57 = vld [vmem:[#allocation2 + $0xc9] sm:$0xff] }
 0x501   : > { %16078 = vst [vmem:[#allocation22_spill] sm:$0xff] %v13895_v57  ;;  %v5198_v3 = vmul.f32 %v13895_v57, %v13603_v27  ;;  %v13919_v57 = vld [vmem:[#allocation2 + $0xd9] sm:$0xff] }
 0x502   : > { %16081 = vst [vmem:[#allocation25_spill] sm:$0xff] %v13919_v57  ;;  %v5207_v43 = vmul.f32 %v13919_v57, %v13603_v27 }
 0x503   : > { %6133 = vmatmul.mubr.bf16.gmra.mxu0 %v5386_v40  ;;  %v13903_v40 = vld [vmem:[#allocation2 + $0xb2] sm:$0xff]  ;;  %v5405_v14 = vpack.c.bf16 %v5198_v3, %v5189_v23  ;;  %v5216_v23 = vmul.f32 %v13923_v61, %v13603_v27 }
 0x504   : > { %6140 = vmatprep.mubr.bf16.mxu0 %v5396_v58  ;;  %v5181_v38 = vmul.f32 %v13903_v40, %v13612_v39  ;;  %v13907_v58 = vld [vmem:[#allocation2 + $0xd8] sm:$0xff] }
 0x505   : > { %16079 = vst [vmem:[#allocation23_spill] sm:$0xff] %v13907_v58  ;;  %v5414_v61 = vpack.c.bf16 %v5216_v23, %v5207_v43  ;;  %v5206_v63 = vmul.f32 %v13907_v58, %v13606_v11 }
 0x506   : > { %v5397_v22 = vpack.c.bf16 %v5181_v38, %v5172_v44  ;;  %v13931_v44 = vld [vmem:[#allocation2 + $0xca] sm:$0xff]  ;;  %v5404_v38 = vpack.c.bf16 %v5197_v9, %v5188_v1  ;;  %v5215_v1 = vmul.f32 %v13911_v37, %v13606_v11 }
 0x507   : > { %6294 = vmatmul.mubr.bf16.gmra.mxu1 %v5388_v19  ;;  %v5191_v19 = vmul.f32 %v13907_v58, %v13609_v52  ;;  %16084 = vst [vmem:[#allocation28_spill] sm:$0xff] %v13931_v44 }
 0x508   : > { %6301 = vmatprep.mubr.bf16.mxu1 %v5398_v26  ;;  %v5200_v26 = vmul.f32 %v13911_v37, %v13609_v52 }
 0x50a   : > { %v5407_v0 = vpack.c.bf16 %v5200_v26, %v5191_v19  ;;  %v13939_v26 = vld [vmem:[#allocation2 + $0xf8] sm:$0xff] }
 0x50b   : > { %6141 = vmatmul.mubr.bf16.gmra.mxu0 %v5395_v35  ;;  %v13935_v35 = vld [vmem:[#allocation2 + $0xf0] sm:$0xff]  ;;  %16086 = vst [vmem:[#allocation30_spill] sm:$0xff] %v13939_v26 }
 0x50c   : > { %6148 = vmatprep.mubr.bf16.mxu0 %v5405_v14  ;;  %v13927_v14 = vld [vmem:[#allocation2 + $0xc2] sm:$0xff]  ;;  %16085 = vst [vmem:[#allocation29_spill] sm:$0xff] %v13935_v35  ;;  %v5209_v19 = vmul.f32 %v13935_v35, %v13609_v52  ;;  %v5224_v58 = vmul.f32 %v13935_v35, %v13606_v11 }
 0x50d   : > { %16083 = vst [vmem:[#allocation27_spill] sm:$0xff] %v13927_v14  ;;  %v5190_v3 = vmul.f32 %v13927_v14, %v13612_v39  ;;  %v13951_v14 = vld [vmem:[#allocation2 + $0xf9] sm:$0xff] }
 0x50e   : > { %16088 = vst [vmem:[#allocation32_spill] sm:$0xff] %v13951_v14  ;;  %v5234_v43 = vmul.f32 %v13951_v14, %v13603_v27  ;;  %v9261_v14 = vmul.f32 -1.442695, %v13584_v24 }
 0x50f   : > { %6302 = vmatmul.mubr.bf16.gmra.mxu1 %v5397_v22  ;;  %v5199_v22 = vmul.f32 %v13931_v44, %v13612_v39  ;;  %v5225_v44 = vmul.f32 %v13947_v2, %v13603_v27 }
 0x510   : > { %6309 = vmatprep.mubr.bf16.mxu1 %v5407_v0  ;;  %v5218_v0 = vmul.f32 %v13939_v26, %v13609_v52  ;;  %11576 = vpow2.f32 %v9261_v14  ;;  %v9260_v14 = vmul.f32 -1.442695, %v13582_v4 }
 0x511   : > { %v5406_v57 = vpack.c.bf16 %v5199_v22, %v5190_v3  ;;  %v13959_v3 = vld [vmem:[#allocation2 + $0xe2] sm:$0xff]  ;;  %v5413_v22 = vpack.c.bf16 %v5215_v1, %v5206_v63  ;;  %v5423_v2 = vpack.c.bf16 %v5234_v43, %v5225_v44  ;;  %v5233_v63 = vmul.f32 %v13939_v26, %v13606_v11  ;;  %v13981_v44 = vld [vmem:[#allocation2 + $0x111] sm:$0xff] }
 0x512   : > { %v5416_v9 = vpack.c.bf16 %v5218_v0, %v5209_v19  ;;  %16090 = vst [vmem:[#allocation34_spill] sm:$0xff] %v13959_v3  ;;  %v13967_v0 = vld [vmem:[#allocation2 + $0x110] sm:$0xff]  ;;  %v9263_v1 = vmul.f32 -1.442695, %v13588_v46  ;;  %16094 = vst [vmem:[#allocation38_spill] sm:$0xff] %v13981_v44  ;;  %v13989_v46 = vld [vmem:[#allocation2 + $0xfa] sm:$0xff] }
 0x513   : > { %6149 = vmatmul.mubr.bf16.gmra.mxu0 %v5404_v38  ;;  %v13963_v38 = vld [vmem:[#allocation2 + $0x108] sm:$0xff]  ;;  %16092 = vst [vmem:[#allocation36_spill] sm:$0xff] %v13967_v0  ;;  %v13985_v43 = vld [vmem:[#allocation2 + $0xf2] sm:$0xff]  ;;  %16095 = vst [vmem:[#allocation39_spill] sm:$0xff] %v13989_v46 }
 0x514   : > { %6156 = vmatprep.mubr.bf16.mxu0 %v5414_v61  ;;  %v13955_v61 = vld [vmem:[#allocation2 + $0xda] sm:$0xff]  ;;  %16091 = vst [vmem:[#allocation35_spill] sm:$0xff] %v13963_v38  ;;  %v5227_v19 = vmul.f32 %v13963_v38, %v13609_v52  ;;  %11578 = vpow2.f32 %v9263_v1  ;;  %v5242_v4 = vmul.f32 %v13963_v38, %v13606_v11 }
 0x515   : > { %16089 = vst [vmem:[#allocation33_spill] sm:$0xff] %v13955_v61  ;;  %v5208_v23 = vmul.f32 %v13955_v61, %v13612_v39  ;;  %v13977_v61 = vld [vmem:[#allocation2 + $0x109] sm:$0xff]  ;;  %11580 = vpow2.f32 %v9260_v14  ;;  %v14007_v1 = vld [vmem:[#allocation2 + $0x121] sm:$0xff]  ;;  %v14023_v14 = vld [vmem:[#allocation2 + $0x138] sm:$0xff] }
 0x516   : > { %16093 = vst [vmem:[#allocation37_spill] sm:$0xff] %v13977_v61  ;;  %v5243_v24 = vmul.f32 %v13977_v61, %v13603_v27  ;;  %v9262_v61 = vmul.f32 -1.442695, %v13586_v5  ;;  %16098 = vst [vmem:[#allocation42_spill] sm:$0xff] %v14007_v1  ;;  %v5261_v35 = vmul.f32 %v14007_v1, %v13603_v27 }
 0x517   : > { %6310 = vmatmul.mubr.bf16.gmra.mxu1 %v5406_v57  ;;  %v5217_v57 = vmul.f32 %v13959_v3, %v13612_v39  ;;  %16102 = vst [vmem:[#allocation46_spill] sm:$0xff] %v14023_v14 }
 0x518   : > { %6317 = vmatprep.mubr.bf16.mxu1 %v5416_v9  ;;  %v5236_v9 = vmul.f32 %v13967_v0, %v13609_v52  ;;  %11582 = vpow2.f32 %v9262_v61 }
 0x519   : > { %v5415_v37 = vpack.c.bf16 %v5217_v57, %v5208_v23  ;;  %v5226_v23 = vmul.f32 %v13985_v43, %v13612_v39  ;;  %v5422_v57 = vpack.c.bf16 %v5233_v63, %v5224_v58  ;;  %v5251_v58 = vmul.f32 %v13967_v0, %v13606_v11 }
 0x51a   : > { %v5425_v3 = vpack.c.bf16 %v5236_v9, %v5227_v19 }
 0x51b   : > { %6157 = vmatmul.mubr.bf16.gmra.mxu0 %v5413_v22  ;;  %v13994_v22 = vld [vmem:[#allocation2 + $0x120] sm:$0xff] }
 0x51c   : > { %6164 = vmatprep.mubr.bf16.mxu0 %v5423_v2  ;;  %v5252_v2 = vmul.f32 %v13981_v44, %v13603_v27  ;;  %16096 = vst [vmem:[#allocation40_spill] sm:$0xff] %v13994_v22  ;;  %v5245_v19 = vmul.f32 %v13994_v22, %v13609_v52  ;;  %v5260_v0 = vmul.f32 %v13994_v22, %v13606_v11 }
 0x51e   : > { %v5432_v44 = vpack.c.bf16 %v5252_v2, %v5243_v24  ;;  %v14011_v24 = vld [vmem:[#allocation2 + $0x129] sm:$0xff] }
 0x51f   : > { %6318 = vmatmul.mubr.bf16.gmra.mxu1 %v5415_v37  ;;  %v5235_v37 = vmul.f32 %v13989_v46, %v13612_v39  ;;  %16099 = vst [vmem:[#allocation43_spill] sm:$0xff] %v14011_v24  ;;  %v5270_v5 = vmul.f32 %v14011_v24, %v13603_v27  ;;  %v11577_v24 = vpop.eup %11576  ;;  %v14063_v46 = vld [vmem:[#allocation2 + $0x151] sm:$0xff] }
 0x520   : > { %6325 = vmatprep.mubr.bf16.mxu1 %v5425_v3  ;;  %v13998_v3 = vld [vmem:[#allocation2 + $0x128] sm:$0xff]  ;;  %v4512_v38 = vadd.f32 1.0, %v11577_v24  ;;  %16110 = vst [vmem:[#allocation54_spill] sm:$0xff] %v14063_v46 }
 0x521   : > { %16097 = vst [vmem:[#allocation41_spill] sm:$0xff] %v13998_v3  ;;  %v5254_v9 = vmul.f32 %v13998_v3, %v13609_v52  ;;  %v5424_v26 = vpack.c.bf16 %v5235_v37, %v5226_v23  ;;  %v14019_v23 = vld [vmem:[#allocation2 + $0x112] sm:$0xff]  ;;  %v5431_v37 = vpack.c.bf16 %v5251_v58, %v5242_v4  ;;  %v5269_v61 = vmul.f32 %v13998_v3, %v13606_v11  ;;  %v11579_v58 = vpop.eup %11578 }
 0x522   : > { %16101 = vst [vmem:[#allocation45_spill] sm:$0xff] %v14019_v23  ;;  %v11581_v24 = vpop.eup %11580  ;;  %11584 = vrcp.f32 %v4512_v38  ;;  %v5297_v38 = vmul.f32 %v14063_v46, %v13603_v27 }
 0x523   : > { %6165 = vmatmul.mubr.bf16.gmra.mxu0 %v5422_v57  ;;  %v5434_v63 = vpack.c.bf16 %v5254_v9, %v5245_v19  ;;  %v5263_v57 = vmul.f32 %v14023_v14, %v13609_v52  ;;  %v14027_v19 = vld [vmem:[#allocation2 + $0x140] sm:$0xff]  ;;  %v4511_v22 = vadd.f32 1.0, %v11581_v24 }
 0x524   : > { %6172 = vmatprep.mubr.bf16.mxu0 %v5432_v44  ;;  %v14015_v44 = vld [vmem:[#allocation2 + $0x10a] sm:$0xff]  ;;  %16103 = vst [vmem:[#allocation47_spill] sm:$0xff] %v14027_v19  ;;  %v5272_v9 = vmul.f32 %v14027_v19, %v13609_v52 }
 0x525   : > { %16100 = vst [vmem:[#allocation44_spill] sm:$0xff] %v14015_v44  ;;  %v5244_v2 = vmul.f32 %v14015_v44, %v13612_v39 }
 0x526   : > { %v5443_v4 = vpack.c.bf16 %v5272_v9, %v5263_v57  ;;  %v4514_v57 = vadd.f32 1.0, %v11579_v58  ;;  %v5440_v9 = vpack.c.bf16 %v5269_v61, %v5260_v0  ;;  %v5278_v0 = vmul.f32 %v14023_v14, %v13606_v11  ;;  %v14095_v14 = vld [vmem:[#allocation2 + $0x171] sm:$0xff] }
 0x527   : > { %6326 = vmatmul.mubr.bf16.gmra.mxu1 %v5424_v26  ;;  %v5253_v26 = vmul.f32 %v14019_v23, %v13612_v39  ;;  %v14035_v23 = vld [vmem:[#allocation2 + $0x139] sm:$0xff]  ;;  %v5287_v61 = vmul.f32 %v14027_v19, %v13606_v11  ;;  %16114 = vst [vmem:[#allocation58_spill] sm:$0xff] %v14095_v14 }
 0x528   : > { %6333 = vmatprep.mubr.bf16.mxu1 %v5434_v63  ;;  %v5441_v63 = vpack.c.bf16 %v5270_v5, %v5261_v35  ;;  %16104 = vst [vmem:[#allocation48_spill] sm:$0xff] %v14035_v23  ;;  %v5279_v44 = vmul.f32 %v14035_v23, %v13603_v27  ;;  %v14039_v35 = vld [vmem:[#allocation2 + $0x141] sm:$0xff]  ;;  %11586 = vrcp.f32 %v4514_v57 }
 0x529   : > { %v5433_v1 = vpack.c.bf16 %v5253_v26, %v5244_v2  ;;  %16105 = vst [vmem:[#allocation49_spill] sm:$0xff] %v14039_v35  ;;  %v5288_v5 = vmul.f32 %v14039_v35, %v13603_v27  ;;  %v14043_v2 = vld [vmem:[#allocation2 + $0x122] sm:$0xff]  ;;  %v14055_v35 = vld [vmem:[#allocation2 + $0x158] sm:$0xff]  ;;  %11588 = vrcp.f32 %v4511_v22  ;;  %v5449_v24 = vpack.c.bf16 %v5287_v61, %v5278_v0 }
 0x52a   : > { %16106 = vst [vmem:[#allocation50_spill] sm:$0xff] %v14043_v2  ;;  %v5262_v26 = vmul.f32 %v14043_v2, %v13612_v39  ;;  %16109 = vst [vmem:[#allocation53_spill] sm:$0xff] %v14055_v35  ;;  %v14079_v57 = vld [vmem:[#allocation2 + $0x168] sm:$0xff]  ;;  %v5305_v22 = vmul.f32 %v14055_v35, %v13606_v11 }
 0x52b   : > { %6173 = vmatmul.mubr.bf16.gmra.mxu0 %v5431_v37  ;;  %v14047_v37 = vld [vmem:[#allocation2 + $0x12a] sm:$0xff]  ;;  %v5450_v3 = vpack.c.bf16 %v5288_v5, %v5279_v44  ;;  %v14067_v44 = vld [vmem:[#allocation2 + $0x159] sm:$0xff] }
 0x52c   : > { %6180 = vmatprep.mubr.bf16.mxu0 %v5441_v63  ;;  %16107 = vst [vmem:[#allocation51_spill] sm:$0xff] %v14047_v37  ;;  %v14051_v63 = vld [vmem:[#allocation2 + $0x150] sm:$0xff]  ;;  %16111 = vst [vmem:[#allocation55_spill] sm:$0xff] %v14067_v44  ;;  %v14071_v5 = vld [vmem:[#allocation2 + $0x13a] sm:$0xff] }
 0x52d   : > { %16108 = vst [vmem:[#allocation52_spill] sm:$0xff] %v14051_v63  ;;  %v5281_v23 = vmul.f32 %v14051_v63, %v13609_v52  ;;  %v14091_v61 = vld [vmem:[#allocation2 + $0x169] sm:$0xff] }
 0x52e   : > { %16113 = vst [vmem:[#allocation57_spill] sm:$0xff] %v14091_v61  ;;  %v5315_v19 = vmul.f32 %v14091_v61, %v13603_v27 }
 0x52f   : > { %6334 = vmatmul.mubr.bf16.gmra.mxu1 %v5433_v1  ;;  %v5271_v1 = vmul.f32 %v14047_v37, %v13612_v39  ;;  %v11583_v37 = vpop.eup %11582 }
 0x530   : > { %6341 = vmatprep.mubr.bf16.mxu1 %v5443_v4  ;;  %v5290_v4 = vmul.f32 %v14055_v35, %v13609_v52 }
 0x531   : > { %v5442_v2 = vpack.c.bf16 %v5271_v1, %v5262_v26  ;;  %v5280_v26 = vmul.f32 %v14071_v5, %v13612_v39  ;;  %v14075_v1 = vld [vmem:[#allocation2 + $0x142] sm:$0xff] }
 0x532   : > { %v5452_v58 = vpack.c.bf16 %v5290_v4, %v5281_v23  ;;  %v5289_v23 = vmul.f32 %v14075_v1, %v13612_v39  ;;  %v14083_v4 = vld [vmem:[#allocation2 + $0x170] sm:$0xff] }
 0x533   : > { %6181 = vmatmul.mubr.bf16.gmra.mxu0 %v5440_v9  ;;  %v5299_v9 = vmul.f32 %v14079_v57, %v13609_v52  ;;  %16112 = vst [vmem:[#allocation56_spill] sm:$0xff] %v14083_v4 }
 0x534   : > { %6188 = vmatprep.mubr.bf16.mxu0 %v5450_v3  ;;  %v5306_v3 = vmul.f32 %v14067_v44, %v13603_v27  ;;  %v5451_v46 = vpack.c.bf16 %v5289_v23, %v5280_v26  ;;  %v14103_v23 = vld [vmem:[#allocation2 + $0x15a] sm:$0xff] }
 0x535   : > { %16115 = vst [vmem:[#allocation59_spill] sm:$0xff] %v14103_v23 }
 0x536   : > { %v5459_v44 = vpack.c.bf16 %v5306_v3, %v5297_v38  ;;  %v5324_v38 = vmul.f32 %v14095_v14, %v13603_v27  ;;  %v14099_v3 = vld [vmem:[#allocation2 + $0x152] sm:$0xff] }
 0x537   : > { %6342 = vmatmul.mubr.bf16.gmra.mxu1 %v5442_v2  ;;  %v4513_v2 = vadd.f32 1.0, %v11583_v37  ;;  %v5296_v37 = vmul.f32 %v14051_v63, %v13606_v11  ;;  %v5298_v26 = vmul.f32 %v14099_v3, %v13612_v39 }
 0x538   : > { %6349 = vmatprep.mubr.bf16.mxu1 %v5452_v58  ;;  %v5308_v58 = vmul.f32 %v14083_v4, %v13609_v52  ;;  %v5468_v61 = vpack.c.bf16 %v5324_v38, %v5315_v19 }
 0x539   : > { %11590 = vrcp.f32 %v4513_v2  ;;  %v5458_v2 = vpack.c.bf16 %v5305_v22, %v5296_v37  ;;  %v5314_v37 = vmul.f32 %v14079_v57, %v13606_v11  ;;  %v5323_v22 = vmul.f32 %v14083_v4, %v13606_v11  ;;  %v11738_v4 = vld [vmem:[#allocation2 + $0x21] sm:$0xff] }
 0x53a   : > { %v5461_v0 = vpack.c.bf16 %v5308_v58, %v5299_v9  ;;  %v14111_v58 = vld [vmem:[#allocation2 + $0x188] sm:$0xff] }
 0x53b   : > { %6189 = vmatmul.mubr.bf16.gmra.mxu0 %v5449_v24  ;;  %v14107_v24 = vld [vmem:[#allocation2 + $0x180] sm:$0xff]  ;;  %16117 = vst [vmem:[#allocation61_spill] sm:$0xff] %v14111_v58  ;;  %v5326_v27 = vmul.f32 %v14111_v58, %v13609_v52 }
 0x53c   : > { %6196 = vmatprep.mubr.bf16.mxu0 %v5459_v44  ;;  %v11585_v44 = vpop.eup %11584  ;;  %16116 = vst [vmem:[#allocation60_spill] sm:$0xff] %v14107_v24  ;;  %v5317_v9 = vmul.f32 %v14107_v24, %v13609_v52  ;;  %v11737_v58 = vld [vmem:[#allocation2 + $0x19] sm:$0xff] }
 0x53d   : > { %v14116_v14 = vrot.slane %v11585_v44, %v13600_v48  ;;  %v14133_v44 = vld [vmem:[#allocation2 + $0x172] sm:$0xff] }
 0x53e   : > { %v5470_v63 = vpack.c.bf16 %v5326_v27, %v5317_v9  ;;  %v5325_v11 = vmul.f32 %v14133_v44, %v13612_v39 }
 0x53f   : > { %6350 = vmatmul.mubr.bf16.gmra.mxu1 %v5451_v46  ;;  %v5307_v46 = vmul.f32 %v14103_v23, %v13612_v39  ;;  %v5049_v52 = vmul.f32 %v13645_v6, %v14116_v14  ;;  %v5058_v19 = vmul.f32 %v13649_v50, %v14116_v14  ;;  %v11735_v6 = vld [vmem:[#allocation2 + $0x31] sm:$0xff]  ;;  %v11736_v50 = vld [vmem:[#allocation2 + $0x39] sm:$0xff] }
 0x540   : > { %6357 = vmatprep.mubr.bf16.mxu1 %v5461_v0  ;;  %v11587_v0 = vpop.eup %11586 }
 0x541   : > { %v5460_v35 = vpack.c.bf16 %v5307_v46, %v5298_v26  ;;  %v14123_v24 = vrot.slane %v11587_v0, %v13600_v48  ;;  %v11589_v23 = vpop.eup %11588  ;;  %v5467_v46 = vpack.c.bf16 %v5323_v22, %v5314_v37  ;;  %v5337_v9 = vpack.c.bf16 %v5058_v19, %v5049_v52  ;;  %v11739_v19 = vld [vmem:[#allocation2 + $0x30] sm:$0xff] }
 0x542   : > { %v5067_v22 = vmul.f32 %v13689_v56, %v14116_v14  ;;  %v5076_v52 = vmul.f32 %v13693_v33, %v14116_v14  ;;  %v11478_v56 = vld [vmem:[%s15936_s8 + $0x230] sm:$0xff]  }
 0x543   : > { %6197 = vmatmul.mubr.bf16.gmra.mxu0 %v5458_v2  ;;  %v5051_v2 = vmul.f32 %v11735_v6, %v14123_v24 }
 0x544   : > { %6204 = vmatprep.mubr.bf16.mxu0 %v5468_v61  ;;  %v14129_v61 = vld [vmem:[#allocation2 + $0x16a] sm:$0xff] }
 0x545   : > { %v5316_v38 = vmul.f32 %v14129_v61, %v13612_v39 }
 0x546   : > { %v11591_v26 = vpop.eup %11590 }
 0x547   : > { %6358 = vmatmul.mubr.bf16.gmra.mxu1 %v5460_v35  ;;  %v14138_v35 = vrot.slane %v11589_v23, %v13600_v48  ;;  %v14143_v27 = vrot.slane %v11591_v26, %v13600_v48  ;;  %v5469_v0 = vpack.c.bf16 %v5325_v11, %v5316_v38 }
 0x548   : > { %6365 = vmatprep.mubr.bf16.mxu1 %v5470_v63  ;;  %v5060_v63 = vmul.f32 %v11736_v50, %v14123_v24 }
 0x549   : > { %v5048_v39 = vmul.f32 %v11737_v58, %v14138_v35  ;;  %v5057_v23 = vmul.f32 %v11738_v4, %v14138_v35  ;;  %v5050_v26 = vmul.f32 %v11739_v19, %v14143_v27  ;;  %v5069_v58 = vmul.f32 %v13675_v29, %v14123_v24 }
 0x54a   : > { %v5339_v37 = vpack.c.bf16 %v5060_v63, %v5051_v2  ;;  %v5078_v4 = vmul.f32 %v13679_v8, %v14123_v24  ;;  %v5346_v2 = vpack.c.bf16 %v5076_v52, %v5067_v22  ;;  %v6921_v63 = vsel %vm692_vm0, %v13883_v47, 0 }
 0x54b   : > { %6205 = vmatmul.mubr.bf16.gmra.mxu0 %v5467_v46  ;;  %v11740_v46 = vld [vmem:[#allocation2 + $0x38] sm:$0xff]  ;;  %v5336_v11 = vpack.c.bf16 %v5057_v23, %v5048_v39  ;;  %v5075_v39 = vmul.f32 %v11736_v50, %v14138_v35  ;;  %v5094_v47 = vmul.f32 %v13739_v21, %v14116_v14  ;;  %v5077_v50 = vmul.f32 %v13660_v42, %v14143_v27  ;;  %v11480_v21 = vld [vmem:[%s15936_s8 + $0x220] sm:$0xff]  }
 0x54c   : > { %6406 = vmatprep.mubr.bf16.mxu0 %v5337_v9  ;;  %v5059_v38 = vmul.f32 %v11740_v46, %v14143_v27  ;;  %v11484_v9 = vld [vmem:[%s15935_s7 + $0x8] sm:$0xff]   ;;  %v5348_v23 = vpack.c.bf16 %v5078_v4, %v5069_v58  ;;  %v5087_v52 = vmul.f32 %v13724_v7, %v14123_v24  ;;  %v5093_v46 = vmul.f32 %v13679_v8, %v14138_v35 }
 0x54d   : > { %v5103_v58 = vmul.f32 %v13775_v60, %v14116_v14  ;;  %v5112_v4 = vmul.f32 %v13779_v41, %v14116_v14  ;;  %v5095_v8 = vmul.f32 %v13704_v34, %v14143_v27  ;;  %v11483_v60 = vld [vmem:[%s15936_s8 + $0x210] sm:$0xff]   ;;  %v5102_v34 = vmul.f32 %v13724_v7, %v14138_v35 }
 0x54e   : > { %v5338_v33 = vpack.c.bf16 %v5059_v38, %v5050_v26  ;;  %v5084_v26 = vmul.f32 %v13675_v29, %v14138_v35  ;;  %v5086_v29 = vmul.f32 %v13700_v12, %v14143_v27  ;;  %v5104_v7 = vmul.f32 %v13743_v10, %v14143_v27 }
 0x54f   : > { %6366 = vmatmul.mubr.bf16.gmra.mxu1 %v5469_v0  ;;  %v5066_v0 = vmul.f32 %v11735_v6, %v14138_v35  ;;  %v5068_v6 = vmul.f32 %v13656_v18, %v14143_v27  ;;  %v11488_v18 = vld [vmem:[%s15935_s7] sm:$0xff]   ;;  %v5364_v41 = vpack.c.bf16 %v5112_v4, %v5103_v58  ;;  %v16119_v4 = vld [vmem:[#allocation21_spill] sm:$0xff] }
 0x550   : > { %6567 = vmatprep.mubr.bf16.mxu1 %v5339_v37  ;;  %v11479_v37 = vld [vmem:[%s15936_s8 + $0x228] sm:$0xff]   ;;  %v5356_v12 = vpack.c.bf16 %v5095_v8, %v5086_v29  ;;  %v5159_v29 = vmul.f32 %v16119_v4, %v14123_v24 }
 0x551   : > { %v5345_v22 = vpack.c.bf16 %v5075_v39, %v5066_v0  ;;  %v5347_v42 = vpack.c.bf16 %v5077_v50, %v5068_v6  ;;  %v11485_v0 = vld [vmem:[%s15936_s8 + $0x208] sm:$0xff]   ;;  %v5121_v39 = vmul.f32 %v13823_v31, %v14116_v14  ;;  %v11486_v31 = vld [vmem:[%s15936_s8 + $0x200] sm:$0xff]   ;;  %v5129_v6 = vmul.f32 %v13768_v15, %v14138_v35 }
 0x552   : > { %v9278_v50 = vmul.f32 -1.442695, %v13598_v62  ;;  %v5131_v62 = vmul.f32 %v13787_v49, %v14143_v27  ;;  %v5147_v49 = vmul.f32 %v13816_v59, %v14138_v35 }
 0x553   : > { %6407 = vmatmul.mubr.bf16.vlgmr.msra.gmra.mxu0 %v5336_v11  ;;  %v11482_v11 = vld [vmem:[%s15936_s8 + $0x218] sm:$0xff]  }
 0x554   : > { %11133 = vmatpush3.bf16.msra.mxu0 %v13810_v17  ;;  %6414 = vmatprep.mubr.bf16.mxu0 %v5346_v2  ;;  %v5085_v17 = vmul.f32 %v13735_v30, %v14116_v14  ;;  %v5096_v30 = vmul.f32 %v13728_v32, %v14123_v24  ;;  %v5105_v2 = vmul.f32 %v13764_v45, %v14123_v24  ;;  %11592 = vpow2.f32 %v9278_v50  ;;  %v16127_v50 = vld [vmem:[#allocation33_spill] sm:$0xff] }
 0x555   : > { %11134 = vmatprep.subr.bf16.mxu0 %v11478_v56 }
 0x556   : > { %v5355_v19 = vpack.c.bf16 %v5094_v47, %v5085_v17  ;;  %v5357_v38 = vpack.c.bf16 %v5096_v30, %v5087_v52  ;;  %v5123_v17 = vmul.f32 %v13812_v53, %v14123_v24  ;;  %v5132_v47 = vmul.f32 %v13816_v59, %v14123_v24  ;;  %v11487_v52 = vld [vmem:[%s15937_s9 + $0x78] sm:$0xff]  }
 0x557   : > { %6568 = vmatmul.mubr.bf16.vlgmr.msra.gmra.mxu1 %v5338_v33  ;;  %v5114_v33 = vmul.f32 %v13768_v15, %v14123_v24  ;;  %v5139_v30 = vmul.f32 %v13864_v13, %v14116_v14 }
 0x558   : > { %6575 = vmatprep.mubr.bf16.mxu1 %v5348_v23  ;;  %11181 = vmatpush3.bf16.msra.mxu1 %v6921_v63  ;;  %v5111_v63 = vmul.f32 %v13728_v32, %v14138_v35  ;;  %v5130_v23 = vmul.f32 %v13827_v51, %v14116_v14  ;;  %v5113_v32 = vmul.f32 %v13747_v55, %v14143_v27 }
 0x559   : > { %11135 = vmatpush3.bf16.msra.mxu0 %v11478_v56  ;;  %11182 = vmatprep.subr.bf16.mxu1 %v11484_v9  ;;  %v5354_v56 = vpack.c.bf16 %v5093_v46, %v5084_v26  ;;  %v5120_v55 = vmul.f32 %v13764_v45, %v14138_v35  ;;  %v5122_v45 = vmul.f32 %v13783_v36, %v14143_v27 }
 0x55a   : > { %11136 = vmatprep.subr.bf16.mxu0 %v11479_v37  ;;  %v5373_v51 = vpack.c.bf16 %v5130_v23, %v5121_v39  ;;  %v5365_v10 = vpack.c.bf16 %v5113_v32, %v5104_v7  ;;  %v5138_v36 = vmul.f32 %v13812_v53, %v14138_v35  ;;  %v5157_v26 = vmul.f32 %v13899_v25, %v14116_v14  ;;  %v16118_v53 = vld [vmem:[#allocation17_spill] sm:$0xff]  ;;  %v16120_v25 = vld [vmem:[#allocation22_spill] sm:$0xff]  ;;  %v16124_v39 = vld [vmem:[#allocation20_spill] sm:$0xff] }
 0x55b   : > { %6415 = vmatmul.mubr.bf16.gmra.mxu0 %v5345_v22  ;;  %v5375_v22 = vpack.c.bf16 %v5132_v47, %v5123_v17  ;;  %v5372_v15 = vpack.c.bf16 %v5129_v6, %v5120_v55  ;;  %v5166_v46 = vmul.f32 %v13903_v40, %v14116_v14  ;;  %v5149_v58 = vmul.f32 %v16118_v53, %v14143_v27 }
 0x55c   : > { %11183 = vmatpush3.bf16.msra.mxu1 %v11484_v9  ;;  %6422 = vmatprep.mubr.bf16.mxu0 %v5355_v19  ;;  %v5366_v9 = vpack.c.bf16 %v5114_v33, %v5105_v2  ;;  %v5150_v19 = vmul.f32 %v13857_v20, %v14123_v24  ;;  %v5381_v59 = vpack.c.bf16 %v5147_v49, %v5138_v36  ;;  %v16132_v36 = vld [vmem:[#allocation32_spill] sm:$0xff] }
 0x55d   : > { %11137 = vmatpush3.bf16.msra.mxu0 %v11479_v37  ;;  %11184 = vmatprep.subr.bf16.mxu1 %v11488_v18  ;;  %v5363_v37 = vpack.c.bf16 %v5111_v63, %v5102_v34  ;;  %v5168_v8 = vmul.f32 %v16120_v25, %v14123_v24  ;;  %v5391_v40 = vpack.c.bf16 %v5166_v46, %v5157_v26  ;;  %v16122_v34 = vld [vmem:[#allocation28_spill] sm:$0xff] }
 0x55e   : > { %11138 = vmatprep.subr.bf16.mxu0 %v11480_v21  ;;  %v5156_v2 = vmul.f32 %v13853_v28, %v14138_v35  ;;  %v5184_v63 = vmul.f32 %v16122_v34, %v14116_v14  ;;  %v5167_v23 = vmul.f32 %v16124_v39, %v14143_v27  ;;  %v5183_v55 = vmul.f32 %v16120_v25, %v14138_v35 }
 0x55f   : > { %6576 = vmatmul.mubr.bf16.gmra.mxu1 %v5347_v42  ;;  %v5393_v33 = vpack.c.bf16 %v5168_v8, %v5159_v29  ;;  %v5204_v49 = vmul.f32 %v16132_v36, %v14123_v24  ;;  %v16134_v29 = vld [vmem:[#allocation29_spill] sm:$0xff]  ;;  %v16135_v8 = vld [vmem:[#allocation30_spill] sm:$0xff] }
 0x560   : > { %6583 = vmatprep.mubr.bf16.mxu1 %v5357_v38  ;;  %11185 = vmatpush3.bf16.msra.mxu1 %v11488_v18  ;;  %v5141_v18 = vmul.f32 %v13853_v28, %v14123_v24  ;;  %v11498_v38 = vld [vmem:[%s15937_s9 + $0xf8] sm:$0xff]   ;;  %v5194_v25 = vmul.f32 %v16134_v29, %v14143_v27 }
 0x561   : > { %11139 = vmatpush3.bf16.msra.mxu0 %v11480_v21  ;;  %v5148_v21 = vmul.f32 %v13868_v16, %v14116_v14  ;;  %v5374_v16 = vpack.c.bf16 %v5131_v62, %v5122_v45  ;;  %10590 = vmatprep.subr.bf16.mxu1 %v11498_v38  ;;  %v16130_v62 = vld [vmem:[#allocation24_spill] sm:$0xff]  ;;  %v16148_v29 = vld [vmem:[#allocation51_spill] sm:$0xff] }
 0x562   : > { %11140 = vmatprep.subr.bf16.mxu0 %v11482_v11  ;;  %v5384_v42 = vpack.c.bf16 %v5150_v19, %v5141_v18 }
 0x563   : > { %6423 = vmatmul.mubr.bf16.gmra.mxu0 %v5354_v56  ;;  %v5382_v13 = vpack.c.bf16 %v5148_v21, %v5139_v30  ;;  %v16129_v21 = vld [vmem:[#allocation23_spill] sm:$0xff] }
 0x564   : > { %6430 = vmatprep.mubr.bf16.mxu0 %v5364_v41  ;;  %v16121_v41 = vld [vmem:[#allocation27_spill] sm:$0xff]  ;;  %v5176_v45 = vmul.f32 %v16129_v21, %v14143_v27 }
 0x565   : > { %11141 = vmatpush3.bf16.msra.mxu0 %v11482_v11  ;;  %v5140_v11 = vmul.f32 %v13834_v54, %v14143_v27  ;;  %v5165_v54 = vmul.f32 %v13857_v20, %v14138_v35  ;;  %v16125_v20 = vld [vmem:[#allocation25_spill] sm:$0xff]  ;;  %v16146_v21 = vld [vmem:[#allocation43_spill] sm:$0xff] }
 0x566   : > { %11142 = vmatprep.subr.bf16.mxu0 %v11483_v60  ;;  %v5177_v32 = vmul.f32 %v16125_v20, %v14123_v24 }
 0x567   : > { %6584 = vmatmul.mubr.bf16.gmra.mxu1 %v5356_v12  ;;  %v5383_v56 = vpack.c.bf16 %v5149_v58, %v5140_v11  ;;  %v5175_v12 = vmul.f32 %v16121_v41, %v14116_v14  ;;  %v5390_v7 = vpack.c.bf16 %v5165_v54, %v5156_v2  ;;  %v5192_v11 = vmul.f32 %v16125_v20, %v14138_v35  ;;  %v16136_v54 = vld [vmem:[#allocation37_spill] sm:$0xff] }
 0x568   : > { %6591 = vmatprep.mubr.bf16.mxu1 %v5366_v9  ;;  %v16123_v9 = vld [vmem:[#allocation18_spill] sm:$0xff]  ;;  %v5211_v58 = vmul.f32 %v13985_v43, %v14116_v14 }
 0x569   : > { %11143 = vmatpush3.bf16.msra.mxu0 %v11483_v60  ;;  %v11593_v60 = vpop.eup %11592  ;;  %v5400_v47 = vpack.c.bf16 %v5184_v63, %v5175_v12  ;;  %v16138_v12 = vld [vmem:[#allocation19_spill] sm:$0xff]  ;;  %v16139_v63 = vld [vmem:[#allocation12_spill] sm:$0xff] }
 0x56a   : > { %11144 = vmatprep.subr.bf16.mxu0 %v11485_v0  ;;  %v4932_v28 = vadd.f32 1.0, %v11593_v60  ;;  %v16137_v60 = vld [vmem:[#allocation38_spill] sm:$0xff]  ;;  %v9250_v34 = vmul.f32 -1.442695, %v16138_v12 }
 0x56b   : > { %6431 = vmatmul.mubr.bf16.gmra.mxu0 %v5363_v37  ;;  %v16126_v37 = vld [vmem:[#allocation26_spill] sm:$0xff]  ;;  %v5222_v41 = vmul.f32 %v16137_v60, %v14123_v24 }
 0x56c   : > { %6438 = vmatprep.mubr.bf16.mxu0 %v5373_v51  ;;  %v5186_v17 = vmul.f32 %v16126_v37, %v14123_v24  ;;  %v14288_v51 = vpop.f32.mrf.mxu0  ;;  %11594 = vrcp.f32 %v4932_v28  ;;  %v5201_v53 = vmul.f32 %v16126_v37, %v14138_v35  ;;  %v5219_v28 = vmul.f32 %v16132_v36, %v14138_v35  ;;  %v3437_v12 = vld [vmem:[#allocation3 + $0xda] sm:$0xff] }
 0x56d   : > { %11145 = vmatpush3.bf16.msra.mxu0 %v11485_v0  ;;  %v5158_v0 = vmul.f32 %v16123_v9, %v14143_v27  ;;  %v9264_v9 = vmul.f32 -1.442695, %v16139_v63  ;;  %11596 = vpow2.f32 %v9250_v34  ;;  %v3438_v34 = vld [vmem:[#allocation3 + $0xe2] sm:$0xff]  ;;  %v3439_v63 = vld [vmem:[#allocation3 + $0xf2] sm:$0xff] }
 0x56e   : > { %11146 = vmatprep.subr.bf16.mxu0 %v11486_v31  ;;  %v5402_v6 = vpack.c.bf16 %v5186_v17, %v5177_v32  ;;  %v14302_v18 = vpop.f32.mrf.mxu0  ;;  %v5408_v2 = vpack.c.bf16 %v5201_v53, %v5192_v11  ;;  %v16141_v32 = vld [vmem:[#allocation45_spill] sm:$0xff]  ;;  %v3435_v53 = vld [vmem:[#allocation3 + $0xc2] sm:$0xff] }
 0x56f   : > { %6592 = vmatmul.mubr.bf16.gmra.mxu1 %v5365_v10  ;;  %v5174_v10 = vmul.f32 %v16119_v4, %v14138_v35  ;;  %v5238_v37 = vmul.f32 %v16141_v32, %v14116_v14  ;;  %11598 = vpow2.f32 %v9264_v9 }
 0x570   : > { %6599 = vmatprep.mubr.bf16.mxu1 %v5375_v22  ;;  %v5193_v22 = vmul.f32 %v16127_v50, %v14116_v14  ;;  %v14308_v46 = vpop.f32.mrf.mxu0 }
 0x571   : > { %11147 = vmatpush3.bf16.msra.mxu0 %v11486_v31  ;;  %v5392_v31 = vpack.c.bf16 %v5167_v23, %v5158_v0  ;;  %v5399_v19 = vpack.c.bf16 %v5183_v55, %v5174_v10  ;;  %v16143_v10 = vld [vmem:[#allocation36_spill] sm:$0xff] }
 0x572   : > { %10478 = vmatprep.subr.bf16.mxu0 %v11487_v52  ;;  %v16128_v52 = vld [vmem:[#allocation34_spill] sm:$0xff]  ;;  %v5221_v55 = vmul.f32 %v16143_v10, %v14143_v27 }
 0x573   : > { %6439 = vmatmul.mubr.bf16.gmra.mxu0 %v5372_v15  ;;  %v5202_v30 = vmul.f32 %v16128_v52, %v14116_v14  ;;  %v5185_v15 = vmul.f32 %v16130_v62, %v14143_v27  ;;  %v16145_v52 = vld [vmem:[#allocation42_spill] sm:$0xff] }
 0x574   : > { %6446 = vmatprep.mubr.bf16.mxu0 %v5382_v13  ;;  %v16131_v13 = vld [vmem:[#allocation31_spill] sm:$0xff] }
 0x575   : > { %v5401_v26 = vpack.c.bf16 %v5185_v15, %v5176_v45  ;;  %v5210_v23 = vmul.f32 %v16131_v13, %v14138_v35  ;;  %v14351_v45 = vmul.f32 %v16146_v21, %v14123_v24 }
 0x577   : > { %6600 = vmatmul.mubr.bf16.gmra.mxu1 %v5374_v16  ;;  %v5195_v16 = vmul.f32 %v16131_v13, %v14123_v24  ;;  %v5417_v13 = vpack.c.bf16 %v5219_v28, %v5210_v23  ;;  %v3440_v23 = vld [vmem:[#allocation3 + $0xfa] sm:$0xff]  ;;  %v3441_v28 = vld [vmem:[#allocation3 + $0x10a] sm:$0xff] }
 0x578   : > { %6607 = vmatprep.mubr.bf16.mxu1 %v5384_v42  ;;  %v5409_v42 = vpack.c.bf16 %v5202_v30, %v5193_v22  ;;  %v14347_v30 = vmul.f32 %v16145_v52, %v14123_v24 }
 0x579   : > { %v5411_v38 = vpack.c.bf16 %v5204_v49, %v5195_v16  ;;  %v11595_v43 = vpop.eup %11594 }
 0x57b   : > { %6447 = vmatmul.mubr.bf16.gmra.mxu0 %v5381_v59  ;;  %v16133_v59 = vld [vmem:[#allocation39_spill] sm:$0xff] }
 0x57c   : > { %6454 = vmatprep.mubr.bf16.mxu0 %v5391_v40  ;;  %v5220_v4 = vmul.f32 %v16133_v59, %v14116_v14  ;;  %v5203_v40 = vmul.f32 %v16135_v8, %v14143_v27  ;;  %v3436_v8 = vld [vmem:[#allocation3 + $0xca] sm:$0xff] }
 0x57e   : > { %v5418_v0 = vpack.c.bf16 %v5220_v4, %v5211_v58  ;;  %v5410_v17 = vpack.c.bf16 %v5203_v40, %v5194_v25  ;;  %v5429_v4 = vpack.c.bf16 %v14351_v45, %v14347_v30  ;;  %v14369_v25 = vmul.f32 %v16148_v29, %v14116_v14 }
 0x57f   : > { %6608 = vmatmul.mubr.bf16.gmra.mxu1 %v5383_v56  ;;  %v14322_v56 = vpop.f32.mrf.mxu0 }
 0x580   : > { %6615 = vmatprep.mubr.bf16.mxu1 %v5393_v33  ;;  %v5213_v33 = vmul.f32 %v16136_v54, %v14123_v24 }
 0x582   : > { %v5420_v22 = vpack.c.bf16 %v5222_v41, %v5213_v33  ;;  %v16150_v33 = vld [vmem:[#allocation40_spill] sm:$0xff]  ;;  %v16151_v41 = vld [vmem:[#allocation41_spill] sm:$0xff] }
 0x583   : > { %6455 = vmatmul.mubr.bf16.gmra.mxu0 %v5390_v7  ;;  %v16140_v7 = vld [vmem:[#allocation44_spill] sm:$0xff] }
 0x584   : > { %6462 = vmatprep.mubr.bf16.mxu0 %v5400_v47  ;;  %v5229_v20 = vmul.f32 %v16140_v7, %v14116_v14  ;;  %v16142_v47 = vld [vmem:[#allocation35_spill] sm:$0xff]  ;;  %v3442_v7 = vld [vmem:[#allocation3 + $0x112] sm:$0xff] }
 0x586   : > { %v5427_v16 = vpack.c.bf16 %v5238_v37, %v5229_v20 }
 0x587   : > { %6616 = vmatmul.mubr.bf16.gmra.mxu1 %v5392_v31  ;;  %v5212_v31 = vmul.f32 %v16142_v47, %v14143_v27  ;;  %v3443_v47 = vld [vmem:[#allocation3 + $0x122] sm:$0xff] }
 0x588   : > { %6623 = vmatprep.mubr.bf16.mxu1 %v5402_v6  ;;  %v14343_v6 = vrot.slane %v11595_v43, %v13600_v48  ;;  %v14380_v43 = vmul.f32 %v16151_v41, %v14143_v27  ;;  %v3449_v41 = vld [vmem:[#allocation3 + $0x16a] sm:$0xff] }
 0x589   : > { %v5419_v49 = vpack.c.bf16 %v5221_v55, %v5212_v31  ;;  %v3444_v31 = vld [vmem:[#allocation3 + $0x12a] sm:$0xff] }
 0x58a   : > { %16144 = vst [vmem:[#allocation17_spill] sm:$0xff] %v14343_v6  ;;  %v14372_v40 = vmul.f32 %v14343_v6, %v3435_v53  ;;  %v14383_v9 = vmul.f32 %v14343_v6, %v3436_v8  ;;  %v14388_v20 = vmul.f32 %v14343_v6, %v3437_v12  ;;  %v14391_v32 = vmul.f32 %v14343_v6, %v3438_v34  ;;  %v3447_v53 = vld [vmem:[#allocation3 + $0x152] sm:$0xff] }
 0x58b   : > { %6463 = vmatmul.mubr.bf16.gmra.mxu0 %v5399_v19  ;;  %v14394_v37 = vmul.f32 %v14343_v6, %v3439_v63  ;;  %v14399_v55 = vmul.f32 %v14343_v6, %v3440_v23  ;;  %v3450_v12 = vld [vmem:[#allocation3 + $0x172] sm:$0xff]  ;;  %v14430_v63 = vmul.f32 %v14343_v6, %v3447_v53 }
 0x58c   : > { %6470 = vmatprep.mubr.bf16.mxu0 %v5409_v42  ;;  %v14355_v42 = vmul.f32 %v16136_v54, %v14138_v35  ;;  %16149 = vst [vmem:[#allocation21_spill] sm:$0xff] %v14372_v40  ;;  %16152 = vst [vmem:[#allocation22_spill] sm:$0xff] %v14383_v9  ;;  %v16164_v23 = vld [vmem:[#allocation48_spill] sm:$0xff]  ;;  %v3295_v40 = vld [vmem:[#allocation3 + $0x19] sm:$0xff] }
 0x58d   : > { %16153 = vst [vmem:[#allocation27_spill] sm:$0xff] %v14388_v20  ;;  %16154 = vst [vmem:[#allocation28_spill] sm:$0xff] %v14391_v32  ;;  %v11523_v9 = vld [vmem:[%s15937_s9 + $0x130] sm:$0xff]  }
 0x58e   : > { %16155 = vst [vmem:[#allocation18_spill] sm:$0xff] %v14394_v37  ;;  %16156 = vst [vmem:[#allocation20_spill] sm:$0xff] %v14399_v55 }
 0x58f   : > { %6624 = vmatmul.mubr.bf16.gmra.mxu1 %v5401_v26  ;;  %v14359_v26 = vmul.f32 %v16137_v60, %v14138_v35  ;;  %v14376_v60 = vmul.f32 %v16150_v33, %v14143_v27  ;;  %v3448_v33 = vld [vmem:[#allocation3 + $0x15a] sm:$0xff]  ;;  %16163 = vst [vmem:[#allocation31_spill] sm:$0xff] %v14430_v63 }
 0x590   : > { %6631 = vmatprep.mubr.bf16.mxu1 %v5411_v38  ;;  %v16147_v38 = vld [vmem:[#allocation50_spill] sm:$0xff] }
 0x591   : > { %v14363_v11 = vmul.f32 %v16147_v38, %v14116_v14  ;;  %v3446_v38 = vld [vmem:[#allocation3 + $0x142] sm:$0xff] }
 0x592   : > { %v14427_v34 = vmul.f32 %v14343_v6, %v3446_v38 }
 0x593   : > { %v10003_v39 = vpop.f32.mrf.mxu0  ;;  %6471 = vmatmul.mubr.bf16.gmra.mxu0 %v5408_v2 }
 0x594   : > { %6478 = vmatprep.mubr.bf16.mxu0 %v5418_v0  ;;  %16162 = vst [vmem:[#allocation24_spill] sm:$0xff] %v14427_v34  ;;  %v11768_v34 = vld [vmem:[#allocation2 + $0xaa] sm:$0xff] }
 0x595   : > { %v10004_v50 = vpop.f32.mrf.mxu0 }
 0x596   : > { %v10005_v62 = vadd.f32 %v10004_v50, %v10003_v39  ;;  %v14402_v50 = vmul.f32 %v14343_v6, %v3441_v28  ;;  %v5249_v28 = vmul.f32 %v16164_v23, %v14123_v24 }
 0x597   : > { %v10115_v15 = vpop.f32.mrf.mxu1  ;;  %6632 = vmatmul.mubr.bf16.gmra.mxu1 %v5410_v17  ;;  %v10006_v19 = vpop.f32.mrf.mxu0 }
 0x598   : > { %6639 = vmatprep.mubr.bf16.mxu1 %v5420_v22  ;;  %16157 = vst [vmem:[#allocation25_spill] sm:$0xff] %v14402_v50  ;;  %v14405_v22 = vmul.f32 %v14343_v6, %v3442_v7  ;;  %v14441_v7 = vmul.f32 %v14343_v6, %v3450_v12  ;;  %v11597_v12 = vpop.eup %11596 }
 0x599   : > { %v10116_v36 = vpop.f32.mrf.mxu1  ;;  %v10007_v58 = vpop.f32.mrf.mxu0 }
 0x59a   : > { %v10117_v59 = vadd.f32 %v10116_v36, %v10115_v15  ;;  %v10008_v2 = vadd.f32 %v10007_v58, %v10006_v19  ;;  %16158 = vst [vmem:[#allocation26_spill] sm:$0xff] %v14405_v22  ;;  %v14410_v19 = vmul.f32 %v14343_v6, %v3443_v47  ;;  %16167 = vst [vmem:[#allocation29_spill] sm:$0xff] %v14441_v7  ;;  %v11767_v7 = vld [vmem:[%s12056_s26 + $0x48] sm:$0xff] }
 0x59b   : > { %v10118_v54 = vpop.f32.mrf.mxu1  ;;  %v10009_v39 = vpop.f32.mrf.mxu0  ;;  %6479 = vmatmul.mubr.bf16.gmra.mxu0 %v5417_v13  ;;  %v14413_v13 = vmul.f32 %v14343_v6, %v3444_v31  ;;  %v5426_v31 = vpack.c.bf16 %v14359_v26, %v14355_v42  ;;  %v11791_v22 = vld [vmem:[%s12056_s26 + $0xa8] sm:$0xff] }
 0x59c   : > { %v14385_v0 = vadd.f32 %v10117_v59, %v10005_v62  ;;  %6486 = vmatprep.mubr.bf16.mxu0 %v5427_v16  ;;  %v3445_v62 = vld [vmem:[#allocation3 + $0x13a] sm:$0xff]  ;;  %16159 = vst [vmem:[#allocation33_spill] sm:$0xff] %v14410_v19  ;;  %v11599_v26 = vpop.eup %11598 }
 0x59d   : > { %v10119_v17 = vpop.f32.mrf.mxu1  ;;  %v10010_v30 = vpop.f32.mrf.mxu0  ;;  %16160 = vst [vmem:[#allocation34_spill] sm:$0xff] %v14413_v13  ;;  %v14420_v29 = vmul.f32 %v14343_v6, %v3445_v62 }
 0x59e   : > { %v10120_v45 = vadd.f32 %v10119_v17, %v10118_v54  ;;  %v10011_v16 = vadd.f32 %v10010_v30, %v10009_v39  ;;  %v16168_v30 = vld [vmem:[#allocation49_spill] sm:$0xff] }
 0x59f   : > { %v10121_v36 = vpop.f32.mrf.mxu1  ;;  %6640 = vmatmul.mubr.bf16.gmra.mxu1 %v5419_v49  ;;  %16161 = vst [vmem:[#allocation23_spill] sm:$0xff] %v14420_v29  ;;  %v10012_v54 = vpop.f32.mrf.mxu0 }
 0x5a0   : > { %v14422_v8 = vadd.f32 %v10120_v45, %v10008_v2  ;;  %6647 = vmatprep.mubr.bf16.mxu1 %v5429_v4  ;;  %v14435_v2 = vmul.f32 %v14343_v6, %v3448_v33  ;;  %v14438_v4 = vmul.f32 %v14343_v6, %v3449_v41  ;;  %v5258_v45 = vmul.f32 %v16168_v30, %v14123_v24 }
 0x5a1   : > { %v10122_v39 = vpop.f32.mrf.mxu1  ;;  %v10013_v17 = vpop.f32.mrf.mxu0  ;;  %v5436_v33 = vpack.c.bf16 %v14369_v25, %v14363_v11  ;;  %v5246_v25 = vmul.f32 %v16145_v52, %v14138_v35 }
 0x5a2   : > { %16165 = vst [vmem:[#allocation32_spill] sm:$0xff] %v14435_v2  ;;  %16166 = vst [vmem:[#allocation39_spill] sm:$0xff] %v14438_v4  ;;  %v10123_v47 = vadd.f32 %v10122_v39, %v10121_v36  ;;  %v10014_v38 = vadd.f32 %v10013_v17, %v10012_v54  ;;  %v5428_v54 = vpack.c.bf16 %v14380_v43, %v14376_v60 }
 0x5a3   : > { %v10124_v53 = vpop.f32.mrf.mxu1  ;;  %v10015_v42 = vpop.f32.mrf.mxu0  ;;  %6487 = vmatmul.mubr.bf16.gmra.mxu0 %v5426_v31  ;;  %v5438_v11 = vpack.c.bf16 %v5258_v45, %v5249_v28  ;;  %v5255_v36 = vmul.f32 %v16146_v21, %v14138_v35  ;;  %v5274_v31 = vmul.f32 %v14075_v1, %v14116_v14  ;;  %v16170_v28 = vld [vmem:[#allocation47_spill] sm:$0xff] }
 0x5a4   : > { %v14455_v39 = vadd.f32 %v10123_v47, %v10011_v16  ;;  %6494 = vmatprep.mubr.bf16.mxu0 %v5436_v33  ;;  %v5265_v47 = vmul.f32 %v14071_v5, %v14116_v14  ;;  %v5257_v21 = vmul.f32 %v16170_v28, %v14143_v27 }
 0x5a5   : > { %v10125_v49 = vpop.f32.mrf.mxu1  ;;  %v10016_v17 = vpop.f32.mrf.mxu0 }
 0x5a6   : > { %v10126_v62 = vadd.f32 %v10125_v49, %v10124_v53  ;;  %v10017_v41 = vadd.f32 %v10016_v17, %v10015_v42  ;;  %v16169_v49 = vld [vmem:[#allocation46_spill] sm:$0xff]  ;;  %v5435_v42 = vpack.c.bf16 %v5255_v36, %v5246_v25  ;;  %v16172_v17 = vld [vmem:[#allocation55_spill] sm:$0xff]  ;;  %v5445_v59 = vpack.c.bf16 %v5274_v31, %v5265_v47 }
 0x5a7   : > { %v10127_v16 = vpop.f32.mrf.mxu1  ;;  %6648 = vmatmul.mubr.bf16.gmra.mxu1 %v5428_v54  ;;  %v10018_v60 = vpop.f32.mrf.mxu0  ;;  %v5248_v52 = vmul.f32 %v16169_v49, %v14143_v27  ;;  %v16171_v54 = vld [vmem:[#allocation54_spill] sm:$0xff]  ;;  %v5276_v1 = vmul.f32 %v16172_v17, %v14123_v24  ;;  %v5264_v36 = vmul.f32 %v16164_v23, %v14138_v35  ;;  %v5273_v25 = vmul.f32 %v16168_v30, %v14138_v35  ;;  %v16174_v23 = vld [vmem:[#allocation52_spill] sm:$0xff]  ;;  %v16175_v30 = vld [vmem:[#allocation53_spill] sm:$0xff] }
 0x5a8   : > { %v14467_v33 = vadd.f32 %v10126_v62, %v10014_v38  ;;  %6655 = vmatprep.mubr.bf16.mxu1 %v5438_v11  ;;  %v5267_v5 = vmul.f32 %v16171_v54, %v14123_v24 }
 0x5a9   : > { %v10128_v43 = vpop.f32.mrf.mxu1  ;;  %v10019_v45 = vpop.f32.mrf.mxu0  ;;  %v5437_v15 = vpack.c.bf16 %v5257_v21, %v5248_v52  ;;  %v4114_v21 = vadd.f32 1.0, %v11597_v12 }
 0x5aa   : > { %v10129_v53 = vadd.f32 %v10128_v43, %v10127_v16  ;;  %v10020_v62 = vadd.f32 %v10019_v45, %v10018_v60  ;;  %v5447_v16 = vpack.c.bf16 %v5276_v1, %v5267_v5  ;;  %v4515_v43 = vadd.f32 1.0, %v11599_v26 }
 0x5ab   : > { %v10130_v38 = vpop.f32.mrf.mxu1  ;;  %v10021_v58 = vpop.f32.mrf.mxu0  ;;  %6495 = vmatmul.mubr.bf16.gmra.mxu0 %v5435_v42  ;;  %v5266_v42 = vmul.f32 %v16174_v23, %v14143_v27  ;;  %v5444_v5 = vpack.c.bf16 %v5273_v25, %v5264_v36 }
 0x5ac   : > { %v14477_v11 = vadd.f32 %v10129_v53, %v10017_v41  ;;  %6502 = vmatprep.mubr.bf16.mxu0 %v5445_v59  ;;  %v5283_v41 = vmul.f32 %v14099_v3, %v14116_v14  ;;  %v16173_v59 = vld [vmem:[#allocation59_spill] sm:$0xff]  ;;  %v16176_v3 = vld [vmem:[#allocation57_spill] sm:$0xff]  ;;  %11600 = vrcp.f32 %v4515_v43  ;;  %v5291_v43 = vmul.f32 %v16172_v17, %v14138_v35 }
 0x5ad   : > { %v10131_v49 = vpop.f32.mrf.mxu1  ;;  %v10022_v28 = vpop.f32.mrf.mxu0  ;;  %v5292_v47 = vmul.f32 %v16173_v59, %v14116_v14  ;;  %v5285_v1 = vmul.f32 %v16176_v3, %v14123_v24  ;;  %11602 = vrcp.f32 %v4114_v21 }
 0x5ae   : > { %v10132_v10 = vadd.f32 %v10131_v49, %v10130_v38  ;;  %v10023_v60 = vadd.f32 %v10022_v28, %v10021_v58  ;;  %v5275_v58 = vmul.f32 %v16175_v30, %v14143_v27  ;;  %v16177_v38 = vld [vmem:[#allocation58_spill] sm:$0xff] }
 0x5af   : > { %v10133_v45 = vpop.f32.mrf.mxu1  ;;  %6656 = vmatmul.mubr.bf16.gmra.mxu1 %v5437_v15  ;;  %v10024_v52 = vpop.f32.mrf.mxu0  ;;  %v5454_v12 = vpack.c.bf16 %v5292_v47, %v5283_v41  ;;  %v5310_v41 = vmul.f32 %v14133_v44, %v14116_v14 }
 0x5b0   : > { %v14487_v31 = vadd.f32 %v10132_v10, %v10020_v62  ;;  %6663 = vmatprep.mubr.bf16.mxu1 %v5447_v16  ;;  %v5294_v10 = vmul.f32 %v16177_v38, %v14123_v24  ;;  %v5446_v23 = vpack.c.bf16 %v5275_v58, %v5266_v42  ;;  %v16178_v58 = vld [vmem:[#allocation56_spill] sm:$0xff] }
 0x5b1   : > { %v10134_v53 = vpop.f32.mrf.mxu1  ;;  %v10025_v26 = vpop.f32.mrf.mxu0  ;;  %v5293_v17 = vmul.f32 %v16178_v58, %v14143_v27 }
 0x5b2   : > { %v10135_v15 = vadd.f32 %v10134_v53, %v10133_v45  ;;  %v10026_v62 = vadd.f32 %v10025_v26, %v10024_v52  ;;  %v5456_v25 = vpack.c.bf16 %v5294_v10, %v5285_v1  ;;  %v5282_v53 = vmul.f32 %v16171_v54, %v14138_v35  ;;  %v11741_v1 = vld [vmem:[#allocation2 + $0x181] sm:$0xff]  ;;  %v11742_v10 = vld [vmem:[#allocation2 + $0x189] sm:$0xff] }
 0x5b3   : > { %v10136_v49 = vpop.f32.mrf.mxu1  ;;  %v10027_v16 = vpop.f32.mrf.mxu0  ;;  %6503 = vmatmul.mubr.bf16.gmra.mxu0 %v5444_v5  ;;  %v5284_v54 = vmul.f32 %v14079_v57, %v14143_v27  ;;  %v5312_v44 = vmul.f32 %v11742_v10, %v14123_v24 }
 0x5b4   : > { %v14497_v28 = vadd.f32 %v10135_v15, %v10023_v60  ;;  %6510 = vmatprep.mubr.bf16.mxu0 %v5454_v12  ;;  %v5301_v60 = vmul.f32 %v14129_v61, %v14116_v14  ;;  %v5453_v5 = vpack.c.bf16 %v5291_v43, %v5282_v53  ;;  %v5303_v61 = vmul.f32 %v11741_v1, %v14123_v24 }
 0x5b5   : > { %v10137_v59 = vpop.f32.mrf.mxu1  ;;  %v10028_v45 = vpop.f32.mrf.mxu0  ;;  %v5300_v53 = vmul.f32 %v16176_v3, %v14138_v35  ;;  %v5309_v43 = vmul.f32 %v16177_v38, %v14138_v35  ;;  %v16179_v38 = vld [vmem:[#allocation60_spill] sm:$0xff] }
 0x5b6   : > { %v10138_v36 = vadd.f32 %v10137_v59, %v10136_v49  ;;  %v10029_v52 = vadd.f32 %v10028_v45, %v10027_v16  ;;  %v5463_v12 = vpack.c.bf16 %v5310_v41, %v5301_v60  ;;  %v14521_v60 = vld [vmem:[#allocation2 + $0x182] sm:$0xff]  ;;  %v14525_v41 = vld [vmem:[#allocation2 + $0x18a] sm:$0xff] }
 0x5b7   : > { %v10139_v30 = vpop.f32.mrf.mxu1  ;;  %6664 = vmatmul.mubr.bf16.gmra.mxu1 %v5446_v23  ;;  %v10030_v21 = vpop.f32.mrf.mxu0  ;;  %v5455_v23 = vpack.c.bf16 %v5293_v17, %v5284_v54 }
 0x5b8   : > { %v14507_v47 = vadd.f32 %v10138_v36, %v10026_v62  ;;  %6671 = vmatprep.mubr.bf16.mxu1 %v5456_v25  ;;  %v5465_v25 = vpack.c.bf16 %v5312_v44, %v5303_v61 }
 0x5b9   : > { %v10140_v42 = vpop.f32.mrf.mxu1  ;;  %v10031_v26 = vpop.f32.mrf.mxu0 }
 0x5ba   : > { %v10141_v15 = vadd.f32 %v10140_v42, %v10139_v30  ;;  %v10032_v62 = vadd.f32 %v10031_v26, %v10030_v21  ;;  %v5328_v42 = vmul.f32 %v14525_v41, %v14116_v14  ;;  %v11601_v54 = vpop.eup %11600  ;;  %v5302_v26 = vmul.f32 %v16179_v38, %v14143_v27 }
 0x5bb   : > { %v10142_v49 = vpop.f32.mrf.mxu1  ;;  %v10033_v59 = vpop.f32.mrf.mxu0  ;;  %6511 = vmatmul.mubr.bf16.gmra.mxu0 %v5453_v5 }
 0x5bc   : > { %v14515_v16 = vadd.f32 %v10141_v15, %v10029_v52  ;;  %6518 = vmatprep.mubr.bf16.mxu0 %v5463_v12  ;;  %v5319_v52 = vmul.f32 %v14521_v60, %v14116_v14  ;;  %v16180_v15 = vld [vmem:[#allocation61_spill] sm:$0xff]  ;;  %v11603_v61 = vpop.eup %11602  ;;  %v5462_v12 = vpack.c.bf16 %v5309_v43, %v5300_v53 }
 0x5bd   : > { %v10143_v57 = vpop.f32.mrf.mxu1  ;;  %v10034_v45 = vpop.f32.mrf.mxu0  ;;  %v5311_v5 = vmul.f32 %v16180_v15, %v14143_v27  ;;  %v11746_v14 = vld [vmem:[#allocation2 + $0x1a1] sm:$0xff]  ;;  %v14543_v15 = vrot.slane %v11603_v61, %v13600_v48 }
 0x5be   : > { %v10144_v36 = vadd.f32 %v10143_v57, %v10142_v49  ;;  %v10035_v30 = vadd.f32 %v10034_v45, %v10033_v59  ;;  %v11745_v59 = vld [vmem:[#allocation2 + $0x199] sm:$0xff] }
 0x5bf   : > { %v10145_v21 = vpop.f32.mrf.mxu1  ;;  %6672 = vmatmul.mubr.bf16.gmra.mxu1 %v5455_v23  ;;  %v10036_v3 = vpop.f32.mrf.mxu0  ;;  %v5321_v57 = vmul.f32 %v11745_v59, %v14123_v24  ;;  %v14538_v23 = vrot.slane %v11601_v54, %v13600_v48  ;;  %v5464_v43 = vpack.c.bf16 %v5311_v5, %v5302_v26  ;;  %v5327_v54 = vmul.f32 %v11742_v10, %v14138_v35  ;;  %v11748_v61 = vld [vmem:[#allocation2 + $0x3a] sm:$0xff]  ;;  %v11751_v10 = vld [vmem:[%s12056_s26 + $0x8] sm:$0xff] }
 0x5c0   : > { %v14529_v58 = vadd.f32 %v10144_v36, %v10032_v62  ;;  %6679 = vmatprep.mubr.bf16.mxu1 %v5465_v25  ;;  %v5330_v62 = vmul.f32 %v11746_v14, %v14123_v24  ;;  %v5472_v25 = vpack.c.bf16 %v5328_v42, %v5319_v52  ;;  %v5318_v24 = vmul.f32 %v11741_v1, %v14138_v35  ;;  %v11747_v42 = vld [vmem:[#allocation2 + $0x32] sm:$0xff]  ;;  %v11750_v1 = vld [vmem:[%s12056_s26] sm:$0xff] }
 0x5c1   : > { %v10146_v17 = vpop.f32.mrf.mxu1  ;;  %v10037_v44 = vpop.f32.mrf.mxu0  ;;  %v4964_v63 = vmul.f32 %v11767_v7, %v14543_v15  ;;  %v11505_v7 = vld [vmem:[%s15937_s9 + $0xa8] sm:$0xff]  }
 0x5c2   : > { %v10147_v49 = vadd.f32 %v10146_v17, %v10145_v21  ;;  %v10038_v45 = vadd.f32 %v10037_v44, %v10036_v3  ;;  %v5474_v59 = vpack.c.bf16 %v5330_v62, %v5321_v57  ;;  %v5052_v3 = vmul.f32 %v11747_v42, %v14538_v23 }
 0x5c3   : > { %v10148_v36 = vpop.f32.mrf.mxu1  ;;  %v10039_v4 = vpop.f32.mrf.mxu0  ;;  %6519 = vmatmul.mubr.bf16.gmra.mxu0 %v5462_v12  ;;  %v5061_v44 = vmul.f32 %v11748_v61, %v14538_v23  ;;  %v14551_v12 = vld [vmem:[#allocation2] sm:$0xff]  ;;  %v4956_v57 = vmul.f32 %v11751_v10, %v14543_v15 }
 0x5c4   : > { %v14540_v38 = vadd.f32 %v10147_v49, %v10035_v30  ;;  %6526 = vmatprep.mubr.bf16.mxu0 %v5472_v25  ;;  %v5320_v35 = vmul.f32 %v14551_v12, %v14143_v27 }
 0x5c5   : > { %v10149_v53 = vpop.f32.mrf.mxu1  ;;  %v10040_v21 = vpop.f32.mrf.mxu0 }
 0x5c6   : > { %v10150_v17 = vadd.f32 %v10149_v53, %v10148_v36  ;;  %v10041_v52 = vadd.f32 %v10040_v21, %v10039_v4  ;;  %v4955_v4 = vmul.f32 %v11750_v1, %v14543_v15  ;;  %v5471_v36 = vpack.c.bf16 %v5327_v54, %v5318_v24  ;;  %v11752_v1 = vld [vmem:[#allocation2 + $0x4a] sm:$0xff] }
 0x5c7   : > { %v10151_v30 = vpop.f32.mrf.mxu1  ;;  %6680 = vmatmul.mubr.bf16.gmra.mxu1 %v5464_v43  ;;  %v10042_v26 = vpop.f32.mrf.mxu0  ;;  %v5340_v53 = vpack.c.bf16 %v5061_v44, %v5052_v3  ;;  %v5070_v10 = vmul.f32 %v11752_v1, %v14538_v23  ;;  %v11490_v1 = vld [vmem:[%s15937_s9 + $0x70] sm:$0xff]  }
 0x5c8   : > { %v14549_v49 = vadd.f32 %v10150_v17, %v10038_v45  ;;  %6687 = vmatprep.mubr.bf16.mxu1 %v5474_v59  ;;  %v5473_v59 = vpack.c.bf16 %v5320_v35, %v5320_v35  ;;  %v4987_v27 = vpack.c.bf16 %v4956_v57, %v4955_v4  ;;  %v11756_v57 = vld [vmem:[%s12056_s26 + $0x10] sm:$0xff] }
 0x5c9   : > { %v10152_v5 = vpop.f32.mrf.mxu1  ;;  %v10043_v14 = vpop.f32.mrf.mxu0 }
 0x5ca   : > { %v10153_v62 = vadd.f32 %v10152_v5, %v10151_v30  ;;  %v10044_v25 = vadd.f32 %v10043_v14, %v10042_v26  ;;  %v11753_v30 = vld [vmem:[#allocation2 + $0x52] sm:$0xff]  ;;  %v11755_v26 = vld [vmem:[#allocation2 + $0x6a] sm:$0xff]  ;;  %v4957_v14 = vmul.f32 %v11756_v57, %v14543_v15 }
 0x5cb   : > { %v10154_v45 = vpop.f32.mrf.mxu1  ;;  %v10045_v21 = vpop.f32.mrf.mxu0  ;;  %6527 = vmatmul.mubr.bf16.gmra.mxu0 %v5471_v36  ;;  %v5079_v24 = vmul.f32 %v11753_v30, %v14538_v23  ;;  %v5097_v5 = vmul.f32 %v11755_v26, %v14538_v23 }
 0x5cc   : > { %v14559_v43 = vadd.f32 %v10153_v62, %v10041_v52  ;;  %11148 = vmatprep.mubr.bf16.mxu0 %v5340_v53  ;;  %v11754_v52 = vld [vmem:[#allocation2 + $0x62] sm:$0xff]  ;;  %v11757_v62 = vld [vmem:[%s12056_s26 + $0x18] sm:$0xff] }
 0x5cd   : > { %v10155_v17 = vpop.f32.mrf.mxu1  ;;  %v10046_v42 = vpop.f32.mrf.mxu0  ;;  %v5088_v44 = vmul.f32 %v11754_v52, %v14538_v23  ;;  %v4958_v36 = vmul.f32 %v11757_v62, %v14543_v15  ;;  %v11489_v53 = vld [vmem:[%s15937_s9 + $0x38] sm:$0xff]  }
 0x5ce   : > { %v10156_v61 = vadd.f32 %v10155_v17, %v10154_v45  ;;  %v10047_v54 = vadd.f32 %v10046_v42, %v10045_v21  ;;  %v11758_v42 = vld [vmem:[%s12056_s26 + $0x20] sm:$0xff] }
 0x5cf   : > { %v10157_v3 = vpop.f32.mrf.mxu1  ;;  %6688 = vmatmul.mubr.bf16.gmra.mxu1 %v5473_v59  ;;  %v10048_v4 = vpop.f32.mrf.mxu0  ;;  %v5349_v59 = vpack.c.bf16 %v5079_v24, %v5070_v10  ;;  %v5358_v26 = vpack.c.bf16 %v5097_v5, %v5088_v44  ;;  %v11499_v10 = vld [vmem:[%s15937_s9 + $0xb8] sm:$0xff]   ;;  %v4988_v24 = vpack.c.bf16 %v4958_v36, %v4957_v14  ;;  %v11502_v44 = vld [vmem:[%s15937_s9 + $0xf0] sm:$0xff]   ;;  %v11761_v14 = vld [vmem:[#allocation2 + $0x82] sm:$0xff] }
 0x5d0   : > { %v14565_v35 = vadd.f32 %v10156_v61, %v10044_v25  ;;  %11186 = vmatprep.mubr.msk.bf16.mxu1 %vm643_vm1, %v4987_v27  ;;  %v4959_v25 = vmul.f32 %v11758_v42, %v14543_v15  ;;  %v11759_v61 = vld [vmem:[%s12056_s26 + $0x28] sm:$0xff]  ;;  %v5115_v36 = vmul.f32 %v11761_v14, %v14538_v23 }
 0x5d1   : > { %v10158_v45 = vpop.f32.mrf.mxu1  ;;  %v10049_v21 = vpop.f32.mrf.mxu0  ;;  %v4960_v27 = vmul.f32 %v11759_v61, %v14543_v15  ;;  %v11762_v61 = vld [vmem:[#allocation2 + $0x92] sm:$0xff] }
 0x5d2   : > { %v10159_v17 = vadd.f32 %v10158_v45, %v10157_v3  ;;  %v10050_v30 = vadd.f32 %v10049_v21, %v10048_v4  ;;  %v11491_v45 = vld [vmem:[%s15937_s9 + $0x30] sm:$0xff]   ;;  %v11760_v21 = vld [vmem:[#allocation2 + $0x7a] sm:$0xff] }
 0x5d3   : > { %v10160_v52 = vpop.f32.mrf.mxu1  ;;  %v10051_v62 = vpop.f32.mrf.mxu0  ;;  %11149 = vmatmul.mubr.bf16.vlgmr.msra.gmra.mxu0 %v5349_v59  ;;  %v4989_v4 = vpack.c.bf16 %v4960_v27, %v4959_v25  ;;  %v5124_v25 = vmul.f32 %v11762_v61, %v14538_v23  ;;  %v11763_v27 = vld [vmem:[#allocation2 + $0x9a] sm:$0xff] }
 0x5d4   : > { %v14582_v57 = vadd.f32 %v10159_v17, %v10047_v54  ;;  %10479 = vmatpush3.bf16.msra.mxu0 %v11489_v53  ;;  %11152 = vmatprep.mubr.bf16.mxu0 %v5358_v26  ;;  %v5106_v17 = vmul.f32 %v11760_v21, %v14538_v23  ;;  %v11492_v53 = vld [vmem:[%s15937_s9 + $0x68] sm:$0xff]   ;;  %v11766_v61 = vld [vmem:[%s12056_s26 + $0x40] sm:$0xff] }
 0x5d5   : > { %v10161_v3 = vpop.f32.mrf.mxu1  ;;  %v10052_v54 = vpop.f32.mrf.mxu0  ;;  %10480 = vmatprep.subr.bf16.mxu0 %v11490_v1  ;;  %v5133_v1 = vmul.f32 %v11763_v27, %v14538_v23  ;;  %v4963_v27 = vmul.f32 %v11766_v61, %v14543_v15  ;;  %v9273_v61 = vmul.f32 -1.442695, %v14302_v18 }
 0x5d6   : > { %v10162_v5 = vadd.f32 %v10161_v3, %v10160_v52  ;;  %v10053_v59 = vadd.f32 %v10052_v54, %v10051_v62  ;;  %v11503_v62 = vld [vmem:[%s15937_s9 + $0xb0] sm:$0xff]   ;;  %v11765_v54 = vld [vmem:[%s12056_s26 + $0x38] sm:$0xff] }
 0x5d7   : > { %v10163_v42 = vpop.f32.mrf.mxu1  ;;  %11187 = vmatmul.mubr.msk.bf16.vlgmr.msra.gmra.mxu1 %vm643_vm1, %v4988_v24  ;;  %v10054_v26 = vpop.f32.mrf.mxu0  ;;  %v11764_v3 = vld [vmem:[%s12056_s26 + $0x30] sm:$0xff]  ;;  %v4962_v21 = vmul.f32 %v11765_v54, %v14543_v15 }
 0x5d8   : > { %v14601_v52 = vadd.f32 %v10162_v5, %v10050_v30  ;;  %11190 = vmatprep.mubr.msk.bf16.mxu1 %vm643_vm1, %v4989_v4  ;;  %10591 = vmatpush3.bf16.msra.mxu1 %v11499_v10  ;;  %v4961_v24 = vmul.f32 %v11764_v3, %v14543_v15  ;;  %v11493_v30 = vld [vmem:[%s15937_s9 + $0x28] sm:$0xff]   ;;  %v5367_v10 = vpack.c.bf16 %v5115_v36, %v5106_v17  ;;  %v11494_v3 = vld [vmem:[%s15937_s9 + $0x60] sm:$0xff]   ;;  %v16181_v54 = vld [vmem:[#allocation14_spill] sm:$0xff] }
 0x5d9   : > { %v10164_v14 = vpop.f32.mrf.mxu1  ;;  %10481 = vmatpush3.bf16.msra.mxu0 %v11491_v45  ;;  %10592 = vmatprep.subr.bf16.mxu1 %v11502_v44  ;;  %v10055_v5 = vpop.f32.mrf.mxu0  ;;  %v11504_v45 = vld [vmem:[%s15937_s9 + $0xe8] sm:$0xff]   ;;  %v9271_v44 = vmul.f32 -1.442695, %v16181_v54  ;;  %v5376_v17 = vpack.c.bf16 %v5133_v1, %v5124_v25  ;;  %v5142_v54 = vmul.f32 %v11768_v34, %v14538_v23  ;;  %v11508_v25 = vld [vmem:[%s15937_s9 + $0xe0] sm:$0xff]   ;;  %v11496_v34 = vld [vmem:[%s15937_s9 + $0x58] sm:$0xff]  }
 0x5da   : > { %v10165_v4 = vadd.f32 %v10164_v14, %v10163_v42  ;;  %10482 = vmatprep.subr.bf16.mxu0 %v11492_v53  ;;  %v10056_v2 = vadd.f32 %v10055_v5, %v10054_v26  ;;  %v4990_v53 = vpack.c.bf16 %v4962_v21, %v4961_v24  ;;  %v11769_v24 = vld [vmem:[#allocation2 + $0xb2] sm:$0xff]  ;;  %v11770_v5 = vld [vmem:[#allocation2 + $0xc2] sm:$0xff] }
 0x5db   : > { %v10166_v42 = vpop.f32.mrf.mxu1  ;;  %v10057_v14 = vpop.f32.mrf.mxu0  ;;  %11153 = vmatmul.mubr.bf16.gmra.mxu0 %v5367_v10  ;;  %v5151_v18 = vmul.f32 %v11769_v24, %v14538_v23  ;;  %11604 = vpow2.f32 %v9271_v44  ;;  %v11774_v24 = vld [vmem:[%s12056_s26 + $0x60] sm:$0xff] }
 0x5dc   : > { %v14625_v36 = vadd.f32 %v10165_v4, %v10053_v59  ;;  %10593 = vmatpush3.bf16.msra.mxu1 %v11503_v62  ;;  %11156 = vmatprep.mubr.bf16.mxu0 %v5376_v17  ;;  %v11495_v59 = vld [vmem:[%s15937_s9 + $0x20] sm:$0xff]   ;;  %v4991_v62 = vpack.c.bf16 %v4964_v63, %v4963_v27  ;;  %v11771_v63 = vld [vmem:[#allocation2 + $0xca] sm:$0xff]  ;;  %11606 = vpow2.f32 %v9273_v61 }
 0x5dd   : > { %v10167_v29 = vpop.f32.mrf.mxu1  ;;  %10483 = vmatpush3.bf16.msra.mxu0 %v11493_v30  ;;  %v10058_v1 = vpop.f32.mrf.mxu0  ;;  %10594 = vmatprep.subr.bf16.mxu1 %v11504_v45  ;;  %v5169_v4 = vmul.f32 %v11771_v63, %v14538_v23  ;;  %v11772_v45 = vld [vmem:[%s12056_s26 + $0x50] sm:$0xff]  ;;  %v11775_v63 = vld [vmem:[%s12056_s26 + $0x68] sm:$0xff] }
 0x5de   : > { %v10168_v26 = vadd.f32 %v10167_v29, %v10166_v42  ;;  %10484 = vmatprep.subr.bf16.mxu0 %v11494_v3  ;;  %v10059_v21 = vadd.f32 %v10058_v1, %v10057_v14  ;;  %v5160_v29 = vmul.f32 %v11770_v5, %v14538_v23  ;;  %v11509_v3 = vld [vmem:[%s15937_s9 + $0xa0] sm:$0xff]   ;;  %v4965_v44 = vmul.f32 %v11772_v45, %v14543_v15  ;;  %v11773_v42 = vld [vmem:[%s12056_s26 + $0x58] sm:$0xff]  ;;  %v16182_v14 = vld [vmem:[#allocation13_spill] sm:$0xff] }
 0x5df   : > { %v10169_v30 = vpop.f32.mrf.mxu1  ;;  %11191 = vmatmul.mubr.msk.bf16.gmra.mxu1 %vm643_vm1, %v4990_v53  ;;  %v10060_v27 = vpop.f32.mrf.mxu0  ;;  %v4966_v17 = vmul.f32 %v11773_v42, %v14543_v15  ;;  %v4967_v5 = vmul.f32 %v11774_v24, %v14543_v15  ;;  %v4968_v45 = vmul.f32 %v11775_v63, %v14543_v15  ;;  %v11500_v61 = vld [vmem:[%s15937_s9 + $0x50] sm:$0xff]   ;;  %v11776_v63 = vld [vmem:[#allocation2 + $0xda] sm:$0xff] }
 0x5e0   : > { %v14645_v10 = vadd.f32 %v10168_v26, %v10056_v2  ;;  %11194 = vmatprep.mubr.msk.bf16.mxu1 %vm643_vm1, %v4991_v62  ;;  %10595 = vmatpush3.bf16.msra.mxu1 %v11505_v7  ;;  %v9270_v2 = vmul.f32 -1.442695, %v16182_v14  ;;  %v11497_v7 = vld [vmem:[%s15937_s9 + $0x18] sm:$0xff]   ;;  %v5385_v62 = vpack.c.bf16 %v5151_v18, %v5142_v54  ;;  %v5394_v14 = vpack.c.bf16 %v5169_v4, %v5160_v29  ;;  %v11514_v29 = vld [vmem:[%s15937_s9 + $0xd0] sm:$0xff]  }
 0x5e1   : > { %v10170_v53 = vpop.f32.mrf.mxu1  ;;  %10485 = vmatpush3.bf16.msra.mxu0 %v11495_v59  ;;  %10596 = vmatprep.subr.bf16.mxu1 %v11508_v25  ;;  %v10061_v1 = vpop.f32.mrf.mxu0  ;;  %v11510_v59 = vld [vmem:[%s15937_s9 + $0xd8] sm:$0xff]  }
 0x5e2   : > { %v10171_v26 = vadd.f32 %v10170_v53, %v10169_v30  ;;  %10486 = vmatprep.subr.bf16.mxu0 %v11496_v34  ;;  %v10062_v42 = vadd.f32 %v10061_v1, %v10060_v27  ;;  %v11511_v18 = vld [vmem:[%s15937_s9 + $0x98] sm:$0xff]   ;;  %v4992_v34 = vpack.c.bf16 %v4966_v17, %v4965_v44  ;;  %v9272_v53 = vmul.f32 -1.442695, %v14288_v51  ;;  %v11777_v51 = vld [vmem:[#allocation2 + $0xe2] sm:$0xff] }
 0x5e3   : > { %v10172_v25 = vpop.f32.mrf.mxu1  ;;  %v10063_v54 = vpop.f32.mrf.mxu0  ;;  %11157 = vmatmul.mubr.bf16.gmra.mxu0 %v5385_v62  ;;  %11608 = vpow2.f32 %v9270_v2  ;;  %v5178_v27 = vmul.f32 %v11776_v63, %v14538_v23  ;;  %v4993_v44 = vpack.c.bf16 %v4968_v45, %v4967_v5  ;;  %v5187_v17 = vmul.f32 %v11777_v51, %v14538_v23  ;;  %v11506_v2 = vld [vmem:[%s15937_s9 + $0x48] sm:$0xff]   ;;  %v11779_v5 = vld [vmem:[#allocation2 + $0xfa] sm:$0xff] }
 0x5e4   : > { %v14669_v30 = vadd.f32 %v10171_v26, %v10059_v21  ;;  %10597 = vmatpush3.bf16.msra.mxu1 %v11509_v3  ;;  %11160 = vmatprep.mubr.bf16.mxu0 %v5394_v14  ;;  %v11501_v21 = vld [vmem:[%s15937_s9 + $0x10] sm:$0xff]   ;;  %v5205_v45 = vmul.f32 %v11779_v5, %v14538_v23  ;;  %v11782_v63 = vld [vmem:[%s12056_s26 + $0x80] sm:$0xff]  ;;  %v11783_v51 = vld [vmem:[%s12056_s26 + $0x88] sm:$0xff]  ;;  %11610 = vpow2.f32 %v9272_v53 }
 0x5e5   : > { %v10173_v24 = vpop.f32.mrf.mxu1  ;;  %10487 = vmatpush3.bf16.msra.mxu0 %v11497_v7  ;;  %v10064_v4 = vpop.f32.mrf.mxu0  ;;  %10598 = vmatprep.subr.bf16.mxu1 %v11510_v59  ;;  %v11778_v26 = vld [vmem:[#allocation2 + $0xf2] sm:$0xff]  ;;  %v5403_v5 = vpack.c.bf16 %v5187_v17, %v5178_v27  ;;  %v11517_v27 = vld [vmem:[%s15937_s9 + $0x88] sm:$0xff]  }
 0x5e6   : > { %v10174_v3 = vadd.f32 %v10173_v24, %v10172_v25  ;;  %10488 = vmatprep.subr.bf16.mxu0 %v11500_v61  ;;  %v10065_v7 = vadd.f32 %v10064_v4, %v10063_v54  ;;  %v5196_v62 = vmul.f32 %v11778_v26, %v14538_v23  ;;  %v11780_v25 = vld [vmem:[%s12056_s26 + $0x70] sm:$0xff]  ;;  %v11781_v54 = vld [vmem:[%s12056_s26 + $0x78] sm:$0xff]  ;;  %v4971_v4 = vmul.f32 %v11782_v63, %v14543_v15 }
 0x5e7   : > { %v10175_v1 = vpop.f32.mrf.mxu1  ;;  %11195 = vmatmul.mubr.msk.bf16.gmra.mxu1 %vm643_vm1, %v4992_v34  ;;  %v4969_v61 = vmul.f32 %v11780_v25, %v14543_v15  ;;  %v10066_v24 = vpop.f32.mrf.mxu0  ;;  %v11515_v59 = vld [vmem:[%s15937_s9 + $0x90] sm:$0xff]   ;;  %v4970_v34 = vmul.f32 %v11781_v54, %v14543_v15  ;;  %v4972_v26 = vmul.f32 %v11783_v51, %v14543_v15  ;;  %v11512_v25 = vld [vmem:[%s15937_s9 + $0x40] sm:$0xff]   ;;  %v11516_v54 = vld [vmem:[%s15937_s9 + $0xc8] sm:$0xff]  }
 0x5e8   : > { %v14691_v14 = vadd.f32 %v10174_v3, %v10062_v42  ;;  %11198 = vmatprep.mubr.msk.bf16.mxu1 %vm643_vm1, %v4993_v44  ;;  %10599 = vmatpush3.bf16.msra.mxu1 %v11511_v18  ;;  %v11507_v18 = vld [vmem:[%s15937_s9 + $0x8] sm:$0xff]   ;;  %v11605_v51 = vpop.eup %11604 }
 0x5e9   : > { %v10176_v42 = vpop.f32.mrf.mxu1  ;;  %10489 = vmatpush3.bf16.msra.mxu0 %v11501_v21  ;;  %10600 = vmatprep.subr.bf16.mxu1 %v11514_v29  ;;  %v10067_v3 = vpop.f32.mrf.mxu0  ;;  %v5412_v21 = vpack.c.bf16 %v5205_v45, %v5196_v62  ;;  %v4994_v29 = vpack.c.bf16 %v4970_v34, %v4969_v61  ;;  %v4995_v17 = vpack.c.bf16 %v4972_v26, %v4971_v4  ;;  %v11518_v34 = vld [vmem:[%s15937_s9 + $0x178] sm:$0xff]   ;;  %v4925_v4 = vadd.f32 1.0, %v11605_v51 }
 0x5ea   : > { %v10177_v44 = vadd.f32 %v10176_v42, %v10175_v1  ;;  %10490 = vmatprep.subr.bf16.mxu0 %v11506_v2  ;;  %v10068_v53 = vadd.f32 %v10067_v3, %v10066_v24  ;;  %v11513_v1 = vld [vmem:[%s15937_s9] sm:$0xff]   ;;  %v11607_v62 = vpop.eup %11606  ;;  %v11785_v3 = vld [vmem:[#allocation2 + $0x112] sm:$0xff] }
 0x5eb   : > { %v10178_v63 = vpop.f32.mrf.mxu1  ;;  %v10069_v13 = vpop.f32.mrf.mxu0  ;;  %11161 = vmatmul.mubr.bf16.gmra.mxu0 %v5403_v5  ;;  %v5223_v61 = vmul.f32 %v11785_v3, %v14538_v23  ;;  %11612 = vrcp.f32 %v4925_v4 }
 0x5ec   : > { %v14712_v19 = vadd.f32 %v10177_v44, %v10065_v7  ;;  %10601 = vmatpush3.bf16.msra.mxu1 %v11515_v59  ;;  %11164 = vmatprep.mubr.bf16.mxu0 %v5412_v21  ;;  %v11519_v7 = vld [vmem:[%s15937_s9 + $0xc0] sm:$0xff]   ;;  %v11784_v59 = vld [vmem:[#allocation2 + $0x10a] sm:$0xff] }
 0x5ed   : > { %v10179_v2 = vpop.f32.mrf.mxu1  ;;  %10491 = vmatpush3.bf16.msra.mxu0 %v11507_v18  ;;  %v10070_v45 = vpop.f32.mrf.mxu0  ;;  %v5214_v42 = vmul.f32 %v11784_v59, %v14538_v23  ;;  %10602 = vmatprep.subr.bf16.mxu1 %v11516_v54  ;;  %v11786_v44 = vld [vmem:[#allocation2 + $0x122] sm:$0xff]  ;;  %v11788_v54 = vld [vmem:[%s12056_s26 + $0x90] sm:$0xff]  ;;  %v4927_v59 = vadd.f32 1.0, %v11607_v62 }
 0x5ee   : > { %v10180_v24 = vadd.f32 %v10179_v2, %v10178_v63  ;;  %10492 = vmatprep.subr.bf16.mxu0 %v11512_v25  ;;  %v10071_v26 = vadd.f32 %v10070_v45, %v10069_v13  ;;  %v5232_v5 = vmul.f32 %v11786_v44, %v14538_v23  ;;  %v11787_v63 = vld [vmem:[#allocation2 + $0x12a] sm:$0xff]  ;;  %v11521_v13 = vld [vmem:[%s15937_s9 + $0x80] sm:$0xff]   ;;  %v4973_v51 = vmul.f32 %v11788_v54, %v14543_v15 }
 0x5ef   : > { %v10181_v18 = vpop.f32.mrf.mxu1  ;;  %11199 = vmatmul.mubr.msk.bf16.gmra.mxu1 %vm643_vm1, %v4994_v29  ;;  %v5241_v21 = vmul.f32 %v11787_v63, %v14538_v23  ;;  %v10072_v25 = vpop.f32.mrf.mxu0  ;;  %v11789_v29 = vld [vmem:[%s12056_s26 + $0x98] sm:$0xff]  ;;  %v5421_v44 = vpack.c.bf16 %v5223_v61, %v5214_v42  ;;  %v11790_v63 = vld [vmem:[%s12056_s26 + $0xa0] sm:$0xff]  ;;  %v4976_v54 = vmul.f32 %v11791_v22, %v14543_v15  ;;  %11614 = vrcp.f32 %v4927_v59 }
 0x5f0   : > { %v14731_v2 = vadd.f32 %v10180_v24, %v10068_v53  ;;  %11202 = vmatprep.mubr.msk.bf16.mxu1 %vm643_vm1, %v4995_v17  ;;  %10603 = vmatpush3.bf16.msra.mxu1 %v11517_v27  ;;  %v4974_v45 = vmul.f32 %v11789_v29, %v14543_v15  ;;  %v11527_v53 = vld [vmem:[%s15937_s9 + $0x1f8] sm:$0xff]   ;;  %v11609_v27 = vpop.eup %11608  ;;  %v4975_v50 = vmul.f32 %v11790_v63, %v14543_v15 }
 0x5f1   : > { %v10182_v3 = vpop.f32.mrf.mxu1  ;;  %10493 = vmatpush3.bf16.msra.mxu0 %v11513_v1  ;;  %10604 = vmatprep.subr.bf16.mxu1 %v11519_v7  ;;  %v10073_v17 = vpop.f32.mrf.mxu0  ;;  %v5430_v1 = vpack.c.bf16 %v5241_v21, %v5232_v5 }
 0x5f2   : > { %v10183_v24 = vadd.f32 %v10182_v3, %v10181_v18  ;;  %10702 = vmatprep.subr.bf16.mxu0 %v11518_v34  ;;  %v10074_v62 = vadd.f32 %v10073_v17, %v10072_v25  ;;  %v4996_v55 = vpack.c.bf16 %v4974_v45, %v4973_v51  ;;  %v4924_v18 = vadd.f32 1.0, %v11609_v27  ;;  %v11611_v61 = vpop.eup %11610  ;;  %v11792_v34 = vld [vmem:[#allocation2 + $0x13a] sm:$0xff]  ;;  %v11796_v27 = vld [vmem:[%s12056_s26 + $0xb0] sm:$0xff] }
 0x5f3   : > { %v10184_v29 = vpop.f32.mrf.mxu1  ;;  %v10075_v37 = vpop.f32.mrf.mxu0  ;;  %11165 = vmatmul.mubr.bf16.gmra.mxu0 %v5421_v44  ;;  %v4997_v22 = vpack.c.bf16 %v4976_v54, %v4975_v50  ;;  %v5250_v4 = vmul.f32 %v11792_v34, %v14538_v23  ;;  %v11795_v45 = vld [vmem:[#allocation2 + $0x15a] sm:$0xff]  ;;  %v4977_v17 = vmul.f32 %v11796_v27, %v14543_v15 }
 0x5f4   : > { %v14748_v7 = vadd.f32 %v10183_v24, %v10071_v26  ;;  %10605 = vmatpush3.bf16.msra.mxu1 %v11521_v13  ;;  %11168 = vmatprep.mubr.bf16.mxu0 %v5430_v1  ;;  %v11793_v26 = vld [vmem:[#allocation2 + $0x142] sm:$0xff]  ;;  %v11794_v13 = vld [vmem:[#allocation2 + $0x152] sm:$0xff]  ;;  %v5277_v59 = vmul.f32 %v11795_v45, %v14538_v23  ;;  %11616 = vrcp.f32 %v4924_v18 }
 0x5f5   : > { %v10185_v42 = vpop.f32.mrf.mxu1  ;;  %10814 = vmatprep.subr.bf16.mxu1 %v11527_v53  ;;  %v10076_v3 = vpop.f32.mrf.mxu0  ;;  %v5259_v5 = vmul.f32 %v11793_v26, %v14538_v23  ;;  %v5268_v51 = vmul.f32 %v11794_v13, %v14538_v23 }
 0x5f6   : > { %v10186_v63 = vadd.f32 %v10185_v42, %v10184_v29  ;;  %v10077_v21 = vadd.f32 %v10076_v3, %v10075_v37  ;;  %v11797_v37 = vld [vmem:[%s12056_s26 + $0xb8] sm:$0xff]  ;;  %v11798_v42 = vld [vmem:[%s12056_s26 + $0xc0] sm:$0xff] }
 0x5f7   : > { %v10187_v25 = vpop.f32.mrf.mxu1  ;;  %11203 = vmatmul.mubr.msk.bf16.gmra.mxu1 %vm643_vm1, %v4996_v55  ;;  %v10078_v53 = vpop.f32.mrf.mxu0  ;;  %v4978_v24 = vmul.f32 %v11797_v37, %v14543_v15  ;;  %v4926_v55 = vadd.f32 1.0, %v11611_v61  ;;  %v5439_v1 = vpack.c.bf16 %v5259_v5, %v5250_v4  ;;  %v4979_v3 = vmul.f32 %v11798_v42, %v14543_v15  ;;  %v11803_v42 = vld [vmem:[%s12056_s26 + $0xd8] sm:$0xff] }
 0x5f8   : > { %v14755_v50 = vadd.f32 %v10186_v63, %v10074_v62  ;;  %11206 = vmatprep.mubr.msk.bf16.mxu1 %vm643_vm1, %v4997_v22  ;;  %v11799_v62 = vld [vmem:[%s12056_s26 + $0xc8] sm:$0xff]  ;;  %v5448_v26 = vpack.c.bf16 %v5277_v59, %v5268_v51  ;;  %v5304_v59 = vmul.f32 %v14521_v60, %v14538_v23 }
 0x5f9   : > { %v10188_v44 = vpop.f32.mrf.mxu1  ;;  %v10079_v54 = vpop.f32.mrf.mxu0  ;;  %v4980_v63 = vmul.f32 %v11799_v62, %v14543_v15  ;;  %v4998_v27 = vpack.c.bf16 %v4978_v24, %v4977_v17  ;;  %11618 = vrcp.f32 %v4926_v55  ;;  %v5313_v17 = vmul.f32 %v14525_v41, %v14538_v23 }
 0x5fa   : > { %v10189_v29 = vadd.f32 %v10188_v44, %v10187_v25  ;;  %v10080_v34 = vadd.f32 %v10079_v54, %v10078_v53  ;;  %v11800_v25 = vld [vmem:[#allocation2 + $0x16a] sm:$0xff]  ;;  %v11801_v44 = vld [vmem:[#allocation2 + $0x172] sm:$0xff]  ;;  %v11613_v24 = vpop.eup %11612 }
 0x5fb   : > { %v10190_v22 = vpop.f32.mrf.mxu1  ;;  %v10081_v45 = vpop.f32.mrf.mxu0  ;;  %11169 = vmatmul.mubr.bf16.gmra.mxu0 %v5439_v1  ;;  %v4999_v5 = vpack.c.bf16 %v4980_v63, %v4979_v3  ;;  %v5286_v37 = vmul.f32 %v11800_v25, %v14538_v23  ;;  %v5295_v53 = vmul.f32 %v11801_v44, %v14538_v23  ;;  %v4982_v3 = vmul.f32 %v11803_v42, %v14543_v15  ;;  %v3294_v42 = vld [vmem:[#allocation3 + $0x9] sm:$0xff] }
 0x5fc   : > { %v14766_v13 = vadd.f32 %v10189_v29, %v10077_v21  ;;  %11172 = vmatprep.mubr.bf16.mxu0 %v5448_v26  ;;  %v11802_v29 = vld [vmem:[%s12056_s26 + $0xd0] sm:$0xff]  ;;  %v11615_v63 = vpop.eup %11614 }
 0x5fd   : > { %v10191_v18 = vpop.f32.mrf.mxu1  ;;  %v10082_v61 = vpop.f32.mrf.mxu0  ;;  %v4981_v1 = vmul.f32 %v11802_v29, %v14543_v15  ;;  %v5457_v26 = vpack.c.bf16 %v5295_v53, %v5286_v37  ;;  %v3293_v29 = vld [vmem:[#allocation3 + $0x1] sm:$0xff]  ;;  %v14792_v37 = vrot.slane %v11615_v63, %v13600_v48 }
 0x5fe   : > { %v10192_v4 = vadd.f32 %v10191_v18, %v10190_v22  ;;  %v10083_v51 = vadd.f32 %v10082_v61, %v10081_v45  ;;  %v11804_v45 = vld [vmem:[%s12056_s26 + $0xe0] sm:$0xff]  ;;  %v14787_v18 = vrot.slane %v11613_v24, %v13600_v48 }
 0x5ff   : > { %v10193_v21 = vpop.f32.mrf.mxu1  ;;  %11207 = vmatmul.mubr.msk.bf16.gmra.mxu1 %vm643_vm1, %v4998_v27  ;;  %v10084_v54 = vpop.f32.mrf.mxu0  ;;  %v4983_v41 = vmul.f32 %v11804_v45, %v14543_v15  ;;  %v11805_v27 = vld [vmem:[%s12056_s26 + $0xe8] sm:$0xff] }
 0x600   : > { %v14775_v55 = vadd.f32 %v10192_v4, %v10080_v34  ;;  %11210 = vmatprep.mubr.msk.bf16.mxu1 %vm643_vm1, %v4999_v5  ;;  %v4984_v34 = vmul.f32 %v11805_v27, %v14543_v15  ;;  %v5466_v5 = vpack.c.bf16 %v5313_v17, %v5304_v59  ;;  %v11807_v59 = vld [vmem:[#allocation2 + $0x1a2] sm:$0xff] }
 0x601   : > { %v10194_v62 = vpop.f32.mrf.mxu1  ;;  %v10085_v22 = vpop.f32.mrf.mxu0  ;;  %v5331_v17 = vmul.f32 %v11807_v59, %v14538_v23 }
 0x602   : > { %v10195_v60 = vadd.f32 %v10194_v62, %v10193_v21  ;;  %v10086_v61 = vadd.f32 %v10085_v22, %v10084_v54  ;;  %v5000_v21 = vpack.c.bf16 %v4982_v3, %v4981_v1  ;;  %v11617_v62 = vpop.eup %11616  ;;  %v5001_v54 = vpack.c.bf16 %v4984_v34, %v4983_v41  ;;  %v11806_v22 = vld [vmem:[#allocation2 + $0x19a] sm:$0xff]  ;;  %v11808_v41 = vld [vmem:[%s12056_s26 + $0xf0] sm:$0xff] }
 0x603   : > { %v10196_v4 = vpop.f32.mrf.mxu1  ;;  %v10087_v44 = vpop.f32.mrf.mxu0  ;;  %11173 = vmatmul.mubr.bf16.gmra.mxu0 %v5457_v26  ;;  %v7121_v1 = vmul.f32 %v14787_v18, %v3293_v29  ;;  %v7130_v3 = vmul.f32 %v14787_v18, %v3294_v42  ;;  %v4985_v34 = vmul.f32 %v11808_v41, %v14543_v15 }
 0x604   : > { %v14789_v25 = vadd.f32 %v10195_v60, %v10083_v51  ;;  %11176 = vmatprep.mubr.bf16.mxu0 %v5466_v5  ;;  %v5322_v51 = vmul.f32 %v11806_v22, %v14538_v23  ;;  %v14807_v23 = vrot.slane %v11617_v62, %v13600_v48 }
 0x605   : > { %v10197_v53 = vpop.f32.mrf.mxu1  ;;  %v10088_v45 = vpop.f32.mrf.mxu0  ;;  %v7409_v41 = vpack.c.bf16 %v7130_v3, %v7121_v1  ;;  %v3326_v1 = vld [vmem:[#allocation3 + $0xa] sm:$0xff] }
 0x606   : > { %v10198_v24 = vadd.f32 %v10197_v53, %v10196_v4  ;;  %v10089_v60 = vadd.f32 %v10088_v45, %v10087_v44  ;;  %v11809_v4 = vld [vmem:[%s12056_s26 + $0xf8] sm:$0xff]  ;;  %v3358_v53 = vld [vmem:[#allocation3 + $0x20] sm:$0xff]  ;;  %v11619_v29 = vpop.eup %11618  ;;  %s9050_s26 = sshll.u32 %s15726_s24, 4  ;;  %s15879_s26 = int_to_ptr.vmem [resolvable:$true] %s9050_s26 }
 0x607   : > { %v10199_v26 = vpop.f32.mrf.mxu1  ;;  %11211 = vmatmul.mubr.msk.bf16.gmra.mxu1 %vm643_vm1, %v5000_v21  ;;  %v10090_v27 = vpop.f32.mrf.mxu0  ;;  %v4986_v5 = vmul.f32 %v11809_v4, %v14543_v15  ;;  %v3357_v21 = vld [vmem:[#allocation3 + $0x18] sm:$0xff]  ;;  %v14814_v4 = vrot.slane %v11619_v29, %v13600_v48  ;;  %s11828_s20 = scalar_lea.vmem %s15879_s26, 4096  ;;  %p11835_p0 = scmp.lt.s32.totalorder %s15879_s26, %s11833_s23 }
 0x608   : > { %v14799_v63 = vadd.f32 %v10198_v24, %v10086_v61  ;;  %11214 = vmatprep.mubr.msk.bf16.mxu1 %vm643_vm1, %v5001_v54  ;;  %v5475_v61 = vpack.c.bf16 %v5331_v17, %v5322_v51  ;;  %v7123_v24 = vmul.f32 %v14792_v37, %v3357_v21  ;;  %v7132_v54 = vmul.f32 %v14792_v37, %v3358_v53  ;;  %p11829_p11 = scmp.ne.s32.totalorder %s15879_s26, %s11828_s20  ;;  %p11836_p1 = scmp.lt.s32.totalorder %s11834_s29, %s11828_s20 }
 0x609   : > { %v10200_v44 = vpop.f32.mrf.mxu1  ;;  %v10091_v45 = vpop.f32.mrf.mxu0  ;;  %v5002_v62 = vpack.c.bf16 %v4986_v5, %v4985_v34  ;;  %v7139_v34 = vmul.f32 %v14787_v18, %v3295_v40 }
 0x60a   : > { %v10201_v42 = vadd.f32 %v10200_v44, %v10199_v26  ;;  %v10092_v22 = vadd.f32 %v10091_v45, %v10090_v27  ;;  %v7411_v17 = vpack.c.bf16 %v7132_v54, %v7123_v24  ;;  %v7120_v44 = vmul.f32 %v14551_v12, %v14807_v23  ;;  %v3296_v27 = vld [vmem:[#allocation3 + $0x21] sm:$0xff]  ;;  %v14828_v54 = vld [vmem:[#allocation3 + $0x30] sm:$0xff]  ;;  %p11830_p12 = pnand %p11829_p11, %p12024_p5  ;;  %p11837_p2 = por %p11836_p1, %p11835_p0 }
 0x60b   : > { %v10202_v59 = vpop.f32.mrf.mxu1  ;;  %v10093_v15 = vpop.f32.mrf.mxu0  ;;  %11177 = vmatmul.mubr.bf16.gmra.mxu0 %v5475_v61  ;;  %v3325_v45 = vld [vmem:[#allocation3 + $0x2] sm:$0xff]  ;;  %v7148_v5 = vmul.f32 %v14787_v18, %v3296_v27  ;;  %v7131_v24 = vmul.f32 %v14814_v4, %v3326_v1 }
 0x60c   : > { %v14811_v20 = vadd.f32 %v10201_v42, %v10089_v60  ;;  %8160 = vmatprep.mubr.bf16.mxu0 %v7409_v41  ;;  %v11520_v12 = vld [vmem:[%s15937_s9 + $0x138] sm:$0xff]   ;;  %v7122_v61 = vmul.f32 %v14814_v4, %v3325_v45  ;;  %p11831_p13 = pneg %p11830_p12 }
 0x60d   : > { %v10203_v32 = vpop.f32.mrf.mxu1  ;;  %v10094_v26 = vpop.f32.mrf.mxu0  ;;  %v7418_v27 = vpack.c.bf16 %v7148_v5, %v7139_v34  ;;  %v11531_v34 = vld [vmem:[%s15937_s9 + $0x1f0] sm:$0xff]  }
 0x60e   : > { %v10204_v51 = vadd.f32 %v10203_v32, %v10202_v59  ;;  %v10095_v60 = vadd.f32 %v10094_v26, %v10093_v15  ;;  %v14830_v59 = vld [vmem:[#allocation3 + $0x38] sm:$0xff]  ;;  %v7408_v15 = vpack.c.bf16 %v7120_v44, %v7120_v44  ;;  %v11522_v26 = vld [vmem:[%s15937_s9 + $0x170] sm:$0xff]   ;;  %v11529_v44 = vld [vmem:[%s15937_s9 + $0x1b8] sm:$0xff]   ;;  %p11838_p3 = pnand %p11837_p2, %p11831_p13 }
 0x60f   : > { %v10205_v3 = vpop.f32.mrf.mxu1  ;;  %11215 = vmatmul.mubr.msk.bf16.gmra.mxu1 %vm643_vm1, %v5002_v62  ;;  %v10096_v42 = vpop.f32.mrf.mxu0  ;;  %v7150_v62 = vmul.f32 %v14792_v37, %v14830_v59 }
 0x610   : > { %v14821_v29 = vadd.f32 %v10204_v51, %v10092_v22  ;;  %8321 = vmatprep.mubr.bf16.mxu1 %v7411_v17  ;;  %v7141_v22 = vmul.f32 %v14792_v37, %v14828_v54 }
 0x611   : > { %v10206_v32 = vpop.f32.mrf.mxu1  ;;  %v10097_v40 = vpop.f32.mrf.mxu0 }
 0x612   : > { %16183 = vst [vmem:[#allocation30_spill] sm:$0xff] %v14821_v29  ;;  %v10207_v41 = vadd.f32 %v10206_v32, %v10205_v3  ;;  %v10098_v51 = vadd.f32 %v10097_v40, %v10096_v42  ;;  %v7410_v32 = vpack.c.bf16 %v7131_v24, %v7122_v61  ;;  %v7420_v42 = vpack.c.bf16 %v7150_v62, %v7141_v22  ;;  %v11524_v61 = vld [vmem:[%s15937_s9 + $0x168] sm:$0xff]   ;;  %v11533_v62 = vld [vmem:[%s15937_s9 + $0x1b0] sm:$0xff]  }
 0x613   : > { %v10208_v17 = vpop.f32.mrf.mxu1  ;;  %v10227_v1 = vpop.f32.mrf.mxu0  ;;  %8161 = vmatmul.mubr.bf16.vlgmr.msra.gmra.mxu0 %v7408_v15  ;;  %v7138_v40 = vmul.f32 %v14807_v23, %v3357_v21  ;;  %v3297_v15 = vld [vmem:[#allocation3 + $0x31] sm:$0xff]  ;;  %v3327_v21 = vld [vmem:[#allocation3 + $0x1a] sm:$0xff]  ;;  %v7156_v29 = vmul.f32 %v14807_v23, %v14828_v54  ;;  %v11530_v54 = vld [vmem:[%s15937_s9 + $0x158] sm:$0xff]  }
 0x614   : > { %v14839_v45 = vadd.f32 %v10207_v41, %v10095_v60  ;;  %10703 = vmatpush3.bf16.msra.mxu0 %v11520_v12  ;;  %8168 = vmatprep.mubr.bf16.mxu0 %v7418_v27  ;;  %v7147_v41 = vmul.f32 %v14807_v23, %v3358_v53  ;;  %v3298_v12 = vld [vmem:[#allocation3 + $0x39] sm:$0xff]  ;;  %v7157_v6 = vmul.f32 %v14787_v18, %v3297_v15  ;;  %v3328_v53 = vld [vmem:[#allocation3 + $0x22] sm:$0xff] }
 0x615   : > { %v10209_v3 = vpop.f32.mrf.mxu1  ;;  %v10228_v5 = vpop.f32.mrf.mxu0  ;;  %10704 = vmatprep.subr.bf16.mxu0 %v11522_v26  ;;  %v14865_v15 = vld [vmem:[#allocation3 + $0x48] sm:$0xff] }
 0x616   : > { %16184 = vst [vmem:[#allocation37_spill] sm:$0xff] %v14839_v45  ;;  %v10210_v60 = vadd.f32 %v10209_v3, %v10208_v17  ;;  %v10229_v24 = vadd.f32 %v10228_v5, %v10227_v1  ;;  %v7166_v17 = vmul.f32 %v14787_v18, %v3298_v12  ;;  %v7149_v5 = vmul.f32 %v14814_v4, %v3328_v53 }
 0x617   : > { %v10339_v27 = vpop.f32.mrf.mxu1  ;;  %8322 = vmatmul.mubr.bf16.vlgmr.msra.gmra.mxu1 %v7410_v32  ;;  %v10230_v22 = vpop.f32.mrf.mxu0  ;;  %v7140_v32 = vmul.f32 %v14814_v4, %v3327_v21  ;;  %v7417_v12 = vpack.c.bf16 %v7147_v41, %v7138_v40  ;;  %v11526_v21 = vld [vmem:[%s15937_s9 + $0x160] sm:$0xff]   ;;  %v11537_v40 = vld [vmem:[%s15937_s9 + $0x1a8] sm:$0xff]  }
 0x618   : > { %v14857_v3 = vadd.f32 %v10210_v60, %v10098_v51  ;;  %8329 = vmatprep.mubr.bf16.mxu1 %v7420_v42  ;;  %10815 = vmatpush3.bf16.msra.mxu1 %v11529_v44  ;;  %v6409_v26 = vadd.f32 %v10229_v24, %v14385_v0  ;;  %v14867_v51 = vld [vmem:[#allocation3 + $0x50] sm:$0xff]  ;;  %v11525_v44 = vld [vmem:[%s15937_s9 + $0x128] sm:$0xff]   ;;  %v7159_v0 = vmul.f32 %v14792_v37, %v14865_v15 }
 0x619   : > { %v10340_v1 = vpop.f32.mrf.mxu1  ;;  %10705 = vmatpush3.bf16.msra.mxu0 %v11523_v9  ;;  %10816 = vmatprep.subr.bf16.mxu1 %v11531_v34  ;;  %v10231_v60 = vpop.f32.mrf.mxu0  ;;  %v7168_v24 = vmul.f32 %v14792_v37, %v14867_v51  ;;  %v11535_v9 = vld [vmem:[%s15937_s9 + $0x1e8] sm:$0xff]   ;;  %v7419_v45 = vpack.c.bf16 %v7149_v5, %v7140_v32 }
 0x61a   : > { %16185 = vst [vmem:[#allocation38_spill] sm:$0xff] %v14857_v3  ;;  %v10341_v42 = vadd.f32 %v10340_v1, %v10339_v27  ;;  %10706 = vmatprep.subr.bf16.mxu0 %v11524_v61  ;;  %v10232_v53 = vadd.f32 %v10231_v60, %v10230_v22  ;;  %v7427_v3 = vpack.c.bf16 %v7166_v17, %v7157_v6  ;;  %v11528_v6 = vld [vmem:[%s15937_s9 + $0x120] sm:$0xff]  }
 0x61b   : > { %v10342_v34 = vpop.f32.mrf.mxu1  ;;  %v10233_v27 = vpop.f32.mrf.mxu0  ;;  %8169 = vmatmul.mubr.bf16.gmra.mxu0 %v7417_v12  ;;  %v11539_v17 = vld [vmem:[%s15937_s9 + $0x1e0] sm:$0xff]  }
 0x61c   : > { %10817 = vmatpush3.bf16.msra.mxu1 %v11533_v62  ;;  %v14885_v41 = vadd.f32 %v10341_v42, %v6409_v26  ;;  %v6412_v61 = vadd.f32 %v10232_v53, %v14422_v8  ;;  %8176 = vmatprep.mubr.bf16.mxu0 %v7427_v3  ;;  %v7429_v26 = vpack.c.bf16 %v7168_v24, %v7159_v0  ;;  %v3299_v3 = vld [vmem:[#allocation3 + $0x49] sm:$0xff]  ;;  %v3300_v32 = vld [vmem:[#allocation3 + $0x51] sm:$0xff]  ;;  %v3330_v24 = vld [vmem:[#allocation3 + $0x3a] sm:$0xff] }
 0x61d   : > { %v10343_v1 = vpop.f32.mrf.mxu1  ;;  %10707 = vmatpush3.bf16.msra.mxu0 %v11525_v44  ;;  %v10234_v22 = vpop.f32.mrf.mxu0  ;;  %v7165_v8 = vmul.f32 %v14807_v23, %v14830_v59  ;;  %10818 = vmatprep.subr.bf16.mxu1 %v11535_v9  ;;  %v7175_v60 = vmul.f32 %v14787_v18, %v3299_v3  ;;  %v7184_v42 = vmul.f32 %v14787_v18, %v3300_v32  ;;  %v3329_v0 = vld [vmem:[#allocation3 + $0x32] sm:$0xff]  ;;  %v11534_v3 = vld [vmem:[%s15937_s9 + $0x150] sm:$0xff]  }
 0x61e   : > { %v10344_v62 = vadd.f32 %v10343_v1, %v10342_v34  ;;  %10708 = vmatprep.subr.bf16.mxu0 %v11526_v21  ;;  %v10235_v5 = vadd.f32 %v10234_v22, %v10233_v27  ;;  %v11541_v59 = vld [vmem:[%s15937_s9 + $0x1a0] sm:$0xff]   ;;  %v7167_v34 = vmul.f32 %v14814_v4, %v3330_v24  ;;  %v14911_v27 = vld [vmem:[#allocation3 + $0x60] sm:$0xff]  ;;  %v14913_v1 = vld [vmem:[#allocation3 + $0x68] sm:$0xff] }
 0x61f   : > { %v10345_v44 = vpop.f32.mrf.mxu1  ;;  %8330 = vmatmul.mubr.bf16.gmra.mxu1 %v7419_v45  ;;  %v10236_v12 = vpop.f32.mrf.mxu0  ;;  %v7158_v45 = vmul.f32 %v14814_v4, %v3329_v0 }
 0x620   : > { %8337 = vmatprep.mubr.bf16.mxu1 %v7429_v26  ;;  %10819 = vmatpush3.bf16.msra.mxu1 %v11537_v40  ;;  %v14906_v21 = vadd.f32 %v10344_v62, %v6412_v61  ;;  %v6417_v9 = vadd.f32 %v10235_v5, %v14455_v39  ;;  %v11532_v40 = vld [vmem:[%s15937_s9 + $0x118] sm:$0xff]   ;;  %v7426_v62 = vpack.c.bf16 %v7165_v8, %v7156_v29 }
 0x621   : > { %v10346_v53 = vpop.f32.mrf.mxu1  ;;  %10709 = vmatpush3.bf16.msra.mxu0 %v11528_v6  ;;  %10820 = vmatprep.subr.bf16.mxu1 %v11539_v17  ;;  %v10237_v22 = vpop.f32.mrf.mxu0  ;;  %v7177_v39 = vmul.f32 %v14792_v37, %v14911_v27  ;;  %v7186_v26 = vmul.f32 %v14792_v37, %v14913_v1  ;;  %v11543_v6 = vld [vmem:[%s15937_s9 + $0x1d8] sm:$0xff]   ;;  %v7436_v5 = vpack.c.bf16 %v7184_v42, %v7175_v60  ;;  %v11536_v60 = vld [vmem:[%s15937_s9 + $0x110] sm:$0xff]  }
 0x622   : > { %v10347_v61 = vadd.f32 %v10346_v53, %v10345_v44  ;;  %10710 = vmatprep.subr.bf16.mxu0 %v11530_v54  ;;  %v10238_v32 = vadd.f32 %v10237_v22, %v10236_v12  ;;  %v11545_v29 = vld [vmem:[%s15937_s9 + $0x198] sm:$0xff]   ;;  %v7428_v24 = vpack.c.bf16 %v7167_v34, %v7158_v45  ;;  %v7174_v53 = vmul.f32 %v14807_v23, %v14865_v15  ;;  %v11546_v42 = vld [vmem:[%s15937_s9 + $0x1d0] sm:$0xff]   ;;  %v11538_v15 = vld [vmem:[%s15937_s9 + $0x148] sm:$0xff]  }
 0x623   : > { %v10348_v17 = vpop.f32.mrf.mxu1  ;;  %v10239_v44 = vpop.f32.mrf.mxu0  ;;  %8177 = vmatmul.mubr.bf16.gmra.mxu0 %v7426_v62  ;;  %v3301_v22 = vld [vmem:[#allocation3 + $0x61] sm:$0xff]  ;;  %v3302_v45 = vld [vmem:[#allocation3 + $0x69] sm:$0xff] }
 0x624   : > { %10821 = vmatpush3.bf16.msra.mxu1 %v11541_v59  ;;  %v14931_v8 = vadd.f32 %v10347_v61, %v6417_v9  ;;  %v6420_v54 = vadd.f32 %v10238_v32, %v14467_v33  ;;  %8184 = vmatprep.mubr.bf16.mxu0 %v7436_v5  ;;  %v7438_v9 = vpack.c.bf16 %v7186_v26, %v7177_v39  ;;  %v3331_v39 = vld [vmem:[#allocation3 + $0x4a] sm:$0xff]  ;;  %v3332_v26 = vld [vmem:[#allocation3 + $0x52] sm:$0xff] }
 0x625   : > { %v10349_v0 = vpop.f32.mrf.mxu1  ;;  %10711 = vmatpush3.bf16.msra.mxu0 %v11532_v40  ;;  %v10240_v12 = vpop.f32.mrf.mxu0  ;;  %v7183_v33 = vmul.f32 %v14807_v23, %v14867_v51  ;;  %10822 = vmatprep.subr.bf16.mxu1 %v11543_v6  ;;  %v7193_v61 = vmul.f32 %v14787_v18, %v3301_v22  ;;  %v7202_v62 = vmul.f32 %v14787_v18, %v3302_v45  ;;  %v11547_v51 = vld [vmem:[%s15937_s9 + $0x190] sm:$0xff]   ;;  %v11542_v22 = vld [vmem:[%s15937_s9 + $0x140] sm:$0xff]  }
 0x626   : > { %v10350_v59 = vadd.f32 %v10349_v0, %v10348_v17  ;;  %10712 = vmatprep.subr.bf16.mxu0 %v11534_v3  ;;  %v10241_v34 = vadd.f32 %v10240_v12, %v10239_v44  ;;  %v7176_v5 = vmul.f32 %v14814_v4, %v3331_v39  ;;  %v7185_v44 = vmul.f32 %v14814_v4, %v3332_v26  ;;  %v14957_v0 = vld [vmem:[#allocation3 + $0x78] sm:$0xff] }
 0x627   : > { %v10351_v40 = vpop.f32.mrf.mxu1  ;;  %8338 = vmatmul.mubr.bf16.gmra.mxu1 %v7428_v24  ;;  %v10242_v32 = vpop.f32.mrf.mxu0  ;;  %v14959_v24 = vld [vmem:[#allocation3 + $0x80] sm:$0xff] }
 0x628   : > { %8345 = vmatprep.mubr.bf16.mxu1 %v7438_v9  ;;  %10823 = vmatpush3.bf16.msra.mxu1 %v11545_v29  ;;  %v14952_v3 = vadd.f32 %v10350_v59, %v6420_v54  ;;  %v6425_v6 = vadd.f32 %v10241_v34, %v14477_v11  ;;  %v11540_v29 = vld [vmem:[%s15937_s9 + $0x108] sm:$0xff]   ;;  %v7435_v59 = vpack.c.bf16 %v7183_v33, %v7174_v53 }
 0x629   : > { %v10352_v17 = vpop.f32.mrf.mxu1  ;;  %10713 = vmatpush3.bf16.msra.mxu0 %v11536_v60  ;;  %10824 = vmatprep.subr.bf16.mxu1 %v11546_v42  ;;  %v10243_v12 = vpop.f32.mrf.mxu0  ;;  %v7195_v11 = vmul.f32 %v14792_v37, %v14957_v0  ;;  %v7204_v9 = vmul.f32 %v14792_v37, %v14959_v24  ;;  %v11548_v60 = vld [vmem:[%s15937_s9 + $0x1c8] sm:$0xff]   ;;  %v7445_v34 = vpack.c.bf16 %v7202_v62, %v7193_v61  ;;  %v11544_v61 = vld [vmem:[%s15937_s9 + $0x100] sm:$0xff]  }
 0x62a   : > { %v10353_v54 = vadd.f32 %v10352_v17, %v10351_v40  ;;  %10714 = vmatprep.subr.bf16.mxu0 %v11538_v15  ;;  %v10244_v45 = vadd.f32 %v10243_v12, %v10242_v32  ;;  %v11549_v53 = vld [vmem:[%s15937_s9 + $0x188] sm:$0xff]   ;;  %v7437_v26 = vpack.c.bf16 %v7185_v44, %v7176_v5  ;;  %v7192_v17 = vmul.f32 %v14807_v23, %v14911_v27  ;;  %v11551_v62 = vld [vmem:[%s15937_s9 + $0x1c0] sm:$0xff]   ;;  %v3304_v5 = vld [vmem:[#allocation3 + $0x81] sm:$0xff] }
 0x62b   : > { %v10354_v42 = vpop.f32.mrf.mxu1  ;;  %v10245_v40 = vpop.f32.mrf.mxu0  ;;  %8185 = vmatmul.mubr.bf16.gmra.mxu0 %v7435_v59  ;;  %v3303_v12 = vld [vmem:[#allocation3 + $0x79] sm:$0xff]  ;;  %v11550_v27 = vld [vmem:[%s15937_s9 + $0x238] sm:$0xff]   ;;  %v7220_v59 = vmul.f32 %v14787_v18, %v3304_v5 }
 0x62c   : > { %10825 = vmatpush3.bf16.msra.mxu1 %v11547_v51  ;;  %v14977_v33 = vadd.f32 %v10353_v54, %v6425_v6  ;;  %v6428_v15 = vadd.f32 %v10244_v45, %v14487_v31  ;;  %8192 = vmatprep.mubr.bf16.mxu0 %v7445_v34  ;;  %v7447_v6 = vpack.c.bf16 %v7204_v9, %v7195_v11  ;;  %v3333_v11 = vld [vmem:[#allocation3 + $0x62] sm:$0xff]  ;;  %v3334_v9 = vld [vmem:[#allocation3 + $0x6a] sm:$0xff] }
 0x62d   : > { %v10355_v39 = vpop.f32.mrf.mxu1  ;;  %10715 = vmatpush3.bf16.msra.mxu0 %v11540_v29  ;;  %v10246_v32 = vpop.f32.mrf.mxu0  ;;  %v7201_v31 = vmul.f32 %v14807_v23, %v14913_v1  ;;  %10826 = vmatprep.subr.bf16.mxu1 %v11548_v60  ;;  %v7211_v54 = vmul.f32 %v14787_v18, %v3303_v12  ;;  %v11552_v1 = vld [vmem:[%s15937_s9 + $0x180] sm:$0xff]   ;;  %v7194_v34 = vmul.f32 %v14814_v4, %v3333_v11 }
 0x62e   : > { %v10356_v51 = vadd.f32 %v10355_v39, %v10354_v42  ;;  %10716 = vmatprep.subr.bf16.mxu0 %v11542_v22  ;;  %v10247_v44 = vadd.f32 %v10246_v32, %v10245_v40  ;;  %v7203_v40 = vmul.f32 %v14814_v4, %v3334_v9  ;;  %v15003_v39 = vld [vmem:[#allocation3 + $0x90] sm:$0xff] }
 0x62f   : > { %v10357_v29 = vpop.f32.mrf.mxu1  ;;  %8346 = vmatmul.mubr.bf16.gmra.mxu1 %v7437_v26  ;;  %v10248_v45 = vpop.f32.mrf.mxu0  ;;  %v15005_v26 = vld [vmem:[#allocation3 + $0x98] sm:$0xff]  ;;  %v7454_v5 = vpack.c.bf16 %v7220_v59, %v7211_v54  ;;  %v7219_v54 = vmul.f32 %v14807_v23, %v14959_v24 }
 0x630   : > { %8353 = vmatprep.mubr.bf16.mxu1 %v7447_v6  ;;  %10827 = vmatpush3.bf16.msra.mxu1 %v11549_v53  ;;  %v14998_v22 = vadd.f32 %v10356_v51, %v6428_v15  ;;  %v6433_v60 = vadd.f32 %v10247_v44, %v14497_v28  ;;  %v7444_v6 = vpack.c.bf16 %v7201_v31, %v7192_v17  ;;  %v3305_v59 = vld [vmem:[#allocation3 + $0x91] sm:$0xff] }
 0x631   : > { %v10358_v42 = vpop.f32.mrf.mxu1  ;;  %10717 = vmatpush3.bf16.msra.mxu0 %v11544_v61  ;;  %10828 = vmatprep.subr.bf16.mxu1 %v11551_v62  ;;  %v10249_v53 = vpop.f32.mrf.mxu0  ;;  %v7213_v15 = vmul.f32 %v14792_v37, %v15003_v39  ;;  %v7222_v28 = vmul.f32 %v14792_v37, %v15005_v26  ;;  %v7446_v17 = vpack.c.bf16 %v7203_v40, %v7194_v34  ;;  %v3336_v40 = vld [vmem:[#allocation3 + $0x82] sm:$0xff] }
 0x632   : > { %v10359_v32 = vadd.f32 %v10358_v42, %v10357_v29  ;;  %11218 = vmatprep.subr.bf16.mxu0 %v11550_v27  ;;  %v10250_v51 = vadd.f32 %v10249_v53, %v10248_v45  ;;  %v7210_v42 = vmul.f32 %v14807_v23, %v14957_v0  ;;  %v3306_v45 = vld [vmem:[#allocation3 + $0x99] sm:$0xff] }
 0x633   : > { %v10360_v12 = vpop.f32.mrf.mxu1  ;;  %v10251_v44 = vpop.f32.mrf.mxu0  ;;  %8193 = vmatmul.mubr.bf16.gmra.mxu0 %v7444_v6  ;;  %v7456_v9 = vpack.c.bf16 %v7222_v28, %v7213_v15  ;;  %v7238_v53 = vmul.f32 %v14787_v18, %v3306_v45  ;;  %v7221_v15 = vmul.f32 %v14814_v4, %v3336_v40  ;;  %v3369_v28 = vld [vmem:[#allocation3 + $0xa8] sm:$0xff] }
 0x634   : > { %10829 = vmatpush3.bf16.msra.mxu1 %v11552_v1  ;;  %v15011_v11 = vadd.f32 %v10359_v32, %v6433_v60  ;;  %v6436_v61 = vadd.f32 %v10250_v51, %v14507_v47  ;;  %8200 = vmatprep.mubr.bf16.mxu0 %v7454_v5  ;;  %v7229_v47 = vmul.f32 %v14787_v18, %v3305_v59  ;;  %v3370_v51 = vld [vmem:[#allocation3 + $0xb0] sm:$0xff] }
 0x635   : > { %v10361_v62 = vpop.f32.mrf.mxu1  ;;  %11272 = vmatprep.subr.bf16.mxu1 %v11550_v27  ;;  %v10252_v31 = vpop.f32.mrf.mxu0  ;;  %v3335_v27 = vld [vmem:[#allocation3 + $0x7a] sm:$0xff] }
 0x636   : > { %v10362_v29 = vadd.f32 %v10361_v62, %v10360_v12  ;;  %v10253_v1 = vadd.f32 %v10252_v31, %v10251_v44  ;;  %v7212_v24 = vmul.f32 %v14814_v4, %v3335_v27  ;;  %v7453_v44 = vpack.c.bf16 %v7219_v54, %v7210_v42 }
 0x637   : > { %v10363_v60 = vpop.f32.mrf.mxu1  ;;  %8354 = vmatmul.mubr.bf16.gmra.mxu1 %v7446_v17  ;;  %v10254_v34 = vpop.f32.mrf.mxu0  ;;  %v7231_v62 = vmul.f32 %v14792_v37, %v3369_v28  ;;  %v7240_v17 = vmul.f32 %v14792_v37, %v3370_v51  ;;  %v7228_v42 = vmul.f32 %v14807_v23, %v15003_v39  ;;  %v7237_v54 = vmul.f32 %v14807_v23, %v15005_v26 }
 0x638   : > { %8361 = vmatprep.mubr.bf16.mxu1 %v7456_v9  ;;  %v15020_v32 = vadd.f32 %v10362_v29, %v6436_v61  ;;  %v6441_v0 = vadd.f32 %v10253_v1, %v14515_v16  ;;  %v7463_v61 = vpack.c.bf16 %v7238_v53, %v7229_v47  ;;  %v7455_v1 = vpack.c.bf16 %v7221_v15, %v7212_v24  ;;  %v3308_v47 = vld [vmem:[#allocation3 + $0xb1] sm:$0xff]  ;;  %v3338_v15 = vld [vmem:[#allocation3 + $0x9a] sm:$0xff] }
 0x639   : > { %v10364_v6 = vpop.f32.mrf.mxu1  ;;  %v10255_v12 = vpop.f32.mrf.mxu0  ;;  %v3337_v24 = vld [vmem:[#allocation3 + $0x92] sm:$0xff] }
 0x63a   : > { %v10365_v5 = vadd.f32 %v10364_v6, %v10363_v60  ;;  %v10256_v31 = vadd.f32 %v10255_v12, %v10254_v34  ;;  %v7465_v60 = vpack.c.bf16 %v7240_v17, %v7231_v62  ;;  %v3307_v34 = vld [vmem:[#allocation3 + $0xa9] sm:$0xff]  ;;  %v7230_v26 = vmul.f32 %v14814_v4, %v3337_v24  ;;  %v3371_v17 = vld [vmem:[#allocation3 + $0xc0] sm:$0xff] }
 0x63b   : > { %v10366_v9 = vpop.f32.mrf.mxu1  ;;  %v10257_v29 = vpop.f32.mrf.mxu0  ;;  %8201 = vmatmul.mubr.bf16.gmra.mxu0 %v7453_v44  ;;  %v7239_v62 = vmul.f32 %v14814_v4, %v3338_v15 }
 0x63c   : > { %v15027_v16 = vadd.f32 %v10365_v5, %v6441_v0  ;;  %v6444_v59 = vadd.f32 %v10256_v31, %v14529_v58  ;;  %8208 = vmatprep.mubr.bf16.mxu0 %v7463_v61  ;;  %v7247_v0 = vmul.f32 %v14787_v18, %v3307_v34  ;;  %v7256_v58 = vmul.f32 %v14787_v18, %v3308_v47  ;;  %v3372_v31 = vld [vmem:[#allocation3 + $0xc8] sm:$0xff] }
 0x63d   : > { %v10367_v45 = vpop.f32.mrf.mxu1  ;;  %v10258_v27 = vpop.f32.mrf.mxu0 }
 0x63e   : > { %v10368_v40 = vadd.f32 %v10367_v45, %v10366_v9  ;;  %v10259_v53 = vadd.f32 %v10258_v27, %v10257_v29  ;;  %v7462_v29 = vpack.c.bf16 %v7237_v54, %v7228_v42  ;;  %v7249_v45 = vmul.f32 %v14792_v37, %v3371_v17 }
 0x63f   : > { %v10369_v6 = vpop.f32.mrf.mxu1  ;;  %8362 = vmatmul.mubr.bf16.gmra.mxu1 %v7455_v1  ;;  %v10260_v12 = vpop.f32.mrf.mxu0  ;;  %v7258_v1 = vmul.f32 %v14792_v37, %v3372_v31  ;;  %v7246_v42 = vmul.f32 %v14807_v23, %v3369_v28  ;;  %v7255_v54 = vmul.f32 %v14807_v23, %v3370_v51 }
 0x640   : > { %8369 = vmatprep.mubr.bf16.mxu1 %v7465_v60  ;;  %v15036_v5 = vadd.f32 %v10368_v40, %v6444_v59  ;;  %v6449_v39 = vadd.f32 %v10259_v53, %v14540_v38  ;;  %v7472_v59 = vpack.c.bf16 %v7256_v58, %v7247_v0  ;;  %v7464_v53 = vpack.c.bf16 %v7239_v62, %v7230_v26  ;;  %v3340_v26 = vld [vmem:[#allocation3 + $0xb2] sm:$0xff] }
 0x641   : > { %v10370_v44 = vpop.f32.mrf.mxu1  ;;  %v10261_v9 = vpop.f32.mrf.mxu0 }
 0x642   : > { %v10371_v61 = vadd.f32 %v10370_v44, %v10369_v6  ;;  %v10262_v27 = vadd.f32 %v10261_v9, %v10260_v12  ;;  %v7474_v6 = vpack.c.bf16 %v7258_v1, %v7249_v45  ;;  %v3309_v44 = vld [vmem:[#allocation3 + $0xc1] sm:$0xff]  ;;  %v3310_v12 = vld [vmem:[#allocation3 + $0xc9] sm:$0xff]  ;;  %v7257_v45 = vmul.f32 %v14814_v4, %v3340_v26  ;;  %v3373_v1 = vld [vmem:[#allocation3 + $0xd8] sm:$0xff] }
 0x643   : > { %v10372_v60 = vpop.f32.mrf.mxu1  ;;  %v10263_v40 = vpop.f32.mrf.mxu0  ;;  %8209 = vmatmul.mubr.bf16.gmra.mxu0 %v7462_v29  ;;  %v7265_v58 = vmul.f32 %v14787_v18, %v3309_v44 }
 0x644   : > { %v15043_v38 = vadd.f32 %v10371_v61, %v6449_v39  ;;  %v6452_v34 = vadd.f32 %v10262_v27, %v14549_v49  ;;  %8216 = vmatprep.mubr.bf16.mxu0 %v7472_v59  ;;  %v7274_v39 = vmul.f32 %v14787_v18, %v3310_v12  ;;  %v3339_v61 = vld [vmem:[#allocation3 + $0xaa] sm:$0xff]  ;;  %v3374_v27 = vld [vmem:[#allocation3 + $0xe0] sm:$0xff] }
 0x645   : > { %v10373_v47 = vpop.f32.mrf.mxu1  ;;  %v10264_v24 = vpop.f32.mrf.mxu0  ;;  %v7248_v51 = vmul.f32 %v14814_v4, %v3339_v61 }
 0x646   : > { %v10374_v15 = vadd.f32 %v10373_v47, %v10372_v60  ;;  %v10265_v9 = vadd.f32 %v10264_v24, %v10263_v40  ;;  %v7471_v40 = vpack.c.bf16 %v7255_v54, %v7246_v42  ;;  %v7267_v47 = vmul.f32 %v14792_v37, %v3373_v1 }
 0x647   : > { %v10375_v0 = vpop.f32.mrf.mxu1  ;;  %8370 = vmatmul.mubr.bf16.gmra.mxu1 %v7464_v53  ;;  %v10266_v49 = vpop.f32.mrf.mxu0  ;;  %v7276_v53 = vmul.f32 %v14792_v37, %v3374_v27  ;;  %v7264_v42 = vmul.f32 %v14807_v23, %v3371_v17  ;;  %v7273_v54 = vmul.f32 %v14807_v23, %v3372_v31 }
 0x648   : > { %8377 = vmatprep.mubr.bf16.mxu1 %v7474_v6  ;;  %v15050_v62 = vadd.f32 %v10374_v15, %v6452_v34  ;;  %v6457_v29 = vadd.f32 %v10265_v9, %v14559_v43  ;;  %v7481_v34 = vpack.c.bf16 %v7274_v39, %v7265_v58  ;;  %v7473_v9 = vpack.c.bf16 %v7257_v45, %v7248_v51  ;;  %v3342_v51 = vld [vmem:[#allocation3 + $0xca] sm:$0xff] }
 0x649   : > { %v10376_v28 = vpop.f32.mrf.mxu1  ;;  %v10267_v60 = vpop.f32.mrf.mxu0 }
 0x64a   : > { %v10377_v59 = vadd.f32 %v10376_v28, %v10375_v0  ;;  %v10268_v24 = vadd.f32 %v10267_v60, %v10266_v49  ;;  %v7483_v0 = vpack.c.bf16 %v7276_v53, %v7267_v47  ;;  %v3311_v28 = vld [vmem:[#allocation3 + $0xd9] sm:$0xff]  ;;  %v3312_v49 = vld [vmem:[#allocation3 + $0xe1] sm:$0xff]  ;;  %v7275_v47 = vmul.f32 %v14814_v4, %v3342_v51  ;;  %v3375_v53 = vld [vmem:[#allocation3 + $0xf0] sm:$0xff] }
 0x64b   : > { %v10378_v6 = vpop.f32.mrf.mxu1  ;;  %v10269_v15 = vpop.f32.mrf.mxu0  ;;  %8217 = vmatmul.mubr.bf16.gmra.mxu0 %v7471_v40  ;;  %v7283_v39 = vmul.f32 %v14787_v18, %v3311_v28 }
 0x64c   : > { %v15057_v43 = vadd.f32 %v10377_v59, %v6457_v29  ;;  %v6460_v44 = vadd.f32 %v10268_v24, %v14565_v35  ;;  %8224 = vmatprep.mubr.bf16.mxu0 %v7481_v34  ;;  %v7292_v29 = vmul.f32 %v14787_v18, %v3312_v49  ;;  %v3341_v59 = vld [vmem:[#allocation3 + $0xc2] sm:$0xff]  ;;  %v3376_v24 = vld [vmem:[#allocation3 + $0xf8] sm:$0xff] }
 0x64d   : > { %v10379_v12 = vpop.f32.mrf.mxu1  ;;  %v10270_v61 = vpop.f32.mrf.mxu0  ;;  %v7266_v31 = vmul.f32 %v14814_v4, %v3341_v59 }
 0x64e   : > { %v10380_v26 = vadd.f32 %v10379_v12, %v10378_v6  ;;  %v10271_v60 = vadd.f32 %v10270_v61, %v10269_v15  ;;  %v7480_v15 = vpack.c.bf16 %v7273_v54, %v7264_v42  ;;  %v7285_v12 = vmul.f32 %v14792_v37, %v3375_v53 }
 0x64f   : > { %v10381_v58 = vpop.f32.mrf.mxu1  ;;  %8378 = vmatmul.mubr.bf16.gmra.mxu1 %v7473_v9  ;;  %v10272_v35 = vpop.f32.mrf.mxu0  ;;  %v7294_v9 = vmul.f32 %v14792_v37, %v3376_v24  ;;  %v7282_v42 = vmul.f32 %v14807_v23, %v3373_v1  ;;  %v7291_v54 = vmul.f32 %v14807_v23, %v3374_v27 }
 0x650   : > { %8385 = vmatprep.mubr.bf16.mxu1 %v7483_v0  ;;  %v15064_v45 = vadd.f32 %v10380_v26, %v6460_v44  ;;  %v6465_v40 = vadd.f32 %v10271_v60, %v14582_v57  ;;  %v7490_v44 = vpack.c.bf16 %v7292_v29, %v7283_v39  ;;  %v7482_v60 = vpack.c.bf16 %v7275_v47, %v7266_v31  ;;  %v3344_v31 = vld [vmem:[#allocation3 + $0xe2] sm:$0xff] }
 0x651   : > { %v10382_v17 = vpop.f32.mrf.mxu1  ;;  %v10273_v6 = vpop.f32.mrf.mxu0 }
 0x652   : > { %16186 = vst [vmem:[#allocation19_spill] sm:$0xff] %v15064_v45  ;;  %v10383_v34 = vadd.f32 %v10382_v17, %v10381_v58  ;;  %v10274_v61 = vadd.f32 %v10273_v6, %v10272_v35  ;;  %v7492_v58 = vpack.c.bf16 %v7294_v9, %v7285_v12  ;;  %v3313_v17 = vld [vmem:[#allocation3 + $0xf1] sm:$0xff]  ;;  %v3314_v35 = vld [vmem:[#allocation3 + $0xf9] sm:$0xff]  ;;  %v7293_v12 = vmul.f32 %v14814_v4, %v3344_v31  ;;  %v15083_v9 = vld [vmem:[#allocation3 + $0x108] sm:$0xff] }
 0x653   : > { %v10384_v0 = vpop.f32.mrf.mxu1  ;;  %v10275_v26 = vpop.f32.mrf.mxu0  ;;  %8225 = vmatmul.mubr.bf16.gmra.mxu0 %v7480_v15  ;;  %v7301_v29 = vmul.f32 %v14787_v18, %v3313_v17  ;;  %v9277_v17 = vmul.f32 -1.442695, %v14322_v56  ;;  %v7300_v45 = vmul.f32 %v14807_v23, %v3375_v53  ;;  %v16188_v53 = vld [vmem:[#allocation15_spill] sm:$0xff] }
 0x654   : > { %v15071_v57 = vadd.f32 %v10383_v34, %v6465_v40  ;;  %v6468_v28 = vadd.f32 %v10274_v61, %v14601_v52  ;;  %8232 = vmatprep.mubr.bf16.mxu0 %v7490_v44  ;;  %v7310_v40 = vmul.f32 %v14787_v18, %v3314_v35  ;;  %v3343_v34 = vld [vmem:[#allocation3 + $0xda] sm:$0xff]  ;;  %v15085_v61 = vld [vmem:[#allocation3 + $0x110] sm:$0xff] }
 0x655   : > { %v10385_v49 = vpop.f32.mrf.mxu1  ;;  %v10276_v59 = vpop.f32.mrf.mxu0  ;;  %v7284_v27 = vmul.f32 %v14814_v4, %v3343_v34 }
 0x656   : > { %v10386_v51 = vadd.f32 %v10385_v49, %v10384_v0  ;;  %v10277_v6 = vadd.f32 %v10276_v59, %v10275_v26  ;;  %v7489_v26 = vpack.c.bf16 %v7291_v54, %v7282_v42  ;;  %v7303_v49 = vmul.f32 %v14792_v37, %v15083_v9 }
 0x657   : > { %v10387_v39 = vpop.f32.mrf.mxu1  ;;  %8386 = vmatmul.mubr.bf16.gmra.mxu1 %v7482_v60  ;;  %v10278_v52 = vpop.f32.mrf.mxu0  ;;  %v16187_v60 = vld [vmem:[#allocation16_spill] sm:$0xff]  ;;  %v7491_v54 = vpack.c.bf16 %v7293_v12, %v7284_v27  ;;  %v3346_v12 = vld [vmem:[#allocation3 + $0xfa] sm:$0xff] }
 0x658   : > { %8393 = vmatprep.mubr.bf16.mxu1 %v7492_v58  ;;  %v15078_v47 = vadd.f32 %v10386_v51, %v6468_v28  ;;  %v6473_v15 = vadd.f32 %v10277_v6, %v14625_v36  ;;  %v7312_v28 = vmul.f32 %v14792_v37, %v15085_v61  ;;  %v9275_v36 = vmul.f32 -1.442695, %v16187_v60  ;;  %v3345_v27 = vld [vmem:[#allocation3 + $0xf2] sm:$0xff] }
 0x659   : > { %v10388_v1 = vpop.f32.mrf.mxu1  ;;  %v10279_v0 = vpop.f32.mrf.mxu0  ;;  %v7499_v58 = vpack.c.bf16 %v7310_v40, %v7301_v29  ;;  %v3316_v29 = vld [vmem:[#allocation3 + $0x111] sm:$0xff]  ;;  %v7302_v60 = vmul.f32 %v14814_v4, %v3345_v27 }
 0x65a   : > { %v10389_v44 = vadd.f32 %v10388_v1, %v10387_v39  ;;  %v10280_v59 = vadd.f32 %v10279_v0, %v10278_v52  ;;  %v7501_v1 = vpack.c.bf16 %v7312_v28, %v7303_v49  ;;  %v7309_v52 = vmul.f32 %v14807_v23, %v3376_v24  ;;  %v3315_v0 = vld [vmem:[#allocation3 + $0x109] sm:$0xff] }
 0x65b   : > { %v10390_v51 = vpop.f32.mrf.mxu1  ;;  %v10281_v35 = vpop.f32.mrf.mxu0  ;;  %8233 = vmatmul.mubr.bf16.gmra.mxu0 %v7489_v26  ;;  %11620 = vpow2.f32 %v9275_v36  ;;  %v9274_v49 = vmul.f32 -1.442695, %v16188_v53  ;;  %v7311_v36 = vmul.f32 %v14814_v4, %v3346_v12 }
 0x65c   : > { %v15093_v6 = vadd.f32 %v10389_v44, %v6473_v15  ;;  %v6476_v39 = vadd.f32 %v10280_v59, %v14645_v10  ;;  %8240 = vmatprep.mubr.bf16.mxu0 %v7499_v58  ;;  %v7319_v15 = vmul.f32 %v14787_v18, %v3315_v0  ;;  %v7328_v10 = vmul.f32 %v14787_v18, %v3316_v29  ;;  %v15106_v59 = vld [vmem:[#allocation3 + $0x120] sm:$0xff] }
 0x65d   : > { %v10391_v42 = vpop.f32.mrf.mxu1  ;;  %v10282_v34 = vpop.f32.mrf.mxu0  ;;  %11622 = vpow2.f32 %v9277_v17 }
 0x65e   : > { %v10392_v31 = vadd.f32 %v10391_v42, %v10390_v51  ;;  %v10283_v56 = vadd.f32 %v10282_v34, %v10281_v35  ;;  %v15108_v51 = vld [vmem:[#allocation3 + $0x128] sm:$0xff]  ;;  %v7498_v35 = vpack.c.bf16 %v7309_v52, %v7300_v45  ;;  %v7508_v34 = vpack.c.bf16 %v7328_v10, %v7319_v15 }
 0x65f   : > { %v10393_v40 = vpop.f32.mrf.mxu1  ;;  %8394 = vmatmul.mubr.bf16.gmra.mxu1 %v7491_v54  ;;  %v10284_v44 = vpop.f32.mrf.mxu0  ;;  %v7330_v42 = vmul.f32 %v14792_v37, %v15108_v51  ;;  %11624 = vpow2.f32 %v9274_v49  ;;  %v7500_v52 = vpack.c.bf16 %v7311_v36, %v7302_v60  ;;  %v7327_v15 = vmul.f32 %v14807_v23, %v15085_v61  ;;  %v3318_v10 = vld [vmem:[#allocation3 + $0x129] sm:$0xff]  ;;  %v3348_v60 = vld [vmem:[#allocation3 + $0x112] sm:$0xff] }
 0x660   : > { %8401 = vmatprep.mubr.bf16.mxu1 %v7501_v1  ;;  %v15100_v26 = vadd.f32 %v10392_v31, %v6476_v39  ;;  %v6481_v24 = vadd.f32 %v10283_v56, %v14669_v30  ;;  %v7321_v39 = vmul.f32 %v14792_v37, %v15106_v59  ;;  %v9276_v31 = vmul.f32 -1.442695, %v14308_v46  ;;  %v3317_v46 = vld [vmem:[#allocation3 + $0x121] sm:$0xff] }
 0x661   : > { %v10394_v28 = vpop.f32.mrf.mxu1  ;;  %v10285_v58 = vpop.f32.mrf.mxu0  ;;  %v7337_v49 = vmul.f32 %v14787_v18, %v3317_v46 }
 0x662   : > { %v10395_v17 = vadd.f32 %v10394_v28, %v10393_v40  ;;  %v10286_v54 = vadd.f32 %v10285_v58, %v10284_v44  ;;  %v7510_v27 = vpack.c.bf16 %v7330_v42, %v7321_v39  ;;  %v7318_v44 = vmul.f32 %v14807_v23, %v15083_v9  ;;  %v3347_v28 = vld [vmem:[#allocation3 + $0x10a] sm:$0xff]  ;;  %v15131_v39 = vld [vmem:[#allocation3 + $0x140] sm:$0xff] }
 0x663   : > { %v10396_v30 = vpop.f32.mrf.mxu1  ;;  %v10287_v1 = vpop.f32.mrf.mxu0  ;;  %8241 = vmatmul.mubr.bf16.gmra.mxu0 %v7498_v35  ;;  %11626 = vpow2.f32 %v9276_v31  ;;  %v7320_v61 = vmul.f32 %v14814_v4, %v3347_v28  ;;  %v15129_v35 = vld [vmem:[#allocation3 + $0x138] sm:$0xff]  ;;  %v7348_v31 = vmul.f32 %v14792_v37, %v15131_v39 }
 0x664   : > { %v15115_v0 = vadd.f32 %v10395_v17, %v6481_v24  ;;  %v6484_v29 = vadd.f32 %v10286_v54, %v14691_v14  ;;  %8248 = vmatprep.mubr.bf16.mxu0 %v7508_v34  ;;  %v7346_v14 = vmul.f32 %v14787_v18, %v3318_v10  ;;  %v7329_v17 = vmul.f32 %v14814_v4, %v3348_v60 }
 0x665   : > { %v10397_v45 = vpop.f32.mrf.mxu1  ;;  %v10288_v56 = vpop.f32.mrf.mxu0  ;;  %v7339_v34 = vmul.f32 %v14792_v37, %v15129_v35 }
 0x666   : > { %v10398_v40 = vadd.f32 %v10397_v45, %v10396_v30  ;;  %v10289_v12 = vadd.f32 %v10288_v56, %v10287_v1  ;;  %v7507_v30 = vpack.c.bf16 %v7327_v15, %v7318_v44  ;;  %v7509_v44 = vpack.c.bf16 %v7329_v17, %v7320_v61  ;;  %v3349_v17 = vld [vmem:[#allocation3 + $0x122] sm:$0xff] }
 0x667   : > { %v10399_v53 = vpop.f32.mrf.mxu1  ;;  %8402 = vmatmul.mubr.bf16.gmra.mxu1 %v7500_v52  ;;  %v10290_v24 = vpop.f32.mrf.mxu0 }
 0x668   : > { %8409 = vmatprep.mubr.bf16.mxu1 %v7510_v27  ;;  %v15124_v36 = vadd.f32 %v10398_v40, %v6484_v29  ;;  %v6489_v9 = vadd.f32 %v10289_v12, %v14712_v19  ;;  %v7517_v29 = vpack.c.bf16 %v7346_v14, %v7337_v49  ;;  %v11621_v45 = vpop.eup %11620  ;;  %v7519_v12 = vpack.c.bf16 %v7348_v31, %v7339_v34  ;;  %v3319_v14 = vld [vmem:[#allocation3 + $0x139] sm:$0xff] }
 0x669   : > { %v10400_v58 = vpop.f32.mrf.mxu1  ;;  %v10291_v42 = vpop.f32.mrf.mxu0  ;;  %v7345_v49 = vmul.f32 %v14807_v23, %v15108_v51  ;;  %v4929_v28 = vadd.f32 1.0, %v11621_v45  ;;  %v7338_v34 = vmul.f32 %v14814_v4, %v3349_v17 }
 0x66a   : > { %v10401_v54 = vadd.f32 %v10400_v58, %v10399_v53  ;;  %v10292_v1 = vadd.f32 %v10291_v42, %v10290_v24  ;;  %v11623_v40 = vpop.eup %11622  ;;  %v7336_v53 = vmul.f32 %v14807_v23, %v15106_v59  ;;  %v3320_v24 = vld [vmem:[#allocation3 + $0x141] sm:$0xff]  ;;  %v3350_v42 = vld [vmem:[#allocation3 + $0x12a] sm:$0xff] }
 0x66b   : > { %v10402_v19 = vpop.f32.mrf.mxu1  ;;  %v10293_v52 = vpop.f32.mrf.mxu0  ;;  %8249 = vmatmul.mubr.bf16.gmra.mxu0 %v7507_v30  ;;  %v7364_v58 = vmul.f32 %v14787_v18, %v3320_v24  ;;  %v4931_v59 = vadd.f32 1.0, %v11623_v40  ;;  %v7347_v31 = vmul.f32 %v14814_v4, %v3350_v42  ;;  %11628 = vrcp.f32 %v4929_v28 }
 0x66c   : > { %v15137_v56 = vadd.f32 %v10401_v54, %v6489_v9  ;;  %v6492_v27 = vadd.f32 %v10292_v1, %v14731_v2  ;;  %8256 = vmatprep.mubr.bf16.mxu0 %v7517_v29  ;;  %v7355_v2 = vmul.f32 %v14787_v18, %v3319_v14  ;;  %v15151_v1 = vld [vmem:[#allocation3 + $0x150] sm:$0xff]  ;;  %v11625_v29 = vpop.eup %11624  ;;  %v7354_v28 = vmul.f32 %v14807_v23, %v15129_v35 }
 0x66d   : > { %v10403_v46 = vpop.f32.mrf.mxu1  ;;  %v10294_v15 = vpop.f32.mrf.mxu0  ;;  %11630 = vrcp.f32 %v4931_v59  ;;  %v4928_v24 = vadd.f32 1.0, %v11625_v29 }
 0x66e   : > { %v10404_v10 = vadd.f32 %v10403_v46, %v10402_v19  ;;  %v10295_v60 = vadd.f32 %v10294_v15, %v10293_v52  ;;  %v15153_v19 = vld [vmem:[#allocation3 + $0x158] sm:$0xff]  ;;  %v7516_v46 = vpack.c.bf16 %v7345_v49, %v7336_v53  ;;  %v7526_v15 = vpack.c.bf16 %v7364_v58, %v7355_v2 }
 0x66f   : > { %v10405_v9 = vpop.f32.mrf.mxu1  ;;  %8410 = vmatmul.mubr.bf16.gmra.mxu1 %v7509_v44  ;;  %v10296_v61 = vpop.f32.mrf.mxu0  ;;  %v7366_v40 = vmul.f32 %v14792_v37, %v15153_v19  ;;  %v7518_v49 = vpack.c.bf16 %v7347_v31, %v7338_v34  ;;  %v7363_v2 = vmul.f32 %v14807_v23, %v15131_v39  ;;  %v3321_v58 = vld [vmem:[#allocation3 + $0x151] sm:$0xff]  ;;  %v3351_v31 = vld [vmem:[#allocation3 + $0x13a] sm:$0xff]  ;;  %11632 = vrcp.f32 %v4928_v24 }
 0x670   : > { %8417 = vmatprep.mubr.bf16.mxu1 %v7519_v12  ;;  %v15146_v54 = vadd.f32 %v10404_v10, %v6492_v27  ;;  %v6497_v30 = vadd.f32 %v10295_v60, %v14748_v7  ;;  %v7357_v27 = vmul.f32 %v14792_v37, %v15151_v1  ;;  %v11627_v14 = vpop.eup %11626  ;;  %v7373_v59 = vmul.f32 %v14787_v18, %v3321_v58 }
 0x671   : > { %v10406_v51 = vpop.f32.mrf.mxu1  ;;  %v10297_v45 = vpop.f32.mrf.mxu0  ;;  %v4930_v29 = vadd.f32 1.0, %v11627_v14 }
 0x672   : > { %v10407_v52 = vadd.f32 %v10406_v51, %v10405_v9  ;;  %v10298_v7 = vadd.f32 %v10297_v45, %v10296_v61  ;;  %v7528_v42 = vpack.c.bf16 %v7366_v40, %v7357_v27  ;;  %v3322_v61 = vld [vmem:[#allocation3 + $0x159] sm:$0xff]  ;;  %v3352_v45 = vld [vmem:[#allocation3 + $0x142] sm:$0xff] }
 0x673   : > { %v10408_v44 = vpop.f32.mrf.mxu1  ;;  %v10299_v10 = vpop.f32.mrf.mxu0  ;;  %8257 = vmatmul.mubr.bf16.gmra.mxu0 %v7516_v46  ;;  %v7356_v46 = vmul.f32 %v14814_v4, %v3351_v31  ;;  %v7365_v27 = vmul.f32 %v14814_v4, %v3352_v45  ;;  %v15173_v40 = vld [vmem:[#allocation3 + $0x168] sm:$0xff]  ;;  %11634 = vrcp.f32 %v4930_v29 }
 0x674   : > { %v15159_v12 = vadd.f32 %v10407_v52, %v6497_v30  ;;  %v6500_v60 = vadd.f32 %v10298_v7, %v14755_v50  ;;  %8264 = vmatprep.mubr.bf16.mxu0 %v7526_v15  ;;  %v7382_v50 = vmul.f32 %v14787_v18, %v3322_v61  ;;  %v15175_v7 = vld [vmem:[#allocation3 + $0x170] sm:$0xff]  ;;  %v7375_v14 = vmul.f32 %v14792_v37, %v15173_v40 }
 0x675   : > { %v10409_v53 = vpop.f32.mrf.mxu1  ;;  %v10300_v9 = vpop.f32.mrf.mxu0  ;;  %v7384_v24 = vmul.f32 %v14792_v37, %v15175_v7  ;;  %v7527_v58 = vpack.c.bf16 %v7365_v27, %v7356_v46  ;;  %v3354_v46 = vld [vmem:[#allocation3 + $0x15a] sm:$0xff] }
 0x676   : > { %v10410_v17 = vadd.f32 %v10409_v53, %v10408_v44  ;;  %v10301_v30 = vadd.f32 %v10300_v9, %v10299_v10  ;;  %v7525_v10 = vpack.c.bf16 %v7363_v2, %v7354_v28  ;;  %v7535_v53 = vpack.c.bf16 %v7382_v50, %v7373_v59  ;;  %v3323_v59 = vld [vmem:[#allocation3 + $0x169] sm:$0xff]  ;;  %v3324_v50 = vld [vmem:[#allocation3 + $0x171] sm:$0xff] }
 0x677   : > { %v10411_v51 = vpop.f32.mrf.mxu1  ;;  %8418 = vmatmul.mubr.bf16.gmra.mxu1 %v7518_v49  ;;  %v10302_v34 = vpop.f32.mrf.mxu0  ;;  %v7537_v61 = vpack.c.bf16 %v7384_v24, %v7375_v14  ;;  %v7391_v29 = vmul.f32 %v14787_v18, %v3323_v59  ;;  %v3388_v14 = vld [vmem:[#allocation3 + $0x188] sm:$0xff] }
 0x678   : > { %8425 = vmatprep.mubr.bf16.mxu1 %v7528_v42  ;;  %v15168_v52 = vadd.f32 %v10410_v17, %v6500_v60  ;;  %v6505_v35 = vadd.f32 %v10301_v30, %v14766_v13  ;;  %v7372_v30 = vmul.f32 %v14807_v23, %v15151_v1  ;;  %v11629_v45 = vpop.eup %11628 }
 0x679   : > { %v10412_v39 = vpop.f32.mrf.mxu1  ;;  %v10303_v44 = vpop.f32.mrf.mxu0 }
 0x67a   : > { %v10413_v15 = vadd.f32 %v10412_v39, %v10411_v51  ;;  %v10304_v60 = vadd.f32 %v10303_v44, %v10302_v34  ;;  %v7381_v51 = vmul.f32 %v14807_v23, %v15153_v19  ;;  %v3353_v39 = vld [vmem:[#allocation3 + $0x152] sm:$0xff]  ;;  %v11631_v24 = vpop.eup %11630 }
 0x67b   : > { %v10414_v13 = vpop.f32.mrf.mxu1  ;;  %v10305_v49 = vpop.f32.mrf.mxu0  ;;  %8265 = vmatmul.mubr.bf16.gmra.mxu0 %v7525_v10  ;;  %v7374_v19 = vmul.f32 %v14814_v4, %v3353_v39  ;;  %v3387_v10 = vld [vmem:[#allocation3 + $0x180] sm:$0xff] }
 0x67c   : > { %v15181_v9 = vadd.f32 %v10413_v15, %v6505_v35  ;;  %v6508_v17 = vadd.f32 %v10304_v60, %v14775_v55  ;;  %8272 = vmatprep.mubr.bf16.mxu0 %v7535_v53  ;;  %v7400_v55 = vmul.f32 %v14787_v18, %v3324_v50  ;;  %v7383_v15 = vmul.f32 %v14814_v4, %v3354_v46  ;;  %v11633_v50 = vpop.eup %11632 }
 0x67d   : > { %v10415_v42 = vpop.f32.mrf.mxu1  ;;  %v10306_v28 = vpop.f32.mrf.mxu0  ;;  %v7534_v18 = vpack.c.bf16 %v7381_v51, %v7372_v30  ;;  %v7393_v53 = vmul.f32 %v14792_v37, %v3387_v10 }
 0x67e   : > { %v10416_v2 = vadd.f32 %v10415_v42, %v10414_v13  ;;  %v10307_v34 = vadd.f32 %v10306_v28, %v10305_v49  ;;  %v7402_v49 = vmul.f32 %v14792_v37, %v3388_v14  ;;  %v7536_v51 = vpack.c.bf16 %v7383_v15, %v7374_v19  ;;  %v3355_v19 = vld [vmem:[#allocation3 + $0x16a] sm:$0xff]  ;;  %v3356_v15 = vld [vmem:[#allocation3 + $0x172] sm:$0xff] }
 0x67f   : > { %v10417_v31 = vpop.f32.mrf.mxu1  ;;  %8426 = vmatmul.mubr.bf16.gmra.mxu1 %v7527_v58  ;;  %v10308_v35 = vpop.f32.mrf.mxu0  ;;  %v7544_v58 = vpack.c.bf16 %v7400_v55, %v7391_v29  ;;  %v7399_v29 = vmul.f32 %v14807_v23, %v15175_v7  ;;  %v3421_v55 = vld [vmem:[#allocation3 + $0x1a] sm:$0xff]  ;;  %v7392_v14 = vmul.f32 %v14814_v4, %v3355_v19 }
 0x680   : > { %8433 = vmatprep.mubr.bf16.mxu1 %v7537_v61  ;;  %v15190_v27 = vadd.f32 %v10416_v2, %v6508_v17  ;;  %v6513_v1 = vadd.f32 %v10307_v34, %v14789_v25  ;;  %v15198_v17 = vrot.slane %v11629_v45, %v13600_v48  ;;  %v15203_v61 = vrot.slane %v11631_v24, %v13600_v48 }
 0x681   : > { %v10418_v44 = vpop.f32.mrf.mxu1  ;;  %v10309_v60 = vpop.f32.mrf.mxu0  ;;  %v7390_v45 = vmul.f32 %v14807_v23, %v15173_v40  ;;  %v15215_v40 = vrot.slane %v11633_v50, %v13600_v48  ;;  %v7401_v24 = vmul.f32 %v14814_v4, %v3356_v15  ;;  %v16189_v50 = vld [vmem:[#allocation30_spill] sm:$0xff] }
 0x682   : > { %v10419_v13 = vadd.f32 %v10418_v44, %v10417_v31  ;;  %v10310_v42 = vadd.f32 %v10309_v60, %v10308_v35  ;;  %v7546_v31 = vpack.c.bf16 %v7402_v49, %v7393_v53  ;;  %v3422_v35 = vld [vmem:[#allocation3 + $0x22] sm:$0xff]  ;;  %v15220_v60 = vld [vmem:[#allocation3 + $0x31] sm:$0xff] }
 0x683   : > { %v10420_v25 = vpop.f32.mrf.mxu1  ;;  %v10311_v28 = vpop.f32.mrf.mxu0  ;;  %8273 = vmatmul.mubr.bf16.gmra.mxu0 %v7534_v18 }
 0x684   : > { %v15200_v2 = vadd.f32 %v10419_v13, %v6513_v1  ;;  %v6516_v59 = vadd.f32 %v10310_v42, %v14799_v63  ;;  %8280 = vmatprep.mubr.bf16.mxu0 %v7544_v58  ;;  %v7125_v63 = vmul.f32 %v15198_v17, %v3421_v55  ;;  %v7134_v1 = vmul.f32 %v15198_v17, %v3422_v35  ;;  %v15222_v13 = vld [vmem:[#allocation3 + $0x39] sm:$0xff]  ;;  %v11635_v18 = vpop.eup %11634 }
 0x685   : > { %v10421_v30 = vpop.f32.mrf.mxu1  ;;  %v10312_v37 = vpop.f32.mrf.mxu0  ;;  %v7543_v42 = vpack.c.bf16 %v7399_v29, %v7390_v45  ;;  %v7136_v58 = vmul.f32 %v15203_v61, %v15222_v13  ;;  %v3389_v45 = vld [vmem:[#allocation3 + $0x19] sm:$0xff]  ;;  %v3390_v29 = vld [vmem:[#allocation3 + $0x21] sm:$0xff] }
 0x686   : > { %v10422_v34 = vadd.f32 %v10421_v30, %v10420_v25  ;;  %v10313_v39 = vadd.f32 %v10312_v37, %v10311_v28  ;;  %v7127_v25 = vmul.f32 %v15203_v61, %v15220_v60 }
 0x687   : > { %v10423_v46 = vpop.f32.mrf.mxu1  ;;  %8434 = vmatmul.mubr.bf16.gmra.mxu1 %v7536_v51  ;;  %v10314_v44 = vpop.f32.mrf.mxu0  ;;  %v15231_v51 = vrot.slane %v11635_v18, %v13600_v48 }
 0x688   : > { %8441 = vmatprep.mubr.bf16.mxu1 %v7546_v31  ;;  %v15212_v10 = vadd.f32 %v10422_v34, %v6516_v59  ;;  %v6521_v23 = vadd.f32 %v10313_v39, %v14811_v20  ;;  %v7413_v59 = vpack.c.bf16 %v7134_v1, %v7125_v63  ;;  %v7545_v31 = vpack.c.bf16 %v7401_v24, %v7392_v14  ;;  %v3423_v1 = vld [vmem:[#allocation3 + $0x32] sm:$0xff] }
 0x689   : > { %v10424_v7 = vpop.f32.mrf.mxu1  ;;  %v10315_v53 = vpop.f32.mrf.mxu0  ;;  %v7415_v39 = vpack.c.bf16 %v7136_v58, %v7127_v25  ;;  %v7133_v63 = vmul.f32 %v15215_v40, %v3390_v29  ;;  %v7143_v48 = vmul.f32 %v15198_v17, %v3423_v1  ;;  %v3454_v14 = vld [vmem:[#allocation3 + $0x30] sm:$0xff]  ;;  %v3455_v24 = vld [vmem:[#allocation3 + $0x38] sm:$0xff]  ;;  %v16191_v1 = vld [vmem:[#allocation38_spill] sm:$0xff] }
 0x68a   : > { %v10425_v49 = vadd.f32 %v10424_v7, %v10423_v46  ;;  %v10316_v20 = vadd.f32 %v10315_v53, %v10314_v44  ;;  %v7124_v46 = vmul.f32 %v15215_v40, %v3389_v45  ;;  %v3424_v44 = vld [vmem:[#allocation3 + $0x3a] sm:$0xff]  ;;  %v7126_v25 = vmul.f32 %v15231_v51, %v3454_v14 }
 0x68b   : > { %v10426_v28 = vpop.f32.mrf.mxu1  ;;  %v10317_v30 = vpop.f32.mrf.mxu0  ;;  %8281 = vmatmul.mubr.bf16.gmra.mxu0 %v7543_v42  ;;  %v16190_v53 = vld [vmem:[#allocation37_spill] sm:$0xff]  ;;  %v7135_v58 = vmul.f32 %v15231_v51, %v3455_v24 }
 0x68c   : > { %v15228_v4 = vadd.f32 %v10425_v49, %v6521_v23  ;;  %v6524_v37 = vadd.f32 %v10316_v20, %v16189_v50  ;;  %8482 = vmatprep.mubr.bf16.mxu0 %v7413_v59  ;;  %v7152_v23 = vmul.f32 %v15198_v17, %v3424_v44  ;;  %v15243_v20 = vld [vmem:[#allocation3 + $0x49] sm:$0xff]  ;;  %v7412_v50 = vpack.c.bf16 %v7133_v63, %v7124_v46 }
 0x68d   : > { %v10427_v34 = vpop.f32.mrf.mxu1  ;;  %v10318_v55 = vpop.f32.mrf.mxu0  ;;  %v11810_v63 = vld [vmem:[%s15937_s9 + $0x238] sm:$0xff]  }
 0x68e   : > { %v10428_v35 = vadd.f32 %v10427_v34, %v10426_v28  ;;  %v10319_v19 = vadd.f32 %v10318_v55, %v10317_v30  ;;  %v15245_v28 = vld [vmem:[#allocation3 + $0x51] sm:$0xff]  ;;  %v7145_v34 = vmul.f32 %v15203_v61, %v15243_v20  ;;  %v7422_v55 = vpack.c.bf16 %v7152_v23, %v7143_v48 }
 0x68f   : > { %v10429_v15 = vpop.f32.mrf.mxu1  ;;  %8442 = vmatmul.mubr.bf16.gmra.mxu1 %v7545_v31  ;;  %v10320_v7 = vpop.f32.mrf.mxu0  ;;  %v11553_v31 = vld [vmem:[%s15937_s9 + $0x230] sm:$0xff]   ;;  %v7142_v48 = vmul.f32 %v15215_v40, %v15220_v60  ;;  %v7151_v23 = vmul.f32 %v15215_v40, %v15222_v13  ;;  %v3456_v13 = vld [vmem:[#allocation3 + $0x48] sm:$0xff] }
 0x690   : > { %8643 = vmatprep.mubr.bf16.mxu1 %v7415_v39  ;;  %v15238_v18 = vadd.f32 %v10428_v35, %v6524_v37  ;;  %v6529_v49 = vadd.f32 %v10319_v19, %v16190_v53  ;;  %v7154_v37 = vmul.f32 %v15203_v61, %v15245_v28  ;;  %v3425_v53 = vld [vmem:[#allocation3 + $0x4a] sm:$0xff] }
 0x691   : > { %v10430_v42 = vpop.f32.mrf.mxu1  ;;  %v10321_v59 = vpop.f32.mrf.mxu0 }
 0x692   : > { %v10431_v30 = vadd.f32 %v10430_v42, %v10429_v15  ;;  %v10322_v45 = vadd.f32 %v10321_v59, %v10320_v7  ;;  %v7414_v15 = vpack.c.bf16 %v7135_v58, %v7126_v25  ;;  %v7424_v24 = vpack.c.bf16 %v7154_v37, %v7145_v34 }
 0x693   : > { %v10432_v29 = vpop.f32.mrf.mxu1  ;;  %v11150_v35 = vpop.f32.mrf.mxu0  ;;  %8483 = vmatmul.mubr.bf16.vlgmr.msra.gmra.mxu0 %v7412_v50  ;;  %v7161_v25 = vmul.f32 %v15198_v17, %v3425_v53  ;;  %v3457_v50 = vld [vmem:[#allocation3 + $0x50] sm:$0xff] }
 0x694   : > { %v15254_v39 = vadd.f32 %v10431_v30, %v6529_v49  ;;  %v6532_v44 = vadd.f32 %v10322_v45, %v16191_v1  ;;  %v6739_v46 = vadd.f32 %v11150_v35, %v14931_v8  ;;  %11219 = vmatpush3.bf16.msra.mxu0 %v11810_v63  ;;  %8490 = vmatprep.mubr.bf16.mxu0 %v7422_v55  ;;  %v3426_v49 = vld [vmem:[#allocation3 + $0x52] sm:$0xff]  ;;  %v15278_v55 = vld [vmem:[#allocation3 + $0x61] sm:$0xff]  ;;  %v15280_v35 = vld [vmem:[#allocation3 + $0x69] sm:$0xff] }
 0x695   : > { %v10433_v19 = vpop.f32.mrf.mxu1  ;;  %v6730_v7 = vpop.f32.mrf.mxu0  ;;  %11220 = vmatprep.subr.bf16.mxu0 %v11553_v31  ;;  %v11554_v8 = vld [vmem:[%s15937_s9 + $0x228] sm:$0xff]   ;;  %v7170_v58 = vmul.f32 %v15198_v17, %v3426_v49 }
 0x696   : > { %v10434_v14 = vadd.f32 %v10433_v19, %v10432_v29  ;;  %v6731_v42 = vadd.f32 %v6730_v7, %v14885_v41  ;;  %v7144_v41 = vmul.f32 %v15231_v51, %v3456_v13  ;;  %v7153_v29 = vmul.f32 %v15231_v51, %v3457_v50  ;;  %v3428_v13 = vld [vmem:[#allocation3 + $0x6a] sm:$0xff] }
 0x697   : > { %v11188_v59 = vpop.f32.mrf.mxu1  ;;  %8644 = vmatmul.mubr.bf16.vlgmr.msra.gmra.mxu1 %v7414_v15  ;;  %v11151_v30 = vpop.f32.mrf.mxu0  ;;  %v7421_v19 = vpack.c.bf16 %v7151_v23, %v7142_v48  ;;  %v7431_v7 = vpack.c.bf16 %v7170_v58, %v7161_v25  ;;  %v7169_v25 = vmul.f32 %v15215_v40, %v15245_v28  ;;  %v3427_v58 = vld [vmem:[#allocation3 + $0x62] sm:$0xff] }
 0x698   : > { %v15271_v60 = vadd.f32 %v11188_v59, %v6739_v46  ;;  %8651 = vmatprep.mubr.bf16.mxu1 %v7424_v24  ;;  %11280 = vmatpush3.bf16.msra.mxu1 %v11810_v63  ;;  %v15273_v34 = vadd.f32 %v10434_v14, %v6532_v44  ;;  %v6742_v37 = vadd.f32 %v11151_v30, %v14952_v3  ;;  %v11555_v63 = vld [vmem:[%s15937_s9 + $0x220] sm:$0xff]   ;;  %v3458_v28 = vld [vmem:[#allocation3 + $0x60] sm:$0xff] }
 0x699   : > { %v6957_v45 = vpop.f32.mrf.mxu1  ;;  %11221 = vmatpush3.bf16.msra.mxu0 %v11553_v31  ;;  %11273 = vmatprep.subr.bf16.mxu1 %v11553_v31  ;;  %v6733_v1 = vpop.f32.mrf.mxu0  ;;  %v7163_v44 = vmul.f32 %v15203_v61, %v15278_v55  ;;  %v7172_v3 = vmul.f32 %v15203_v61, %v15280_v35  ;;  %v7423_v49 = vpack.c.bf16 %v7153_v29, %v7144_v41  ;;  %v3459_v29 = vld [vmem:[#allocation3 + $0x68] sm:$0xff] }
 0x69a   : > { %v15282_v46 = vadd.f32 %v6957_v45, %v6731_v42  ;;  %11222 = vmatprep.subr.bf16.mxu0 %v11554_v8  ;;  %v6734_v15 = vadd.f32 %v6733_v1, %v14906_v21  ;;  %v7160_v42 = vmul.f32 %v15215_v40, %v15243_v20  ;;  %v7179_v20 = vmul.f32 %v15198_v17, %v3427_v58 }
 0x69b   : > { %v11189_v14 = vpop.f32.mrf.mxu1  ;;  %v11154_v24 = vpop.f32.mrf.mxu0  ;;  %8491 = vmatmul.mubr.bf16.gmra.mxu0 %v7421_v19  ;;  %v7433_v21 = vpack.c.bf16 %v7172_v3, %v7163_v44  ;;  %v7162_v44 = vmul.f32 %v15231_v51, %v3458_v28  ;;  %v15312_v3 = vld [vmem:[#allocation3 + $0x79] sm:$0xff]  ;;  %v3430_v28 = vld [vmem:[#allocation3 + $0x82] sm:$0xff] }
 0x69c   : > { %v15292_v53 = vadd.f32 %v11189_v14, %v6742_v37  ;;  %11281 = vmatpush3.bf16.msra.mxu1 %v11553_v31  ;;  %v6755_v48 = vadd.f32 %v11154_v24, %v15011_v11  ;;  %8498 = vmatprep.mubr.bf16.mxu0 %v7431_v7  ;;  %v11556_v11 = vld [vmem:[%s15937_s9 + $0x218] sm:$0xff]   ;;  %v7188_v37 = vmul.f32 %v15198_v17, %v3428_v13 }
 0x69d   : > { %v6960_v23 = vpop.f32.mrf.mxu1  ;;  %11223 = vmatpush3.bf16.msra.mxu0 %v11554_v8  ;;  %v6746_v59 = vpop.f32.mrf.mxu0  ;;  %11274 = vmatprep.subr.bf16.mxu1 %v11554_v8  ;;  %v7430_v24 = vpack.c.bf16 %v7169_v25, %v7160_v42 }
 0x69e   : > { %v15297_v30 = vadd.f32 %v6960_v23, %v6734_v15  ;;  %11224 = vmatprep.subr.bf16.mxu0 %v11555_v63  ;;  %v6747_v31 = vadd.f32 %v6746_v59, %v14977_v33  ;;  %v7171_v33 = vmul.f32 %v15231_v51, %v3459_v29  ;;  %v15314_v15 = vld [vmem:[#allocation3 + $0x81] sm:$0xff]  ;;  %v7440_v59 = vpack.c.bf16 %v7188_v37, %v7179_v20 }
 0x69f   : > { %v11192_v50 = vpop.f32.mrf.mxu1  ;;  %8652 = vmatmul.mubr.bf16.gmra.mxu1 %v7423_v49  ;;  %v11155_v45 = vpop.f32.mrf.mxu0  ;;  %v7187_v20 = vmul.f32 %v15215_v40, %v15280_v35  ;;  %v3429_v37 = vld [vmem:[#allocation3 + $0x7a] sm:$0xff] }
 0x6a0   : > { %v15307_v41 = vadd.f32 %v11192_v50, %v6755_v48  ;;  %8659 = vmatprep.mubr.bf16.mxu1 %v7433_v21  ;;  %11282 = vmatpush3.bf16.msra.mxu1 %v11554_v8  ;;  %v6758_v1 = vadd.f32 %v11155_v45, %v15020_v32  ;;  %v7181_v8 = vmul.f32 %v15203_v61, %v15312_v3  ;;  %v11557_v48 = vld [vmem:[%s15937_s9 + $0x210] sm:$0xff]   ;;  %v3460_v35 = vld [vmem:[#allocation3 + $0x78] sm:$0xff] }
 0x6a1   : > { %v6973_v19 = vpop.f32.mrf.mxu1  ;;  %11225 = vmatpush3.bf16.msra.mxu0 %v11555_v63  ;;  %11275 = vmatprep.subr.bf16.mxu1 %v11555_v63  ;;  %v6749_v14 = vpop.f32.mrf.mxu0  ;;  %v7190_v32 = vmul.f32 %v15203_v61, %v15314_v15  ;;  %v7432_v13 = vpack.c.bf16 %v7171_v33, %v7162_v44  ;;  %v3461_v33 = vld [vmem:[#allocation3 + $0x80] sm:$0xff] }
 0x6a2   : > { %v15316_v7 = vadd.f32 %v6973_v19, %v6747_v31  ;;  %11226 = vmatprep.subr.bf16.mxu0 %v11556_v11  ;;  %v6750_v23 = vadd.f32 %v6749_v14, %v14998_v22  ;;  %v7178_v31 = vmul.f32 %v15215_v40, %v15278_v55  ;;  %v7197_v55 = vmul.f32 %v15198_v17, %v3429_v37 }
 0x6a3   : > { %v11193_v49 = vpop.f32.mrf.mxu1  ;;  %v11158_v21 = vpop.f32.mrf.mxu0  ;;  %8499 = vmatmul.mubr.bf16.gmra.mxu0 %v7430_v24  ;;  %v7442_v22 = vpack.c.bf16 %v7190_v32, %v7181_v8  ;;  %v7180_v8 = vmul.f32 %v15231_v51, %v3460_v35  ;;  %v15346_v32 = vld [vmem:[#allocation3 + $0x91] sm:$0xff]  ;;  %v3432_v35 = vld [vmem:[#allocation3 + $0x9a] sm:$0xff] }
 0x6a4   : > { %v15326_v58 = vadd.f32 %v11193_v49, %v6758_v1  ;;  %11283 = vmatpush3.bf16.msra.mxu1 %v11555_v63  ;;  %v6771_v42 = vadd.f32 %v11158_v21, %v15043_v38  ;;  %8506 = vmatprep.mubr.bf16.mxu0 %v7440_v59  ;;  %v11558_v38 = vld [vmem:[%s15937_s9 + $0x208] sm:$0xff]   ;;  %v7206_v1 = vmul.f32 %v15198_v17, %v3430_v28 }
 0x6a5   : > { %v6976_v25 = vpop.f32.mrf.mxu1  ;;  %11227 = vmatpush3.bf16.msra.mxu0 %v11556_v11  ;;  %v6762_v50 = vpop.f32.mrf.mxu0  ;;  %11276 = vmatprep.subr.bf16.mxu1 %v11556_v11  ;;  %v7439_v21 = vpack.c.bf16 %v7187_v20, %v7178_v31 }
 0x6a6   : > { %v15331_v45 = vadd.f32 %v6976_v25, %v6750_v23  ;;  %11228 = vmatprep.subr.bf16.mxu0 %v11557_v48  ;;  %v6763_v63 = vadd.f32 %v6762_v50, %v15027_v16  ;;  %v7189_v16 = vmul.f32 %v15231_v51, %v3461_v33  ;;  %v15348_v23 = vld [vmem:[#allocation3 + $0x99] sm:$0xff]  ;;  %v7449_v50 = vpack.c.bf16 %v7206_v1, %v7197_v55 }
 0x6a7   : > { %v11196_v29 = vpop.f32.mrf.mxu1  ;;  %8660 = vmatmul.mubr.bf16.gmra.mxu1 %v7432_v13  ;;  %v11159_v19 = vpop.f32.mrf.mxu0  ;;  %v7205_v55 = vmul.f32 %v15215_v40, %v15314_v15  ;;  %v3431_v1 = vld [vmem:[#allocation3 + $0x92] sm:$0xff] }
 0x6a8   : > { %v15341_v44 = vadd.f32 %v11196_v29, %v6771_v42  ;;  %8667 = vmatprep.mubr.bf16.mxu1 %v7442_v22  ;;  %11284 = vmatpush3.bf16.msra.mxu1 %v11556_v11  ;;  %v6774_v14 = vadd.f32 %v11159_v19, %v15050_v62  ;;  %v7199_v11 = vmul.f32 %v15203_v61, %v15346_v32  ;;  %v11559_v42 = vld [vmem:[%s15937_s9 + $0x200] sm:$0xff]  }
 0x6a9   : > { %v6989_v24 = vpop.f32.mrf.mxu1  ;;  %11229 = vmatpush3.bf16.msra.mxu0 %v11557_v48  ;;  %11277 = vmatprep.subr.bf16.mxu1 %v11557_v48  ;;  %v6765_v49 = vpop.f32.mrf.mxu0  ;;  %v7208_v62 = vmul.f32 %v15203_v61, %v15348_v23  ;;  %v7441_v28 = vpack.c.bf16 %v7189_v16, %v7180_v8  ;;  %v7215_v33 = vmul.f32 %v15198_v17, %v3431_v1  ;;  %v3462_v8 = vld [vmem:[#allocation3 + $0x90] sm:$0xff]  ;;  %v3463_v16 = vld [vmem:[#allocation3 + $0x98] sm:$0xff] }
 0x6aa   : > { %16192 = vst [vmem:[#allocation12_spill] sm:$0xff] %v15341_v44  ;;  %v15350_v59 = vadd.f32 %v6989_v24, %v6763_v63  ;;  %11230 = vmatprep.subr.bf16.mxu0 %v11558_v38  ;;  %v6766_v25 = vadd.f32 %v6765_v49, %v15036_v5  ;;  %v7196_v63 = vmul.f32 %v15215_v40, %v15312_v3 }
 0x6ab   : > { %v11197_v13 = vpop.f32.mrf.mxu1  ;;  %v11162_v22 = vpop.f32.mrf.mxu0  ;;  %8507 = vmatmul.mubr.bf16.gmra.mxu0 %v7439_v21  ;;  %v7451_v5 = vpack.c.bf16 %v7208_v62, %v7199_v11  ;;  %v7224_v3 = vmul.f32 %v15198_v17, %v3432_v35  ;;  %v7198_v21 = vmul.f32 %v15231_v51, %v3462_v8  ;;  %v3496_v11 = vld [vmem:[#allocation3 + $0xa9] sm:$0xff]  ;;  %v3497_v62 = vld [vmem:[#allocation3 + $0xb1] sm:$0xff] }
 0x6ac   : > { %16193 = vst [vmem:[#allocation44_spill] sm:$0xff] %v15350_v59  ;;  %v15360_v37 = vadd.f32 %v11197_v13, %v6774_v14  ;;  %11285 = vmatpush3.bf16.msra.mxu1 %v11557_v48  ;;  %v6787_v31 = vadd.f32 %v11162_v22, %v15071_v57  ;;  %8514 = vmatprep.mubr.bf16.mxu0 %v7449_v50  ;;  %v3434_v8 = vld [vmem:[#allocation3 + $0xb2] sm:$0xff] }
 0x6ad   : > { %v6992_v20 = vpop.f32.mrf.mxu1  ;;  %11231 = vmatpush3.bf16.msra.mxu0 %v11558_v38  ;;  %v6778_v29 = vpop.f32.mrf.mxu0  ;;  %11278 = vmatprep.subr.bf16.mxu1 %v11558_v38  ;;  %v7448_v50 = vpack.c.bf16 %v7205_v55, %v7196_v63  ;;  %v7217_v22 = vmul.f32 %v15203_v61, %v3496_v11 }
 0x6ae   : > { %16194 = vst [vmem:[#allocation45_spill] sm:$0xff] %v15360_v37  ;;  %v15365_v19 = vadd.f32 %v6992_v20, %v6766_v25  ;;  %11232 = vmatprep.subr.bf16.mxu0 %v11559_v42  ;;  %v6779_v57 = vadd.f32 %v6778_v29, %v15057_v43  ;;  %v7207_v43 = vmul.f32 %v15231_v51, %v3463_v16 }
 0x6af   : > { %v11200_v48 = vpop.f32.mrf.mxu1  ;;  %8668 = vmatmul.mubr.bf16.gmra.mxu1 %v7441_v28  ;;  %v11163_v14 = vpop.f32.mrf.mxu0  ;;  %v7458_v28 = vpack.c.bf16 %v7224_v3, %v7215_v33  ;;  %v7223_v33 = vmul.f32 %v15215_v40, %v15348_v23  ;;  %v3433_v3 = vld [vmem:[#allocation3 + $0xaa] sm:$0xff] }
 0x6b0   : > { %16195 = vst [vmem:[#allocation35_spill] sm:$0xff] %v15365_v19  ;;  %v15372_v24 = vadd.f32 %v11200_v48, %v6787_v31  ;;  %8675 = vmatprep.mubr.bf16.mxu1 %v7451_v5  ;;  %11286 = vmatpush3.bf16.msra.mxu1 %v11558_v38  ;;  %v6790_v15 = vadd.f32 %v11163_v14, %v15078_v47  ;;  %v16198_v38 = vld [vmem:[#allocation19_spill] sm:$0xff] }
 0x6b1   : > { %v7005_v49 = vpop.f32.mrf.mxu1  ;;  %11233 = vmatpush3.bf16.msra.mxu0 %v11559_v42  ;;  %11279 = vmatprep.subr.bf16.mxu1 %v11559_v42  ;;  %v6781_v25 = vpop.f32.mrf.mxu0  ;;  %v7226_v31 = vmul.f32 %v15203_v61, %v3497_v62  ;;  %v7214_v14 = vmul.f32 %v15215_v40, %v15346_v32 }
 0x6b2   : > { %16196 = vst [vmem:[#allocation36_spill] sm:$0xff] %v15372_v24  ;;  %v15377_v13 = vadd.f32 %v7005_v49, %v6779_v57  ;;  %v6782_v20 = vadd.f32 %v6781_v25, %v16198_v38  ;;  %v7450_v57 = vpack.c.bf16 %v7207_v43, %v7198_v21  ;;  %v3464_v43 = vld [vmem:[#allocation3 + $0xa8] sm:$0xff]  ;;  %v3465_v25 = vld [vmem:[#allocation3 + $0xb0] sm:$0xff] }
 0x6b3   : > { %v11201_v47 = vpop.f32.mrf.mxu1  ;;  %v11166_v29 = vpop.f32.mrf.mxu0  ;;  %8515 = vmatmul.mubr.bf16.gmra.mxu0 %v7448_v50  ;;  %v7460_v55 = vpack.c.bf16 %v7226_v31, %v7217_v22  ;;  %v7216_v23 = vmul.f32 %v15231_v51, %v3464_v43  ;;  %v7225_v22 = vmul.f32 %v15231_v51, %v3465_v25  ;;  %v3499_v31 = vld [vmem:[#allocation3 + $0xc9] sm:$0xff] }
 0x6b4   : > { %16197 = vst [vmem:[#allocation42_spill] sm:$0xff] %v15377_v13  ;;  %v15382_v5 = vadd.f32 %v11201_v47, %v6790_v15  ;;  %11287 = vmatpush3.bf16.msra.mxu1 %v11559_v42  ;;  %v6803_v1 = vadd.f32 %v11166_v29, %v15115_v0  ;;  %8522 = vmatprep.mubr.bf16.mxu0 %v7458_v28  ;;  %v11812_v25 = vld [vmem:[#allocation3 + $0xca] sm:$0xff] }
 0x6b5   : > { %v7008_v35 = vpop.f32.mrf.mxu1  ;;  %v6794_v48 = vpop.f32.mrf.mxu0  ;;  %v7233_v0 = vmul.f32 %v15198_v17, %v3433_v3  ;;  %v7242_v15 = vmul.f32 %v15198_v17, %v3434_v8  ;;  %v7457_v47 = vpack.c.bf16 %v7223_v33, %v7214_v14  ;;  %v7244_v29 = vmul.f32 %v15203_v61, %v3499_v31 }
 0x6b6   : > { %16199 = vst [vmem:[#allocation43_spill] sm:$0xff] %v15382_v5  ;;  %v15385_v63 = vadd.f32 %v7008_v35, %v6782_v20  ;;  %v6795_v16 = vadd.f32 %v6794_v48, %v15093_v6  ;;  %v3498_v6 = vld [vmem:[#allocation3 + $0xc1] sm:$0xff]  ;;  %v7459_v8 = vpack.c.bf16 %v7225_v22, %v7216_v23  ;;  %v7232_v33 = vmul.f32 %v15215_v40, %v3496_v11 }
 0x6b7   : > { %v11204_v42 = vpop.f32.mrf.mxu1  ;;  %8676 = vmatmul.mubr.bf16.gmra.mxu1 %v7450_v57  ;;  %v11167_v49 = vpop.f32.mrf.mxu0  ;;  %v7235_v28 = vmul.f32 %v15203_v61, %v3498_v6  ;;  %v7467_v57 = vpack.c.bf16 %v7242_v15, %v7233_v0  ;;  %v11811_v15 = vld [vmem:[#allocation3 + $0xc2] sm:$0xff] }
 0x6b8   : > { %16200 = vst [vmem:[#allocation50_spill] sm:$0xff] %v15385_v63  ;;  %v15394_v21 = vadd.f32 %v11204_v42, %v6803_v1  ;;  %8683 = vmatprep.mubr.bf16.mxu1 %v7460_v55  ;;  %v6806_v32 = vadd.f32 %v11167_v49, %v15124_v36  ;;  %v7241_v49 = vmul.f32 %v15215_v40, %v3497_v62  ;;  %v3466_v23 = vld [vmem:[#allocation3 + $0xc0] sm:$0xff]  ;;  %v3467_v22 = vld [vmem:[#allocation3 + $0xc8] sm:$0xff] }
 0x6b9   : > { %v7021_v50 = vpop.f32.mrf.mxu1  ;;  %v6797_v38 = vpop.f32.mrf.mxu0  ;;  %v7469_v14 = vpack.c.bf16 %v7244_v29, %v7235_v28  ;;  %v7251_v43 = vmul.f32 %v11811_v15, %v15198_v17  ;;  %v7234_v62 = vmul.f32 %v15231_v51, %v3466_v23  ;;  %v3501_v28 = vld [vmem:[#allocation3 + $0xe1] sm:$0xff] }
 0x6ba   : > { %16201 = vst [vmem:[#allocation51_spill] sm:$0xff] %v15394_v21  ;;  %v15399_v20 = vadd.f32 %v7021_v50, %v6795_v16  ;;  %v6798_v1 = vadd.f32 %v6797_v38, %v15100_v26 }
 0x6bb   : > { %v11205_v35 = vpop.f32.mrf.mxu1  ;;  %v11170_v36 = vpop.f32.mrf.mxu0  ;;  %8523 = vmatmul.mubr.bf16.gmra.mxu0 %v7457_v47  ;;  %v3500_v47 = vld [vmem:[#allocation3 + $0xd9] sm:$0xff] }
 0x6bc   : > { %16202 = vst [vmem:[#allocation40_spill] sm:$0xff] %v15399_v20  ;;  %v15404_v48 = vadd.f32 %v11205_v35, %v6806_v32  ;;  %v6819_v55 = vadd.f32 %v11170_v36, %v15159_v12  ;;  %8530 = vmatprep.mubr.bf16.mxu0 %v7467_v57  ;;  %v7260_v12 = vmul.f32 %v11812_v25, %v15198_v17 }
 0x6bd   : > { %v7024_v3 = vpop.f32.mrf.mxu1  ;;  %v6810_v16 = vpop.f32.mrf.mxu0  ;;  %v7466_v35 = vpack.c.bf16 %v7241_v49, %v7232_v33  ;;  %v7253_v57 = vmul.f32 %v15203_v61, %v3500_v47  ;;  %v7262_v36 = vmul.f32 %v15203_v61, %v3501_v28  ;;  %v7250_v49 = vmul.f32 %v15215_v40, %v3498_v6 }
 0x6be   : > { %16203 = vst [vmem:[#allocation41_spill] sm:$0xff] %v15404_v48  ;;  %v15407_v42 = vadd.f32 %v7024_v3, %v6798_v1  ;;  %v6811_v26 = vadd.f32 %v6810_v16, %v15137_v56  ;;  %v7243_v56 = vmul.f32 %v15231_v51, %v3467_v22  ;;  %v11814_v22 = vld [vmem:[#allocation3 + $0xe2] sm:$0xff] }
 0x6bf   : > { %v11208_v0 = vpop.f32.mrf.mxu1  ;;  %8684 = vmatmul.mubr.bf16.gmra.mxu1 %v7459_v8  ;;  %v11171_v32 = vpop.f32.mrf.mxu0  ;;  %v7476_v8 = vpack.c.bf16 %v7260_v12, %v7251_v43  ;;  %v7478_v33 = vpack.c.bf16 %v7262_v36, %v7253_v57  ;;  %v11813_v12 = vld [vmem:[#allocation3 + $0xda] sm:$0xff] }
 0x6c0   : > { %16204 = vst [vmem:[#allocation48_spill] sm:$0xff] %v15407_v42  ;;  %v15414_v50 = vadd.f32 %v11208_v0, %v6819_v55  ;;  %8691 = vmatprep.mubr.bf16.mxu1 %v7469_v14  ;;  %v6822_v11 = vadd.f32 %v11171_v32, %v15168_v52  ;;  %v7468_v15 = vpack.c.bf16 %v7243_v56, %v7234_v62  ;;  %v3468_v62 = vld [vmem:[#allocation3 + $0xd8] sm:$0xff]  ;;  %v3469_v56 = vld [vmem:[#allocation3 + $0xe0] sm:$0xff] }
 0x6c1   : > { %v7037_v38 = vpop.f32.mrf.mxu1  ;;  %v6813_v29 = vpop.f32.mrf.mxu0  ;;  %v7259_v32 = vmul.f32 %v15215_v40, %v3499_v31  ;;  %v7269_v23 = vmul.f32 %v11813_v12, %v15198_v17  ;;  %v7252_v31 = vmul.f32 %v15231_v51, %v3468_v62  ;;  %v3503_v57 = vld [vmem:[#allocation3 + $0xf9] sm:$0xff] }
 0x6c2   : > { %16205 = vst [vmem:[#allocation49_spill] sm:$0xff] %v15414_v50  ;;  %v15419_v1 = vadd.f32 %v7037_v38, %v6811_v26  ;;  %v6814_v55 = vadd.f32 %v6813_v29, %v15146_v54 }
 0x6c3   : > { %v11209_v3 = vpop.f32.mrf.mxu1  ;;  %v11174_v52 = vpop.f32.mrf.mxu0  ;;  %8531 = vmatmul.mubr.bf16.gmra.mxu0 %v7466_v35  ;;  %v3502_v35 = vld [vmem:[#allocation3 + $0xf1] sm:$0xff] }
 0x6c4   : > { %16206 = vst [vmem:[#allocation46_spill] sm:$0xff] %v15419_v1  ;;  %v15424_v16 = vadd.f32 %v11209_v3, %v6822_v11  ;;  %v6835_v14 = vadd.f32 %v11174_v52, %v15200_v2  ;;  %8538 = vmatprep.mubr.bf16.mxu0 %v7476_v8  ;;  %v7278_v2 = vmul.f32 %v11814_v22, %v15198_v17 }
 0x6c5   : > { %v7040_v0 = vpop.f32.mrf.mxu1  ;;  %v6826_v26 = vpop.f32.mrf.mxu0  ;;  %v7475_v3 = vpack.c.bf16 %v7259_v32, %v7250_v49  ;;  %v7271_v8 = vmul.f32 %v15203_v61, %v3502_v35  ;;  %v7280_v52 = vmul.f32 %v15203_v61, %v3503_v57  ;;  %v7268_v32 = vmul.f32 %v15215_v40, %v3500_v47 }
 0x6c6   : > { %16207 = vst [vmem:[#allocation47_spill] sm:$0xff] %v15424_v16  ;;  %v15427_v25 = vadd.f32 %v7040_v0, %v6814_v55  ;;  %v6827_v54 = vadd.f32 %v6826_v26, %v15181_v9  ;;  %v7261_v9 = vmul.f32 %v15231_v51, %v3469_v56  ;;  %v11816_v56 = vld [vmem:[#allocation3 + $0xfa] sm:$0xff] }
 0x6c7   : > { %v11212_v43 = vpop.f32.mrf.mxu1  ;;  %8692 = vmatmul.mubr.bf16.gmra.mxu1 %v7468_v15  ;;  %v11175_v11 = vpop.f32.mrf.mxu0  ;;  %v7485_v15 = vpack.c.bf16 %v7278_v2, %v7269_v23  ;;  %v7487_v49 = vpack.c.bf16 %v7280_v52, %v7271_v8  ;;  %v11815_v2 = vld [vmem:[#allocation3 + $0xf2] sm:$0xff] }
 0x6c8   : > { %16208 = vst [vmem:[#allocation54_spill] sm:$0xff] %v15427_v25  ;;  %v15434_v38 = vadd.f32 %v11212_v43, %v6835_v14  ;;  %8699 = vmatprep.mubr.bf16.mxu1 %v7478_v33  ;;  %v6838_v6 = vadd.f32 %v11175_v11, %v15212_v10  ;;  %v7477_v12 = vpack.c.bf16 %v7261_v9, %v7252_v31  ;;  %v3470_v31 = vld [vmem:[#allocation3 + $0xf0] sm:$0xff]  ;;  %v3471_v9 = vld [vmem:[#allocation3 + $0xf8] sm:$0xff] }
 0x6c9   : > { %v7053_v29 = vpop.f32.mrf.mxu1  ;;  %v6829_v36 = vpop.f32.mrf.mxu0  ;;  %v7277_v11 = vmul.f32 %v15215_v40, %v3501_v28  ;;  %v7287_v62 = vmul.f32 %v11815_v2, %v15198_v17  ;;  %v7270_v28 = vmul.f32 %v15231_v51, %v3470_v31  ;;  %v3505_v8 = vld [vmem:[#allocation3 + $0x111] sm:$0xff] }
 0x6ca   : > { %16209 = vst [vmem:[#allocation55_spill] sm:$0xff] %v15434_v38  ;;  %v15439_v55 = vadd.f32 %v7053_v29, %v6827_v54  ;;  %v6830_v14 = vadd.f32 %v6829_v36, %v15190_v27 }
 0x6cb   : > { %v11213_v0 = vpop.f32.mrf.mxu1  ;;  %v11178_v10 = vpop.f32.mrf.mxu0  ;;  %8539 = vmatmul.mubr.bf16.gmra.mxu0 %v7475_v3  ;;  %v3504_v3 = vld [vmem:[#allocation3 + $0x109] sm:$0xff] }
 0x6cc   : > { %16210 = vst [vmem:[#allocation59_spill] sm:$0xff] %v15439_v55  ;;  %v15444_v26 = vadd.f32 %v11213_v0, %v6838_v6  ;;  %v6851_v33 = vadd.f32 %v11178_v10, %v15254_v39  ;;  %8546 = vmatprep.mubr.bf16.mxu0 %v7485_v15  ;;  %v7296_v39 = vmul.f32 %v11816_v56, %v15198_v17 }
 0x6cd   : > { %v7056_v43 = vpop.f32.mrf.mxu1  ;;  %v6842_v54 = vpop.f32.mrf.mxu0  ;;  %v7484_v0 = vpack.c.bf16 %v7277_v11, %v7268_v32  ;;  %v7289_v15 = vmul.f32 %v15203_v61, %v3504_v3  ;;  %v7298_v10 = vmul.f32 %v15203_v61, %v3505_v8  ;;  %v7286_v32 = vmul.f32 %v15215_v40, %v3502_v35 }
 0x6ce   : > { %16211 = vst [vmem:[#allocation52_spill] sm:$0xff] %v15444_v26  ;;  %v15447_v22 = vadd.f32 %v7056_v43, %v6830_v14  ;;  %v6843_v27 = vadd.f32 %v6842_v54, %v15228_v4  ;;  %v7279_v4 = vmul.f32 %v15231_v51, %v3471_v9  ;;  %v7295_v11 = vmul.f32 %v15215_v40, %v3503_v57  ;;  %v3507_v57 = vld [vmem:[#allocation3 + $0x129] sm:$0xff] }
 0x6cf   : > { %v11216_v23 = vpop.f32.mrf.mxu1  ;;  %8700 = vmatmul.mubr.bf16.gmra.mxu1 %v7477_v12  ;;  %v11179_v6 = vpop.f32.mrf.mxu0  ;;  %v7494_v12 = vpack.c.bf16 %v7296_v39, %v7287_v62  ;;  %v7496_v56 = vpack.c.bf16 %v7298_v10, %v7289_v15  ;;  %v11818_v39 = vld [vmem:[#allocation3 + $0x112] sm:$0xff] }
 0x6d0   : > { %16212 = vst [vmem:[#allocation53_spill] sm:$0xff] %v15447_v22  ;;  %v15454_v29 = vadd.f32 %v11216_v23, %v6851_v33  ;;  %8707 = vmatprep.mubr.bf16.mxu1 %v7487_v49  ;;  %v6854_v47 = vadd.f32 %v11179_v6, %v15273_v34  ;;  %v7486_v23 = vpack.c.bf16 %v7279_v4, %v7270_v28  ;;  %v3473_v28 = vld [vmem:[#allocation3 + $0x110] sm:$0xff] }
 0x6d1   : > { %v7069_v36 = vpop.f32.mrf.mxu1  ;;  %v6845_v52 = vpop.f32.mrf.mxu0  ;;  %v7314_v9 = vmul.f32 %v11818_v39, %v15198_v17  ;;  %v7297_v35 = vmul.f32 %v15231_v51, %v3473_v28 }
 0x6d2   : > { %v15459_v14 = vadd.f32 %v7069_v36, %v6843_v27  ;;  %v6846_v33 = vadd.f32 %v6845_v52, %v15238_v18  ;;  %v11817_v18 = vld [vmem:[#allocation3 + $0x10a] sm:$0xff] }
 0x6d3   : > { %v11217_v43 = vpop.f32.mrf.mxu1  ;;  %v10494_v54 = vpop.f32.mrf.mxu0  ;;  %8547 = vmatmul.mubr.bf16.gmra.mxu0 %v7484_v0  ;;  %v7305_v62 = vmul.f32 %v11817_v18, %v15198_v17  ;;  %v3472_v36 = vld [vmem:[#allocation3 + $0x108] sm:$0xff] }
 0x6d4   : > { %v15464_v34 = vadd.f32 %v11217_v43, %v6854_v47  ;;  %8554 = vmatprep.mubr.bf16.mxu0 %v7494_v12  ;;  %v7288_v52 = vmul.f32 %v15231_v51, %v3472_v36  ;;  %v3506_v0 = vld [vmem:[#allocation3 + $0x121] sm:$0xff]  ;;  %v7316_v12 = vmul.f32 %v15203_v61, %v3507_v57 }
 0x6d5   : > { %v7072_v49 = vpop.f32.mrf.mxu1  ;;  %v10495_v27 = vpop.f32.mrf.mxu0  ;;  %v7307_v43 = vmul.f32 %v15203_v61, %v3506_v0 }
 0x6d6   : > { %v15466_v2 = vadd.f32 %v7072_v49, %v6846_v33  ;;  %v10496_v6 = vadd.f32 %v10495_v27, %v10494_v54  ;;  %v7493_v33 = vpack.c.bf16 %v7295_v11, %v7286_v32  ;;  %v7495_v39 = vpack.c.bf16 %v7297_v35, %v7288_v52  ;;  %v3474_v52 = vld [vmem:[#allocation3 + $0x120] sm:$0xff]  ;;  %v3475_v35 = vld [vmem:[#allocation3 + $0x128] sm:$0xff] }
 0x6d7   : > { %v10606_v31 = vpop.f32.mrf.mxu1  ;;  %8708 = vmatmul.mubr.bf16.gmra.mxu1 %v7486_v23  ;;  %v10497_v47 = vpop.f32.mrf.mxu0  ;;  %v7503_v23 = vpack.c.bf16 %v7314_v9, %v7305_v62  ;;  %v7505_v22 = vpack.c.bf16 %v7316_v12, %v7307_v43  ;;  %v7313_v32 = vmul.f32 %v15215_v40, %v3505_v8  ;;  %v7315_v8 = vmul.f32 %v15231_v51, %v3475_v35  ;;  %v3508_v43 = vld [vmem:[#allocation3 + $0x139] sm:$0xff]  ;;  %v3509_v12 = vld [vmem:[#allocation3 + $0x141] sm:$0xff] }
 0x6d8   : > { %8715 = vmatprep.mubr.bf16.mxu1 %v7496_v56 }
 0x6d9   : > { %v10607_v4 = vpop.f32.mrf.mxu1  ;;  %v10498_v15 = vpop.f32.mrf.mxu0 }
 0x6da   : > { %v10608_v10 = vadd.f32 %v10607_v4, %v10606_v31  ;;  %v10499_v54 = vadd.f32 %v10498_v15, %v10497_v47  ;;  %v7304_v31 = vmul.f32 %v15215_v40, %v3504_v3  ;;  %v11819_v47 = vld [vmem:[#allocation3 + $0x122] sm:$0xff]  ;;  %v7306_v3 = vmul.f32 %v15231_v51, %v3474_v52 }
 0x6db   : > { %v10609_v49 = vpop.f32.mrf.mxu1  ;;  %v10500_v56 = vpop.f32.mrf.mxu0  ;;  %8555 = vmatmul.mubr.bf16.gmra.mxu0 %v7493_v33  ;;  %v7323_v62 = vmul.f32 %v11819_v47, %v15198_v17 }
 0x6dc   : > { %v15476_v27 = vadd.f32 %v10608_v10, %v10496_v6  ;;  %8562 = vmatprep.mubr.bf16.mxu0 %v7503_v23  ;;  %v11820_v6 = vld [vmem:[#allocation3 + $0x12a] sm:$0xff]  ;;  %v7504_v52 = vpack.c.bf16 %v7315_v8, %v7306_v3  ;;  %v3476_v3 = vld [vmem:[#allocation3 + $0x138] sm:$0xff]  ;;  %v3477_v8 = vld [vmem:[#allocation3 + $0x140] sm:$0xff] }
 0x6dd   : > { %v10610_v18 = vpop.f32.mrf.mxu1  ;;  %v10501_v36 = vpop.f32.mrf.mxu0  ;;  %v7332_v9 = vmul.f32 %v11820_v6, %v15198_v17 }
 0x6de   : > { %v10611_v28 = vadd.f32 %v10610_v18, %v10609_v49  ;;  %v10502_v11 = vadd.f32 %v10501_v36, %v10500_v56  ;;  %v7502_v56 = vpack.c.bf16 %v7313_v32, %v7304_v31  ;;  %v7325_v18 = vmul.f32 %v15203_v61, %v3508_v43 }
 0x6df   : > { %v10612_v4 = vpop.f32.mrf.mxu1  ;;  %8716 = vmatmul.mubr.bf16.gmra.mxu1 %v7495_v39  ;;  %v10503_v10 = vpop.f32.mrf.mxu0  ;;  %v7334_v39 = vmul.f32 %v15203_v61, %v3509_v12  ;;  %v7331_v31 = vmul.f32 %v15215_v40, %v3507_v57  ;;  %v7333_v57 = vmul.f32 %v15231_v51, %v3477_v8 }
 0x6e0   : > { %v15482_v15 = vadd.f32 %v10611_v28, %v10499_v54  ;;  %8723 = vmatprep.mubr.bf16.mxu1 %v7505_v22  ;;  %v7512_v28 = vpack.c.bf16 %v7332_v9, %v7323_v62 }
 0x6e1   : > { %v10613_v33 = vpop.f32.mrf.mxu1  ;;  %v10504_v49 = vpop.f32.mrf.mxu0  ;;  %v7514_v55 = vpack.c.bf16 %v7334_v39, %v7325_v18  ;;  %v3510_v18 = vld [vmem:[#allocation3 + $0x151] sm:$0xff]  ;;  %v3511_v39 = vld [vmem:[#allocation3 + $0x159] sm:$0xff] }
 0x6e2   : > { %v10614_v23 = vadd.f32 %v10613_v33, %v10612_v4  ;;  %v10505_v54 = vadd.f32 %v10504_v49, %v10503_v10  ;;  %v7322_v4 = vmul.f32 %v15215_v40, %v3506_v0  ;;  %v11821_v10 = vld [vmem:[#allocation3 + $0x13a] sm:$0xff]  ;;  %v7324_v0 = vmul.f32 %v15231_v51, %v3476_v3 }
 0x6e3   : > { %v10615_v36 = vpop.f32.mrf.mxu1  ;;  %v10506_v47 = vpop.f32.mrf.mxu0  ;;  %8563 = vmatmul.mubr.bf16.gmra.mxu0 %v7502_v56  ;;  %v7341_v62 = vmul.f32 %v11821_v10, %v15198_v17 }
 0x6e4   : > { %v15488_v22 = vadd.f32 %v10614_v23, %v10502_v11  ;;  %8570 = vmatprep.mubr.bf16.mxu0 %v7512_v28  ;;  %v11822_v11 = vld [vmem:[#allocation3 + $0x142] sm:$0xff]  ;;  %v7513_v3 = vpack.c.bf16 %v7333_v57, %v7324_v0  ;;  %v3478_v0 = vld [vmem:[#allocation3 + $0x150] sm:$0xff]  ;;  %v3479_v57 = vld [vmem:[#allocation3 + $0x158] sm:$0xff] }
 0x6e5   : > { %v10616_v6 = vpop.f32.mrf.mxu1  ;;  %v10507_v35 = vpop.f32.mrf.mxu0  ;;  %v7350_v9 = vmul.f32 %v11822_v11, %v15198_v17 }
 0x6e6   : > { %v10617_v26 = vadd.f32 %v10616_v6, %v10615_v36  ;;  %v10508_v32 = vadd.f32 %v10507_v35, %v10506_v47  ;;  %v7511_v47 = vpack.c.bf16 %v7331_v31, %v7322_v4  ;;  %v7343_v6 = vmul.f32 %v15203_v61, %v3510_v18 }
 0x6e7   : > { %v10618_v33 = vpop.f32.mrf.mxu1  ;;  %8724 = vmatmul.mubr.bf16.gmra.mxu1 %v7504_v52  ;;  %v10509_v23 = vpop.f32.mrf.mxu0  ;;  %v7352_v52 = vmul.f32 %v15203_v61, %v3511_v39  ;;  %v7521_v35 = vpack.c.bf16 %v7350_v9, %v7341_v62  ;;  %v7349_v4 = vmul.f32 %v15215_v40, %v3509_v12  ;;  %v7351_v12 = vmul.f32 %v15231_v51, %v3479_v57 }
 0x6e8   : > { %v15494_v49 = vadd.f32 %v10617_v26, %v10505_v54  ;;  %8731 = vmatprep.mubr.bf16.mxu1 %v7514_v55 }
 0x6e9   : > { %v10619_v56 = vpop.f32.mrf.mxu1  ;;  %v10510_v36 = vpop.f32.mrf.mxu0  ;;  %v7523_v25 = vpack.c.bf16 %v7352_v52, %v7343_v6  ;;  %v3512_v6 = vld [vmem:[#allocation3 + $0x169] sm:$0xff]  ;;  %v3513_v52 = vld [vmem:[#allocation3 + $0x171] sm:$0xff] }
 0x6ea   : > { %v10620_v28 = vadd.f32 %v10619_v56, %v10618_v33  ;;  %v10511_v26 = vadd.f32 %v10510_v36, %v10509_v23  ;;  %v7340_v33 = vmul.f32 %v15215_v40, %v3508_v43  ;;  %v11823_v23 = vld [vmem:[#allocation3 + $0x152] sm:$0xff]  ;;  %v7342_v43 = vmul.f32 %v15231_v51, %v3478_v0 }
 0x6eb   : > { %v10621_v54 = vpop.f32.mrf.mxu1  ;;  %v10512_v10 = vpop.f32.mrf.mxu0  ;;  %8571 = vmatmul.mubr.bf16.gmra.mxu0 %v7511_v47  ;;  %v7359_v62 = vmul.f32 %v11823_v23, %v15198_v17 }
 0x6ec   : > { %v15500_v55 = vadd.f32 %v10620_v28, %v10508_v32  ;;  %8578 = vmatprep.mubr.bf16.mxu0 %v7521_v35  ;;  %v11824_v32 = vld [vmem:[#allocation3 + $0x15a] sm:$0xff]  ;;  %v7522_v0 = vpack.c.bf16 %v7351_v12, %v7342_v43  ;;  %v3480_v43 = vld [vmem:[#allocation3 + $0x168] sm:$0xff]  ;;  %v3481_v12 = vld [vmem:[#allocation3 + $0x170] sm:$0xff] }
 0x6ed   : > { %v10622_v11 = vpop.f32.mrf.mxu1  ;;  %v10513_v8 = vpop.f32.mrf.mxu0  ;;  %v7368_v9 = vmul.f32 %v11824_v32, %v15198_v17 }
 0x6ee   : > { %v10623_v38 = vadd.f32 %v10622_v11, %v10621_v54  ;;  %v10514_v31 = vadd.f32 %v10513_v8, %v10512_v10  ;;  %v7520_v10 = vpack.c.bf16 %v7349_v4, %v7340_v33  ;;  %v7361_v11 = vmul.f32 %v15203_v61, %v3512_v6 }
 0x6ef   : > { %v10624_v56 = vpop.f32.mrf.mxu1  ;;  %8732 = vmatmul.mubr.bf16.gmra.mxu1 %v7513_v3  ;;  %v10515_v28 = vpop.f32.mrf.mxu0  ;;  %v7370_v3 = vmul.f32 %v15203_v61, %v3513_v52  ;;  %v7530_v8 = vpack.c.bf16 %v7368_v9, %v7359_v62  ;;  %v7367_v33 = vmul.f32 %v15215_v40, %v3511_v39  ;;  %v7369_v39 = vmul.f32 %v15231_v51, %v3481_v12 }
 0x6f0   : > { %v15506_v36 = vadd.f32 %v10623_v38, %v10511_v26  ;;  %8739 = vmatprep.mubr.bf16.mxu1 %v7523_v25 }
 0x6f1   : > { %v10625_v47 = vpop.f32.mrf.mxu1  ;;  %v10516_v54 = vpop.f32.mrf.mxu0  ;;  %v7532_v1 = vpack.c.bf16 %v7370_v3, %v7361_v11  ;;  %v3514_v11 = vld [vmem:[#allocation3 + $0x181] sm:$0xff]  ;;  %v3515_v3 = vld [vmem:[#allocation3 + $0x189] sm:$0xff] }
 0x6f2   : > { %v10626_v35 = vadd.f32 %v10625_v47, %v10624_v56  ;;  %v10517_v38 = vadd.f32 %v10516_v54, %v10515_v28  ;;  %v7358_v56 = vmul.f32 %v15215_v40, %v3510_v18  ;;  %v11825_v28 = vld [vmem:[#allocation3 + $0x16a] sm:$0xff]  ;;  %v7360_v18 = vmul.f32 %v15231_v51, %v3480_v43 }
 0x6f3   : > { %v10627_v26 = vpop.f32.mrf.mxu1  ;;  %v10518_v23 = vpop.f32.mrf.mxu0  ;;  %8579 = vmatmul.mubr.bf16.gmra.mxu0 %v7520_v10  ;;  %v7377_v62 = vmul.f32 %v11825_v28, %v15198_v17 }
 0x6f4   : > { %v15512_v25 = vadd.f32 %v10626_v35, %v10514_v31  ;;  %8586 = vmatprep.mubr.bf16.mxu0 %v7530_v8  ;;  %v11826_v31 = vld [vmem:[#allocation3 + $0x172] sm:$0xff]  ;;  %v7531_v43 = vpack.c.bf16 %v7369_v39, %v7360_v18  ;;  %v3482_v39 = vld [vmem:[#allocation3 + $0x180] sm:$0xff] }
 0x6f5   : > { %v10628_v32 = vpop.f32.mrf.mxu1  ;;  %v10519_v57 = vpop.f32.mrf.mxu0  ;;  %v7386_v9 = vmul.f32 %v11826_v31, %v15198_v17 }
 0x6f6   : > { %v10629_v16 = vadd.f32 %v10628_v32, %v10627_v26  ;;  %v10520_v4 = vadd.f32 %v10519_v57, %v10518_v23  ;;  %v7529_v23 = vpack.c.bf16 %v7367_v33, %v7358_v56  ;;  %v7379_v32 = vmul.f32 %v15203_v61, %v3514_v11  ;;  %v3451_v33 = vld [vmem:[#allocation3 + $0x182] sm:$0xff] }
 0x6f7   : > { %v10630_v47 = vpop.f32.mrf.mxu1  ;;  %8740 = vmatmul.mubr.bf16.gmra.mxu1 %v7522_v0  ;;  %v10521_v35 = vpop.f32.mrf.mxu0  ;;  %v7388_v0 = vmul.f32 %v15203_v61, %v3515_v3  ;;  %v7539_v57 = vpack.c.bf16 %v7386_v9, %v7377_v62  ;;  %v7385_v56 = vmul.f32 %v15215_v40, %v3513_v52  ;;  %v3516_v9 = vld [vmem:[#allocation3 + $0x199] sm:$0xff]  ;;  %v7378_v52 = vmul.f32 %v15231_v51, %v3482_v39 }
 0x6f8   : > { %v15518_v54 = vadd.f32 %v10629_v16, %v10517_v38  ;;  %8747 = vmatprep.mubr.bf16.mxu1 %v7532_v1 }
 0x6f9   : > { %v10631_v10 = vpop.f32.mrf.mxu1  ;;  %v10522_v26 = vpop.f32.mrf.mxu0  ;;  %v7541_v42 = vpack.c.bf16 %v7388_v0, %v7379_v32 }
 0x6fa   : > { %v10632_v8 = vadd.f32 %v10631_v10, %v10630_v47  ;;  %v10523_v16 = vadd.f32 %v10522_v26, %v10521_v35  ;;  %v7376_v47 = vmul.f32 %v15215_v40, %v3512_v6  ;;  %v3452_v10 = vld [vmem:[#allocation3 + $0x18a] sm:$0xff]  ;;  %v3517_v26 = vld [vmem:[#allocation3 + $0x1a1] sm:$0xff] }
 0x6fb   : > { %v10633_v38 = vpop.f32.mrf.mxu1  ;;  %v10524_v28 = vpop.f32.mrf.mxu0  ;;  %8587 = vmatmul.mubr.bf16.gmra.mxu0 %v7529_v23  ;;  %v7404_v62 = vmul.f32 %v15198_v17, %v3452_v10  ;;  %v3483_v23 = vld [vmem:[#allocation3 + $0x188] sm:$0xff] }
 0x6fc   : > { %v15524_v1 = vadd.f32 %v10632_v8, %v10520_v4  ;;  %8594 = vmatprep.mubr.bf16.mxu0 %v7539_v57  ;;  %v7395_v4 = vmul.f32 %v15198_v17, %v3451_v33  ;;  %v7387_v32 = vmul.f32 %v15231_v51, %v3483_v23  ;;  %v7538_v57 = vpack.c.bf16 %v7385_v56, %v7376_v47  ;;  %v3518_v56 = vld [vmem:[#allocation3 + $0x32] sm:$0xff] }
 0x6fd   : > { %v10634_v31 = vpop.f32.mrf.mxu1  ;;  %v10525_v12 = vpop.f32.mrf.mxu0  ;;  %v7406_v17 = vmul.f32 %v15203_v61, %v3517_v26  ;;  %v7403_v47 = vmul.f32 %v15215_v40, %v3515_v3 }
 0x6fe   : > { %v10635_v50 = vadd.f32 %v10634_v31, %v10633_v38  ;;  %v10526_v48 = vadd.f32 %v10525_v12, %v10524_v28  ;;  %v7397_v28 = vmul.f32 %v15203_v61, %v3516_v9  ;;  %v7540_v20 = vpack.c.bf16 %v7387_v32, %v7378_v52  ;;  %v3519_v9 = vld [vmem:[#allocation3 + $0x3a] sm:$0xff]  ;;  %v11827_v32 = vld [vmem:[#allocation2] sm:$0xff] }
 0x6ff   : > { %v10636_v35 = vpop.f32.mrf.mxu1  ;;  %8748 = vmatmul.mubr.bf16.gmra.mxu1 %v7531_v43  ;;  %v10527_v18 = vpop.f32.mrf.mxu0 }
 0x700   : > { %v15530_v8 = vadd.f32 %v10635_v50, %v10523_v16  ;;  %8755 = vmatprep.mubr.bf16.mxu1 %v7541_v42  ;;  %v7548_v50 = vpack.c.bf16 %v7404_v62, %v7395_v4  ;;  %v7550_v23 = vpack.c.bf16 %v7406_v17, %v7397_v28  ;;  %v16213_v4 = vld [vmem:[#allocation17_spill] sm:$0xff] }
 0x701   : > { %v10637_v6 = vpop.f32.mrf.mxu1  ;;  %v10528_v0 = vpop.f32.mrf.mxu0  ;;  %v7137_v62 = vmul.f32 %v16213_v4, %v3519_v9  ;;  %v7380_v3 = vmul.f32 %v16213_v4, %v3451_v33  ;;  %v3549_v9 = vld [vmem:[#allocation3 + $0x1a2] sm:$0xff] }
 0x702   : > { %v10638_v38 = vadd.f32 %v10637_v6, %v10636_v35  ;;  %v10529_v31 = vadd.f32 %v10528_v0, %v10527_v18  ;;  %v7394_v35 = vmul.f32 %v15215_v40, %v3514_v11  ;;  %v7396_v0 = vmul.f32 %v11827_v32, %v15231_v51  ;;  %v3522_v51 = vld [vmem:[#allocation3 + $0x62] sm:$0xff] }
 0x703   : > { %v10639_v43 = vpop.f32.mrf.mxu1  ;;  %v10530_v42 = vpop.f32.mrf.mxu0  ;;  %8595 = vmatmul.mubr.bf16.gmra.mxu0 %v7538_v57  ;;  %v7389_v57 = vmul.f32 %v16213_v4, %v3452_v10 }
 0x704   : > { %v15536_v16 = vadd.f32 %v10638_v38, %v10526_v48  ;;  %8602 = vmatprep.mubr.bf16.mxu0 %v7548_v50  ;;  %v7128_v48 = vmul.f32 %v16213_v4, %v3518_v56  ;;  %v7547_v40 = vpack.c.bf16 %v7403_v47, %v7394_v35  ;;  %v7549_v50 = vpack.c.bf16 %v7396_v0, %v7396_v0  ;;  %v3523_v47 = vld [vmem:[#allocation3 + $0x6a] sm:$0xff]  ;;  %v3548_v56 = vld [vmem:[#allocation3 + $0x19a] sm:$0xff] }
 0x705   : > { %v10640_v12 = vpop.f32.mrf.mxu1  ;;  %v10531_v39 = vpop.f32.mrf.mxu0  ;;  %v7542_v35 = vpack.c.bf16 %v7389_v57, %v7380_v3  ;;  %v7398_v0 = vmul.f32 %v16213_v4, %v3548_v56 }
 0x706   : > { %v10641_v21 = vadd.f32 %v10640_v12, %v10639_v43  ;;  %v10532_v61 = vadd.f32 %v10531_v39, %v10530_v42  ;;  %v7416_v17 = vpack.c.bf16 %v7137_v62, %v7128_v48  ;;  %v3520_v42 = vld [vmem:[#allocation3 + $0x4a] sm:$0xff]  ;;  %v3521_v12 = vld [vmem:[#allocation3 + $0x52] sm:$0xff]  ;;  %v7164_v48 = vmul.f32 %v16213_v4, %v3522_v51 }
 0x707   : > { %v10642_v26 = vpop.f32.mrf.mxu1  ;;  %8756 = vmatmul.mubr.bf16.gmra.mxu1 %v7540_v20  ;;  %v10533_v6 = vpop.f32.mrf.mxu0  ;;  %v7146_v33 = vmul.f32 %v16213_v4, %v3520_v42  ;;  %v7155_v10 = vmul.f32 %v16213_v4, %v3521_v12  ;;  %v7173_v62 = vmul.f32 %v16213_v4, %v3523_v47  ;;  %v3524_v42 = vld [vmem:[#allocation3 + $0x7a] sm:$0xff]  ;;  %v3525_v12 = vld [vmem:[#allocation3 + $0x82] sm:$0xff]  ;;  %v3526_v47 = vld [vmem:[#allocation3 + $0x92] sm:$0xff] }
 0x708   : > { %v15542_v18 = vadd.f32 %v10641_v21, %v10529_v31  ;;  %8763 = vmatprep.mubr.bf16.mxu1 %v7550_v23 }
 0x709   : > { %v10643_v52 = vpop.f32.mrf.mxu1  ;;  %v10534_v11 = vpop.f32.mrf.mxu0  ;;  %v7425_v3 = vpack.c.bf16 %v7155_v10, %v7146_v33  ;;  %v3527_v33 = vld [vmem:[#allocation3 + $0x9a] sm:$0xff] }
 0x70a   : > { %v10644_v38 = vadd.f32 %v10643_v52, %v10642_v26  ;;  %v10535_v20 = vadd.f32 %v10534_v11, %v10533_v6  ;;  %v7407_v11 = vmul.f32 %v16213_v4, %v3549_v9  ;;  %v7200_v9 = vmul.f32 %v16213_v4, %v3526_v47 }
 0x70b   : > { %v10645_v28 = vpop.f32.mrf.mxu1  ;;  %v10536_v21 = vpop.f32.mrf.mxu0  ;;  %8603 = vmatmul.mubr.bf16.gmra.mxu0 %v7547_v40 }
 0x70c   : > { %v15547_v43 = vadd.f32 %v10644_v38, %v10532_v61  ;;  %11234 = vmatprep.mubr.bf16.mxu0 %v7416_v17  ;;  %v7434_v17 = vpack.c.bf16 %v7173_v62, %v7164_v48 }
 0x70d   : > { %v10646_v31 = vpop.f32.mrf.mxu1  ;;  %v10537_v39 = vpop.f32.mrf.mxu0 }
 0x70e   : > { %v10647_v23 = vadd.f32 %v10646_v31, %v10645_v28  ;;  %v10538_v61 = vadd.f32 %v10537_v39, %v10536_v21 }
 0x70f   : > { %v10648_v26 = vpop.f32.mrf.mxu1  ;;  %8764 = vmatmul.mubr.bf16.gmra.mxu1 %v7549_v50  ;;  %v10539_v52 = vpop.f32.mrf.mxu0  ;;  %v7551_v50 = vpack.c.bf16 %v7407_v11, %v7398_v0 }
 0x710   : > { %v15553_v6 = vadd.f32 %v10647_v23, %v10535_v20  ;;  %11262 = vmatprep.mubr.bf16.mxu1 %v7542_v35  ;;  %v7182_v23 = vmul.f32 %v16213_v4, %v3524_v42  ;;  %v7191_v35 = vmul.f32 %v16213_v4, %v3525_v12 }
 0x711   : > { %v10649_v32 = vpop.f32.mrf.mxu1  ;;  %v10540_v38 = vpop.f32.mrf.mxu0 }
 0x712   : > { %v10650_v40 = vadd.f32 %v10649_v32, %v10648_v26  ;;  %v10541_v57 = vadd.f32 %v10540_v38, %v10539_v52  ;;  %v7443_v0 = vpack.c.bf16 %v7191_v35, %v7182_v23 }
 0x713   : > { %v10651_v28 = vpop.f32.mrf.mxu1  ;;  %v10542_v31 = vpop.f32.mrf.mxu0  ;;  %11235 = vmatmul.mubr.bf16.vlgmr.msra.gmra.mxu0 %v7425_v3 }
 0x714   : > { %v15557_v21 = vadd.f32 %v10650_v40, %v10538_v61  ;;  %11238 = vmatprep.mubr.bf16.mxu0 %v7434_v17  ;;  %v7209_v61 = vmul.f32 %v16213_v4, %v3527_v33 }
 0x715   : > { %v10652_v20 = vpop.f32.mrf.mxu1  ;;  %v10543_v51 = vpop.f32.mrf.mxu0 }
 0x716   : > { %v10653_v39 = vadd.f32 %v10652_v20, %v10651_v28  ;;  %v10544_v10 = vadd.f32 %v10543_v51, %v10542_v31  ;;  %v7452_v40 = vpack.c.bf16 %v7209_v61, %v7200_v9  ;;  %v3528_v31 = vld [vmem:[#allocation3 + $0xaa] sm:$0xff]  ;;  %v3529_v20 = vld [vmem:[#allocation3 + $0xb2] sm:$0xff] }
 0x717   : > { %v10654_v56 = vpop.f32.mrf.mxu1  ;;  %11263 = vmatmul.mubr.bf16.vlgmr.msra.gmra.mxu1 %v7551_v50  ;;  %v10545_v48 = vpop.f32.mrf.mxu0  ;;  %v7227_v12 = vmul.f32 %v16213_v4, %v3529_v20 }
 0x718   : > { %v15563_v26 = vadd.f32 %v10653_v39, %v10541_v57  ;;  %v7218_v57 = vmul.f32 %v16213_v4, %v3528_v31 }
 0x719   : > { %v10655_v62 = vpop.f32.mrf.mxu1  ;;  %v10546_v52 = vpop.f32.mrf.mxu0 }
 0x71a   : > { %v10656_v32 = vadd.f32 %v10655_v62, %v10654_v56  ;;  %v10547_v11 = vadd.f32 %v10546_v52, %v10545_v48  ;;  %v7461_v56 = vpack.c.bf16 %v7227_v12, %v7218_v57  ;;  %v16214_v52 = vld [vmem:[#allocation22_spill] sm:$0xff] }
 0x71b   : > { %v10657_v38 = vpop.f32.mrf.mxu1  ;;  %v10548_v28 = vpop.f32.mrf.mxu0  ;;  %11239 = vmatmul.mubr.bf16.gmra.mxu0 %v7443_v0 }
 0x71c   : > { %v15565_v3 = vadd.f32 %v10656_v32, %v10544_v10  ;;  %11242 = vmatprep.mubr.bf16.mxu0 %v7452_v40  ;;  %v16215_v32 = vld [vmem:[#allocation21_spill] sm:$0xff] }
 0x71d   : > { %v10658_v17 = vpop.f32.mrf.mxu1  ;;  %v10549_v50 = vpop.f32.mrf.mxu0  ;;  %v16216_v0 = vpack.c.bf16 %v16214_v52, %v16215_v32 }
 0x71e   : > { %v10659_v42 = vadd.f32 %v10658_v17, %v10657_v38  ;;  %v10550_v51 = vadd.f32 %v10549_v50, %v10548_v28 }
 0x71f   : > { %v10660_v39 = vpop.f32.mrf.mxu1  ;;  %v10551_v35 = vpop.f32.mrf.mxu0 }
 0x720   : > { %v15569_v23 = vadd.f32 %v10659_v42, %v10547_v11 }
 0x721   : > { %v10661_v47 = vpop.f32.mrf.mxu1  ;;  %v10552_v33 = vpop.f32.mrf.mxu0 }
 0x722   : > { %v10662_v10 = vadd.f32 %v10661_v47, %v10660_v39  ;;  %v10553_v9 = vadd.f32 %v10552_v33, %v10551_v35  ;;  %v16217_v35 = vld [vmem:[#allocation28_spill] sm:$0xff]  ;;  %v16218_v47 = vld [vmem:[#allocation27_spill] sm:$0xff] }
 0x723   : > { %v10663_v61 = vpop.f32.mrf.mxu1  ;;  %v10554_v62 = vpop.f32.mrf.mxu0  ;;  %11243 = vmatmul.mubr.bf16.gmra.mxu0 %v7461_v56  ;;  %v16219_v33 = vpack.c.bf16 %v16217_v35, %v16218_v47  ;;  %v16221_v56 = vld [vmem:[#allocation18_spill] sm:$0xff]  ;;  %v16224_v47 = vld [vmem:[#allocation25_spill] sm:$0xff] }
 0x724   : > { %v15571_v48 = vadd.f32 %v10662_v10, %v10550_v51  ;;  %11246 = vmatprep.mubr.bf16.mxu0 %v16216_v0  ;;  %v16220_v10 = vld [vmem:[#allocation20_spill] sm:$0xff]  ;;  %v16223_v35 = vld [vmem:[#allocation26_spill] sm:$0xff] }
 0x725   : > { %v10664_v4 = vpop.f32.mrf.mxu1  ;;  %v10555_v38 = vpop.f32.mrf.mxu0 }
 0x726   : > { %v10665_v40 = vadd.f32 %v10664_v4, %v10663_v61  ;;  %v10556_v11 = vadd.f32 %v10555_v38, %v10554_v62  ;;  %v16222_v61 = vpack.c.bf16 %v16220_v10, %v16221_v56  ;;  %v16226_v10 = vld [vmem:[#allocation34_spill] sm:$0xff]  ;;  %v16227_v56 = vld [vmem:[#allocation33_spill] sm:$0xff] }
 0x727   : > { %v10666_v28 = vpop.f32.mrf.mxu1  ;;  %v10557_v31 = vpop.f32.mrf.mxu0 }
 0x728   : > { %v15576_v17 = vadd.f32 %v10665_v40, %v10553_v9 }
 0x729   : > { %v10667_v20 = vpop.f32.mrf.mxu1  ;;  %v10558_v50 = vpop.f32.mrf.mxu0 }
 0x72a   : > { %v10668_v42 = vadd.f32 %v10667_v20, %v10666_v28  ;;  %v10559_v57 = vadd.f32 %v10558_v50, %v10557_v31 }
 0x72b   : > { %v10669_v12 = vpop.f32.mrf.mxu1  ;;  %v10560_v39 = vpop.f32.mrf.mxu0  ;;  %11247 = vmatmul.mubr.bf16.gmra.mxu0 %v16219_v33  ;;  %v16225_v33 = vpack.c.bf16 %v16223_v35, %v16224_v47  ;;  %v16229_v47 = vld [vmem:[#allocation24_spill] sm:$0xff] }
 0x72c   : > { %v15578_v51 = vadd.f32 %v10668_v42, %v10556_v11  ;;  %11250 = vmatprep.mubr.bf16.mxu0 %v16222_v61 }
 0x72d   : > { %v10670_v62 = vpop.f32.mrf.mxu1  ;;  %v10561_v9 = vpop.f32.mrf.mxu0 }
 0x72e   : > { %v10671_v52 = vadd.f32 %v10670_v62, %v10669_v12  ;;  %v10562_v32 = vadd.f32 %v10561_v9, %v10560_v39  ;;  %v16228_v12 = vpack.c.bf16 %v16226_v10, %v16227_v56  ;;  %v16232_v56 = vld [vmem:[#allocation32_spill] sm:$0xff] }
 0x72f   : > { %v10672_v0 = vpop.f32.mrf.mxu1  ;;  %v10563_v38 = vpop.f32.mrf.mxu0 }
 0x730   : > { %v15586_v4 = vadd.f32 %v10671_v52, %v10559_v57 }
 0x731   : > { %v10673_v40 = vpop.f32.mrf.mxu1  ;;  %v10564_v11 = vpop.f32.mrf.mxu0 }
 0x732   : > { %v10674_v28 = vadd.f32 %v10673_v40, %v10672_v0  ;;  %v10565_v31 = vadd.f32 %v10564_v11, %v10563_v38 }
 0x733   : > { %v10675_v20 = vpop.f32.mrf.mxu1  ;;  %v10566_v42 = vpop.f32.mrf.mxu0  ;;  %11251 = vmatmul.mubr.bf16.gmra.mxu0 %v16225_v33  ;;  %v16230_v33 = vld [vmem:[#allocation23_spill] sm:$0xff] }
 0x734   : > { %v15588_v50 = vadd.f32 %v10674_v28, %v10562_v32  ;;  %11254 = vmatprep.mubr.bf16.mxu0 %v16228_v12  ;;  %v16231_v10 = vpack.c.bf16 %v16229_v47, %v16230_v33  ;;  %v16233_v12 = vld [vmem:[#allocation31_spill] sm:$0xff]  ;;  %v16235_v33 = vld [vmem:[#allocation29_spill] sm:$0xff] }
 0x735   : > { %v10676_v39 = vpop.f32.mrf.mxu1  ;;  %v10567_v57 = vpop.f32.mrf.mxu0 }
 0x736   : > { %v10677_v61 = vadd.f32 %v10676_v39, %v10675_v20  ;;  %v10568_v62 = vadd.f32 %v10567_v57, %v10566_v42  ;;  %v16234_v20 = vpack.c.bf16 %v16232_v56, %v16233_v12 }
 0x737   : > { %v10678_v9 = vpop.f32.mrf.mxu1  ;;  %v10569_v0 = vpop.f32.mrf.mxu0 }
 0x738   : > { %v15596_v52 = vadd.f32 %v10677_v61, %v10565_v31 }
 0x739   : > { %v10679_v38 = vpop.f32.mrf.mxu1  ;;  %v10570_v32 = vpop.f32.mrf.mxu0 }
 0x73a   : > { %v10680_v40 = vadd.f32 %v10679_v38, %v10678_v9  ;;  %v10571_v11 = vadd.f32 %v10570_v32, %v10569_v0 }
 0x73b   : > { %v10681_v28 = vpop.f32.mrf.mxu1  ;;  %v10572_v35 = vpop.f32.mrf.mxu0  ;;  %11255 = vmatmul.mubr.bf16.gmra.mxu0 %v16231_v10  ;;  %v16236_v10 = vld [vmem:[#allocation39_spill] sm:$0xff] }
 0x73c   : > { %v15598_v63 = vadd.f32 %v10680_v40, %v10568_v62  ;;  %11258 = vmatprep.mubr.bf16.mxu0 %v16234_v20  ;;  %v16237_v56 = vpack.c.bf16 %v16235_v33, %v16236_v10 }
 0x73d   : > { %v10682_v42 = vpop.f32.mrf.mxu1  ;;  %v10573_v31 = vpop.f32.mrf.mxu0 }
 0x73e   : > { %v10683_v39 = vadd.f32 %v10682_v42, %v10681_v28  ;;  %v10574_v57 = vadd.f32 %v10573_v31, %v10572_v35 }
 0x73f   : > { %v10684_v61 = vpop.f32.mrf.mxu1  ;;  %v10575_v9 = vpop.f32.mrf.mxu0 }
 0x740   : > { %v15606_v5 = vadd.f32 %v10683_v39, %v10571_v11 }
 0x741   : > { %v10685_v0 = vpop.f32.mrf.mxu1  ;;  %v10576_v62 = vpop.f32.mrf.mxu0 }
 0x742   : > { %v10686_v38 = vadd.f32 %v10685_v0, %v10684_v61  ;;  %v10577_v32 = vadd.f32 %v10576_v62, %v10575_v9 }
 0x743   : > { %v10687_v40 = vpop.f32.mrf.mxu1  ;;  %v10578_v47 = vpop.f32.mrf.mxu0  ;;  %11259 = vmatmul.mubr.bf16.gmra.mxu0 %v16237_v56 }
 0x744   : > { %v15608_v13 = vadd.f32 %v10686_v38, %v10574_v57 }
 0x745   : > { %v10688_v12 = vpop.f32.mrf.mxu1  ;;  %v10579_v20 = vpop.f32.mrf.mxu0 }
 0x746   : > { %v10689_v28 = vadd.f32 %v10688_v12, %v10687_v40  ;;  %v10580_v35 = vadd.f32 %v10579_v20, %v10578_v47 }
 0x747   : > { %v10690_v42 = vpop.f32.mrf.mxu1  ;;  %v10581_v31 = vpop.f32.mrf.mxu0 }
 0x748   : > { %v15613_v11 = vadd.f32 %v10689_v28, %v10577_v32 }
 0x749   : > { %v10691_v39 = vpop.f32.mrf.mxu1  ;;  %v10582_v24 = vpop.f32.mrf.mxu0 }
 0x74a   : > { %v10692_v61 = vadd.f32 %v10691_v39, %v10690_v42  ;;  %v10583_v9 = vadd.f32 %v10582_v24, %v10581_v31 }
 0x74b   : > { %v10693_v0 = vpop.f32.mrf.mxu1  ;;  %v10584_v62 = vpop.f32.mrf.mxu0 }
 0x74c   : > { %v15615_v57 = vadd.f32 %v10692_v61, %v10580_v35 }
 0x74d   : > { %v10694_v38 = vpop.f32.mrf.mxu1  ;;  %v10585_v19 = vpop.f32.mrf.mxu0 }
 0x74e   : > { %v10695_v33 = vadd.f32 %v10694_v38, %v10693_v0  ;;  %v10586_v10 = vadd.f32 %v10585_v19, %v10584_v62 }
 0x74f   : > { %v10696_v56 = vpop.f32.mrf.mxu1  ;;  %v10587_v40 = vpop.f32.mrf.mxu0 }
 0x750   : > { %v15617_v37 = vadd.f32 %v10695_v33, %v10583_v9 }
 0x751   : > { %v10697_v47 = vpop.f32.mrf.mxu1  ;;  %v10588_v32 = vpop.f32.mrf.mxu0 }
 0x752   : > { %v10698_v12 = vadd.f32 %v10697_v47, %v10696_v56  ;;  %v10589_v20 = vadd.f32 %v10588_v32, %v10587_v40 }
 0x753   : > { %v10699_v28 = vpop.f32.mrf.mxu1  ;;  %v10718_v24 = vpop.f32.mrf.mxu0 }
 0x754   : > { %v15619_v59 = vadd.f32 %v10698_v12, %v10586_v10 }
 0x755   : > { %v10700_v42 = vpop.f32.mrf.mxu1  ;;  %v10719_v31 = vpop.f32.mrf.mxu0 }
 0x756   : > { %v10701_v35 = vadd.f32 %v10700_v42, %v10699_v28  ;;  %v10720_v39 = vadd.f32 %v10719_v31, %v10718_v24 }
 0x757   : > { %v10830_v61 = vpop.f32.mrf.mxu1  ;;  %v10721_v19 = vpop.f32.mrf.mxu0 }
 0x758   : > { %v15621_v44 = vadd.f32 %v10701_v35, %v10589_v20  ;;  %v8485_v9 = vadd.f32 %v10720_v39, %v15476_v27 }
 0x759   : > { %v10831_v0 = vpop.f32.mrf.mxu1  ;;  %v10722_v62 = vpop.f32.mrf.mxu0 }
 0x75a   : > { %v10832_v38 = vadd.f32 %v10831_v0, %v10830_v61  ;;  %v10723_v33 = vadd.f32 %v10722_v62, %v10721_v19 }
 0x75b   : > { %v10833_v56 = vpop.f32.mrf.mxu1  ;;  %v10724_v40 = vpop.f32.mrf.mxu0 }
 0x75c   : > { %v15624_v47 = vadd.f32 %v10832_v38, %v8485_v9  ;;  %v8488_v10 = vadd.f32 %v10723_v33, %v15482_v15 }
 0x75d   : > { %v10834_v32 = vpop.f32.mrf.mxu1  ;;  %v10725_v12 = vpop.f32.mrf.mxu0 }
 0x75e   : > { %v10835_v28 = vadd.f32 %v10834_v32, %v10833_v56  ;;  %v10726_v24 = vadd.f32 %v10725_v12, %v10724_v40 }
 0x75f   : > { %v10836_v42 = vpop.f32.mrf.mxu1  ;;  %v10727_v20 = vpop.f32.mrf.mxu0 }
 0x760   : > { %v15627_v35 = vadd.f32 %v10835_v28, %v8488_v10  ;;  %v8493_v27 = vadd.f32 %v10726_v24, %v15488_v22 }
 0x761   : > { %v10837_v31 = vpop.f32.mrf.mxu1  ;;  %v10728_v39 = vpop.f32.mrf.mxu0 }
 0x762   : > { %v10838_v61 = vadd.f32 %v10837_v31, %v10836_v42  ;;  %v10729_v19 = vadd.f32 %v10728_v39, %v10727_v20 }
 0x763   : > { %v10839_v0 = vpop.f32.mrf.mxu1  ;;  %v10730_v62 = vpop.f32.mrf.mxu0 }
 0x764   : > { %v15630_v9 = vadd.f32 %v10838_v61, %v8493_v27  ;;  %v8496_v15 = vadd.f32 %v10729_v19, %v15494_v49 }
 0x765   : > { %v10840_v38 = vpop.f32.mrf.mxu1  ;;  %v10731_v33 = vpop.f32.mrf.mxu0 }
 0x766   : > { %v10841_v56 = vadd.f32 %v10840_v38, %v10839_v0  ;;  %v10732_v40 = vadd.f32 %v10731_v33, %v10730_v62 }
 0x767   : > { %v10842_v32 = vpop.f32.mrf.mxu1  ;;  %v10733_v12 = vpop.f32.mrf.mxu0 }
 0x768   : > { %v15633_v10 = vadd.f32 %v10841_v56, %v8496_v15  ;;  %v8501_v22 = vadd.f32 %v10732_v40, %v15500_v55 }
 0x769   : > { %v10843_v28 = vpop.f32.mrf.mxu1  ;;  %v10734_v24 = vpop.f32.mrf.mxu0 }
 0x76a   : > { %v10844_v42 = vadd.f32 %v10843_v28, %v10842_v32  ;;  %v10735_v20 = vadd.f32 %v10734_v24, %v10733_v12 }
 0x76b   : > { %v10845_v31 = vpop.f32.mrf.mxu1  ;;  %v10736_v39 = vpop.f32.mrf.mxu0 }
 0x76c   : > { %v15636_v27 = vadd.f32 %v10844_v42, %v8501_v22  ;;  %v8504_v49 = vadd.f32 %v10735_v20, %v15506_v36 }
 0x76d   : > { %v10846_v61 = vpop.f32.mrf.mxu1  ;;  %v10737_v19 = vpop.f32.mrf.mxu0 }
 0x76e   : > { %v10847_v0 = vadd.f32 %v10846_v61, %v10845_v31  ;;  %v10738_v62 = vadd.f32 %v10737_v19, %v10736_v39 }
 0x76f   : > { %v10848_v38 = vpop.f32.mrf.mxu1  ;;  %v10739_v33 = vpop.f32.mrf.mxu0 }
 0x770   : > { %v15639_v15 = vadd.f32 %v10847_v0, %v8504_v49  ;;  %v8509_v55 = vadd.f32 %v10738_v62, %v15512_v25 }
 0x771   : > { %v10849_v56 = vpop.f32.mrf.mxu1  ;;  %v10740_v40 = vpop.f32.mrf.mxu0 }
 0x772   : > { %v10850_v32 = vadd.f32 %v10849_v56, %v10848_v38  ;;  %v10741_v12 = vadd.f32 %v10740_v40, %v10739_v33 }
 0x773   : > { %v10851_v28 = vpop.f32.mrf.mxu1  ;;  %v10742_v24 = vpop.f32.mrf.mxu0 }
 0x774   : > { %v15642_v22 = vadd.f32 %v10850_v32, %v8509_v55  ;;  %v8512_v36 = vadd.f32 %v10741_v12, %v15518_v54 }
 0x775   : > { %v10852_v42 = vpop.f32.mrf.mxu1  ;;  %v10743_v20 = vpop.f32.mrf.mxu0 }
 0x776   : > { %v10853_v31 = vadd.f32 %v10852_v42, %v10851_v28  ;;  %v10744_v39 = vadd.f32 %v10743_v20, %v10742_v24 }
 0x777   : > { %v10854_v61 = vpop.f32.mrf.mxu1  ;;  %v10745_v19 = vpop.f32.mrf.mxu0 }
 0x778   : > { %v15645_v49 = vadd.f32 %v10853_v31, %v8512_v36  ;;  %v8517_v25 = vadd.f32 %v10744_v39, %v15524_v1 }
 0x779   : > { %v10855_v0 = vpop.f32.mrf.mxu1  ;;  %v10746_v62 = vpop.f32.mrf.mxu0 }
 0x77a   : > { %v10856_v38 = vadd.f32 %v10855_v0, %v10854_v61  ;;  %v10747_v33 = vadd.f32 %v10746_v62, %v10745_v19 }
 0x77b   : > { %v10857_v56 = vpop.f32.mrf.mxu1  ;;  %v10748_v40 = vpop.f32.mrf.mxu0 }
 0x77c   : > { %v15648_v55 = vadd.f32 %v10856_v38, %v8517_v25  ;;  %v8520_v54 = vadd.f32 %v10747_v33, %v15530_v8 }
 0x77d   : > { %v10858_v32 = vpop.f32.mrf.mxu1  ;;  %v10749_v12 = vpop.f32.mrf.mxu0 }
 0x77e   : > { %v10859_v28 = vadd.f32 %v10858_v32, %v10857_v56  ;;  %v10750_v24 = vadd.f32 %v10749_v12, %v10748_v40 }
 0x77f   : > { %v10860_v42 = vpop.f32.mrf.mxu1  ;;  %v10751_v20 = vpop.f32.mrf.mxu0 }
 0x780   : > { %v15651_v36 = vadd.f32 %v10859_v28, %v8520_v54  ;;  %v8525_v1 = vadd.f32 %v10750_v24, %v15536_v16 }
 0x781   : > { %v10861_v31 = vpop.f32.mrf.mxu1  ;;  %v10752_v39 = vpop.f32.mrf.mxu0 }
 0x782   : > { %v10862_v61 = vadd.f32 %v10861_v31, %v10860_v42  ;;  %v10753_v19 = vadd.f32 %v10752_v39, %v10751_v20 }
 0x783   : > { %v10863_v0 = vpop.f32.mrf.mxu1  ;;  %v10754_v62 = vpop.f32.mrf.mxu0 }
 0x784   : > { %v15654_v25 = vadd.f32 %v10862_v61, %v8525_v1  ;;  %v8528_v8 = vadd.f32 %v10753_v19, %v15542_v18 }
 0x785   : > { %v10864_v38 = vpop.f32.mrf.mxu1  ;;  %v10755_v33 = vpop.f32.mrf.mxu0 }
 0x786   : > { %v10865_v56 = vadd.f32 %v10864_v38, %v10863_v0  ;;  %v10756_v40 = vadd.f32 %v10755_v33, %v10754_v62 }
 0x787   : > { %v10866_v32 = vpop.f32.mrf.mxu1  ;;  %v10757_v12 = vpop.f32.mrf.mxu0 }
 0x788   : > { %v15657_v54 = vadd.f32 %v10865_v56, %v8528_v8  ;;  %v8533_v16 = vadd.f32 %v10756_v40, %v15547_v43 }
 0x789   : > { %v10867_v28 = vpop.f32.mrf.mxu1  ;;  %v10758_v24 = vpop.f32.mrf.mxu0 }
 0x78a   : > { %v10868_v42 = vadd.f32 %v10867_v28, %v10866_v32  ;;  %v10759_v20 = vadd.f32 %v10758_v24, %v10757_v12 }
 0x78b   : > { %v10869_v31 = vpop.f32.mrf.mxu1  ;;  %v10760_v39 = vpop.f32.mrf.mxu0 }
 0x78c   : > { %v15660_v1 = vadd.f32 %v10868_v42, %v8533_v16  ;;  %v8536_v18 = vadd.f32 %v10759_v20, %v15553_v6 }
 0x78d   : > { %v10870_v61 = vpop.f32.mrf.mxu1  ;;  %v10761_v19 = vpop.f32.mrf.mxu0 }
 0x78e   : > { %v10871_v0 = vadd.f32 %v10870_v61, %v10869_v31  ;;  %v10762_v62 = vadd.f32 %v10761_v19, %v10760_v39 }
 0x78f   : > { %v10872_v38 = vpop.f32.mrf.mxu1  ;;  %v10763_v33 = vpop.f32.mrf.mxu0 }
 0x790   : > { %v15663_v8 = vadd.f32 %v10871_v0, %v8536_v18  ;;  %v8541_v43 = vadd.f32 %v10762_v62, %v15557_v21 }
 0x791   : > { %v10873_v56 = vpop.f32.mrf.mxu1  ;;  %v10764_v40 = vpop.f32.mrf.mxu0 }
 0x792   : > { %v10874_v32 = vadd.f32 %v10873_v56, %v10872_v38  ;;  %v10765_v12 = vadd.f32 %v10764_v40, %v10763_v33 }
 0x793   : > { %v10875_v28 = vpop.f32.mrf.mxu1  ;;  %v10766_v24 = vpop.f32.mrf.mxu0 }
 0x794   : > { %v15666_v16 = vadd.f32 %v10874_v32, %v8541_v43  ;;  %v8544_v6 = vadd.f32 %v10765_v12, %v15563_v26 }
 0x795   : > { %v10876_v42 = vpop.f32.mrf.mxu1  ;;  %v10767_v20 = vpop.f32.mrf.mxu0 }
 0x796   : > { %v10877_v31 = vadd.f32 %v10876_v42, %v10875_v28  ;;  %v10768_v39 = vadd.f32 %v10767_v20, %v10766_v24 }
 0x797   : > { %v10878_v61 = vpop.f32.mrf.mxu1  ;;  %v10769_v19 = vpop.f32.mrf.mxu0 }
 0x798   : > { %v15669_v18 = vadd.f32 %v10877_v31, %v8544_v6  ;;  %v8549_v21 = vadd.f32 %v10768_v39, %v15565_v3 }
 0x799   : > { %v10879_v0 = vpop.f32.mrf.mxu1  ;;  %v10770_v62 = vpop.f32.mrf.mxu0 }
 0x79a   : > { %v10880_v38 = vadd.f32 %v10879_v0, %v10878_v61  ;;  %v10771_v33 = vadd.f32 %v10770_v62, %v10769_v19 }
 0x79b   : > { %v10881_v56 = vpop.f32.mrf.mxu1  ;;  %v10772_v40 = vpop.f32.mrf.mxu0 }
 0x79c   : > { %v15672_v43 = vadd.f32 %v10880_v38, %v8549_v21  ;;  %v8552_v26 = vadd.f32 %v10771_v33, %v15569_v23 }
 0x79d   : > { %v10882_v32 = vpop.f32.mrf.mxu1  ;;  %v10773_v12 = vpop.f32.mrf.mxu0 }
 0x79e   : > { %v10883_v28 = vadd.f32 %v10882_v32, %v10881_v56  ;;  %v10774_v24 = vadd.f32 %v10773_v12, %v10772_v40 }
 0x79f   : > { %v10884_v42 = vpop.f32.mrf.mxu1  ;;  %v10775_v20 = vpop.f32.mrf.mxu0 }
 0x7a0   : > { %v15675_v6 = vadd.f32 %v10883_v28, %v8552_v26  ;;  %v8557_v3 = vadd.f32 %v10774_v24, %v15571_v48 }
 0x7a1   : > { %v10885_v31 = vpop.f32.mrf.mxu1  ;;  %v10776_v39 = vpop.f32.mrf.mxu0 }
 0x7a2   : > { %v10886_v61 = vadd.f32 %v10885_v31, %v10884_v42  ;;  %v10777_v19 = vadd.f32 %v10776_v39, %v10775_v20 }
 0x7a3   : > { %v10887_v0 = vpop.f32.mrf.mxu1  ;;  %v10778_v62 = vpop.f32.mrf.mxu0 }
 0x7a4   : > { %v15678_v21 = vadd.f32 %v10886_v61, %v8557_v3  ;;  %v8560_v23 = vadd.f32 %v10777_v19, %v15576_v17 }
 0x7a5   : > { %v10888_v38 = vpop.f32.mrf.mxu1  ;;  %v10779_v33 = vpop.f32.mrf.mxu0 }
 0x7a6   : > { %v10889_v56 = vadd.f32 %v10888_v38, %v10887_v0  ;;  %v10780_v40 = vadd.f32 %v10779_v33, %v10778_v62 }
 0x7a7   : > { %v10890_v32 = vpop.f32.mrf.mxu1  ;;  %v10781_v12 = vpop.f32.mrf.mxu0 }
 0x7a8   : > { %v15681_v26 = vadd.f32 %v10889_v56, %v8560_v23  ;;  %v8565_v48 = vadd.f32 %v10780_v40, %v15578_v51 }
 0x7a9   : > { %v10891_v28 = vpop.f32.mrf.mxu1  ;;  %v10782_v24 = vpop.f32.mrf.mxu0 }
 0x7aa   : > { %v10892_v42 = vadd.f32 %v10891_v28, %v10890_v32  ;;  %v10783_v20 = vadd.f32 %v10782_v24, %v10781_v12 }
 0x7ab   : > { %v10893_v31 = vpop.f32.mrf.mxu1  ;;  %v10784_v39 = vpop.f32.mrf.mxu0 }
 0x7ac   : > { %v15684_v3 = vadd.f32 %v10892_v42, %v8565_v48  ;;  %v8568_v17 = vadd.f32 %v10783_v20, %v15586_v4 }
 0x7ad   : > { %v10894_v61 = vpop.f32.mrf.mxu1  ;;  %v10785_v19 = vpop.f32.mrf.mxu0 }
 0x7ae   : > { %v10895_v0 = vadd.f32 %v10894_v61, %v10893_v31  ;;  %v10786_v62 = vadd.f32 %v10785_v19, %v10784_v39 }
 0x7af   : > { %v10896_v38 = vpop.f32.mrf.mxu1  ;;  %v10787_v33 = vpop.f32.mrf.mxu0 }
 0x7b0   : > { %v15687_v23 = vadd.f32 %v10895_v0, %v8568_v17  ;;  %v8573_v51 = vadd.f32 %v10786_v62, %v15588_v50 }
 0x7b1   : > { %v10897_v56 = vpop.f32.mrf.mxu1  ;;  %v10788_v40 = vpop.f32.mrf.mxu0 }
 0x7b2   : > { %16238 = vst [vmem:[#allocation57_spill] sm:$0xff] %v15687_v23  ;;  %v10898_v32 = vadd.f32 %v10897_v56, %v10896_v38  ;;  %v10789_v12 = vadd.f32 %v10788_v40, %v10787_v33 }
 0x7b3   : > { %v10899_v28 = vpop.f32.mrf.mxu1  ;;  %v10790_v24 = vpop.f32.mrf.mxu0 }
 0x7b4   : > { %v15690_v48 = vadd.f32 %v10898_v32, %v8573_v51  ;;  %v8576_v4 = vadd.f32 %v10789_v12, %v15596_v52 }
 0x7b5   : > { %v10900_v42 = vpop.f32.mrf.mxu1  ;;  %v10791_v20 = vpop.f32.mrf.mxu0 }
 0x7b6   : > { %v10901_v31 = vadd.f32 %v10900_v42, %v10899_v28  ;;  %v10792_v39 = vadd.f32 %v10791_v20, %v10790_v24 }
 0x7b7   : > { %v10902_v61 = vpop.f32.mrf.mxu1  ;;  %v10793_v19 = vpop.f32.mrf.mxu0 }
 0x7b8   : > { %v15693_v17 = vadd.f32 %v10901_v31, %v8576_v4  ;;  %v8581_v50 = vadd.f32 %v10792_v39, %v15598_v63 }
 0x7b9   : > { %v10903_v0 = vpop.f32.mrf.mxu1  ;;  %v10794_v62 = vpop.f32.mrf.mxu0 }
 0x7ba   : > { %v10904_v38 = vadd.f32 %v10903_v0, %v10902_v61  ;;  %v10795_v33 = vadd.f32 %v10794_v62, %v10793_v19 }
 0x7bb   : > { %v10905_v56 = vpop.f32.mrf.mxu1  ;;  %v10796_v40 = vpop.f32.mrf.mxu0 }
 0x7bc   : > { %v15696_v51 = vadd.f32 %v10904_v38, %v8581_v50  ;;  %v8584_v52 = vadd.f32 %v10795_v33, %v15606_v5 }
 0x7bd   : > { %v10906_v32 = vpop.f32.mrf.mxu1  ;;  %v10797_v12 = vpop.f32.mrf.mxu0 }
 0x7be   : > { %16239 = vst [vmem:[#allocation58_spill] sm:$0xff] %v15696_v51  ;;  %v10907_v28 = vadd.f32 %v10906_v32, %v10905_v56  ;;  %v10798_v24 = vadd.f32 %v10797_v12, %v10796_v40 }
 0x7bf   : > { %v10908_v42 = vpop.f32.mrf.mxu1  ;;  %v10799_v20 = vpop.f32.mrf.mxu0 }
 0x7c0   : > { %v15699_v4 = vadd.f32 %v10907_v28, %v8584_v52  ;;  %v8589_v63 = vadd.f32 %v10798_v24, %v15608_v13 }
 0x7c1   : > { %v10909_v31 = vpop.f32.mrf.mxu1  ;;  %v10800_v39 = vpop.f32.mrf.mxu0 }
 0x7c2   : > { %16240 = vst [vmem:[#allocation56_spill] sm:$0xff] %v15699_v4  ;;  %v10910_v61 = vadd.f32 %v10909_v31, %v10908_v42  ;;  %v10801_v19 = vadd.f32 %v10800_v39, %v10799_v20 }
 0x7c3   : > { %v10911_v0 = vpop.f32.mrf.mxu1  ;;  %v10802_v62 = vpop.f32.mrf.mxu0 }
 0x7c4   : > { %v15702_v50 = vadd.f32 %v10910_v61, %v8589_v63  ;;  %v8592_v5 = vadd.f32 %v10801_v19, %v15613_v11 }
 0x7c5   : > { %v10912_v38 = vpop.f32.mrf.mxu1  ;;  %v10803_v33 = vpop.f32.mrf.mxu0 }
 0x7c6   : > { %16241 = vst [vmem:[#allocation60_spill] sm:$0xff] %v15702_v50  ;;  %v10913_v56 = vadd.f32 %v10912_v38, %v10911_v0  ;;  %v10804_v11 = vadd.f32 %v10803_v33, %v10802_v62  ;;  %v15716_v62 = vld [vmem:[%s15938_s10] ss:$0 sm:$0xff] }
 0x7c7   : > { %v10914_v40 = vpop.f32.mrf.mxu1  ;;  %v10805_v32 = vpop.f32.mrf.mxu0 }
 0x7c8   : > { %v15705_v52 = vadd.f32 %v10913_v56, %v8592_v5  ;;  %v8597_v23 = vadd.f32 %v10804_v11, %v15615_v57 }
 0x7c9   : > { %v10915_v12 = vpop.f32.mrf.mxu1  ;;  %v10806_v13 = vpop.f32.mrf.mxu0 }
 0x7ca   : > { %16242 = vst [vmem:[#allocation61_spill] sm:$0xff] %v15705_v52  ;;  %v10916_v38 = vadd.f32 %v10915_v12, %v10914_v40 }
 0x7cb   : > { %v10917_v28 = vpop.f32.mrf.mxu1  ;;  %v10808_v24 = vpop.f32.mrf.mxu0 }
 0x7cc   : > { %v8758_v57 = vadd.f32 %v10916_v38, %v8597_v23 }
 0x7cd   : > { %v10918_v42 = vpop.f32.mrf.mxu1  ;;  %v10809_v20 = vpop.f32.mrf.mxu0 }
 0x7ce   : > { %v10810_v63 = vadd.f32 %v10809_v20, %v10808_v24  ;;  %v10807_v24 = vadd.f32 %v10806_v13, %v10805_v32 }
 0x7cf   : > { %v10920_v31 = vpop.f32.mrf.mxu1  ;;  %v10811_v39 = vpop.f32.mrf.mxu0 }
 0x7d0   : > { %v8605_v5 = vadd.f32 %v10810_v63, %v15619_v59  ;;  %v10919_v63 = vadd.f32 %v10918_v42, %v10917_v28 }
 0x7d1   : > { %v10921_v61 = vpop.f32.mrf.mxu1  ;;  %v10812_v19 = vpop.f32.mrf.mxu0 }
 0x7d2   : > { %v10922_v4 = vadd.f32 %v10921_v61, %v10920_v31  ;;  %v10813_v56 = vadd.f32 %v10812_v19, %v10811_v39 }
 0x7d3   : > { %v10923_v0 = vpop.f32.mrf.mxu1  ;;  %v11236_v52 = vpop.f32.mrf.mxu0 }
 0x7d4   : > { %v8815_v51 = vadd.f32 %v11236_v52, %v15630_v9  ;;  %v8766_v40 = vadd.f32 %v10922_v4, %v8605_v5  ;;  %v8608_v9 = vadd.f32 %v10813_v56, %v15621_v44  ;;  %v8600_v4 = vadd.f32 %v10807_v24, %v15617_v37 }
 0x7d5   : > { %v10924_v50 = vpop.f32.mrf.mxu1  ;;  %v8806_v20 = vpop.f32.mrf.mxu0 }
 0x7d6   : > { %v10925_v33 = vadd.f32 %v10924_v50, %v10923_v0  ;;  %v8935_v59 = vadd.f32 %v8815_v51, %v15271_v60  ;;  %v8807_v12 = vadd.f32 %v8806_v20, %v15624_v47  ;;  %v8761_v19 = vadd.f32 %v10919_v63, %v8600_v4  ;;  %v16244_v4 = vld [vmem:[#allocation44_spill] sm:$0xff] }
 0x7d7   : > { %v11264_v31 = vpop.f32.mrf.mxu1  ;;  %v11237_v52 = vpop.f32.mrf.mxu0 }
 0x7d8   : > { %v8927_v39 = vadd.f32 %v11264_v31, %v8766_v40  ;;  %v8974_v32 = vadd.f32 %v15716_v62, %v8935_v59  ;;  %v8933_v13 = vadd.f32 %v8807_v12, %v15282_v46  ;;  %v8818_v61 = vadd.f32 %v11237_v52, %v15633_v10 }
 0x7d9   : > { %v8918_v50 = vpop.f32.mrf.mxu1  ;;  %v8809_v51 = vpop.f32.mrf.mxu0  ;;  %v8769_v11 = vadd.f32 %v10925_v33, %v8608_v9 }
 0x7da   : > { %v8963_v60 = vadd.f32 %v8927_v39, %v15454_v29  ;;  %v8919_v47 = vadd.f32 %v8918_v50, %v8758_v57  ;;  %9006 = vst.msk [vmem:[%s15726_s24 + $0x10] sm:$0xff] %vm1008_vm2, %v8974_v32  ;;  %v8972_v44 = vadd.f32 %v15716_v62, %v8933_v13  ;;  %v8936_v46 = vadd.f32 %v8818_v61, %v15292_v53  ;;  %v16243_v32 = vld [vmem:[#allocation12_spill] sm:$0xff] }
 0x7db   : > { %v8810_v10 = vadd.f32 %v8809_v51, %v15627_v35  ;;  %v11265_v23 = vpop.f32.mrf.mxu1  ;;  %v11240_v28 = vpop.f32.mrf.mxu0 }
 0x7dc   : > { %v9002_v37 = vadd.f32 %v15716_v62, %v8963_v60  ;;  %v8961_v29 = vadd.f32 %v8919_v47, %v15459_v14  ;;  %v8930_v42 = vadd.f32 %v11265_v23, %v8769_v11  ;;  %9004 = vst.msk [vmem:[%s15726_s24] sm:$0xff] %vm1008_vm2, %v8972_v44  ;;  %v8975_v0 = vadd.f32 %v15716_v62, %v8936_v46  ;;  %v16245_v47 = vld [vmem:[#allocation45_spill] sm:$0xff] }
 0x7dd   : > { %v8934_v38 = vadd.f32 %v8810_v10, %v15297_v30  ;;  %v8831_v53 = vadd.f32 %v11240_v28, %v15642_v22  ;;  %v8921_v35 = vpop.f32.mrf.mxu1  ;;  %v8822_v56 = vpop.f32.mrf.mxu0  ;;  %v16246_v10 = vld [vmem:[#allocation35_spill] sm:$0xff]  ;;  %v16247_v28 = vld [vmem:[#allocation36_spill] sm:$0xff] }
 0x7de   : > { %9034 = vst.msk [vmem:[%s15726_s24 + $0xf0] sm:$0xff] %vm1008_vm2, %v9002_v37  ;;  %v9000_v5 = vadd.f32 %v15716_v62, %v8961_v29  ;;  %v8964_v14 = vadd.f32 %v8930_v42, %v15464_v34  ;;  %v8922_v24 = vadd.f32 %v8921_v35, %v8761_v19  ;;  %9007 = vst.msk [vmem:[%s15726_s24 + $0x18] sm:$0xff] %vm1008_vm2, %v8975_v0 }
 0x7df   : > { %v8973_v33 = vadd.f32 %v15716_v62, %v8934_v38  ;;  %v8939_v30 = vadd.f32 %v8831_v53, %v15307_v41  ;;  %v8823_v20 = vadd.f32 %v8822_v56, %v15636_v27  ;;  %v11241_v34 = vpop.f32.mrf.mxu0  ;;  %v16248_v38 = vld [vmem:[#allocation42_spill] sm:$0xff] }
 0x7e0   : > { %9032 = vst.msk [vmem:[%s15726_s24 + $0xe0] sm:$0xff] %vm1008_vm2, %v9000_v5  ;;  %v9003_v22 = vadd.f32 %v15716_v62, %v8964_v14  ;;  %v8962_v40 = vadd.f32 %v8922_v24, %v15466_v2  ;;  %v8834_v41 = vadd.f32 %v11241_v34, %v15645_v49  ;;  %v16249_v14 = vld [vmem:[#allocation43_spill] sm:$0xff] }
 0x7e1   : > { %9005 = vst.msk [vmem:[%s15726_s24 + $0x8] sm:$0xff] %vm1008_vm2, %v8973_v33  ;;  %v8978_v59 = vadd.f32 %v15716_v62, %v8939_v30  ;;  %v8937_v12 = vadd.f32 %v8823_v20, %v15316_v7  ;;  %v8825_v31 = vpop.f32.mrf.mxu0  ;;  %v16250_v30 = vld [vmem:[#allocation50_spill] sm:$0xff]  ;;  %v16251_v34 = vld [vmem:[#allocation51_spill] sm:$0xff] }
 0x7e2   : > { %9035 = vst.msk [vmem:[%s15726_s24 + $0xf8] sm:$0xff] %vm1008_vm2, %v9003_v22  ;;  %v9001_v27 = vadd.f32 %v15716_v62, %v8962_v40  ;;  %v8940_v63 = vadd.f32 %v8834_v41, %v15326_v58  ;;  %v8826_v9 = vadd.f32 %v8825_v31, %v15639_v15 }
 0x7e3   : > { %9010 = vst.msk [vmem:[%s15726_s24 + $0x30] sm:$0xff] %vm1008_vm2, %v8978_v59  ;;  %v8976_v2 = vadd.f32 %v15716_v62, %v8937_v12  ;;  %v11244_v7 = vpop.f32.mrf.mxu0 }
 0x7e4   : > { %9033 = vst.msk [vmem:[%s15726_s24 + $0xe8] sm:$0xff] %vm1008_vm2, %v9001_v27  ;;  %v8979_v49 = vadd.f32 %v15716_v62, %v8940_v63  ;;  %v8938_v52 = vadd.f32 %v8826_v9, %v15331_v45  ;;  %v8847_v39 = vadd.f32 %v11244_v7, %v15654_v25  ;;  %v16252_v27 = vld [vmem:[#allocation40_spill] sm:$0xff]  ;;  %v16253_v9 = vld [vmem:[#allocation41_spill] sm:$0xff] }
 0x7e5   : > { %9008 = vst.msk [vmem:[%s15726_s24 + $0x20] sm:$0xff] %vm1008_vm2, %v8976_v2  ;;  %v8838_v57 = vpop.f32.mrf.mxu0 }
 0x7e6   : > { %9011 = vst.msk [vmem:[%s15726_s24 + $0x38] sm:$0xff] %vm1008_vm2, %v8979_v49  ;;  %v8977_v58 = vadd.f32 %v15716_v62, %v8938_v52  ;;  %v8943_v15 = vadd.f32 %v8847_v39, %v16243_v32  ;;  %v8839_v13 = vadd.f32 %v8838_v57, %v15648_v55  ;;  %v16254_v39 = vld [vmem:[#allocation48_spill] sm:$0xff] }
 0x7e7   : > { %v11245_v61 = vpop.f32.mrf.mxu0 }
 0x7e8   : > { %9009 = vst.msk [vmem:[%s15726_s24 + $0x28] sm:$0xff] %vm1008_vm2, %v8977_v58  ;;  %v8982_v50 = vadd.f32 %v15716_v62, %v8943_v15  ;;  %v8941_v45 = vadd.f32 %v8839_v13, %v16244_v4  ;;  %v8850_v25 = vadd.f32 %v11245_v61, %v15657_v54  ;;  %v16255_v15 = vld [vmem:[#allocation49_spill] sm:$0xff]  ;;  %v16256_v4 = vld [vmem:[#allocation46_spill] sm:$0xff] }
 0x7e9   : > { %v8841_v60 = vpop.f32.mrf.mxu0 }
 0x7ea   : > { %9014 = vst.msk [vmem:[%s15726_s24 + $0x50] sm:$0xff] %vm1008_vm2, %v8982_v50  ;;  %v8980_v51 = vadd.f32 %v15716_v62, %v8941_v45  ;;  %v8944_v11 = vadd.f32 %v8850_v25, %v16245_v47  ;;  %v8842_v55 = vadd.f32 %v8841_v60, %v15651_v36 }
 0x7eb   : > { %v11248_v44 = vpop.f32.mrf.mxu0 }
 0x7ec   : > { %9012 = vst.msk [vmem:[%s15726_s24 + $0x40] sm:$0xff] %vm1008_vm2, %v8980_v51  ;;  %v8983_v46 = vadd.f32 %v15716_v62, %v8944_v11  ;;  %v8942_v23 = vadd.f32 %v8842_v55, %v16246_v10  ;;  %v8863_v54 = vadd.f32 %v11248_v44, %v15666_v16  ;;  %v16257_v51 = vld [vmem:[#allocation47_spill] sm:$0xff]  ;;  %v16258_v11 = vld [vmem:[#allocation57_spill] sm:$0xff] }
 0x7ed   : > { %v8854_v37 = vpop.f32.mrf.mxu0 }
 0x7ee   : > { %9015 = vst.msk [vmem:[%s15726_s24 + $0x58] sm:$0xff] %vm1008_vm2, %v8983_v46  ;;  %v8981_v29 = vadd.f32 %v15716_v62, %v8942_v23  ;;  %v8947_v42 = vadd.f32 %v8863_v54, %v16247_v28  ;;  %v8855_v36 = vadd.f32 %v8854_v37, %v15660_v1  ;;  %v16259_v46 = vld [vmem:[#allocation54_spill] sm:$0xff]  ;;  %v16260_v23 = vld [vmem:[#allocation60_spill] sm:$0xff] }
 0x7ef   : > { %v11249_v19 = vpop.f32.mrf.mxu0 }
 0x7f0   : > { %9013 = vst.msk [vmem:[%s15726_s24 + $0x48] sm:$0xff] %vm1008_vm2, %v8981_v29  ;;  %v8986_v0 = vadd.f32 %v15716_v62, %v8947_v42  ;;  %v8945_v53 = vadd.f32 %v8855_v36, %v16248_v38  ;;  %v8866_v16 = vadd.f32 %v11249_v19, %v15669_v18  ;;  %v16261_v29 = vld [vmem:[#allocation55_spill] sm:$0xff]  ;;  %v16262_v42 = vld [vmem:[#allocation58_spill] sm:$0xff] }
 0x7f1   : > { %v8857_v35 = vpop.f32.mrf.mxu0  ;;  %v16263_v38 = vld [vmem:[#allocation59_spill] sm:$0xff] }
 0x7f2   : > { %9018 = vst.msk [vmem:[%s15726_s24 + $0x70] sm:$0xff] %vm1008_vm2, %v8986_v0  ;;  %v8984_v5 = vadd.f32 %v15716_v62, %v8945_v53  ;;  %v8948_v56 = vadd.f32 %v8866_v16, %v16249_v14  ;;  %v8858_v1 = vadd.f32 %v8857_v35, %v15663_v8  ;;  %v16264_v16 = vld [vmem:[#allocation61_spill] sm:$0xff] }
 0x7f3   : > { %v11252_v24 = vpop.f32.mrf.mxu0 }
 0x7f4   : > { %9016 = vst.msk [vmem:[%s15726_s24 + $0x60] sm:$0xff] %vm1008_vm2, %v8984_v5  ;;  %v8987_v33 = vadd.f32 %v15716_v62, %v8948_v56  ;;  %v8946_v20 = vadd.f32 %v8858_v1, %v16250_v30  ;;  %v8879_v18 = vadd.f32 %v11252_v24, %v15678_v21  ;;  %v16265_v56 = vld [vmem:[#allocation52_spill] sm:$0xff] }
 0x7f5   : > { %v8870_v22 = vpop.f32.mrf.mxu0  ;;  %v16266_v24 = vld [vmem:[#allocation56_spill] sm:$0xff] }
 0x7f6   : > { %9019 = vst.msk [vmem:[%s15726_s24 + $0x78] sm:$0xff] %vm1008_vm2, %v8987_v33  ;;  %v8985_v40 = vadd.f32 %v15716_v62, %v8946_v20  ;;  %v8951_v59 = vadd.f32 %v8879_v18, %v16251_v34  ;;  %v8871_v8 = vadd.f32 %v8870_v22, %v15672_v43  ;;  %v16267_v20 = vld [vmem:[#allocation53_spill] sm:$0xff] }
 0x7f7   : > { %v11253_v12 = vpop.f32.mrf.mxu0 }
 0x7f8   : > { %9017 = vst.msk [vmem:[%s15726_s24 + $0x68] sm:$0xff] %vm1008_vm2, %v8985_v40  ;;  %v8990_v41 = vadd.f32 %v15716_v62, %v8951_v59  ;;  %v8949_v31 = vadd.f32 %v8871_v8, %v16252_v27  ;;  %v8882_v21 = vadd.f32 %v11253_v12, %v15681_v26 }
 0x7f9   : > { %v8873_v2 = vpop.f32.mrf.mxu0 }
 0x7fa   : > { %9022 = vst.msk [vmem:[%s15726_s24 + $0x90] sm:$0xff] %vm1008_vm2, %v8990_v41  ;;  %v8988_v63 = vadd.f32 %v15716_v62, %v8949_v31  ;;  %v8952_v7 = vadd.f32 %v8882_v21, %v16253_v9  ;;  %v8874_v43 = vadd.f32 %v8873_v2, %v15675_v6 }
 0x7fb   : > { %v11256_v49 = vpop.f32.mrf.mxu0 }
 0x7fc   : > { %9020 = vst.msk [vmem:[%s15726_s24 + $0x80] sm:$0xff] %vm1008_vm2, %v8988_v63  ;;  %v8991_v52 = vadd.f32 %v15716_v62, %v8952_v7  ;;  %v8950_v57 = vadd.f32 %v8874_v43, %v16254_v39  ;;  %v8895_v26 = vadd.f32 %v11256_v49, %v15690_v48 }
 0x7fd   : > { %v8886_v58 = vpop.f32.mrf.mxu0 }
 0x7fe   : > { %9023 = vst.msk [vmem:[%s15726_s24 + $0x98] sm:$0xff] %vm1008_vm2, %v8991_v52  ;;  %v8989_v32 = vadd.f32 %v15716_v62, %v8950_v57  ;;  %v8955_v13 = vadd.f32 %v8895_v26, %v16255_v15  ;;  %v8887_v6 = vadd.f32 %v8886_v58, %v15684_v3 }
 0x7ff   : > { %v11257_v61 = vpop.f32.mrf.mxu0 }
 0x800   : > { %9021 = vst.msk [vmem:[%s15726_s24 + $0x88] sm:$0xff] %vm1008_vm2, %v8989_v32  ;;  %v8994_v50 = vadd.f32 %v15716_v62, %v8955_v13  ;;  %v8953_v45 = vadd.f32 %v8887_v6, %v16256_v4  ;;  %v8898_v48 = vadd.f32 %v11257_v61, %v15693_v17 }
 0x801   : > { %v8889_v25 = vpop.f32.mrf.mxu0 }
 0x802   : > { %9026 = vst.msk [vmem:[%s15726_s24 + $0xb0] sm:$0xff] %vm1008_vm2, %v8994_v50  ;;  %v8992_v60 = vadd.f32 %v15716_v62, %v8953_v45  ;;  %v8956_v47 = vadd.f32 %v8898_v48, %v16257_v51  ;;  %v8890_v3 = vadd.f32 %v8889_v25, %v16258_v11 }
 0x803   : > { %v11260_v55 = vpop.f32.mrf.mxu0 }
 0x804   : > { %9024 = vst.msk [vmem:[%s15726_s24 + $0xa0] sm:$0xff] %vm1008_vm2, %v8992_v60  ;;  %v8995_v44 = vadd.f32 %v15716_v62, %v8956_v47  ;;  %v8954_v10 = vadd.f32 %v8890_v3, %v16259_v46  ;;  %v8911_v17 = vadd.f32 %v11260_v55, %v16260_v23 }
 0x805   : > { %v8902_v54 = vpop.f32.mrf.mxu0 }
 0x806   : > { %9027 = vst.msk [vmem:[%s15726_s24 + $0xb8] sm:$0xff] %vm1008_vm2, %v8995_v44  ;;  %v8993_v37 = vadd.f32 %v15716_v62, %v8954_v10  ;;  %v8959_v28 = vadd.f32 %v8911_v17, %v16261_v29  ;;  %v8903_v36 = vadd.f32 %v8902_v54, %v16262_v42 }
 0x807   : > { %v11261_v19 = vpop.f32.mrf.mxu0 }
 0x808   : > { %9025 = vst.msk [vmem:[%s15726_s24 + $0xa8] sm:$0xff] %vm1008_vm2, %v8993_v37  ;;  %v8998_v0 = vadd.f32 %v15716_v62, %v8959_v28  ;;  %v8957_v53 = vadd.f32 %v8903_v36, %v16263_v38  ;;  %v8914_v35 = vadd.f32 %v11261_v19, %v16264_v16 }
 0x809   : > { %v8905_v5 = vpop.f32.mrf.mxu0 }
 0x80a   : > { %9030 = vst.msk [vmem:[%s15726_s24 + $0xd0] sm:$0xff] %vm1008_vm2, %v8998_v0  ;;  %v8996_v14 = vadd.f32 %v15716_v62, %v8957_v53  ;;  %v8960_v1 = vadd.f32 %v8914_v35, %v16265_v56  ;;  %v8906_v33 = vadd.f32 %v8905_v5, %v16266_v24 }
 0x80c   : > { %9028 = vst.msk [vmem:[%s15726_s24 + $0xc0] sm:$0xff] %vm1008_vm2, %v8996_v14  ;;  %v8999_v30 = vadd.f32 %v15716_v62, %v8960_v1  ;;  %v8958_v18 = vadd.f32 %v8906_v33, %v16267_v20 }
 0x80e   : > { %9031 = vst.msk [vmem:[%s15726_s24 + $0xd8] sm:$0xff] %vm1008_vm2, %v8999_v30  ;;  %v8997_v22 = vadd.f32 %v15716_v62, %v8958_v18 }
 0x810   : > { %9029 = vst.msk [vmem:[%s15726_s24 + $0xc8] sm:$0xff] %vm1008_vm2, %v8997_v22 }
 0x811   : > { %11841 = shalt.err (!%p11838_p3)
}
 0x812   : > { %s11842_s21 = scalar_lea.hbm %s15877_s19, 4096  ;;  %s11846_s18 = scalar_lea.hbm %s15945_s17, 8192 }
 0x813   : > { %p11843_p4 = scmp.ne.s32.totalorder %s15877_s19, %s11842_s21  ;;  %p11847_p9 = scmp.lt.s32.totalorder %s15877_s19, %s15945_s17 }
 0x814   : > { %p11848_p10 = scmp.lt.s32.totalorder %s11846_s18, %s11842_s21 }
 0x815   : > { %p11844_p7 = pnand %p11843_p4, %p12024_p5 }
 0x816   : > { %p11849_p11 = por %p11848_p10, %p11847_p9 }
 0x817   : > { %p11845_p8 = pneg %p11844_p7 }
 0x819   : > { %p11850_p12 = pnand %p11849_p11, %p11845_p8 }
 0x81b   : > { %11853 = shalt.err (!%p11850_p12)
}
 0x81c   : > { %s11894_s20 = smov 128   ;;  %s11895_s30 = smov 8  }
 0x81d   : > { %11292 = dma.vmem_to_hbm [thread:$0]  (%p12024_p5), %s15879_s26, 4096, %s15877_s19, %s15888_s28, %s11894_s20, %s11894_s20, %s11895_s30  }
 0x81e PF: > { %s16268_s23 = sld [smem:[#allocation7_spill]]  ;;  %p11298_p13 = scmp.ge.s32.totalorder %s11888_s27, 2 }
 0x820   : > { %p11295_p0 = pnand %p11298_p13, %p12028_p6 }
 0x822   : > { %p11296_p1 = pneg %p11295_p0 }
 0x824   : > { %s9065_s2 = sand.u32 1, %s16268_s23  }
 0x825   : > { %s9066_s21 = scalar_lea.sflag [#allocation5], %s9065_s2 }
 0x826   : > { %11871 = dma.done.wait (%p11296_p1), %s9066_s21, 4096  }
 0x827   : > { %11873 = vsyncadd (%p11296_p1), %s9066_s21, 4294963200  ;;  %s16270_s27 = sld [smem:[#allocation9_spill]]  ;;  %s16273_s24 = smov %s11880_s25 }
 0x828   : > { %s16271_s18 = sld [smem:[#allocation8_spill]] }
 0x829   : > { %s16272_s26 = sld [smem:[#allocation10_spill]] }
 0x82d   : > { %p27_p2 = scmp.ge.s32.totalorder %s16270_s27, 4  }
 0x82e   : > { %s16274_s25 = smov %s16271_s18 }
 0x82f   :  { %29 = sbr.rel (!%p27_p2) target bundleno = 7 (0x7), region = 130 }
 0x834   :  { %9071 = vsyncpa [#allocation5], 1 }
 0x835   :  { %9073 = vsyncpa [#allocation5 + $0x1], 1 }

</bundles_post_ra>
